<compile_context>
chip_gen: v5e
topology: v5e:2x2
jax: 0.10.0
libtpu: 0.0.40
codegen_flags: <defaults>
</compile_context>

<pallas_src>
import functools
import math

import numpy as np

import jax
import jax.numpy as jnp
from jax.experimental import pallas as pl
from jax.experimental.pallas import tpu as pltpu


_MIN_PALLAS_ROWS = 256      # below this a pallas launch is overhead-dominated
_MAX_ROW_TILE = 2048        # big tiles amortize the ~0.35us/step grid overhead


@functools.lru_cache(maxsize=None)
def _num_tensorcores():
    """TensorCores per JAX device: 2 on v7x (and megacore v4/v5p), else 1."""
    try:
        kind = jax.devices()[0].device_kind.lower()
    except Exception:
        return 1
    if "7" in kind or "v4" in kind or "v5p" in kind:
        return 2
    return 1


def _pick_tiling(M, max_tm=_MAX_ROW_TILE):
    """Row-tile size + padded row count. Splits rows across grid steps only
    when the chip has >1 TensorCore; otherwise one full-extent block."""
    n_tc = _num_tensorcores()
    if M <= max_tm:
        if n_tc > 1 and M >= 512 and M % (16 * n_tc) == 0:
            return M // n_tc, M            # shard rows across the TCs
        return M, M                        # single full-extent block
    for tm in (2048, 1024, 768, 512, 384, 256, 128):
        if tm <= max_tm and M % tm == 0:
            return tm, M
    g = -(-M // max_tm)
    tm = (-(-M // g) + 15) // 16 * 16      # multiple of 16 (bf16 sublane pack)
    return tm, g * tm


# ----------------------------------------------------------------------------
# Pallas kernel: fused  out = relu( (X @ W) + shift ), bf16 in/out, f32 acc
# ----------------------------------------------------------------------------
def _fused_matmul_kernel(x_ref, w_ref, shift_ref, o_ref, *, relu):
    acc = jnp.dot(x_ref[...], w_ref[...], preferred_element_type=jnp.float32)
    acc = acc + shift_ref[...]
    if relu:
        acc = jnp.maximum(acc, 0.0)
    o_ref[...] = acc.astype(o_ref.dtype)


def fused_matmul(x, w, shift=None, relu=False):
    """out = relu((x @ w) + shift). x: (M, K) bf16, w: (K, N) bf16 pre-folded."""
    M, K = x.shape
    Kw, N = w.shape
    assert K == Kw, (x.shape, w.shape)
    if shift is None:
        shift = jnp.zeros((1, N), jnp.float32)
    shift = shift.reshape(1, N).astype(jnp.float32)

    # Lane-sparse (N not a multiple of 128) or tiny-row layers go to plain XLA
    # per the review: masked vst + <25% MXU width means Pallas cannot win.
    if M < _MIN_PALLAS_ROWS or N % 128 != 0:
        y = jnp.dot(x, w, preferred_element_type=jnp.float32) + shift
        if relu:
            y = jnp.maximum(y, 0.0)
        return y.astype(x.dtype)

    tm, Mp = _pick_tiling(M)
    xb = x if Mp == M else jnp.pad(x, ((0, Mp - M), (0, 0)))
    # Blocks here are KB-scale; at real backbone sizes add K-grid tiling and an
    # explicit vmem_limit_bytes derived from the per-generation VMEM budget.
    out = pl.pallas_call(
        functools.partial(_fused_matmul_kernel, relu=relu),
        out_shape=jax.ShapeDtypeStruct((Mp, N), x.dtype),
        grid_spec=pltpu.PrefetchScalarGridSpec(
            num_scalar_prefetch=0,
            grid=(Mp // tm,),
            in_specs=[
                pl.BlockSpec((tm, K), lambda i: (i, 0)),
                pl.BlockSpec((K, N), lambda i: (0, 0)),
                pl.BlockSpec((1, N), lambda i: (0, 0)),
            ],
            out_specs=pl.BlockSpec((tm, N), lambda i: (i, 0)),
        ),
        compiler_params=pltpu.CompilerParams(
            dimension_semantics=("parallel",)),
    )(xb, w, shift)
    return out if Mp == M else out[:M]


# ----------------------------------------------------------------------------
# Pallas kernel: fused tap-accumulation conv (stride 1), no HBM im2col.
# The padded feature map for one batch element sits in VMEM; a static loop
# over the live kh*kw taps slices shifted windows, matmuls against the per-tap
# weights on the MXU and accumulates in f32; +shift / ReLU fused in the
# epilogue; bf16 output.
# ----------------------------------------------------------------------------
def _conv_tap_kernel(x_ref, w_ref, shift_ref, o_ref, *, taps, dilation,
                     out_h, out_w, relu):
    acc = None
    for t, (ti, tj) in enumerate(taps):
        h0 = ti * dilation
        w0 = tj * dilation
        win = x_ref[0, h0:h0 + out_h, w0:w0 + out_w, :]       # (oh, ow, Cin)
        win = win.reshape(out_h * out_w, win.shape[-1])
        part = jnp.dot(win, w_ref[t], preferred_element_type=jnp.float32)
        acc = part if acc is None else acc + part
    acc = acc + shift_ref[...]
    if relu:
        acc = jnp.maximum(acc, 0.0)
    o_ref[0] = acc.astype(o_ref.dtype)


def conv2d(x, w, shift, relu=False, stride=1, dilation=1, padding=0):
    """x: (N, H, W, Cin) bf16 NHWC; w: (kh, kw, Cin, Cout) bf16 (BN pre-folded);
    shift: (1, Cout) f32."""
    N, H, W, C = x.shape
    kh, kw, cin, cout = w.shape
    assert cin == C
    out_h = (H + 2 * padding - dilation * (kh - 1) - 1) // stride + 1
    out_w = (W + 2 * padding - dilation * (kw - 1) - 1) // stride + 1
    shift = shift.reshape(1, cout).astype(jnp.float32)

    # Statically skip taps that read only the zero padding (rate-6/12/18 ASPP
    # branches collapse to their center tap on a 4x4 feature map).
    live = []
    for i in range(kh):
        for j in range(kw):
            h0 = i * dilation - padding
            w0 = j * dilation - padding
            if (h0 + stride * (out_h - 1) < 0 or h0 >= H or
                    w0 + stride * (out_w - 1) < 0 or w0 >= W):
                continue
            live.append((i, j))

    # Single live tap whose window lies inside the unpadded input (1x1 convs,
    # collapsed dilated branches): a plain fused matmul.
    if stride == 1 and len(live) == 1:
        i, j = live[0]
        h0, w0 = i * dilation - padding, j * dilation - padding
        if 0 <= h0 and h0 + out_h <= H and 0 <= w0 and w0 + out_w <= W:
            patch = x[:, h0:h0 + out_h, w0:w0 + out_w, :]
            y = fused_matmul(patch.reshape(-1, C), w[i, j].reshape(C, cout),
                             shift, relu)
            return y.reshape(N, out_h, out_w, cout)

    rows = N * out_h * out_w
    Hp, Wp = H + 2 * padding, W + 2 * padding
    fits_vmem = (Hp * Wp * C * 2 <= (8 << 20)) and \
                (out_h * out_w * cout * 4 <= (8 << 20))
    if stride == 1 and rows >= _MIN_PALLAS_ROWS and out_w % 8 == 0 and fits_vmem:
        xp = x if padding == 0 else jnp.pad(
            x, ((0, 0), (padding, padding), (padding, padding), (0, 0)))
        if len(live) == kh * kw:
            wt = w.reshape(kh * kw, cin, cout)       # free reshape
        else:
            wt = jnp.stack([w[i, j] for (i, j) in live], axis=0)
        # TODO(synk): at real DeepLab resolutions tile the output rows and
        # pipeline input row-bands instead of keeping the full map resident.
        out = pl.pallas_call(
            functools.partial(_conv_tap_kernel, taps=tuple(live),
                              dilation=dilation, out_h=out_h, out_w=out_w,
                              relu=relu),
            out_shape=jax.ShapeDtypeStruct((N, out_h * out_w, cout), x.dtype),
            grid_spec=pltpu.PrefetchScalarGridSpec(
                num_scalar_prefetch=0,
                grid=(N,),
                in_specs=[
                    pl.BlockSpec((1, Hp, Wp, C), lambda n: (n, 0, 0, 0)),
                    pl.BlockSpec((len(live), cin, cout), lambda n: (0, 0, 0)),
                    pl.BlockSpec((1, cout), lambda n: (0, 0)),
                ],
                out_specs=pl.BlockSpec((1, out_h * out_w, cout),
                                       lambda n: (n, 0, 0)),
            ),
            compiler_params=pltpu.CompilerParams(
                dimension_semantics=("parallel",)),
        )(xp, wt, shift)
        return out.reshape(N, out_h, out_w, cout)

    # Tiny / strided convs (backbone stand-in, ASPP at 4x4): a single XLA conv
    # -- no HBM im2col buffer, no extra launches.
    y = jax.lax.conv_general_dilated(
        x, w, window_strides=(stride, stride),
        padding=[(padding, padding), (padding, padding)],
        rhs_dilation=(dilation, dilation),
        dimension_numbers=("NHWC", "HWIO", "NHWC"),
        preferred_element_type=jnp.float32)
    y = y + shift.reshape(1, 1, 1, cout)
    if relu:
        y = jnp.maximum(y, 0.0)
    return y.astype(x.dtype)


# ----------------------------------------------------------------------------
# Separable bilinear resize (align_corners=True): W-interp on the small
# pre-upsample tensor (XLA), then H-interp as a Pallas matmul over the widened
# tensor with channels folded into the lane dim. No kron matrix.
# ----------------------------------------------------------------------------
def _interp_matrix(out_size, in_size):
    if out_size == 1:
        src = np.zeros((1,), np.float32)
    else:
        src = np.arange(out_size, dtype=np.float32) * (
            (in_size - 1) / (out_size - 1))
    lo = np.clip(np.floor(src).astype(np.int32), 0, in_size - 1)
    hi = np.minimum(lo + 1, in_size - 1)
    w_hi = (src - lo.astype(np.float32)).astype(np.float32)
    w_lo = 1.0 - w_hi
    A = np.zeros((out_size, in_size), np.float32)
    rows = np.arange(out_size)
    A[rows, lo] += w_lo
    A[rows, hi] += w_hi
    return jnp.asarray(A)


def _hinterp_kernel(a_ref, x_ref, o_ref):
    o_ref[0] = jnp.dot(a_ref[...], x_ref[0],
                       preferred_element_type=jnp.float32).astype(o_ref.dtype)


def bilinear_resize(x, out_hw):
    """x: (N, H, W, C) -> (N, H2, W2, C), bilinear, align_corners=True."""
    N, H, W, C = x.shape
    H2, W2 = out_hw
    if (H2, W2) == (H, W):
        return x
    if H == 1 and W == 1:                  # constant source -> pure broadcast
        return jnp.broadcast_to(x, (N, H2, W2, C))
    Ah = _interp_matrix(H2, H)             # (H2, H) compile-time constant
    Aw = _interp_matrix(W2, W)             # (W2, W) compile-time constant

    # Step 1 (W-interp) runs in XLA on the *small* pre-upsample tensor.
    u = jnp.einsum("bw,nhwc->nhbc", Aw, x.astype(jnp.float32))
    u = u.astype(x.dtype).reshape(N, H, W2 * C)        # free reshape
    WC = W2 * C

    # Step 2 (H-interp): tiny resizes stay in XLA, the big final upsample runs
    # as a Pallas matmul (channels in lanes, bf16 operands, f32 accumulate).
    if N * H2 * WC < 64 * 1024 or WC < 512:
        z = jnp.einsum("ah,nhk->nak", Ah,
                       u.astype(jnp.float32)).astype(x.dtype)
        return z.reshape(N, H2, W2, C)

    # Ah's block index is constant across grid steps -> it stays VMEM-resident
    # (the review's "keep the constant operand resident" request).
    out = pl.pallas_call(
        _hinterp_kernel,
        out_shape=jax.ShapeDtypeStruct((N, H2, WC), x.dtype),
        grid_spec=pltpu.PrefetchScalarGridSpec(
            num_scalar_prefetch=0,
            grid=(N,),
            in_specs=[
                pl.BlockSpec((H2, H), lambda n: (0, 0)),
                pl.BlockSpec((1, H, WC), lambda n: (n, 0, 0)),
            ],
            out_specs=pl.BlockSpec((1, H2, WC), lambda n: (n, 0, 0)),
        ),
        compiler_params=pltpu.CompilerParams(
            dimension_semantics=("parallel",)),
    )(Ah.astype(jnp.bfloat16), u.astype(jnp.bfloat16))
    return out.astype(x.dtype).reshape(N, H2, W2, C)


# ----------------------------------------------------------------------------
# Parameter init (deterministic, synthetic). BN is folded into the weights and
# the weights are cast to bf16 ONCE here; the classifier is lane-padded here.
# ----------------------------------------------------------------------------
def _conv_params(key, kh, kw, cin, cout, eps=1e-5):
    k1, k2, k3 = jax.random.split(key, 3)
    w = jax.random.normal(k1, (kh, kw, cin, cout), jnp.float32) / math.sqrt(
        kh * kw * cin)
    gamma = 1.0 + 0.1 * jax.random.normal(k2, (cout,), jnp.float32)
    beta = 0.1 * jax.random.normal(k3, (cout,), jnp.float32)
    mean = jnp.zeros((cout,), jnp.float32)
    var = jnp.ones((cout,), jnp.float32)
    scale = gamma / jnp.sqrt(var + eps)
    shift = (beta - mean * scale).reshape(1, cout)
    w = w * scale.reshape(1, 1, 1, cout)          # fold BN scale once
    return w.astype(jnp.bfloat16), shift.astype(jnp.float32)


def init_params(key, num_classes=21):
    keys = iter(jax.random.split(key, 48))
    nk = lambda: next(keys)

    # Scaled-down conv stem standing in for the external ResNet backbone
    # (high-level features at stride 16, low-level features at stride 4).
    bb = {}
    for idx, (ci, co) in enumerate([(3, 16), (16, 24), (24, 32), (32, 64)], 1):
        bb[f"w{idx}"], bb[f"b{idx}"] = _conv_params(nk(), 3, 3, ci, co)

    # ASPP: 1x1 + three dilated 3x3 + global-pool branch, then 1x1 merge.
    cin, mid = 64, 32
    aspp = {}
    aspp["w1"], aspp["b1"] = _conv_params(nk(), 1, 1, cin, mid)
    for idx in (2, 3, 4):
        aspp[f"w{idx}"], aspp[f"b{idx}"] = _conv_params(nk(), 3, 3, cin, mid)
    aspp["w5"], aspp["b5"] = _conv_params(nk(), 1, 1, cin, mid)
    aspp["wm"], aspp["bm"] = _conv_params(nk(), 1, 1, 5 * mid, mid)

    # Decoder.
    low_c, low_red = 24, 12
    dec = {}
    dec["w_low"], dec["b_low"] = _conv_params(nk(), 1, 1, low_c, low_red)
    dec["w_c1"], dec["b_c1"] = _conv_params(nk(), 3, 3, mid + low_red, mid)
    dec["w_c2"], dec["b_c2"] = _conv_params(nk(), 3, 3, mid, mid)

    # Classifier (no BN): pad output channels to 128 once, at init, so its
    # Pallas matmul stores are lane-dense; the pad is sliced off right after.
    ncp = -(-num_classes // 128) * 128
    w_cls = jax.random.normal(nk(), (1, 1, mid, num_classes),
                              jnp.float32) / math.sqrt(mid)
    b_cls = 0.01 * jax.random.normal(nk(), (num_classes,), jnp.float32)
    dec["w_cls"] = jnp.pad(
        w_cls, ((0, 0), (0, 0), (0, 0), (0, ncp - num_classes))
    ).astype(jnp.bfloat16)
    dec["b_cls"] = jnp.pad(b_cls, (0, ncp - num_classes)).reshape(1, ncp)

    return {"backbone": bb, "aspp": aspp, "decoder": dec}


# ----------------------------------------------------------------------------
# DeepLab forward
# ----------------------------------------------------------------------------
def deeplab_forward(params, x_nchw, num_classes=21):
    x = jnp.transpose(x_nchw, (0, 2, 3, 1)).astype(jnp.bfloat16)   # -> NHWC
    N, H, W, _ = x.shape

    # ---- backbone (stride 16 features + stride 4 low-level features) ----
    p = params["backbone"]
    h = conv2d(x, p["w1"], p["b1"], relu=True, stride=2, padding=1)   # /2
    h = conv2d(h, p["w2"], p["b2"], relu=True, stride=2, padding=1)   # /4
    low_level_feat = h
    h = conv2d(h, p["w3"], p["b3"], relu=True, stride=2, padding=1)   # /8
    h = conv2d(h, p["w4"], p["b4"], relu=True, stride=2, padding=1)   # /16

    # ---- ASPP (rates 1/6/12/18 for output_stride=16) ----
    a = params["aspp"]
    fh, fw, c_in = h.shape[1], h.shape[2], h.shape[3]
    y1 = conv2d(h, a["w1"], a["b1"], relu=True)
    y2 = conv2d(h, a["w2"], a["b2"], relu=True, dilation=6, padding=6)
    y3 = conv2d(h, a["w3"], a["b3"], relu=True, dilation=12, padding=12)
    y4 = conv2d(h, a["w4"], a["b4"], relu=True, dilation=18, padding=18)
    pooled = jnp.mean(h.astype(jnp.float32), axis=(1, 2)).astype(jnp.bfloat16)
    y5 = fused_matmul(pooled, a["w5"].reshape(c_in, -1), a["b5"], relu=True)
    y5 = bilinear_resize(y5.reshape(N, 1, 1, -1), (fh, fw))
    ycat = jnp.concatenate([y1, y2, y3, y4, y5], axis=-1)
    y = conv2d(ycat, a["wm"], a["bm"], relu=True)
    # TODO(synk): ASPP Dropout(0.5) omitted (eval semantics -> identity).

    # ---- decoder ----
    d = params["decoder"]
    low = conv2d(low_level_feat, d["w_low"], d["b_low"], relu=True)
    yu = bilinear_resize(y, (low.shape[1], low.shape[2]))
    cat = jnp.concatenate([yu, low], axis=-1)
    z = conv2d(cat, d["w_c1"], d["b_c1"], relu=True, padding=1)
    z = conv2d(z, d["w_c2"], d["b_c2"], relu=True, padding=1)
    # TODO(synk): decoder Dropout(0.5)/Dropout(0.1) omitted (eval -> identity).

    # Classifier: lane-dense 128-channel Pallas matmul; slice the pad off
    # BEFORE the big upsample so the largest tensor is not 6x wider than needed.
    zc = conv2d(z, d["w_cls"], d["b_cls"], relu=False)
    zc = zc[..., :num_classes]

    # ---- final bilinear upsample to input size (align_corners=True) ----
    zc = bilinear_resize(zc, (H, W))
    return jnp.transpose(zc, (0, 3, 1, 2)).astype(jnp.float32)      # NCHW


if __name__ == "__main__":
    num_classes = 21
    key = jax.random.PRNGKey(0)
    k_in, k_params = jax.random.split(key)
    x = jax.random.normal(k_in, (2, 3, 64, 64), jnp.float32)   # NCHW input
    params = init_params(k_params, num_classes=num_classes)

    fwd = jax.jit(deeplab_forward, static_argnames=("num_classes",))
    out = jax.block_until_ready(fwd(params, x, num_classes=num_classes))
    assert out.shape == (2, num_classes, 64, 64), out.shape
    assert bool(jnp.all(jnp.isfinite(out)))
    print("KERNEL_OK")
</pallas_src>

<mosaic_0001>
module attributes {stable_mosaic.version = 11 : i64} {
  func.func @_conv_tap_kernel(%arg0: i32, %arg1: memref<1x18x18x44xbf16, #tpu.memory_space<vmem>>, %arg2: memref<9x44x32xbf16, #tpu.memory_space<vmem>>, %arg3: memref<1x32xf32, #tpu.memory_space<vmem>>, %arg4: memref<1x256x32xbf16, #tpu.memory_space<vmem>>) attributes {dimension_semantics = [#tpu.dimension_semantics<parallel>], iteration_bounds = array<i64: 2>, scalar_prefetch = 0 : i64, scratch_operands = 0 : i64, tpu.core_type = #tpu.core_type<tc>, window_params = [{transform_indices = @transform_0, window_bounds = array<i64: 1, 18, 18, 44>}, {pipeline_mode = #tpu.pipeline_mode<synchronous>, transform_indices = @transform_1, window_bounds = array<i64: 9, 44, 32>}, {pipeline_mode = #tpu.pipeline_mode<synchronous>, transform_indices = @transform_2, window_bounds = array<i64: 1, 32>}, {transform_indices = @transform_3, window_bounds = array<i64: 1, 256, 32>}]} {
    %c0 = arith.constant 0 : index
    %c0_0 = arith.constant 0 : index
    %c0_1 = arith.constant 0 : index
    %c0_2 = arith.constant 0 : index
    %0 = vector.load %arg1[%c0, %c0_0, %c0_1, %c0_2] : memref<1x18x18x44xbf16, #tpu.memory_space<vmem>>, vector<1x16x16x44xbf16>
    %1 = vector.shape_cast %0 : vector<1x16x16x44xbf16> to vector<16x16x44xbf16>
    %2 = vector.shape_cast %1 : vector<16x16x44xbf16> to vector<256x44xbf16>
    %c0_3 = arith.constant 0 : index
    %c0_4 = arith.constant 0 : index
    %c0_5 = arith.constant 0 : index
    %3 = vector.load %arg2[%c0_3, %c0_4, %c0_5] : memref<9x44x32xbf16, #tpu.memory_space<vmem>>, vector<1x44x32xbf16>
    %4 = vector.shape_cast %3 : vector<1x44x32xbf16> to vector<44x32xbf16>
    %cst = arith.constant dense<0.000000e+00> : vector<256x32xf32>
    %5 = tpu.matmul %2, %4, %cst {dimension_numbers = #tpu.dot_dimension_numbers<[1], [0], [0], [1], [0, 0, 1, 1], [], []>} : vector<256x44xbf16>, vector<44x32xbf16>, vector<256x32xf32> -> vector<256x32xf32>
    %c0_6 = arith.constant 0 : index
    %c0_7 = arith.constant 0 : index
    %c1 = arith.constant 1 : index
    %c0_8 = arith.constant 0 : index
    %6 = vector.load %arg1[%c0_6, %c0_7, %c1, %c0_8] : memref<1x18x18x44xbf16, #tpu.memory_space<vmem>>, vector<1x16x16x44xbf16>
    %7 = vector.shape_cast %6 : vector<1x16x16x44xbf16> to vector<16x16x44xbf16>
    %8 = vector.shape_cast %7 : vector<16x16x44xbf16> to vector<256x44xbf16>
    %c1_9 = arith.constant 1 : index
    %c0_10 = arith.constant 0 : index
    %c0_11 = arith.constant 0 : index
    %9 = vector.load %arg2[%c1_9, %c0_10, %c0_11] : memref<9x44x32xbf16, #tpu.memory_space<vmem>>, vector<1x44x32xbf16>
    %10 = vector.shape_cast %9 : vector<1x44x32xbf16> to vector<44x32xbf16>
    %cst_12 = arith.constant dense<0.000000e+00> : vector<256x32xf32>
    %11 = tpu.matmul %8, %10, %cst_12 {dimension_numbers = #tpu.dot_dimension_numbers<[1], [0], [0], [1], [0, 0, 1, 1], [], []>} : vector<256x44xbf16>, vector<44x32xbf16>, vector<256x32xf32> -> vector<256x32xf32>
    %12 = arith.addf %5, %11 : vector<256x32xf32>
    %c0_13 = arith.constant 0 : index
    %c0_14 = arith.constant 0 : index
    %c2 = arith.constant 2 : index
    %c0_15 = arith.constant 0 : index
    %13 = vector.load %arg1[%c0_13, %c0_14, %c2, %c0_15] : memref<1x18x18x44xbf16, #tpu.memory_space<vmem>>, vector<1x16x16x44xbf16>
    %14 = vector.shape_cast %13 : vector<1x16x16x44xbf16> to vector<16x16x44xbf16>
    %15 = vector.shape_cast %14 : vector<16x16x44xbf16> to vector<256x44xbf16>
    %c2_16 = arith.constant 2 : index
    %c0_17 = arith.constant 0 : index
    %c0_18 = arith.constant 0 : index
    %16 = vector.load %arg2[%c2_16, %c0_17, %c0_18] : memref<9x44x32xbf16, #tpu.memory_space<vmem>>, vector<1x44x32xbf16>
    %17 = vector.shape_cast %16 : vector<1x44x32xbf16> to vector<44x32xbf16>
    %cst_19 = arith.constant dense<0.000000e+00> : vector<256x32xf32>
    %18 = tpu.matmul %15, %17, %cst_19 {dimension_numbers = #tpu.dot_dimension_numbers<[1], [0], [0], [1], [0, 0, 1, 1], [], []>} : vector<256x44xbf16>, vector<44x32xbf16>, vector<256x32xf32> -> vector<256x32xf32>
    %19 = arith.addf %12, %18 : vector<256x32xf32>
    %c0_20 = arith.constant 0 : index
    %c1_21 = arith.constant 1 : index
    %c0_22 = arith.constant 0 : index
    %c0_23 = arith.constant 0 : index
    %20 = vector.load %arg1[%c0_20, %c1_21, %c0_22, %c0_23] : memref<1x18x18x44xbf16, #tpu.memory_space<vmem>>, vector<1x16x16x44xbf16>
    %21 = vector.shape_cast %20 : vector<1x16x16x44xbf16> to vector<16x16x44xbf16>
    %22 = vector.shape_cast %21 : vector<16x16x44xbf16> to vector<256x44xbf16>
    %c3 = arith.constant 3 : index
    %c0_24 = arith.constant 0 : index
    %c0_25 = arith.constant 0 : index
    %23 = vector.load %arg2[%c3, %c0_24, %c0_25] : memref<9x44x32xbf16, #tpu.memory_space<vmem>>, vector<1x44x32xbf16>
    %24 = vector.shape_cast %23 : vector<1x44x32xbf16> to vector<44x32xbf16>
    %cst_26 = arith.constant dense<0.000000e+00> : vector<256x32xf32>
    %25 = tpu.matmul %22, %24, %cst_26 {dimension_numbers = #tpu.dot_dimension_numbers<[1], [0], [0], [1], [0, 0, 1, 1], [], []>} : vector<256x44xbf16>, vector<44x32xbf16>, vector<256x32xf32> -> vector<256x32xf32>
    %26 = arith.addf %19, %25 : vector<256x32xf32>
    %c0_27 = arith.constant 0 : index
    %c1_28 = arith.constant 1 : index
    %c1_29 = arith.constant 1 : index
    %c0_30 = arith.constant 0 : index
    %27 = vector.load %arg1[%c0_27, %c1_28, %c1_29, %c0_30] : memref<1x18x18x44xbf16, #tpu.memory_space<vmem>>, vector<1x16x16x44xbf16>
    %28 = vector.shape_cast %27 : vector<1x16x16x44xbf16> to vector<16x16x44xbf16>
    %29 = vector.shape_cast %28 : vector<16x16x44xbf16> to vector<256x44xbf16>
    %c4 = arith.constant 4 : index
    %c0_31 = arith.constant 0 : index
    %c0_32 = arith.constant 0 : index
    %30 = vector.load %arg2[%c4, %c0_31, %c0_32] : memref<9x44x32xbf16, #tpu.memory_space<vmem>>, vector<1x44x32xbf16>
    %31 = vector.shape_cast %30 : vector<1x44x32xbf16> to vector<44x32xbf16>
    %cst_33 = arith.constant dense<0.000000e+00> : vector<256x32xf32>
    %32 = tpu.matmul %29, %31, %cst_33 {dimension_numbers = #tpu.dot_dimension_numbers<[1], [0], [0], [1], [0, 0, 1, 1], [], []>} : vector<256x44xbf16>, vector<44x32xbf16>, vector<256x32xf32> -> vector<256x32xf32>
    %33 = arith.addf %26, %32 : vector<256x32xf32>
    %c0_34 = arith.constant 0 : index
    %c1_35 = arith.constant 1 : index
    %c2_36 = arith.constant 2 : index
    %c0_37 = arith.constant 0 : index
    %34 = vector.load %arg1[%c0_34, %c1_35, %c2_36, %c0_37] : memref<1x18x18x44xbf16, #tpu.memory_space<vmem>>, vector<1x16x16x44xbf16>
    %35 = vector.shape_cast %34 : vector<1x16x16x44xbf16> to vector<16x16x44xbf16>
    %36 = vector.shape_cast %35 : vector<16x16x44xbf16> to vector<256x44xbf16>
    %c5 = arith.constant 5 : index
    %c0_38 = arith.constant 0 : index
    %c0_39 = arith.constant 0 : index
    %37 = vector.load %arg2[%c5, %c0_38, %c0_39] : memref<9x44x32xbf16, #tpu.memory_space<vmem>>, vector<1x44x32xbf16>
    %38 = vector.shape_cast %37 : vector<1x44x32xbf16> to vector<44x32xbf16>
    %cst_40 = arith.constant dense<0.000000e+00> : vector<256x32xf32>
    %39 = tpu.matmul %36, %38, %cst_40 {dimension_numbers = #tpu.dot_dimension_numbers<[1], [0], [0], [1], [0, 0, 1, 1], [], []>} : vector<256x44xbf16>, vector<44x32xbf16>, vector<256x32xf32> -> vector<256x32xf32>
    %40 = arith.addf %33, %39 : vector<256x32xf32>
    %c0_41 = arith.constant 0 : index
    %c2_42 = arith.constant 2 : index
    %c0_43 = arith.constant 0 : index
    %c0_44 = arith.constant 0 : index
    %41 = vector.load %arg1[%c0_41, %c2_42, %c0_43, %c0_44] : memref<1x18x18x44xbf16, #tpu.memory_space<vmem>>, vector<1x16x16x44xbf16>
    %42 = vector.shape_cast %41 : vector<1x16x16x44xbf16> to vector<16x16x44xbf16>
    %43 = vector.shape_cast %42 : vector<16x16x44xbf16> to vector<256x44xbf16>
    %c6 = arith.constant 6 : index
    %c0_45 = arith.constant 0 : index
    %c0_46 = arith.constant 0 : index
    %44 = vector.load %arg2[%c6, %c0_45, %c0_46] : memref<9x44x32xbf16, #tpu.memory_space<vmem>>, vector<1x44x32xbf16>
    %45 = vector.shape_cast %44 : vector<1x44x32xbf16> to vector<44x32xbf16>
    %cst_47 = arith.constant dense<0.000000e+00> : vector<256x32xf32>
    %46 = tpu.matmul %43, %45, %cst_47 {dimension_numbers = #tpu.dot_dimension_numbers<[1], [0], [0], [1], [0, 0, 1, 1], [], []>} : vector<256x44xbf16>, vector<44x32xbf16>, vector<256x32xf32> -> vector<256x32xf32>
    %47 = arith.addf %40, %46 : vector<256x32xf32>
    %c0_48 = arith.constant 0 : index
    %c2_49 = arith.constant 2 : index
    %c1_50 = arith.constant 1 : index
    %c0_51 = arith.constant 0 : index
    %48 = vector.load %arg1[%c0_48, %c2_49, %c1_50, %c0_51] : memref<1x18x18x44xbf16, #tpu.memory_space<vmem>>, vector<1x16x16x44xbf16>
    %49 = vector.shape_cast %48 : vector<1x16x16x44xbf16> to vector<16x16x44xbf16>
    %50 = vector.shape_cast %49 : vector<16x16x44xbf16> to vector<256x44xbf16>
    %c7 = arith.constant 7 : index
    %c0_52 = arith.constant 0 : index
    %c0_53 = arith.constant 0 : index
    %51 = vector.load %arg2[%c7, %c0_52, %c0_53] : memref<9x44x32xbf16, #tpu.memory_space<vmem>>, vector<1x44x32xbf16>
    %52 = vector.shape_cast %51 : vector<1x44x32xbf16> to vector<44x32xbf16>
    %cst_54 = arith.constant dense<0.000000e+00> : vector<256x32xf32>
    %53 = tpu.matmul %50, %52, %cst_54 {dimension_numbers = #tpu.dot_dimension_numbers<[1], [0], [0], [1], [0, 0, 1, 1], [], []>} : vector<256x44xbf16>, vector<44x32xbf16>, vector<256x32xf32> -> vector<256x32xf32>
    %54 = arith.addf %47, %53 : vector<256x32xf32>
    %c0_55 = arith.constant 0 : index
    %c2_56 = arith.constant 2 : index
    %c2_57 = arith.constant 2 : index
    %c0_58 = arith.constant 0 : index
    %55 = vector.load %arg1[%c0_55, %c2_56, %c2_57, %c0_58] : memref<1x18x18x44xbf16, #tpu.memory_space<vmem>>, vector<1x16x16x44xbf16>
    %56 = vector.shape_cast %55 : vector<1x16x16x44xbf16> to vector<16x16x44xbf16>
    %57 = vector.shape_cast %56 : vector<16x16x44xbf16> to vector<256x44xbf16>
    %c8 = arith.constant 8 : index
    %c0_59 = arith.constant 0 : index
    %c0_60 = arith.constant 0 : index
    %58 = vector.load %arg2[%c8, %c0_59, %c0_60] : memref<9x44x32xbf16, #tpu.memory_space<vmem>>, vector<1x44x32xbf16>
    %59 = vector.shape_cast %58 : vector<1x44x32xbf16> to vector<44x32xbf16>
    %cst_61 = arith.constant dense<0.000000e+00> : vector<256x32xf32>
    %60 = tpu.matmul %57, %59, %cst_61 {dimension_numbers = #tpu.dot_dimension_numbers<[1], [0], [0], [1], [0, 0, 1, 1], [], []>} : vector<256x44xbf16>, vector<44x32xbf16>, vector<256x32xf32> -> vector<256x32xf32>
    %61 = arith.addf %54, %60 : vector<256x32xf32>
    %c0_62 = arith.constant 0 : index
    %c0_63 = arith.constant 0 : index
    %62 = vector.load %arg3[%c0_62, %c0_63] : memref<1x32xf32, #tpu.memory_space<vmem>>, vector<1x32xf32>
    %63 = vector.broadcast %62 : vector<1x32xf32> to vector<256x32xf32>
    %64 = arith.addf %61, %63 : vector<256x32xf32>
    %cst_64 = arith.constant 0.000000e+00 : f32
    %65 = vector.broadcast %cst_64 : f32 to vector<256x32xf32>
    %66 = arith.maximumf %64, %65 : vector<256x32xf32>
    %67 = arith.truncf %66 : vector<256x32xf32> to vector<256x32xbf16>
    %c0_65 = arith.constant 0 : index
    %c0_66 = arith.constant 0 : index
    %c0_67 = arith.constant 0 : index
    %68 = vector.load %arg4[%c0_65, %c0_66, %c0_67] : memref<1x256x32xbf16, #tpu.memory_space<vmem>>, vector<1x256x32xbf16>
    %69 = vector.shape_cast %68 : vector<1x256x32xbf16> to vector<256x32xbf16>
    %70 = vector.shape_cast %67 : vector<256x32xbf16> to vector<1x256x32xbf16>
    tpu.vector_store %arg4[%c0_65, %c0_66, %c0_67], %70 {strides = array<i32>} : memref<1x256x32xbf16, #tpu.memory_space<vmem>>, vector<1x256x32xbf16>,
    return
  }
  func.func @transform_0(%arg0: i32) -> (i32, i32, i32, i32) {
    %c0_i32 = arith.constant 0 : i32
    %c0_i32_0 = arith.constant 0 : i32
    %c0_i32_1 = arith.constant 0 : i32
    %c0_i32_2 = arith.constant 0 : i32
    return %arg0, %c0_i32, %c0_i32_0, %c0_i32_1 : i32, i32, i32, i32
  }
  func.func @transform_1(%arg0: i32) -> (i32, i32, i32) {
    %c0_i32 = arith.constant 0 : i32
    %c0_i32_0 = arith.constant 0 : i32
    %c0_i32_1 = arith.constant 0 : i32
    %c0_i32_2 = arith.constant 0 : i32
    return %c0_i32, %c0_i32_0, %c0_i32_1 : i32, i32, i32
  }
  func.func @transform_2(%arg0: i32) -> (i32, i32) {
    %c0_i32 = arith.constant 0 : i32
    %c0_i32_0 = arith.constant 0 : i32
    %c0_i32_1 = arith.constant 0 : i32
    return %c0_i32, %c0_i32_0 : i32, i32
  }
  func.func @transform_3(%arg0: i32) -> (i32, i32, i32) {
    %c0_i32 = arith.constant 0 : i32
    %c0_i32_0 = arith.constant 0 : i32
    %c0_i32_1 = arith.constant 0 : i32
    return %arg0, %c0_i32, %c0_i32_0 : i32, i32, i32
  }
}

module attributes {stable_mosaic.version = 11 : i64} {
  func.func @_conv_tap_kernel(%arg0: i32, %arg1: memref<1x18x18x32xbf16, #tpu.memory_space<vmem>>, %arg2: memref<9x32x32xbf16, #tpu.memory_space<vmem>>, %arg3: memref<1x32xf32, #tpu.memory_space<vmem>>, %arg4: memref<1x256x32xbf16, #tpu.memory_space<vmem>>) attributes {dimension_semantics = [#tpu.dimension_semantics<parallel>], iteration_bounds = array<i64: 2>, scalar_prefetch = 0 : i64, scratch_operands = 0 : i64, tpu.core_type = #tpu.core_type<tc>, window_params = [{transform_indices = @transform_0, window_bounds = array<i64: 1, 18, 18, 32>}, {pipeline_mode = #tpu.pipeline_mode<synchronous>, transform_indices = @transform_1, window_bounds = array<i64: 9, 32, 32>}, {pipeline_mode = #tpu.pipeline_mode<synchronous>, transform_indices = @transform_2, window_bounds = array<i64: 1, 32>}, {transform_indices = @transform_3, window_bounds = array<i64: 1, 256, 32>}]} {
    %c0 = arith.constant 0 : index
    %c0_0 = arith.constant 0 : index
    %c0_1 = arith.constant 0 : index
    %c0_2 = arith.constant 0 : index
    %0 = vector.load %arg1[%c0, %c0_0, %c0_1, %c0_2] : memref<1x18x18x32xbf16, #tpu.memory_space<vmem>>, vector<1x16x16x32xbf16>
    %1 = vector.shape_cast %0 : vector<1x16x16x32xbf16> to vector<16x16x32xbf16>
    %2 = vector.shape_cast %1 : vector<16x16x32xbf16> to vector<256x32xbf16>
    %c0_3 = arith.constant 0 : index
    %c0_4 = arith.constant 0 : index
    %c0_5 = arith.constant 0 : index
    %3 = vector.load %arg2[%c0_3, %c0_4, %c0_5] : memref<9x32x32xbf16, #tpu.memory_space<vmem>>, vector<1x32x32xbf16>
    %4 = vector.shape_cast %3 : vector<1x32x32xbf16> to vector<32x32xbf16>
    %cst = arith.constant dense<0.000000e+00> : vector<256x32xf32>
    %5 = tpu.matmul %2, %4, %cst {dimension_numbers = #tpu.dot_dimension_numbers<[1], [0], [0], [1], [0, 0, 1, 1], [], []>} : vector<256x32xbf16>, vector<32x32xbf16>, vector<256x32xf32> -> vector<256x32xf32>
    %c0_6 = arith.constant 0 : index
    %c0_7 = arith.constant 0 : index
    %c1 = arith.constant 1 : index
    %c0_8 = arith.constant 0 : index
    %6 = vector.load %arg1[%c0_6, %c0_7, %c1, %c0_8] : memref<1x18x18x32xbf16, #tpu.memory_space<vmem>>, vector<1x16x16x32xbf16>
    %7 = vector.shape_cast %6 : vector<1x16x16x32xbf16> to vector<16x16x32xbf16>
    %8 = vector.shape_cast %7 : vector<16x16x32xbf16> to vector<256x32xbf16>
    %c1_9 = arith.constant 1 : index
    %c0_10 = arith.constant 0 : index
    %c0_11 = arith.constant 0 : index
    %9 = vector.load %arg2[%c1_9, %c0_10, %c0_11] : memref<9x32x32xbf16, #tpu.memory_space<vmem>>, vector<1x32x32xbf16>
    %10 = vector.shape_cast %9 : vector<1x32x32xbf16> to vector<32x32xbf16>
    %cst_12 = arith.constant dense<0.000000e+00> : vector<256x32xf32>
    %11 = tpu.matmul %8, %10, %cst_12 {dimension_numbers = #tpu.dot_dimension_numbers<[1], [0], [0], [1], [0, 0, 1, 1], [], []>} : vector<256x32xbf16>, vector<32x32xbf16>, vector<256x32xf32> -> vector<256x32xf32>
    %12 = arith.addf %5, %11 : vector<256x32xf32>
    %c0_13 = arith.constant 0 : index
    %c0_14 = arith.constant 0 : index
    %c2 = arith.constant 2 : index
    %c0_15 = arith.constant 0 : index
    %13 = vector.load %arg1[%c0_13, %c0_14, %c2, %c0_15] : memref<1x18x18x32xbf16, #tpu.memory_space<vmem>>, vector<1x16x16x32xbf16>
    %14 = vector.shape_cast %13 : vector<1x16x16x32xbf16> to vector<16x16x32xbf16>
    %15 = vector.shape_cast %14 : vector<16x16x32xbf16> to vector<256x32xbf16>
    %c2_16 = arith.constant 2 : index
    %c0_17 = arith.constant 0 : index
    %c0_18 = arith.constant 0 : index
    %16 = vector.load %arg2[%c2_16, %c0_17, %c0_18] : memref<9x32x32xbf16, #tpu.memory_space<vmem>>, vector<1x32x32xbf16>
    %17 = vector.shape_cast %16 : vector<1x32x32xbf16> to vector<32x32xbf16>
    %cst_19 = arith.constant dense<0.000000e+00> : vector<256x32xf32>
    %18 = tpu.matmul %15, %17, %cst_19 {dimension_numbers = #tpu.dot_dimension_numbers<[1], [0], [0], [1], [0, 0, 1, 1], [], []>} : vector<256x32xbf16>, vector<32x32xbf16>, vector<256x32xf32> -> vector<256x32xf32>
    %19 = arith.addf %12, %18 : vector<256x32xf32>
    %c0_20 = arith.constant 0 : index
    %c1_21 = arith.constant 1 : index
    %c0_22 = arith.constant 0 : index
    %c0_23 = arith.constant 0 : index
    %20 = vector.load %arg1[%c0_20, %c1_21, %c0_22, %c0_23] : memref<1x18x18x32xbf16, #tpu.memory_space<vmem>>, vector<1x16x16x32xbf16>
    %21 = vector.shape_cast %20 : vector<1x16x16x32xbf16> to vector<16x16x32xbf16>
    %22 = vector.shape_cast %21 : vector<16x16x32xbf16> to vector<256x32xbf16>
    %c3 = arith.constant 3 : index
    %c0_24 = arith.constant 0 : index
    %c0_25 = arith.constant 0 : index
    %23 = vector.load %arg2[%c3, %c0_24, %c0_25] : memref<9x32x32xbf16, #tpu.memory_space<vmem>>, vector<1x32x32xbf16>
    %24 = vector.shape_cast %23 : vector<1x32x32xbf16> to vector<32x32xbf16>
    %cst_26 = arith.constant dense<0.000000e+00> : vector<256x32xf32>
    %25 = tpu.matmul %22, %24, %cst_26 {dimension_numbers = #tpu.dot_dimension_numbers<[1], [0], [0], [1], [0, 0, 1, 1], [], []>} : vector<256x32xbf16>, vector<32x32xbf16>, vector<256x32xf32> -> vector<256x32xf32>
    %26 = arith.addf %19, %25 : vector<256x32xf32>
    %c0_27 = arith.constant 0 : index
    %c1_28 = arith.constant 1 : index
    %c1_29 = arith.constant 1 : index
    %c0_30 = arith.constant 0 : index
    %27 = vector.load %arg1[%c0_27, %c1_28, %c1_29, %c0_30] : memref<1x18x18x32xbf16, #tpu.memory_space<vmem>>, vector<1x16x16x32xbf16>
    %28 = vector.shape_cast %27 : vector<1x16x16x32xbf16> to vector<16x16x32xbf16>
    %29 = vector.shape_cast %28 : vector<16x16x32xbf16> to vector<256x32xbf16>
    %c4 = arith.constant 4 : index
    %c0_31 = arith.constant 0 : index
    %c0_32 = arith.constant 0 : index
    %30 = vector.load %arg2[%c4, %c0_31, %c0_32] : memref<9x32x32xbf16, #tpu.memory_space<vmem>>, vector<1x32x32xbf16>
    %31 = vector.shape_cast %30 : vector<1x32x32xbf16> to vector<32x32xbf16>
    %cst_33 = arith.constant dense<0.000000e+00> : vector<256x32xf32>
    %32 = tpu.matmul %29, %31, %cst_33 {dimension_numbers = #tpu.dot_dimension_numbers<[1], [0], [0], [1], [0, 0, 1, 1], [], []>} : vector<256x32xbf16>, vector<32x32xbf16>, vector<256x32xf32> -> vector<256x32xf32>
    %33 = arith.addf %26, %32 : vector<256x32xf32>
    %c0_34 = arith.constant 0 : index
    %c1_35 = arith.constant 1 : index
    %c2_36 = arith.constant 2 : index
    %c0_37 = arith.constant 0 : index
    %34 = vector.load %arg1[%c0_34, %c1_35, %c2_36, %c0_37] : memref<1x18x18x32xbf16, #tpu.memory_space<vmem>>, vector<1x16x16x32xbf16>
    %35 = vector.shape_cast %34 : vector<1x16x16x32xbf16> to vector<16x16x32xbf16>
    %36 = vector.shape_cast %35 : vector<16x16x32xbf16> to vector<256x32xbf16>
    %c5 = arith.constant 5 : index
    %c0_38 = arith.constant 0 : index
    %c0_39 = arith.constant 0 : index
    %37 = vector.load %arg2[%c5, %c0_38, %c0_39] : memref<9x32x32xbf16, #tpu.memory_space<vmem>>, vector<1x32x32xbf16>
    %38 = vector.shape_cast %37 : vector<1x32x32xbf16> to vector<32x32xbf16>
    %cst_40 = arith.constant dense<0.000000e+00> : vector<256x32xf32>
    %39 = tpu.matmul %36, %38, %cst_40 {dimension_numbers = #tpu.dot_dimension_numbers<[1], [0], [0], [1], [0, 0, 1, 1], [], []>} : vector<256x32xbf16>, vector<32x32xbf16>, vector<256x32xf32> -> vector<256x32xf32>
    %40 = arith.addf %33, %39 : vector<256x32xf32>
    %c0_41 = arith.constant 0 : index
    %c2_42 = arith.constant 2 : index
    %c0_43 = arith.constant 0 : index
    %c0_44 = arith.constant 0 : index
    %41 = vector.load %arg1[%c0_41, %c2_42, %c0_43, %c0_44] : memref<1x18x18x32xbf16, #tpu.memory_space<vmem>>, vector<1x16x16x32xbf16>
    %42 = vector.shape_cast %41 : vector<1x16x16x32xbf16> to vector<16x16x32xbf16>
    %43 = vector.shape_cast %42 : vector<16x16x32xbf16> to vector<256x32xbf16>
    %c6 = arith.constant 6 : index
    %c0_45 = arith.constant 0 : index
    %c0_46 = arith.constant 0 : index
    %44 = vector.load %arg2[%c6, %c0_45, %c0_46] : memref<9x32x32xbf16, #tpu.memory_space<vmem>>, vector<1x32x32xbf16>
    %45 = vector.shape_cast %44 : vector<1x32x32xbf16> to vector<32x32xbf16>
    %cst_47 = arith.constant dense<0.000000e+00> : vector<256x32xf32>
    %46 = tpu.matmul %43, %45, %cst_47 {dimension_numbers = #tpu.dot_dimension_numbers<[1], [0], [0], [1], [0, 0, 1, 1], [], []>} : vector<256x32xbf16>, vector<32x32xbf16>, vector<256x32xf32> -> vector<256x32xf32>
    %47 = arith.addf %40, %46 : vector<256x32xf32>
    %c0_48 = arith.constant 0 : index
    %c2_49 = arith.constant 2 : index
    %c1_50 = arith.constant 1 : index
    %c0_51 = arith.constant 0 : index
    %48 = vector.load %arg1[%c0_48, %c2_49, %c1_50, %c0_51] : memref<1x18x18x32xbf16, #tpu.memory_space<vmem>>, vector<1x16x16x32xbf16>
    %49 = vector.shape_cast %48 : vector<1x16x16x32xbf16> to vector<16x16x32xbf16>
    %50 = vector.shape_cast %49 : vector<16x16x32xbf16> to vector<256x32xbf16>
    %c7 = arith.constant 7 : index
    %c0_52 = arith.constant 0 : index
    %c0_53 = arith.constant 0 : index
    %51 = vector.load %arg2[%c7, %c0_52, %c0_53] : memref<9x32x32xbf16, #tpu.memory_space<vmem>>, vector<1x32x32xbf16>
    %52 = vector.shape_cast %51 : vector<1x32x32xbf16> to vector<32x32xbf16>
    %cst_54 = arith.constant dense<0.000000e+00> : vector<256x32xf32>
    %53 = tpu.matmul %50, %52, %cst_54 {dimension_numbers = #tpu.dot_dimension_numbers<[1], [0], [0], [1], [0, 0, 1, 1], [], []>} : vector<256x32xbf16>, vector<32x32xbf16>, vector<256x32xf32> -> vector<256x32xf32>
    %54 = arith.addf %47, %53 : vector<256x32xf32>
    %c0_55 = arith.constant 0 : index
    %c2_56 = arith.constant 2 : index
    %c2_57 = arith.constant 2 : index
    %c0_58 = arith.constant 0 : index
    %55 = vector.load %arg1[%c0_55, %c2_56, %c2_57, %c0_58] : memref<1x18x18x32xbf16, #tpu.memory_space<vmem>>, vector<1x16x16x32xbf16>
    %56 = vector.shape_cast %55 : vector<1x16x16x32xbf16> to vector<16x16x32xbf16>
    %57 = vector.shape_cast %56 : vector<16x16x32xbf16> to vector<256x32xbf16>
    %c8 = arith.constant 8 : index
    %c0_59 = arith.constant 0 : index
    %c0_60 = arith.constant 0 : index
    %58 = vector.load %arg2[%c8, %c0_59, %c0_60] : memref<9x32x32xbf16, #tpu.memory_space<vmem>>, vector<1x32x32xbf16>
    %59 = vector.shape_cast %58 : vector<1x32x32xbf16> to vector<32x32xbf16>
    %cst_61 = arith.constant dense<0.000000e+00> : vector<256x32xf32>
    %60 = tpu.matmul %57, %59, %cst_61 {dimension_numbers = #tpu.dot_dimension_numbers<[1], [0], [0], [1], [0, 0, 1, 1], [], []>} : vector<256x32xbf16>, vector<32x32xbf16>, vector<256x32xf32> -> vector<256x32xf32>
    %61 = arith.addf %54, %60 : vector<256x32xf32>
    %c0_62 = arith.constant 0 : index
    %c0_63 = arith.constant 0 : index
    %62 = vector.load %arg3[%c0_62, %c0_63] : memref<1x32xf32, #tpu.memory_space<vmem>>, vector<1x32xf32>
    %63 = vector.broadcast %62 : vector<1x32xf32> to vector<256x32xf32>
    %64 = arith.addf %61, %63 : vector<256x32xf32>
    %cst_64 = arith.constant 0.000000e+00 : f32
    %65 = vector.broadcast %cst_64 : f32 to vector<256x32xf32>
    %66 = arith.maximumf %64, %65 : vector<256x32xf32>
    %67 = arith.truncf %66 : vector<256x32xf32> to vector<256x32xbf16>
    %c0_65 = arith.constant 0 : index
    %c0_66 = arith.constant 0 : index
    %c0_67 = arith.constant 0 : index
    %68 = vector.load %arg4[%c0_65, %c0_66, %c0_67] : memref<1x256x32xbf16, #tpu.memory_space<vmem>>, vector<1x256x32xbf16>
    %69 = vector.shape_cast %68 : vector<1x256x32xbf16> to vector<256x32xbf16>
    %70 = vector.shape_cast %67 : vector<256x32xbf16> to vector<1x256x32xbf16>
    tpu.vector_store %arg4[%c0_65, %c0_66, %c0_67], %70 {strides = array<i32>} : memref<1x256x32xbf16, #tpu.memory_space<vmem>>, vector<1x256x32xbf16>,
    return
  }
  func.func @transform_0(%arg0: i32) -> (i32, i32, i32, i32) {
    %c0_i32 = arith.constant 0 : i32
    %c0_i32_0 = arith.constant 0 : i32
    %c0_i32_1 = arith.constant 0 : i32
    %c0_i32_2 = arith.constant 0 : i32
    return %arg0, %c0_i32, %c0_i32_0, %c0_i32_1 : i32, i32, i32, i32
  }
  func.func @transform_1(%arg0: i32) -> (i32, i32, i32) {
    %c0_i32 = arith.constant 0 : i32
    %c0_i32_0 = arith.constant 0 : i32
    %c0_i32_1 = arith.constant 0 : i32
    %c0_i32_2 = arith.constant 0 : i32
    return %c0_i32, %c0_i32_0, %c0_i32_1 : i32, i32, i32
  }
  func.func @transform_2(%arg0: i32) -> (i32, i32) {
    %c0_i32 = arith.constant 0 : i32
    %c0_i32_0 = arith.constant 0 : i32
    %c0_i32_1 = arith.constant 0 : i32
    return %c0_i32, %c0_i32_0 : i32, i32
  }
  func.func @transform_3(%arg0: i32) -> (i32, i32, i32) {
    %c0_i32 = arith.constant 0 : i32
    %c0_i32_0 = arith.constant 0 : i32
    %c0_i32_1 = arith.constant 0 : i32
    return %arg0, %c0_i32, %c0_i32_0 : i32, i32, i32
  }
}

module attributes {stable_mosaic.version = 11 : i64} {
  func.func @_fused_matmul_kernel(%arg0: i32, %arg1: memref<512x32xbf16, #tpu.memory_space<vmem>>, %arg2: memref<32x128xbf16, #tpu.memory_space<vmem>>, %arg3: memref<1x128xf32, #tpu.memory_space<vmem>>, %arg4: memref<512x128xbf16, #tpu.memory_space<vmem>>) attributes {dimension_semantics = [#tpu.dimension_semantics<parallel>], iteration_bounds = array<i64: 1>, scalar_prefetch = 0 : i64, scratch_operands = 0 : i64, tpu.core_type = #tpu.core_type<tc>, window_params = [{transform_indices = @transform_0, window_bounds = array<i64: 512, 32>}, {pipeline_mode = #tpu.pipeline_mode<synchronous>, transform_indices = @transform_1, window_bounds = array<i64: 32, 128>}, {pipeline_mode = #tpu.pipeline_mode<synchronous>, transform_indices = @transform_2, window_bounds = array<i64: 1, 128>}, {transform_indices = @transform_3, window_bounds = array<i64: 512, 128>}]} {
    %c0 = arith.constant 0 : index
    %c0_0 = arith.constant 0 : index
    %0 = vector.load %arg1[%c0, %c0_0] : memref<512x32xbf16, #tpu.memory_space<vmem>>, vector<512x32xbf16>
    %c0_1 = arith.constant 0 : index
    %c0_2 = arith.constant 0 : index
    %1 = vector.load %arg2[%c0_1, %c0_2] : memref<32x128xbf16, #tpu.memory_space<vmem>>, vector<32x128xbf16>
    %cst = arith.constant dense<0.000000e+00> : vector<512x128xf32>
    %2 = tpu.matmul %0, %1, %cst {dimension_numbers = #tpu.dot_dimension_numbers<[1], [0], [0], [1], [0, 0, 1, 1], [], []>} : vector<512x32xbf16>, vector<32x128xbf16>, vector<512x128xf32> -> vector<512x128xf32>
    %c0_3 = arith.constant 0 : index
    %c0_4 = arith.constant 0 : index
    %3 = vector.load %arg3[%c0_3, %c0_4] : memref<1x128xf32, #tpu.memory_space<vmem>>, vector<1x128xf32>
    %4 = vector.broadcast %3 : vector<1x128xf32> to vector<512x128xf32>
    %5 = arith.addf %2, %4 : vector<512x128xf32>
    %6 = arith.truncf %5 : vector<512x128xf32> to vector<512x128xbf16>
    %c0_5 = arith.constant 0 : index
    %c0_6 = arith.constant 0 : index
    %7 = vector.load %arg4[%c0_5, %c0_6] : memref<512x128xbf16, #tpu.memory_space<vmem>>, vector<512x128xbf16>
    tpu.vector_store %arg4[%c0_5, %c0_6], %6 {strides = array<i32>} : memref<512x128xbf16, #tpu.memory_space<vmem>>, vector<512x128xbf16>,
    return
  }
  func.func @transform_0(%arg0: i32) -> (i32, i32) {
    %c0_i32 = arith.constant 0 : i32
    %c0_i32_0 = arith.constant 0 : i32
    return %arg0, %c0_i32 : i32, i32
  }
  func.func @transform_1(%arg0: i32) -> (i32, i32) {
    %c0_i32 = arith.constant 0 : i32
    %c0_i32_0 = arith.constant 0 : i32
    %c0_i32_1 = arith.constant 0 : i32
    return %c0_i32, %c0_i32_0 : i32, i32
  }
  func.func @transform_2(%arg0: i32) -> (i32, i32) {
    %c0_i32 = arith.constant 0 : i32
    %c0_i32_0 = arith.constant 0 : i32
    %c0_i32_1 = arith.constant 0 : i32
    return %c0_i32, %c0_i32_0 : i32, i32
  }
  func.func @transform_3(%arg0: i32) -> (i32, i32) {
    %c0_i32 = arith.constant 0 : i32
    %c0_i32_0 = arith.constant 0 : i32
    return %arg0, %c0_i32 : i32, i32
  }
}

module attributes {stable_mosaic.version = 11 : i64} {
  func.func @_hinterp_kernel(%arg0: i32, %arg1: memref<64x16xbf16, #tpu.memory_space<vmem>>, %arg2: memref<1x16x1344xbf16, #tpu.memory_space<vmem>>, %arg3: memref<1x64x1344xbf16, #tpu.memory_space<vmem>>) attributes {dimension_semantics = [#tpu.dimension_semantics<parallel>], iteration_bounds = array<i64: 2>, scalar_prefetch = 0 : i64, scratch_operands = 0 : i64, tpu.core_type = #tpu.core_type<tc>, window_params = [{pipeline_mode = #tpu.pipeline_mode<synchronous>, transform_indices = @transform_0, window_bounds = array<i64: 64, 16>}, {transform_indices = @transform_1, window_bounds = array<i64: 1, 16, 1344>}, {transform_indices = @transform_2, window_bounds = array<i64: 1, 64, 1344>}]} {
    %c0 = arith.constant 0 : index
    %c0_0 = arith.constant 0 : index
    %0 = vector.load %arg1[%c0, %c0_0] : memref<64x16xbf16, #tpu.memory_space<vmem>>, vector<64x16xbf16>
    %c0_1 = arith.constant 0 : index
    %c0_2 = arith.constant 0 : index
    %c0_3 = arith.constant 0 : index
    %1 = vector.load %arg2[%c0_1, %c0_2, %c0_3] : memref<1x16x1344xbf16, #tpu.memory_space<vmem>>, vector<1x16x1344xbf16>
    %2 = vector.shape_cast %1 : vector<1x16x1344xbf16> to vector<16x1344xbf16>
    %cst = arith.constant dense<0.000000e+00> : vector<64x1344xf32>
    %3 = tpu.matmul %0, %2, %cst {dimension_numbers = #tpu.dot_dimension_numbers<[1], [0], [0], [1], [0, 0, 1, 1], [], []>} : vector<64x16xbf16>, vector<16x1344xbf16>, vector<64x1344xf32> -> vector<64x1344xf32>
    %4 = arith.truncf %3 : vector<64x1344xf32> to vector<64x1344xbf16>
    %c0_4 = arith.constant 0 : index
    %c0_5 = arith.constant 0 : index
    %c0_6 = arith.constant 0 : index
    %5 = vector.load %arg3[%c0_4, %c0_5, %c0_6] : memref<1x64x1344xbf16, #tpu.memory_space<vmem>>, vector<1x64x1344xbf16>
    %6 = vector.shape_cast %5 : vector<1x64x1344xbf16> to vector<64x1344xbf16>
    %7 = vector.shape_cast %4 : vector<64x1344xbf16> to vector<1x64x1344xbf16>
    tpu.vector_store %arg3[%c0_4, %c0_5, %c0_6], %7 {strides = array<i32>} : memref<1x64x1344xbf16, #tpu.memory_space<vmem>>, vector<1x64x1344xbf16>,
    return
  }
  func.func @transform_0(%arg0: i32) -> (i32, i32) {
    %c0_i32 = arith.constant 0 : i32
    %c0_i32_0 = arith.constant 0 : i32
    %c0_i32_1 = arith.constant 0 : i32
    return %c0_i32, %c0_i32_0 : i32, i32
  }
  func.func @transform_1(%arg0: i32) -> (i32, i32, i32) {
    %c0_i32 = arith.constant 0 : i32
    %c0_i32_0 = arith.constant 0 : i32
    %c0_i32_1 = arith.constant 0 : i32
    return %arg0, %c0_i32, %c0_i32_0 : i32, i32, i32
  }
  func.func @transform_2(%arg0: i32) -> (i32, i32, i32) {
    %c0_i32 = arith.constant 0 : i32
    %c0_i32_0 = arith.constant 0 : i32
    %c0_i32_1 = arith.constant 0 : i32
    return %arg0, %c0_i32, %c0_i32_0 : i32, i32, i32
  }
}

</mosaic_0001>

<bundles_post_ra>
// kernel: deeplab_forward.6
= control target key start
LH: loop header
LB: loop body
LE: loop exit
PB: predicated region body
PF: predicated region fallthrough
CT: control target
= control target key end

     0   :  { %vm259_vm0 = vcmask 261120   ;;  %s1376_s1 = inlined_call_operand.vmem [shape: bf16[32,128], index: 1, kind: input, shape index: {}]   ;;  %s1377_s0 = inlined_call_operand.vmem [shape: bf16[512,32], index: 0, kind: input, shape index: {}]   ;;  %s1378_s2 = inlined_call_operand.vmem [shape: f32[1,128], index: 2, kind: input, shape index: {}]   ;;  %s1379_s3 = inlined_call_operand.vmem [shape: bf16[512,128], index: 3, kind: output, shape index: {}]  }
   0x1   :  { %v858_v0 = vld [vmem:[%s1376_s1 + $0x8] sm:$0xff]  ;;  %v857_v1 = vld [vmem:[%s1376_s1] sm:$0xff]  ;;  %v827_v10 = vld [vmem:[%s1377_s0 + $0x10] sm:$0xff] }
   0x2   :  { %362 = vmatpush.bf16.msra.mxu0 %v858_v0  ;;  %1050 = vmatpush.bf16.msra.mxu1 %v858_v0  ;;  %v825_v2 = vld [vmem:[%s1377_s0] sm:$0xff]  ;;  %v826_v6 = vld [vmem:[%s1377_s0 + $0x8] sm:$0xff]  ;;  %v835_v11 = vld [vmem:[%s1377_s0 + $0x50] sm:$0xff] }
   0x3   :  { %1051 = vmatpush.bf16.msra.mxu2 %v858_v0  ;;  %1052 = vmatpush.bf16.msra.mxu3 %v858_v0  ;;  %v833_v3 = vld [vmem:[%s1377_s0 + $0x40] sm:$0xff]  ;;  %v834_v7 = vld [vmem:[%s1377_s0 + $0x48] sm:$0xff]  ;;  %v843_v12 = vld [vmem:[%s1377_s0 + $0x90] sm:$0xff] }
   0x4   :  { %v841_v4 = vld [vmem:[%s1377_s0 + $0x80] sm:$0xff]  ;;  %v842_v8 = vld [vmem:[%s1377_s0 + $0x88] sm:$0xff]  ;;  %v851_v13 = vld [vmem:[%s1377_s0 + $0xd0] sm:$0xff] }
   0x5   :  { %v849_v5 = vld [vmem:[%s1377_s0 + $0xc0] sm:$0xff]  ;;  %v850_v9 = vld [vmem:[%s1377_s0 + $0xc8] sm:$0xff]  ;;  %v828_v14 = vld [vmem:[%s1377_s0 + $0x18] sm:$0xff] }
   0x6   :  { %363 = vmatpush.bf16.msra.mxu0 %v857_v1  ;;  %1053 = vmatpush.bf16.msra.mxu1 %v857_v1  ;;  %v836_v15 = vld [vmem:[%s1377_s0 + $0x58] sm:$0xff]  ;;  %v829_v18 = vld [vmem:[%s1377_s0 + $0x20] sm:$0xff]  ;;  %v830_v22 = vld [vmem:[%s1377_s0 + $0x28] sm:$0xff] }
   0x7   :  { %1054 = vmatpush.bf16.msra.mxu2 %v857_v1  ;;  %1055 = vmatpush.bf16.msra.mxu3 %v857_v1  ;;  %v844_v16 = vld [vmem:[%s1377_s0 + $0x98] sm:$0xff]  ;;  %v837_v19 = vld [vmem:[%s1377_s0 + $0x60] sm:$0xff]  ;;  %v838_v23 = vld [vmem:[%s1377_s0 + $0x68] sm:$0xff] }
   0x8   :  { %v852_v17 = vld [vmem:[%s1377_s0 + $0xd8] sm:$0xff]  ;;  %v845_v20 = vld [vmem:[%s1377_s0 + $0xa0] sm:$0xff]  ;;  %v846_v24 = vld [vmem:[%s1377_s0 + $0xa8] sm:$0xff] }
   0x9   :  { %793 = vmatmul.msk.bf16.vlgmr.msra.gmra.mxu0 %vm259_vm0, %v825_v2  ;;  %801 = vmatmul.msk.bf16.vlgmr.msra.gmra.mxu1 %vm259_vm0, %v833_v3  ;;  %v853_v21 = vld [vmem:[%s1377_s0 + $0xe0] sm:$0xff]  ;;  %v854_v25 = vld [vmem:[%s1377_s0 + $0xe8] sm:$0xff]  ;;  %v831_v26 = vld [vmem:[%s1377_s0 + $0x30] sm:$0xff] }
   0xa   :  { %809 = vmatmul.msk.bf16.vlgmr.msra.gmra.mxu2 %vm259_vm0, %v841_v4  ;;  %817 = vmatmul.msk.bf16.vlgmr.msra.gmra.mxu3 %vm259_vm0, %v849_v5  ;;  %v839_v27 = vld [vmem:[%s1377_s0 + $0x70] sm:$0xff]  ;;  %v832_v30 = vld [vmem:[%s1377_s0 + $0x38] sm:$0xff]  ;;  %v1214_v36 = vld [vmem:[%s1378_s2] ss:$0 sm:$0xff] }
   0xb   :  { %v847_v28 = vld [vmem:[%s1377_s0 + $0xb0] sm:$0xff]  ;;  %v840_v31 = vld [vmem:[%s1377_s0 + $0x78] sm:$0xff] }
   0xc   :  { %v855_v29 = vld [vmem:[%s1377_s0 + $0xf0] sm:$0xff]  ;;  %v848_v32 = vld [vmem:[%s1377_s0 + $0xb8] sm:$0xff] }
   0xd   :  { %v856_v33 = vld [vmem:[%s1377_s0 + $0xf8] sm:$0xff] }
  0x19   :  { %794 = vmatmul.msk.bf16.gmra.mxu0 %vm259_vm0, %v826_v6  ;;  %802 = vmatmul.msk.bf16.gmra.mxu1 %vm259_vm0, %v834_v7 }
  0x1a   :  { %810 = vmatmul.msk.bf16.gmra.mxu2 %vm259_vm0, %v842_v8  ;;  %818 = vmatmul.msk.bf16.gmra.mxu3 %vm259_vm0, %v850_v9 }
  0x29   :  { %795 = vmatmul.msk.bf16.gmra.mxu0 %vm259_vm0, %v827_v10  ;;  %803 = vmatmul.msk.bf16.gmra.mxu1 %vm259_vm0, %v835_v11 }
  0x2a   :  { %811 = vmatmul.msk.bf16.gmra.mxu2 %vm259_vm0, %v843_v12  ;;  %819 = vmatmul.msk.bf16.gmra.mxu3 %vm259_vm0, %v851_v13 }
  0x39   :  { %796 = vmatmul.msk.bf16.gmra.mxu0 %vm259_vm0, %v828_v14  ;;  %804 = vmatmul.msk.bf16.gmra.mxu1 %vm259_vm0, %v836_v15 }
  0x3a   :  { %812 = vmatmul.msk.bf16.gmra.mxu2 %vm259_vm0, %v844_v16  ;;  %820 = vmatmul.msk.bf16.gmra.mxu3 %vm259_vm0, %v852_v17 }
  0x49   :  { %797 = vmatmul.msk.bf16.gmra.mxu0 %vm259_vm0, %v829_v18  ;;  %805 = vmatmul.msk.bf16.gmra.mxu1 %vm259_vm0, %v837_v19 }
  0x4a   :  { %813 = vmatmul.msk.bf16.gmra.mxu2 %vm259_vm0, %v845_v20  ;;  %821 = vmatmul.msk.bf16.gmra.mxu3 %vm259_vm0, %v853_v21 }
  0x59   :  { %798 = vmatmul.msk.bf16.gmra.mxu0 %vm259_vm0, %v830_v22  ;;  %806 = vmatmul.msk.bf16.gmra.mxu1 %vm259_vm0, %v838_v23 }
  0x5a   :  { %814 = vmatmul.msk.bf16.gmra.mxu2 %vm259_vm0, %v846_v24  ;;  %822 = vmatmul.msk.bf16.gmra.mxu3 %vm259_vm0, %v854_v25 }
  0x69   :  { %799 = vmatmul.msk.bf16.gmra.mxu0 %vm259_vm0, %v831_v26  ;;  %807 = vmatmul.msk.bf16.gmra.mxu1 %vm259_vm0, %v839_v27 }
  0x6a   :  { %815 = vmatmul.msk.bf16.gmra.mxu2 %vm259_vm0, %v847_v28  ;;  %823 = vmatmul.msk.bf16.gmra.mxu3 %vm259_vm0, %v855_v29 }
  0x79   :  { %800 = vmatmul.msk.bf16.gmra.mxu0 %vm259_vm0, %v832_v30  ;;  %808 = vmatmul.msk.bf16.gmra.mxu1 %vm259_vm0, %v840_v31 }
  0x7a   :  { %816 = vmatmul.msk.bf16.gmra.mxu2 %vm259_vm0, %v848_v32  ;;  %824 = vmatmul.msk.bf16.gmra.mxu3 %vm259_vm0, %v856_v33 }
  0x86   :  { %v365_v34 = vpop.f32.mrf.mxu0  ;;  %v405_v35 = vpop.f32.mrf.mxu1 }
  0x87   :  { %v366_v41 = vadd.f32 %v1214_v36, %v365_v34  ;;  %v406_v42 = vadd.f32 %v1214_v36, %v405_v35 }
  0x8d   :  { %v445_v37 = vpop.f32.mrf.mxu2  ;;  %v485_v38 = vpop.f32.mrf.mxu3 }
  0x8e   :  { %v367_v39 = vpop.f32.mrf.mxu0  ;;  %v407_v40 = vpop.f32.mrf.mxu1  ;;  %v446_v49 = vadd.f32 %v1214_v36, %v445_v37  ;;  %v486_v50 = vadd.f32 %v1214_v36, %v485_v38 }
  0x8f   :  { %v368_v43 = vadd.f32 %v1214_v36, %v367_v39  ;;  %v408_v44 = vadd.f32 %v1214_v36, %v407_v40 }
  0x91   :  { %v862_v45 = vpack.c.bf16 %v368_v43, %v366_v41  ;;  %v902_v46 = vpack.c.bf16 %v408_v44, %v406_v42 }
  0x93   :  { %863 = vst [vmem:[%s1379_s3] sm:$0xff] %v862_v45  }
  0x94   :  { %1026 = vst [vmem:[%s1379_s3 + $0x40] sm:$0xff] %v902_v46  }
  0x95   :  { %v447_v47 = vpop.f32.mrf.mxu2  ;;  %v487_v48 = vpop.f32.mrf.mxu3 }
  0x96   :  { %v448_v51 = vadd.f32 %v1214_v36, %v447_v47  ;;  %v488_v52 = vadd.f32 %v1214_v36, %v487_v48  ;;  %v370_v53 = vpop.f32.mrf.mxu0  ;;  %v410_v54 = vpop.f32.mrf.mxu1 }
  0x97   :  { %v371_v61 = vadd.f32 %v1214_v36, %v370_v53  ;;  %v411_v62 = vadd.f32 %v1214_v36, %v410_v54 }
  0x98   :  { %v942_v55 = vpack.c.bf16 %v448_v51, %v446_v49  ;;  %v982_v56 = vpack.c.bf16 %v488_v52, %v486_v50 }
  0x9a   :  { %1034 = vst [vmem:[%s1379_s3 + $0x80] sm:$0xff] %v942_v55  }
  0x9b   :  { %1042 = vst [vmem:[%s1379_s3 + $0xc0] sm:$0xff] %v982_v56  }
  0x9d   :  { %v450_v57 = vpop.f32.mrf.mxu2  ;;  %v490_v58 = vpop.f32.mrf.mxu3 }
  0x9e   :  { %v372_v59 = vpop.f32.mrf.mxu0  ;;  %v412_v60 = vpop.f32.mrf.mxu1  ;;  %v451_v5 = vadd.f32 %v1214_v36, %v450_v57  ;;  %v491_v6 = vadd.f32 %v1214_v36, %v490_v58 }
  0x9f   :  { %v373_v63 = vadd.f32 %v1214_v36, %v372_v59  ;;  %v413_v0 = vadd.f32 %v1214_v36, %v412_v60 }
  0xa1   :  { %v867_v1 = vpack.c.bf16 %v373_v63, %v371_v61  ;;  %v907_v2 = vpack.c.bf16 %v413_v0, %v411_v62 }
  0xa3   :  { %1019 = vst [vmem:[%s1379_s3 + $0x8] sm:$0xff] %v867_v1  }
  0xa4   :  { %1027 = vst [vmem:[%s1379_s3 + $0x48] sm:$0xff] %v907_v2  }
  0xa5   :  { %v452_v3 = vpop.f32.mrf.mxu2  ;;  %v492_v4 = vpop.f32.mrf.mxu3 }
  0xa6   :  { %v453_v7 = vadd.f32 %v1214_v36, %v452_v3  ;;  %v493_v8 = vadd.f32 %v1214_v36, %v492_v4  ;;  %v375_v9 = vpop.f32.mrf.mxu0  ;;  %v415_v10 = vpop.f32.mrf.mxu1 }
  0xa7   :  { %v376_v17 = vadd.f32 %v1214_v36, %v375_v9  ;;  %v416_v18 = vadd.f32 %v1214_v36, %v415_v10 }
  0xa8   :  { %v947_v11 = vpack.c.bf16 %v453_v7, %v451_v5  ;;  %v987_v12 = vpack.c.bf16 %v493_v8, %v491_v6 }
  0xaa   :  { %1035 = vst [vmem:[%s1379_s3 + $0x88] sm:$0xff] %v947_v11  }
  0xab   :  { %1043 = vst [vmem:[%s1379_s3 + $0xc8] sm:$0xff] %v987_v12  }
  0xad   :  { %v455_v13 = vpop.f32.mrf.mxu2  ;;  %v495_v14 = vpop.f32.mrf.mxu3 }
  0xae   :  { %v377_v15 = vpop.f32.mrf.mxu0  ;;  %v417_v16 = vpop.f32.mrf.mxu1  ;;  %v456_v25 = vadd.f32 %v1214_v36, %v455_v13  ;;  %v496_v26 = vadd.f32 %v1214_v36, %v495_v14 }
  0xaf   :  { %v378_v19 = vadd.f32 %v1214_v36, %v377_v15  ;;  %v418_v20 = vadd.f32 %v1214_v36, %v417_v16 }
  0xb1   :  { %v872_v21 = vpack.c.bf16 %v378_v19, %v376_v17  ;;  %v912_v22 = vpack.c.bf16 %v418_v20, %v416_v18 }
  0xb3   :  { %1020 = vst [vmem:[%s1379_s3 + $0x10] sm:$0xff] %v872_v21  }
  0xb4   :  { %1028 = vst [vmem:[%s1379_s3 + $0x50] sm:$0xff] %v912_v22  }
  0xb5   :  { %v457_v23 = vpop.f32.mrf.mxu2  ;;  %v497_v24 = vpop.f32.mrf.mxu3 }
  0xb6   :  { %v458_v27 = vadd.f32 %v1214_v36, %v457_v23  ;;  %v498_v28 = vadd.f32 %v1214_v36, %v497_v24  ;;  %v380_v29 = vpop.f32.mrf.mxu0  ;;  %v420_v30 = vpop.f32.mrf.mxu1 }
  0xb7   :  { %v381_v38 = vadd.f32 %v1214_v36, %v380_v29  ;;  %v421_v39 = vadd.f32 %v1214_v36, %v420_v30 }
  0xb8   :  { %v952_v31 = vpack.c.bf16 %v458_v27, %v456_v25  ;;  %v992_v32 = vpack.c.bf16 %v498_v28, %v496_v26 }
  0xba   :  { %1036 = vst [vmem:[%s1379_s3 + $0x90] sm:$0xff] %v952_v31  }
  0xbb   :  { %1044 = vst [vmem:[%s1379_s3 + $0xd0] sm:$0xff] %v992_v32  }
  0xbd   :  { %v460_v33 = vpop.f32.mrf.mxu2  ;;  %v500_v34 = vpop.f32.mrf.mxu3 }
  0xbe   :  { %v382_v35 = vpop.f32.mrf.mxu0  ;;  %v422_v37 = vpop.f32.mrf.mxu1  ;;  %v461_v46 = vadd.f32 %v1214_v36, %v460_v33  ;;  %v501_v47 = vadd.f32 %v1214_v36, %v500_v34 }
  0xbf   :  { %v383_v40 = vadd.f32 %v1214_v36, %v382_v35  ;;  %v423_v41 = vadd.f32 %v1214_v36, %v422_v37 }
  0xc1   :  { %v877_v42 = vpack.c.bf16 %v383_v40, %v381_v38  ;;  %v917_v43 = vpack.c.bf16 %v423_v41, %v421_v39 }
  0xc3   :  { %1021 = vst [vmem:[%s1379_s3 + $0x18] sm:$0xff] %v877_v42  }
  0xc4   :  { %1029 = vst [vmem:[%s1379_s3 + $0x58] sm:$0xff] %v917_v43  }
  0xc5   :  { %v462_v44 = vpop.f32.mrf.mxu2  ;;  %v502_v45 = vpop.f32.mrf.mxu3 }
  0xc6   :  { %v463_v48 = vadd.f32 %v1214_v36, %v462_v44  ;;  %v503_v49 = vadd.f32 %v1214_v36, %v502_v45  ;;  %v385_v50 = vpop.f32.mrf.mxu0  ;;  %v425_v51 = vpop.f32.mrf.mxu1 }
  0xc7   :  { %v386_v58 = vadd.f32 %v1214_v36, %v385_v50  ;;  %v426_v59 = vadd.f32 %v1214_v36, %v425_v51 }
  0xc8   :  { %v957_v52 = vpack.c.bf16 %v463_v48, %v461_v46  ;;  %v997_v53 = vpack.c.bf16 %v503_v49, %v501_v47 }
  0xca   :  { %1037 = vst [vmem:[%s1379_s3 + $0x98] sm:$0xff] %v957_v52  }
  0xcb   :  { %1045 = vst [vmem:[%s1379_s3 + $0xd8] sm:$0xff] %v997_v53  }
  0xcd   :  { %v465_v54 = vpop.f32.mrf.mxu2  ;;  %v505_v55 = vpop.f32.mrf.mxu3 }
  0xce   :  { %v387_v56 = vpop.f32.mrf.mxu0  ;;  %v427_v57 = vpop.f32.mrf.mxu1  ;;  %v466_v2 = vadd.f32 %v1214_v36, %v465_v54  ;;  %v506_v3 = vadd.f32 %v1214_v36, %v505_v55 }
  0xcf   :  { %v388_v60 = vadd.f32 %v1214_v36, %v387_v56  ;;  %v428_v61 = vadd.f32 %v1214_v36, %v427_v57 }
  0xd1   :  { %v882_v62 = vpack.c.bf16 %v388_v60, %v386_v58  ;;  %v922_v63 = vpack.c.bf16 %v428_v61, %v426_v59 }
  0xd3   :  { %1022 = vst [vmem:[%s1379_s3 + $0x20] sm:$0xff] %v882_v62  }
  0xd4   :  { %1030 = vst [vmem:[%s1379_s3 + $0x60] sm:$0xff] %v922_v63  }
  0xd5   :  { %v467_v0 = vpop.f32.mrf.mxu2  ;;  %v507_v1 = vpop.f32.mrf.mxu3 }
  0xd6   :  { %v468_v4 = vadd.f32 %v1214_v36, %v467_v0  ;;  %v508_v5 = vadd.f32 %v1214_v36, %v507_v1  ;;  %v390_v6 = vpop.f32.mrf.mxu0  ;;  %v430_v7 = vpop.f32.mrf.mxu1 }
  0xd7   :  { %v391_v14 = vadd.f32 %v1214_v36, %v390_v6  ;;  %v431_v15 = vadd.f32 %v1214_v36, %v430_v7 }
  0xd8   :  { %v962_v8 = vpack.c.bf16 %v468_v4, %v466_v2  ;;  %v1002_v9 = vpack.c.bf16 %v508_v5, %v506_v3 }
  0xda   :  { %1038 = vst [vmem:[%s1379_s3 + $0xa0] sm:$0xff] %v962_v8  }
  0xdb   :  { %1046 = vst [vmem:[%s1379_s3 + $0xe0] sm:$0xff] %v1002_v9  }
  0xdd   :  { %v470_v10 = vpop.f32.mrf.mxu2  ;;  %v510_v11 = vpop.f32.mrf.mxu3 }
  0xde   :  { %v392_v12 = vpop.f32.mrf.mxu0  ;;  %v432_v13 = vpop.f32.mrf.mxu1  ;;  %v471_v22 = vadd.f32 %v1214_v36, %v470_v10  ;;  %v511_v23 = vadd.f32 %v1214_v36, %v510_v11 }
  0xdf   :  { %v393_v16 = vadd.f32 %v1214_v36, %v392_v12  ;;  %v433_v17 = vadd.f32 %v1214_v36, %v432_v13 }
  0xe1   :  { %v887_v18 = vpack.c.bf16 %v393_v16, %v391_v14  ;;  %v927_v19 = vpack.c.bf16 %v433_v17, %v431_v15 }
  0xe3   :  { %1023 = vst [vmem:[%s1379_s3 + $0x28] sm:$0xff] %v887_v18  }
  0xe4   :  { %1031 = vst [vmem:[%s1379_s3 + $0x68] sm:$0xff] %v927_v19  }
  0xe5   :  { %v472_v20 = vpop.f32.mrf.mxu2  ;;  %v512_v21 = vpop.f32.mrf.mxu3 }
  0xe6   :  { %v473_v24 = vadd.f32 %v1214_v36, %v472_v20  ;;  %v513_v25 = vadd.f32 %v1214_v36, %v512_v21  ;;  %v395_v26 = vpop.f32.mrf.mxu0  ;;  %v435_v27 = vpop.f32.mrf.mxu1 }
  0xe7   :  { %v396_v34 = vadd.f32 %v1214_v36, %v395_v26  ;;  %v436_v35 = vadd.f32 %v1214_v36, %v435_v27 }
  0xe8   :  { %v967_v28 = vpack.c.bf16 %v473_v24, %v471_v22  ;;  %v1007_v29 = vpack.c.bf16 %v513_v25, %v511_v23 }
  0xea   :  { %1039 = vst [vmem:[%s1379_s3 + $0xa8] sm:$0xff] %v967_v28  }
  0xeb   :  { %1047 = vst [vmem:[%s1379_s3 + $0xe8] sm:$0xff] %v1007_v29  }
  0xed   :  { %v475_v30 = vpop.f32.mrf.mxu2  ;;  %v515_v31 = vpop.f32.mrf.mxu3 }
  0xee   :  { %v397_v32 = vpop.f32.mrf.mxu0  ;;  %v437_v33 = vpop.f32.mrf.mxu1  ;;  %v476_v43 = vadd.f32 %v1214_v36, %v475_v30  ;;  %v516_v44 = vadd.f32 %v1214_v36, %v515_v31 }
  0xef   :  { %v398_v37 = vadd.f32 %v1214_v36, %v397_v32  ;;  %v438_v38 = vadd.f32 %v1214_v36, %v437_v33 }
  0xf1   :  { %v892_v39 = vpack.c.bf16 %v398_v37, %v396_v34  ;;  %v932_v40 = vpack.c.bf16 %v438_v38, %v436_v35 }
  0xf3   :  { %1024 = vst [vmem:[%s1379_s3 + $0x30] sm:$0xff] %v892_v39  }
  0xf4   :  { %1032 = vst [vmem:[%s1379_s3 + $0x70] sm:$0xff] %v932_v40  }
  0xf5   :  { %v477_v41 = vpop.f32.mrf.mxu2  ;;  %v517_v42 = vpop.f32.mrf.mxu3 }
  0xf6   :  { %v478_v45 = vadd.f32 %v1214_v36, %v477_v41  ;;  %v518_v46 = vadd.f32 %v1214_v36, %v517_v42  ;;  %v400_v47 = vpop.f32.mrf.mxu0  ;;  %v440_v48 = vpop.f32.mrf.mxu1 }
  0xf7   :  { %v401_v55 = vadd.f32 %v1214_v36, %v400_v47  ;;  %v441_v56 = vadd.f32 %v1214_v36, %v440_v48 }
  0xf8   :  { %v972_v49 = vpack.c.bf16 %v478_v45, %v476_v43  ;;  %v1012_v50 = vpack.c.bf16 %v518_v46, %v516_v44 }
  0xfa   :  { %1040 = vst [vmem:[%s1379_s3 + $0xb0] sm:$0xff] %v972_v49  }
  0xfb   :  { %1048 = vst [vmem:[%s1379_s3 + $0xf0] sm:$0xff] %v1012_v50  }
  0xfd   :  { %v480_v51 = vpop.f32.mrf.mxu2  ;;  %v520_v52 = vpop.f32.mrf.mxu3 }
  0xfe   :  { %v402_v53 = vpop.f32.mrf.mxu0  ;;  %v442_v54 = vpop.f32.mrf.mxu1  ;;  %v481_v63 = vadd.f32 %v1214_v36, %v480_v51  ;;  %v521_v0 = vadd.f32 %v1214_v36, %v520_v52 }
  0xff   :  { %v403_v57 = vadd.f32 %v1214_v36, %v402_v53  ;;  %v443_v58 = vadd.f32 %v1214_v36, %v442_v54 }
 0x101   :  { %v897_v59 = vpack.c.bf16 %v403_v57, %v401_v55  ;;  %v937_v60 = vpack.c.bf16 %v443_v58, %v441_v56 }
 0x103   :  { %1025 = vst [vmem:[%s1379_s3 + $0x38] sm:$0xff] %v897_v59  }
 0x104   :  { %1033 = vst [vmem:[%s1379_s3 + $0x78] sm:$0xff] %v937_v60  }
 0x105   :  { %v482_v61 = vpop.f32.mrf.mxu2  ;;  %v522_v62 = vpop.f32.mrf.mxu3 }
 0x106   :  { %v483_v1 = vadd.f32 %v1214_v36, %v482_v61  ;;  %v523_v2 = vadd.f32 %v1214_v36, %v522_v62 }
 0x108   :  { %v977_v3 = vpack.c.bf16 %v483_v1, %v481_v63  ;;  %v1017_v4 = vpack.c.bf16 %v523_v2, %v521_v0 }
 0x10a   :  { %1041 = vst [vmem:[%s1379_s3 + $0xb8] sm:$0xff] %v977_v3  }
 0x10b   :  { %1049 = vst [vmem:[%s1379_s3 + $0xf8] sm:$0xff] %v1017_v4  }

// kernel: deeplab_forward.5
= control target key start
LH: loop header
LB: loop body
LE: loop exit
PB: predicated region body
PF: predicated region fallthrough
CT: control target
= control target key end

     0   :  { %s5230_s12 = smov 0   ;;  %s6667_s0 = inlined_call_operand.vmem [shape: bf16[2,18,18,32], index: 0, kind: input, shape index: {}]   ;;  %s6668_s1 = inlined_call_operand.vmem [shape: bf16[9,32,32], index: 1, kind: input, shape index: {}]   ;;  %s6669_s2 = inlined_call_operand.vmem [shape: f32[1,32], index: 2, kind: input, shape index: {}]   ;;  %s6670_s3 = inlined_call_operand.vmem [shape: bf16[2,256,32], index: 3, kind: output, shape index: {}]  }
   0x1 LB: > { %s4378_s13 = sadd.s32 4294967295, %s5208_s12   ;;  %p4382_p0 = scmp.ge.s32.totalorder %s5208_s12, 1  ;;  %s5208_s12 = sphi %s5230_s12, %s13_s12  }
   0x2   : > { %p137_p1 = scmp.lt.s32.totalorder %s5208_s12, 3 }
   0x4   : > { %p138_p2 = pnand %p4382_p0, %p137_p1 }
   0x6   : > { %141 = sbr.rel (%p138_p2) target bundleno = 760 (0x2f8), region = 32 }
   0xb   : > { %v5088_v0 = vld [vmem:[%s6668_s1 + $0x18] sm:$0xff]  ;;  %p161_p3 = scmp.lt.s32.totalorder %s4378_s13, 1  ;;  %v5087_v1 = vld [vmem:[%s6668_s1 + $0x10] sm:$0xff]  ;;  %v5090_v2 = vld [vmem:[%s6668_s1 + $0x28] sm:$0xff]  ;;  %vm224_vm0 = vsmask.f32 3328 }
   0xc   : > { %5135 = vmatpush.bf16.msra.mxu1 %v5088_v0  ;;  %5136 = vmatpush.bf16.msra.mxu2 %v5088_v0  ;;  %v5108_v3 = vld [vmem:[%s6668_s1 + $0x38] sm:$0xff]  ;;  %v5086_v4 = vld [vmem:[%s6668_s1 + $0x8] sm:$0xff]  ;;  %vm225_vm1 = vsmask.f32 7440  ;;  %vm676_vm3 = vcmask 261120   ;;  %vm1091_vm4 = vcmask 1042432  }
   0xd   : > { %s6682_s13 = smov (!%p161_p3, %s4378_s13), 1  ;;  %5137 = vmatpush.bf16.msra.mxu3 %v5088_v0  ;;  %731 = vmatpush.bf16.msra.mxu0 %v5088_v0  ;;  %v5110_v5 = vld [vmem:[%s6668_s1 + $0x48] sm:$0xff]  ;;  %vm5274_vm2 = vmor %vm224_vm0, %vm225_vm1  ;;  %vm1092_vm5 = vcmask 1046532   ;;  %vm4290_vm7 = vcmask 257024  }
   0xe   : > { %s5141_s18 = smul.u32 216, %s6682_s13  ;;  %vm5469_vm6 = vmor %vm1091_vm4, %vm1092_vm5  ;;  %s5068_s5 = sshll.u32 %s6682_s13, 7 }
   0xf   : > { %s6329_s8 = scalar_lea.vmem %s6670_s3, %s5068_s5 }
  0x10   : > { %5138 = vmatpush.bf16.msra.mxu1 %v5087_v1  ;;  %5139 = vmatpush.bf16.msra.mxu2 %v5087_v1  ;;  %s5262_s29 = scalar_lea.vmem %s6667_s0, %s5141_s18 }
  0x11   : > { %5140 = vmatpush.bf16.msra.mxu3 %v5087_v1  ;;  %732 = vmatpush.bf16.msra.mxu0 %v5087_v1  ;;  %v180_v6 = vld [vmem:[%s5262_s29 + $0x30] sm:$0xf]  ;;  %v181_v7 = vld [vmem:[%s5262_s29 + $0x34] sm:$0xf]  ;;  %v212_v8 = vld [vmem:[%s5262_s29 + $0x38] sm:$0x1] }
  0x12   : > { %v324_v9 = vshrl.u32 %v180_v6, 16  ;;  %v327_v10 = vshll.u32 %v180_v6, 16  ;;  %v333_v11 = vshll.u32 %v181_v7, 16  ;;  %v337_v12 = vshrl.u32 %v181_v7, 16  ;;  %v188_v13 = vld [vmem:[%s5262_s29 + $0x60] sm:$0xf] }
  0x13   : > { %v343_v14 = vshll.u32 %v212_v8, 16  ;;  %v189_v15 = vld [vmem:[%s5262_s29 + $0x64] sm:$0xf]  ;;  %v216_v16 = vld [vmem:[%s5262_s29 + $0x68] sm:$0x1]  ;;  %v420_v17 = vshrl.u32 %v188_v13, 16 }
  0x14   : > { %1325 = vmatpush.bf16.msrb.mxu2 %v5090_v2  ;;  %960 = vmatpush.bf16.msrb.mxu1 %v5086_v4  ;;  %v326_v18 = vrot.slane %v324_v9, 4  ;;  %v329_v19 = vrot.slane %v327_v10, 5  ;;  %v335_v20 = vrot.slane %v333_v11, 5  ;;  %v339_v21 = vrot.slane %v337_v12, 4  ;;  %v196_v22 = vld [vmem:[%s5262_s29 + $0x90] sm:$0xf] }
  0x15   : > { %1624 = vmatpush.bf16.msrb.mxu3 %v5108_v3  ;;  %2290 = vmatpush.bf16.msrb.mxu0 %v5110_v5  ;;  %v345_v23 = vrot.slane %v343_v14, 5  ;;  %v422_v24 = vrot.slane %v420_v17, 4  ;;  %v423_v25 = vshll.u32 %v188_v13, 16  ;;  %v429_v26 = vshll.u32 %v189_v15, 16  ;;  %v197_v31 = vld [vmem:[%s5262_s29 + $0x94] sm:$0xf] }
  0x16   : > { %v330_v27 = vor.u32 %v329_v19, %v326_v18  ;;  %v340_v28 = vor.u32 %v339_v21, %v335_v20  ;;  %v433_v29 = vshrl.u32 %v189_v15, 16  ;;  %v439_v30 = vshll.u32 %v216_v16, 16  ;;  %v220_v41 = vld [vmem:[%s5262_s29 + $0x98] sm:$0x1]  ;;  %v172_v57 = vld [vmem:[%s5262_s29] sm:$0xf] }
  0x17   : > { %v425_v33 = vrot.slane %v423_v25, 5  ;;  %v431_v34 = vrot.slane %v429_v26, 5  ;;  %v516_v35 = vshrl.u32 %v196_v22, 16  ;;  %v519_v43 = vshll.u32 %v196_v22, 16  ;;  %v5287_v61 = vld [vmem:[%s5262_s29 + $0x4] sm:$0xf] }
  0x18   : > { %v331_v36 = vrot.slane %v330_v27, 4  ;;  %v341_v37 = vrot.slane %v340_v28, 4  ;;  %v435_v38 = vrot.slane %v433_v29, 4  ;;  %v441_v39 = vrot.slane %v439_v30, 5  ;;  %v5290_v62 = vld [vmem:[%s5262_s29 + $0x8] sm:$0x1] }
  0x19   : > { %v426_v40 = vor.u32 %v425_v33, %v422_v24  ;;  %v518_v42 = vrot.slane %v516_v35, 4  ;;  %v525_v44 = vshll.u32 %v197_v31, 16  ;;  %v529_v48 = vshrl.u32 %v197_v31, 16  ;;  %v182_v15 = vld [vmem:[%s5262_s29 + $0x3c] sm:$0xf] }
  0x1a   : > { %v336_v45 = vsel %vm5274_vm2, %v331_v36, %v335_v20  ;;  %v346_v46 = vsel %vm5274_vm2, %v341_v37, %v345_v23  ;;  %v436_v47 = vor.u32 %v435_v38, %v431_v34  ;;  %v521_v52 = vrot.slane %v519_v43, 5  ;;  %v5302_v16 = vld [vmem:[%s5262_s29 + $0x40] sm:$0xf]  ;;  %v5307_v21 = vld [vmem:[%s5262_s29 + $0x44] sm:$0x1] }
  0x1b   : > { %v624_v49 = vunpack.c.l.b16 %v336_v45  ;;  %v625_v50 = vunpack.c.l.b16 %v346_v46  ;;  %v427_v51 = vrot.slane %v426_v40, 4  ;;  %v527_v54 = vrot.slane %v525_v44, 5  ;;  %v190_v29 = vld [vmem:[%s5262_s29 + $0x6c] sm:$0xf]  ;;  %v217_v43 = vld [vmem:[%s5262_s29 + $0x74] sm:$0x1] }
  0x1c   : > { %v437_v53 = vrot.slane %v436_v47, 4  ;;  %v531_v55 = vrot.slane %v529_v48, 4  ;;  %v535_v56 = vshll.u32 %v220_v41, 16  ;;  %v522_v60 = vor.u32 %v521_v52, %v518_v42 }
  0x1d   : > { %v652_v58 = vpack.c.b16 %v625_v50, %v624_v49  ;;  %v432_v59 = vsel %vm5274_vm2, %v427_v51, %v431_v34  ;;  %v228_v5 = vshrl.u32 %v172_v57, 16  ;;  %v231_v6 = vshll.u32 %v172_v57, 16  ;;  %v198_v57 = vld [vmem:[%s5262_s29 + $0x9c] sm:$0xf] }
  0x1e   : > { %v442_v63 = vsel %vm5274_vm2, %v437_v53, %v441_v39  ;;  %v632_v0 = vunpack.c.l.b16 %v432_v59  ;;  %v532_v1 = vor.u32 %v531_v55, %v527_v54  ;;  %v537_v2 = vrot.slane %v535_v56, 5  ;;  %v191_v39 = vld [vmem:[%s5262_s29 + $0x70] sm:$0xf] }
  0x1f   : > { %4402 = vmatmul.msk.bf16.vlgmr.msra.gmra.mxu1 %vm676_vm3, %v652_v58  ;;  %v633_v3 = vunpack.c.l.b16 %v442_v63  ;;  %v523_v4 = vrot.slane %v522_v60, 4  ;;  %v237_v8 = vshll.u32 %v5287_v61, 16  ;;  %v241_v9 = vshrl.u32 %v5287_v61, 16  ;;  %v199_v63 = vld [vmem:[%s5262_s29 + $0xa0] sm:$0xf] }
  0x20   : > { %v533_v7 = vrot.slane %v532_v1, 4  ;;  %v247_v10 = vshll.u32 %v5290_v62, 16  ;;  %v230_v13 = vrot.slane %v228_v5, 4  ;;  %v233_v14 = vrot.slane %v231_v6, 5 }
  0x21   : > { %v656_v11 = vpack.c.b16 %v633_v3, %v632_v0  ;;  %v528_v12 = vsel %vm5274_vm2, %v523_v4, %v527_v54  ;;  %v239_v19 = vrot.slane %v237_v8, 5  ;;  %v243_v20 = vrot.slane %v241_v9, 4  ;;  %v221_v4 = vld [vmem:[%s5262_s29 + $0xa4] sm:$0x1] }
  0x22   : > { %v538_v17 = vsel %vm5274_vm2, %v533_v7, %v537_v2  ;;  %v640_v18 = vunpack.c.l.b16 %v528_v12  ;;  %v234_v23 = vor.u32 %v233_v14, %v230_v13  ;;  %v249_v24 = vrot.slane %v247_v10, 5  ;;  %v174_v13 = vld [vmem:[%s5262_s29 + $0xc] sm:$0xf] }
  0x23   : > { %4406 = vmatmul.msk.bf16.vlgmr.msra.gmra.mxu2 %vm676_vm3, %v656_v11  ;;  %v641_v22 = vunpack.c.l.b16 %v538_v17  ;;  %v244_v25 = vor.u32 %v243_v20, %v239_v19  ;;  %v348_v26 = vshrl.u32 %v182_v15, 16  ;;  %v351_v27 = vshll.u32 %v182_v15, 16 }
  0x24   : > { %v357_v28 = vshll.u32 %v5302_v16, 16  ;;  %v235_v31 = vrot.slane %v234_v23, 4  ;;  %v361_v33 = vshrl.u32 %v5302_v16, 16  ;;  %v367_v34 = vshll.u32 %v5307_v21, 16 }
  0x25   : > { %v660_v30 = vpack.c.b16 %v641_v22, %v640_v18  ;;  %v245_v35 = vrot.slane %v244_v25, 4  ;;  %v350_v36 = vrot.slane %v348_v26, 4  ;;  %v353_v37 = vrot.slane %v351_v27, 5  ;;  %v5336_v25 = vld [vmem:[%s5262_s29 + $0x10] sm:$0xf] }
  0x26   : > { %v359_v38 = vrot.slane %v357_v28, 5  ;;  %v240_v40 = vsel %vm5274_vm2, %v235_v31, %v239_v19  ;;  %v363_v41 = vrot.slane %v361_v33, 4  ;;  %v369_v42 = vrot.slane %v367_v34, 5  ;;  %v5089_v19 = vld [vmem:[%s6668_s1 + $0x20] sm:$0xff] }
  0x27   : > { %4410 = vmatmul.msk.bf16.vlgmr.msra.gmra.mxu3 %vm676_vm3, %v660_v30  ;;  %v444_v44 = vshrl.u32 %v190_v29, 16  ;;  %v250_v45 = vsel %vm5274_vm2, %v245_v35, %v249_v24  ;;  %v616_v46 = vunpack.c.l.b16 %v240_v40  ;;  %v354_v47 = vor.u32 %v353_v37, %v350_v36  ;;  %1326 = vmatpush.bf16.msrb.mxu2 %v5089_v19  ;;  %v5347_v40 = vld [vmem:[%s5262_s29 + $0x4c] sm:$0xf] }
  0x28   : > { %v447_v48 = vshll.u32 %v190_v29, 16  ;;  %v617_v49 = vunpack.c.l.b16 %v250_v45  ;;  %v364_v50 = vor.u32 %v363_v41, %v359_v38  ;;  %v453_v52 = vshll.u32 %v191_v39, 16  ;;  %v5339_v29 = vld [vmem:[%s5262_s29 + $0x14] sm:$0x1] }
  0x29   : > { %v446_v51 = vrot.slane %v444_v44, 4  ;;  %v355_v53 = vrot.slane %v354_v47, 4  ;;  %v457_v55 = vshrl.u32 %v191_v39, 16  ;;  %v463_v56 = vshll.u32 %v217_v43, 16  ;;  %v184_v39 = vld [vmem:[%s5262_s29 + $0x48] sm:$0xf] }
  0x2a   : > { %v449_v54 = vrot.slane %v447_v48, 5  ;;  %v648_v58 = vpack.c.b16 %v617_v49, %v616_v46  ;;  %v365_v59 = vrot.slane %v364_v50, 4  ;;  %v455_v60 = vrot.slane %v453_v52, 5  ;;  %v5107_v45 = vld [vmem:[%s6668_s1 + $0x30] sm:$0xff]  ;;  %v5085_v46 = vld [vmem:[%s6668_s1] sm:$0xff] }
  0x2b   : > { %v360_v0 = vsel %vm5274_vm2, %v355_v53, %v359_v38  ;;  %v459_v2 = vrot.slane %v457_v55, 4  ;;  %v465_v3 = vrot.slane %v463_v56, 5  ;;  %v540_v7 = vshrl.u32 %v198_v57, 16  ;;  %v5363_v56 = vld [vmem:[%s5262_s29 + $0x50] sm:$0x1]  ;;  %1625 = vmatpush.bf16.msrb.mxu3 %v5107_v45  ;;  %961 = vmatpush.bf16.msrb.mxu1 %v5085_v46 }
  0x2c   : > { %v450_v1 = vor.u32 %v449_v54, %v446_v51  ;;  %4398 = vmatmul.msk.bf16.vlgmr.msra.gmra.mxu0 %vm676_vm3, %v648_v58  ;;  %v370_v5 = vsel %vm5274_vm2, %v365_v59, %v369_v42  ;;  %v626_v6 = vunpack.c.l.b16 %v360_v0  ;;  %v543_v8 = vshll.u32 %v198_v57, 16  ;;  %v5109_v51 = vld [vmem:[%s6668_s1 + $0x40] sm:$0xff] }
  0x2d   : > { %v627_v9 = vunpack.c.l.b16 %v370_v5  ;;  %v460_v11 = vor.u32 %v459_v2, %v455_v60  ;;  %v549_v12 = vshll.u32 %v199_v63, 16  ;;  %v542_v14 = vrot.slane %v540_v7, 4  ;;  %2291 = vmatpush.bf16.msrb.mxu0 %v5109_v51 }
  0x2e   : > { %v451_v10 = vrot.slane %v450_v1, 4  ;;  %v545_v15 = vrot.slane %v543_v8, 5  ;;  %v553_v17 = vshrl.u32 %v199_v63, 16  ;;  %v559_v18 = vshll.u32 %v221_v4, 16  ;;  %v193_v8 = vld [vmem:[%s5262_s29 + $0x7c] sm:$0xf] }
  0x2f   : > { %v653_v20 = vpack.c.b16 %v627_v9, %v626_v6  ;;  %v461_v23 = vrot.slane %v460_v11, 4  ;;  %v551_v24 = vrot.slane %v549_v12, 5  ;;  %v252_v33 = vshrl.u32 %v174_v13, 16 }
  0x30   : > { %v456_v22 = vsel %vm5274_vm2, %v451_v10, %v455_v60  ;;  %v546_v27 = vor.u32 %v545_v15, %v542_v14  ;;  %v555_v28 = vrot.slane %v553_v17, 4  ;;  %v561_v31 = vrot.slane %v559_v18, 5  ;;  %v218_v17 = vld [vmem:[%s5262_s29 + $0x80] sm:$0x1] }
  0x31   : > { %v634_v26 = vunpack.c.l.b16 %v456_v22  ;;  %4403 = vmatmul.msk.bf16.gmra.mxu1 %vm676_vm3, %v653_v20  ;;  %v466_v30 = vsel %vm5274_vm2, %v461_v23, %v465_v3  ;;  %v255_v34 = vshll.u32 %v174_v13, 16  ;;  %v261_v38 = vshll.u32 %v5336_v25, 16  ;;  %v192_v3 = vld [vmem:[%s5262_s29 + $0x78] sm:$0xf] }
  0x32   : > { %v635_v35 = vunpack.c.l.b16 %v466_v30  ;;  %v547_v36 = vrot.slane %v546_v27, 4  ;;  %v556_v37 = vor.u32 %v555_v28, %v551_v24  ;;  %v254_v41 = vrot.slane %v252_v33, 4 }
  0x33   : > { %v257_v42 = vrot.slane %v255_v34, 5  ;;  %v265_v43 = vshrl.u32 %v5336_v25, 16  ;;  %v271_v44 = vshll.u32 %v5339_v29, 16  ;;  %v263_v50 = vrot.slane %v261_v38, 5 }
  0x34   : > { %v657_v47 = vpack.c.b16 %v635_v35, %v634_v26  ;;  %v552_v48 = vsel %vm5274_vm2, %v547_v36, %v551_v24  ;;  %v557_v49 = vrot.slane %v556_v37, 4  ;;  %v372_v58 = vshrl.u32 %v184_v39, 16  ;;  %v200_v35 = vld [vmem:[%s5262_s29 + $0xa8] sm:$0xf] }
  0x35   : > { %v642_v52 = vunpack.c.l.b16 %v552_v48  ;;  %v258_v53 = vor.u32 %v257_v42, %v254_v41  ;;  %v267_v54 = vrot.slane %v265_v43, 4  ;;  %v273_v55 = vrot.slane %v271_v44, 5  ;;  %v222_v41 = vld [vmem:[%s5262_s29 + $0xb0] sm:$0x1] }
  0x36   : > { %4407 = vmatmul.msk.bf16.gmra.mxu2 %vm676_vm3, %v657_v47  ;;  %v562_v57 = vsel %vm5274_vm2, %v557_v49, %v561_v31  ;;  %v375_v59 = vshll.u32 %v184_v39, 16  ;;  %v381_v60 = vshll.u32 %v5347_v40, 16  ;;  %v385_v2 = vshrl.u32 %v5347_v40, 16  ;;  %v201_v39 = vld [vmem:[%s5262_s29 + $0xac] sm:$0xf] }
  0x37   : > { %v643_v63 = vunpack.c.l.b16 %v562_v57  ;;  %v259_v0 = vrot.slane %v258_v53, 4  ;;  %v268_v1 = vor.u32 %v267_v54, %v263_v50  ;;  %v374_v4 = vrot.slane %v372_v58, 4 }
  0x38   : > { %v377_v5 = vrot.slane %v375_v59, 5  ;;  %v383_v6 = vrot.slane %v381_v60, 5  ;;  %v391_v7 = vshll.u32 %v5363_v56, 16  ;;  %v387_v12 = vrot.slane %v385_v2, 4  ;;  %v176_v59 = vld [vmem:[%s5262_s29 + $0x18] sm:$0xf] }
  0x39   : > { %v661_v9 = vpack.c.b16 %v643_v63, %v642_v52  ;;  %v264_v10 = vsel %vm5274_vm2, %v259_v0, %v263_v50  ;;  %v269_v11 = vrot.slane %v268_v1, 4  ;;  %v468_v18 = vshrl.u32 %v192_v3, 16  ;;  %v5391_v1 = vld [vmem:[%s5262_s29 + $0x1c] sm:$0xf]  ;;  %v5394_v2 = vld [vmem:[%s5262_s29 + $0x20] sm:$0x1] }
  0x3a   : > { %v618_v13 = vunpack.c.l.b16 %v264_v10  ;;  %v378_v14 = vor.u32 %v377_v5, %v374_v4  ;;  %v393_v15 = vrot.slane %v391_v7, 5  ;;  %v388_v20 = vor.u32 %v387_v12, %v383_v6 }
  0x3b   : > { %4411 = vmatmul.msk.bf16.gmra.mxu3 %vm676_vm3, %v661_v9  ;;  %v274_v19 = vsel %vm5274_vm2, %v269_v11, %v273_v55  ;;  %v471_v22 = vshll.u32 %v192_v3, 16  ;;  %v477_v23 = vshll.u32 %v193_v8, 16  ;;  %v470_v27 = vrot.slane %v468_v18, 4 }
  0x3c   : > { %v619_v24 = vunpack.c.l.b16 %v274_v19  ;;  %v379_v26 = vrot.slane %v378_v14, 4  ;;  %v481_v28 = vshrl.u32 %v193_v8, 16  ;;  %v389_v30 = vrot.slane %v388_v20, 4 }
  0x3d   : > { %v473_v31 = vrot.slane %v471_v22, 5  ;;  %v479_v33 = vrot.slane %v477_v23, 5  ;;  %v487_v34 = vshll.u32 %v218_v17, 16  ;;  %v564_v48 = vshrl.u32 %v200_v35, 16  ;;  %v5404_v22 = vld [vmem:[%s5262_s29 + $0x58] sm:$0xf] }
  0x3e   : > { %v649_v36 = vpack.c.b16 %v619_v24, %v618_v13  ;;  %v384_v37 = vsel %vm5274_vm2, %v379_v26, %v383_v6  ;;  %v483_v38 = vrot.slane %v481_v28, 4  ;;  %v394_v42 = vsel %vm5274_vm2, %v389_v30, %v393_v15  ;;  %v186_v15 = vld [vmem:[%s5262_s29 + $0x54] sm:$0xf]  ;;  %v5409_v28 = vld [vmem:[%s5262_s29 + $0x5c] sm:$0x1] }
  0x3f   : > { %v628_v43 = vunpack.c.l.b16 %v384_v37  ;;  %v474_v44 = vor.u32 %v473_v31, %v470_v27  ;;  %v489_v45 = vrot.slane %v487_v34, 5  ;;  %v629_v46 = vunpack.c.l.b16 %v394_v42 }
  0x40   : > { %4399 = vmatmul.msk.bf16.gmra.mxu0 %vm676_vm3, %v649_v36  ;;  %v484_v47 = vor.u32 %v483_v38, %v479_v33  ;;  %v567_v49 = vshll.u32 %v200_v35, 16  ;;  %v573_v51 = vshll.u32 %v201_v39, 16  ;;  %v577_v52 = vshrl.u32 %v201_v39, 16  ;;  %v194_v39 = vld [vmem:[%s5262_s29 + $0x84] sm:$0xf] }
  0x41   : > { %v475_v50 = vrot.slane %v474_v44, 4  ;;  %v583_v53 = vshll.u32 %v222_v41, 16  ;;  %v654_v54 = vpack.c.b16 %v629_v46, %v628_v43  ;;  %v566_v57 = vrot.slane %v564_v48, 4 }
  0x42   : > { %v485_v55 = vrot.slane %v484_v47, 4  ;;  %v569_v58 = vrot.slane %v567_v49, 5  ;;  %v575_v63 = vrot.slane %v573_v51, 5  ;;  %v579_v0 = vrot.slane %v577_v52, 4  ;;  %v195_v49 = vld [vmem:[%s5262_s29 + $0x88] sm:$0xf] }
  0x43   : > { %v480_v60 = vsel %vm5274_vm2, %v475_v50, %v479_v33  ;;  %4404 = vmatmul.msk.bf16.gmra.mxu1 %vm676_vm3, %v654_v54  ;;  %v585_v6 = vrot.slane %v583_v53, 5  ;;  %v276_v9 = vshrl.u32 %v176_v59, 16  ;;  %v279_v10 = vshll.u32 %v176_v59, 16  ;;  %v219_v53 = vld [vmem:[%s5262_s29 + $0x8c] sm:$0x1] }
  0x44   : > { %v490_v3 = vsel %vm5274_vm2, %v485_v55, %v489_v45  ;;  %v636_v4 = vunpack.c.l.b16 %v480_v60  ;;  %v570_v5 = vor.u32 %v569_v58, %v566_v57  ;;  %v580_v8 = vor.u32 %v579_v0, %v575_v63 }
  0x45   : > { %v637_v7 = vunpack.c.l.b16 %v490_v3  ;;  %v285_v12 = vshll.u32 %v5391_v1, 16  ;;  %v289_v13 = vshrl.u32 %v5391_v1, 16  ;;  %v295_v14 = vshll.u32 %v5394_v2, 16 }
  0x46   : > { %v571_v11 = vrot.slane %v570_v5, 4  ;;  %v581_v18 = vrot.slane %v580_v8, 4  ;;  %v278_v19 = vrot.slane %v276_v9, 4  ;;  %v281_v20 = vrot.slane %v279_v10, 5  ;;  %v202_v8 = vld [vmem:[%s5262_s29 + $0xb4] sm:$0xf] }
  0x47   : > { %v658_v17 = vpack.c.b16 %v637_v7, %v636_v4  ;;  %v287_v24 = vrot.slane %v285_v12, 5  ;;  %v291_v26 = vrot.slane %v289_v13, 4  ;;  %v297_v27 = vrot.slane %v295_v14, 5  ;;  %v203_v12 = vld [vmem:[%s5262_s29 + $0xb8] sm:$0xf] }
  0x48   : > { %v576_v23 = vsel %vm5274_vm2, %v571_v11, %v575_v63  ;;  %v586_v30 = vsel %vm5274_vm2, %v581_v18, %v585_v6  ;;  %v282_v33 = vor.u32 %v281_v20, %v278_v19  ;;  %v396_v34 = vshrl.u32 %v186_v15, 16  ;;  %v223_v18 = vld [vmem:[%s5262_s29 + $0xbc] sm:$0x1]  ;;  %v5130_v19 = vld [vmem:[%s6668_s1 + $0x68] sm:$0xff] }
  0x49   : > { %4408 = vmatmul.msk.bf16.gmra.mxu2 %vm676_vm3, %v658_v17  ;;  %v644_v31 = vunpack.c.l.b16 %v576_v23  ;;  %v645_v35 = vunpack.c.l.b16 %v586_v30  ;;  %v292_v36 = vor.u32 %v291_v26, %v287_v24  ;;  %v399_v37 = vshll.u32 %v186_v15, 16 }
  0x4a   : > { %v405_v38 = vshll.u32 %v5404_v22, 16  ;;  %v283_v41 = vrot.slane %v282_v33, 4  ;;  %v398_v42 = vrot.slane %v396_v34, 4  ;;  %v409_v43 = vshrl.u32 %v5404_v22, 16  ;;  %2999 = vmatpush.bf16.msra.mxu2 %v5130_v19 }
  0x4b   : > { %v415_v44 = vshll.u32 %v5409_v28, 16  ;;  %v662_v45 = vpack.c.b16 %v645_v35, %v644_v31  ;;  %v293_v46 = vrot.slane %v292_v36, 4  ;;  %v401_v47 = vrot.slane %v399_v37, 5 }
  0x4c   : > { %v407_v48 = vrot.slane %v405_v38, 5  ;;  %v288_v50 = vsel %vm5274_vm2, %v283_v41, %v287_v24  ;;  %v411_v51 = vrot.slane %v409_v43, 4  ;;  %v492_v54 = vshrl.u32 %v194_v39, 16  ;;  %v178_v38 = vld [vmem:[%s5262_s29 + $0x24] sm:$0xf] }
  0x4d   : > { %v417_v52 = vrot.slane %v415_v44, 5  ;;  %4412 = vmatmul.msk.bf16.gmra.mxu3 %vm676_vm3, %v662_v45  ;;  %v298_v55 = vsel %vm5274_vm2, %v293_v46, %v297_v27  ;;  %v620_v57 = vunpack.c.l.b16 %v288_v50  ;;  %v402_v58 = vor.u32 %v401_v47, %v398_v42  ;;  %v5440_v44 = vld [vmem:[%s5262_s29 + $0x28] sm:$0xf]  ;;  %v5443_v45 = vld [vmem:[%s5262_s29 + $0x2c] sm:$0x1]  ;;  %v5132_v50 = vld [vmem:[%s6668_s1 + $0x78] sm:$0xff] }
  0x4e   : > { %v495_v59 = vshll.u32 %v194_v39, 16  ;;  %v621_v60 = vunpack.c.l.b16 %v298_v55  ;;  %v412_v63 = vor.u32 %v411_v51, %v407_v48  ;;  %v494_v0 = vrot.slane %v492_v54, 4  ;;  %v5112_v51 = vld [vmem:[%s6668_s1 + $0x58] sm:$0xff]  ;;  %3665 = vmatpush.bf16.msra.mxu3 %v5132_v50 }
  0x4f   : > { %v501_v3 = vshll.u32 %v195_v49, 16  ;;  %v403_v4 = vrot.slane %v402_v58, 4  ;;  %v505_v6 = vshrl.u32 %v195_v49, 16  ;;  %v511_v7 = vshll.u32 %v219_v53, 16  ;;  %2700 = vmatpush.bf16.msra.mxu1 %v5112_v51 }
  0x50   : > { %v497_v5 = vrot.slane %v495_v59, 5  ;;  %v650_v9 = vpack.c.b16 %v621_v60, %v620_v57  ;;  %v413_v10 = vrot.slane %v412_v63, 4  ;;  %v588_v24 = vshrl.u32 %v202_v8, 16 }
  0x51   : > { %v503_v11 = vrot.slane %v501_v3, 5  ;;  %v408_v13 = vsel %vm5274_vm2, %v403_v4, %v407_v48  ;;  %v507_v15 = vrot.slane %v505_v6, 4  ;;  %v513_v17 = vrot.slane %v511_v7, 5  ;;  %v1043_v6 = vld [vmem:[%s5262_s29] sm:$0xe] }
  0x52   : > { %v498_v14 = vor.u32 %v497_v5, %v494_v0  ;;  %4400 = vmatmul.msk.bf16.gmra.mxu0 %vm676_vm3, %v650_v9  ;;  %v418_v20 = vsel %vm5274_vm2, %v413_v10, %v417_v52  ;;  %v630_v23 = vunpack.c.l.b16 %v408_v13  ;;  %v591_v26 = vshll.u32 %v202_v8, 16  ;;  %v5134_v52 = vld [vmem:[%s6668_s1 + $0x88] sm:$0xff] }
  0x53   : > { %v631_v27 = vunpack.c.l.b16 %v418_v20  ;;  %v508_v31 = vor.u32 %v507_v15, %v503_v11  ;;  %v597_v33 = vshll.u32 %v203_v12, 16  ;;  %v590_v34 = vrot.slane %v588_v24, 4  ;;  %4075 = vmatpush.bf16.msra.mxu0 %v5134_v52  ;;  %v4670_v15 = vld [vmem:[%s5262_s29 + $0xc] sm:$0xf] }
  0x54   : > { %v499_v30 = vrot.slane %v498_v14, 4  ;;  %v593_v35 = vrot.slane %v591_v26, 5  ;;  %v601_v36 = vshrl.u32 %v203_v12, 16  ;;  %v607_v37 = vshll.u32 %v223_v18, 16 }
  0x55   : > { %v655_v39 = vpack.c.b16 %v631_v27, %v630_v23  ;;  %v509_v42 = vrot.slane %v508_v31, 4  ;;  %v599_v43 = vrot.slane %v597_v33, 5  ;;  %v1099_v46 = vrot.slane %v5290_v62, 5  ;;  %v4673_v62 = vld [vmem:[%s5262_s29 + $0x18] sm:$0xf] }
  0x56   : > { %v504_v41 = vsel %vm5274_vm2, %v499_v30, %v503_v11  ;;  %v594_v48 = vor.u32 %v593_v35, %v590_v34  ;;  %v603_v49 = vrot.slane %v601_v36, 4  ;;  %v609_v54 = vrot.slane %v607_v37, 5 }
  0x57   : > { %v638_v47 = vunpack.c.l.b16 %v504_v41  ;;  %4405 = vmatmul.msk.bf16.gmra.mxu1 %vm676_vm3, %v655_v39  ;;  %v514_v53 = vsel %vm5274_vm2, %v509_v42, %v513_v17  ;;  %v300_v55 = vshrl.u32 %v178_v38, 16  ;;  %v303_v57 = vshll.u32 %v178_v38, 16  ;;  %v4671_v17 = vld [vmem:[%s5262_s29 + $0x10] sm:$0xf] }
  0x58   : > { %v639_v58 = vunpack.c.l.b16 %v514_v53  ;;  %v595_v59 = vrot.slane %v594_v48, 4  ;;  %v604_v60 = vor.u32 %v603_v49, %v599_v43  ;;  %v309_v63 = vshll.u32 %v5440_v44, 16  ;;  %v5069_v53 = vld [vmem:[%s5262_s29] sm:$0xff] }
  0x59   : > { %v302_v0 = vrot.slane %v300_v55, 4  ;;  %v305_v3 = vrot.slane %v303_v57, 5  ;;  %v313_v4 = vshrl.u32 %v5440_v44, 16  ;;  %v319_v5 = vshll.u32 %v5443_v45, 16 }
  0x5a   : > { %v659_v7 = vpack.c.b16 %v639_v58, %v638_v47  ;;  %v600_v8 = vsel %vm5274_vm2, %v595_v59, %v599_v43  ;;  %v605_v9 = vrot.slane %v604_v60, 4  ;;  %v311_v10 = vrot.slane %v309_v63, 5  ;;  %v4672_v43 = vld [vmem:[%s5262_s29 + $0x14] sm:$0x1] }
  0x5b   : > { %v646_v11 = vunpack.c.l.b16 %v600_v8  ;;  %v306_v12 = vor.u32 %v305_v3, %v302_v0  ;;  %v315_v13 = vrot.slane %v313_v4, 4  ;;  %v321_v14 = vrot.slane %v319_v5, 5  ;;  %v4674_v4 = vld [vmem:[%s5262_s29 + $0x1c] sm:$0xf]  ;;  %v1044_v5 = vld [vmem:[%s5262_s29 + $0xc] sm:$0xe] }
  0x5c   : > { %4409 = vmatmul.msk.bf16.gmra.mxu2 %vm676_vm3, %v659_v7  ;;  %v610_v18 = vsel %vm5274_vm2, %v605_v9, %v609_v54  ;;  %v4502_v19 = vrot.slane %v1043_v6, 9  ;;  %v1096_v27 = vrot.slane %v5287_v61, 5  ;;  %v1788_v30 = vshrl.u32 %v4670_v15, 16 }
  0x5d   : > { %v647_v20 = vunpack.c.l.b16 %v610_v18  ;;  %v307_v23 = vrot.slane %v306_v12, 4  ;;  %v316_v24 = vor.u32 %v315_v13, %v311_v10  ;;  %v1791_v31 = vshll.u32 %v4670_v15, 16  ;;  %v5091_v12 = vld [vmem:[%s5262_s29 + $0xc] sm:$0xff] }
  0x5e   : > { %v1797_v33 = vshll.u32 %v4671_v17, 16  ;;  %v1801_v34 = vshrl.u32 %v4671_v17, 16  ;;  %v1097_v38 = vsel %vm5469_vm6, %v4502_v19, %v1096_v27  ;;  %v1098_v41 = vrot.slane %v1096_v27, 4 }
  0x5f   : > { %v663_v35 = vpack.c.b16 %v647_v20, %v646_v11  ;;  %v312_v36 = vsel %vm5274_vm2, %v307_v23, %v311_v10  ;;  %v317_v37 = vrot.slane %v316_v24, 4  ;;  %v1211_v42 = vunpack.c.l.b16 %v1097_v38  ;;  %v4675_v24 = vld [vmem:[%s5262_s29 + $0x20] sm:$0x1] }
  0x60   : > { %v622_v39 = vunpack.c.l.b16 %v312_v36  ;;  %v1790_v47 = vrot.slane %v1788_v30, 4  ;;  %v1793_v48 = vrot.slane %v1791_v31, 5  ;;  %v1799_v49 = vrot.slane %v1797_v33, 5  ;;  %v5070_v33 = vld [vmem:[%s5262_s29 + $0xc] sm:$0xff] }
  0x61   : > { %4413 = vmatmul.msk.bf16.gmra.mxu3 %vm676_vm3, %v663_v35  ;;  %v322_v61 = vsel %vm5274_vm2, %v317_v37, %v321_v14  ;;  %v1803_v50 = vrot.slane %v1801_v34, 4  ;;  %v1100_v52 = vsel %vm5469_vm6, %v1098_v41, %v1099_v46  ;;  %v1807_v58 = vshll.u32 %v4672_v43, 16  ;;  %v4677_v43 = vld [vmem:[%s5262_s29 + $0x28] sm:$0xf] }
  0x62   : > { %v623_v51 = vunpack.c.l.b16 %v322_v61  ;;  %v1212_v54 = vunpack.c.l.b16 %v1100_v52  ;;  %v1794_v55 = vor.u32 %v1793_v48, %v1790_v47  ;;  %v1103_v46 = vrot.slane %v5336_v25, 5  ;;  %v1045_v61 = vld [vmem:[%s5262_s29 + $0x18] sm:$0xe] }
  0x63   : > { %v1804_v57 = vor.u32 %v1803_v50, %v1799_v49  ;;  %v1809_v3 = vrot.slane %v1807_v58, 5  ;;  %v1812_v6 = vshrl.u32 %v4673_v62, 16  ;;  %v1815_v7 = vshll.u32 %v4673_v62, 16 }
  0x64   : > { %v651_v59 = vpack.c.b16 %v623_v51, %v622_v39  ;;  %v1243_v60 = vpack.c.b16 %v1212_v54, %v1211_v42  ;;  %v1795_v63 = vrot.slane %v1794_v55, 4  ;;  %v1821_v10 = vshll.u32 %v4674_v4, 16  ;;  %v4676_v39 = vld [vmem:[%s5262_s29 + $0x24] sm:$0xf] }
  0x65   : > { %v1805_v0 = vrot.slane %v1804_v57, 4  ;;  %v1825_v11 = vshrl.u32 %v4674_v4, 16  ;;  %v4503_v13 = vrot.slane %v1044_v5, 9  ;;  %v1105_v14 = vrot.slane %v1103_v46, 4  ;;  %v5092_v57 = vld [vmem:[%s5262_s29 + $0x18] sm:$0xff] }
  0x66   : > { %4401 = vmatmul.msk.bf16.gmra.mxu0 %vm676_vm3, %v651_v59  ;;  %v1800_v8 = vsel %vm5274_vm2, %v1795_v63, %v1799_v49  ;;  %v1106_v25 = vrot.slane %v5339_v29, 5  ;;  %v1814_v18 = vrot.slane %v1812_v6, 4  ;;  %v1817_v19 = vrot.slane %v1815_v7, 5  ;;  %v4678_v4 = vld [vmem:[%s5262_s29 + $0x2c] sm:$0x1] }
  0x67   : > { %4486 = vmatmul.msk.bf16.vlgmr.msrb.gmra.mxu1 %vm676_vm3, %v5069_v53  ;;  %v1810_v9 = vsel %vm5274_vm2, %v1805_v0, %v1809_v3  ;;  %v2176_v15 = vunpack.c.l.b16 %v1800_v8  ;;  %v1823_v20 = vrot.slane %v1821_v10, 5  ;;  %v1827_v23 = vrot.slane %v1825_v11, 4 }
  0x68   : > { %v2177_v17 = vunpack.c.l.b16 %v1810_v9  ;;  %v1104_v27 = vsel %vm5469_vm6, %v4503_v13, %v1103_v46  ;;  %v1107_v30 = vsel %vm5469_vm6, %v1105_v14, %v1106_v25  ;;  %v1818_v29 = vor.u32 %v1817_v19, %v1814_v18  ;;  %v5071_v9 = vld [vmem:[%s5262_s29 + $0x18] sm:$0xff] }
  0x69   : > { %v1828_v34 = vor.u32 %v1827_v23, %v1823_v20  ;;  %v1831_v35 = vshll.u32 %v4675_v24, 16  ;;  %v1213_v36 = vunpack.c.l.b16 %v1104_v27  ;;  %v1214_v37 = vunpack.c.l.b16 %v1107_v30  ;;  %v1046_v23 = vld [vmem:[%s5262_s29 + $0x24] sm:$0xe] }
  0x6a   : > { %v2208_v31 = vpack.c.b16 %v2177_v17, %v2176_v15  ;;  %v1819_v38 = vrot.slane %v1818_v29, 4  ;;  %v1110_v48 = vrot.slane %v5391_v1, 5  ;;  %v1836_v49 = vshrl.u32 %v4676_v39, 16  ;;  %v4679_v15 = vld [vmem:[%s5262_s29 + $0x30] sm:$0xf]  ;;  %v5093_v29 = vld [vmem:[%s5262_s29 + $0x24] sm:$0xff] }
  0x6b   : > { %v1829_v41 = vrot.slane %v1828_v34, 4  ;;  %v1833_v42 = vrot.slane %v1831_v35, 5  ;;  %v1244_v47 = vpack.c.b16 %v1214_v37, %v1213_v36  ;;  %v1839_v51 = vshll.u32 %v4676_v39, 16  ;;  %v4680_v17 = vld [vmem:[%s5262_s29 + $0x34] sm:$0xf] }
  0x6c   : > { %4530 = vmatmul.msk.bf16.vlgmr.msrb.gmra.mxu2 %vm676_vm3, %v1243_v60  ;;  %v1824_v50 = vsel %vm5274_vm2, %v1819_v38, %v1823_v20  ;;  %v1845_v52 = vshll.u32 %v4677_v43, 16  ;;  %v1849_v53 = vshrl.u32 %v4677_v43, 16  ;;  %v4504_v55 = vrot.slane %v1045_v61, 9 }
  0x6d   : > { %v1834_v54 = vsel %vm5274_vm2, %v1829_v41, %v1833_v42  ;;  %v2178_v58 = vunpack.c.l.b16 %v1824_v50  ;;  %v1112_v59 = vrot.slane %v1110_v48, 4  ;;  %v1113_v1 = vrot.slane %v5394_v2, 5  ;;  %v4681_v42 = vld [vmem:[%s5262_s29 + $0x38] sm:$0x1] }
  0x6e   : > { %v1838_v60 = vrot.slane %v1836_v49, 4  ;;  %v2179_v63 = vunpack.c.l.b16 %v1834_v54  ;;  %v1841_v0 = vrot.slane %v1839_v51, 5  ;;  %v1847_v3 = vrot.slane %v1845_v52, 5  ;;  %v4683_v54 = vld [vmem:[%s5262_s29 + $0x40] sm:$0xf] }
  0x6f   : > { %v1851_v62 = vrot.slane %v1849_v53, 4  ;;  %v1111_v46 = vsel %vm5469_vm6, %v4504_v55, %v1110_v48  ;;  %v1114_v5 = vsel %vm5469_vm6, %v1112_v59, %v1113_v1  ;;  %v1855_v2 = vshll.u32 %v4678_v4, 16  ;;  %v4682_v53 = vld [vmem:[%s5262_s29 + $0x3c] sm:$0xf]  ;;  %v5151_v1 = vld [vmem:[%s5262_s29 + $0x34] sm:$0xf] }
  0x70   : > { %v2209_v6 = vpack.c.b16 %v2179_v63, %v2178_v58  ;;  %v1842_v7 = vor.u32 %v1841_v0, %v1838_v60  ;;  %v1215_v10 = vunpack.c.l.b16 %v1111_v46  ;;  %v1216_v11 = vunpack.c.l.b16 %v1114_v5  ;;  %v1047_v63 = vld [vmem:[%s5262_s29 + $0x30] sm:$0xe] }
  0x71   : > { %4654 = vmatmul.msk.bf16.vlgmr.msrb.gmra.mxu3 %vm676_vm3, %v5091_v12  ;;  %v1852_v8 = vor.u32 %v1851_v62, %v1847_v3  ;;  %v1857_v14 = vrot.slane %v1855_v2, 5  ;;  %v1117_v18 = vrot.slane %v5440_v44, 5  ;;  %v1860_v24 = vshrl.u32 %v4679_v15, 16  ;;  %v5152_v2 = vld [vmem:[%s5262_s29 + $0x38] sm:$0x1] }
  0x72   : > { %v1843_v12 = vrot.slane %v1842_v7, 4  ;;  %v1245_v25 = vpack.c.b16 %v1216_v11, %v1215_v10  ;;  %v1863_v27 = vshll.u32 %v4679_v15, 16  ;;  %v1869_v30 = vshll.u32 %v4680_v17, 16  ;;  %v5094_v10 = vld [vmem:[%s5262_s29 + $0x30] sm:$0xff] }
  0x73   : > { %v1853_v13 = vrot.slane %v1852_v8, 4  ;;  %v1119_v34 = vrot.slane %v1117_v18, 4  ;;  %v1120_v44 = vrot.slane %v5443_v45, 5  ;;  %v1862_v37 = vrot.slane %v1860_v24, 4  ;;  %v5072_v45 = vld [vmem:[%s5262_s29 + $0x24] sm:$0xff] }
  0x74   : > { %v1848_v19 = vsel %vm5274_vm2, %v1843_v12, %v1847_v3  ;;  %v1865_v38 = vrot.slane %v1863_v27, 5  ;;  %v1871_v39 = vrot.slane %v1869_v30, 5  ;;  %v1879_v50 = vshll.u32 %v4681_v42, 16  ;;  %v5073_v30 = vld [vmem:[%s5262_s29 + $0x30] sm:$0xff] }
  0x75   : > { %v1858_v20 = vsel %vm5274_vm2, %v1853_v13, %v1857_v14  ;;  %v2180_v35 = vunpack.c.l.b16 %v1848_v19  ;;  %v1124_v60 = vrot.slane %v5151_v1, 5  ;;  %v1884_v0 = vshrl.u32 %v4682_v53, 16 }
  0x76   : > { %4730 = vmatmul.msk.bf16.vlgmr.msrb.gmra.mxu0 %vm676_vm3, %v2208_v31  ;;  %v1873_v31 = vshrl.u32 %v4680_v17, 16  ;;  %v2181_v36 = vunpack.c.l.b16 %v1858_v20  ;;  %v1866_v48 = vor.u32 %v1865_v38, %v1862_v37  ;;  %v1881_v58 = vrot.slane %v1879_v50, 5  ;;  %v4684_v17 = vld [vmem:[%s5262_s29 + $0x44] sm:$0x1]  ;;  %v4685_v37 = vld [vmem:[%s5262_s29 + $0x48] sm:$0xf] }
  0x77   : > { %4487 = vmatmul.msk.bf16.gmra.mxu1 %vm676_vm3, %v5070_v33  ;;  %v4505_v33 = vrot.slane %v1046_v23, 9  ;;  %v1887_v3 = vshll.u32 %v4682_v53, 16  ;;  %v1893_v62 = vshll.u32 %v4683_v54, 16  ;;  %v1897_v4 = vshrl.u32 %v4683_v54, 16  ;;  %v4686_v38 = vld [vmem:[%s5262_s29 + $0x4c] sm:$0xf] }
  0x78   : > { %v1875_v41 = vrot.slane %v1873_v31, 4  ;;  %v2210_v61 = vpack.c.b16 %v2181_v36, %v2180_v35  ;;  %v1867_v55 = vrot.slane %v1866_v48, 4  ;;  %v4506_v7 = vrot.slane %v1047_v63, 9  ;;  %v5095_v53 = vld [vmem:[%s5262_s29 + $0x3c] sm:$0xff] }
  0x79   : > { %v1118_v43 = vsel %vm5469_vm6, %v4505_v33, %v1117_v18  ;;  %v1126_v8 = vrot.slane %v1124_v60, 4  ;;  %v1886_v11 = vrot.slane %v1884_v0, 4  ;;  %v1889_v12 = vrot.slane %v1887_v3, 5  ;;  %v4687_v3 = vld [vmem:[%s5262_s29 + $0x50] sm:$0x1] }
  0x7a   : > { %v1876_v49 = vor.u32 %v1875_v41, %v1871_v39  ;;  %v1217_v51 = vunpack.c.l.b16 %v1118_v43  ;;  %v1872_v5 = vsel %vm5274_vm2, %v1867_v55, %v1871_v39  ;;  %v1895_v13 = vrot.slane %v1893_v62, 5 }
  0x7b   : > { %v1899_v14 = vrot.slane %v1897_v4, 4  ;;  %v1125_v18 = vsel %vm5469_vm6, %v4506_v7, %v1124_v60  ;;  %v1890_v20 = vor.u32 %v1889_v12, %v1886_v11  ;;  %v1903_v24 = vshll.u32 %v4684_v17, 16 }
  0x7c   : > { %4531 = vmatmul.msk.bf16.gmra.mxu2 %vm676_vm3, %v1244_v47  ;;  %v1121_v47 = vsel %vm5469_vm6, %v1119_v34, %v1120_v44  ;;  %v1908_v48 = vshrl.u32 %v4685_v37, 16  ;;  %v1917_v50 = vshll.u32 %v4686_v38, 16 }
  0x7d   : > { %v1218_v52 = vunpack.c.l.b16 %v1121_v47  ;;  %v1900_v23 = vor.u32 %v1899_v14, %v1895_v13  ;;  %v1891_v44 = vrot.slane %v1890_v20, 4  ;;  %v1905_v36 = vrot.slane %v1903_v24, 5 }
  0x7e   : > { %v1919_v63 = vrot.slane %v1917_v50, 5  ;;  %v1138_v20 = vrot.slane %v5347_v40, 5 }
  0x7f   : > { %v1246_v59 = vpack.c.b16 %v1218_v52, %v1217_v51  ;;  %v1901_v35 = vrot.slane %v1900_v23, 4  ;;  %v1896_v42 = vsel %vm5274_vm2, %v1891_v44, %v1895_v13  ;;  %v1921_v51 = vshrl.u32 %v4686_v38, 16 }
  0x80   : > { %v2184_v52 = vunpack.c.l.b16 %v1896_v42  ;;  %v1140_v38 = vrot.slane %v1138_v20, 4 }
  0x81   : > { %4655 = vmatmul.msk.bf16.gmra.mxu3 %vm676_vm3, %v5092_v57  ;;  %v1877_v57 = vrot.slane %v1876_v49, 4  ;;  %v1906_v43 = vsel %vm5274_vm2, %v1901_v35, %v1905_v36  ;;  %v1911_v49 = vshll.u32 %v4685_v37, 16  ;;  %v1923_v0 = vrot.slane %v1921_v51, 4  ;;  %v5096_v36 = vld [vmem:[%s5262_s29 + $0x48] sm:$0xff]  ;;  %v4690_v51 = vld [vmem:[%s5262_s29 + $0x5c] sm:$0x1] }
  0x82   : > { %v2185_v54 = vunpack.c.l.b16 %v1906_v43 }
  0x83   : > { %v1913_v60 = vrot.slane %v1911_v49, 5  ;;  %v1924_v7 = vor.u32 %v1923_v0, %v1919_v63 }
  0x85   : > { %v1925_v13 = vrot.slane %v1924_v7, 4 }
  0x86   : > { %4731 = vmatmul.msk.bf16.gmra.mxu0 %vm676_vm3, %v2209_v6  ;;  %v1882_v6 = vsel %vm5274_vm2, %v1877_v57, %v1881_v58 }
  0x87   : > { %4488 = vmatmul.msk.bf16.gmra.mxu1 %vm676_vm3, %v5071_v9  ;;  %v1127_v9 = vrot.slane %v5152_v2, 5  ;;  %v2183_v15 = vunpack.c.l.b16 %v1882_v6 }
  0x89   : > { %v1128_v19 = vsel %vm5469_vm6, %v1126_v8, %v1127_v9  ;;  %v1927_v8 = vshll.u32 %v4687_v3, 16  ;;  %v5074_v9 = vld [vmem:[%s5262_s29 + $0x3c] sm:$0xff] }
  0x8a   : > { %v1220_v33 = vunpack.c.l.b16 %v1128_v19  ;;  %v4689_v19 = vld [vmem:[%s5262_s29 + $0x58] sm:$0xf]  ;;  %v4691_v3 = vld [vmem:[%s5262_s29 + $0x60] sm:$0xf] }
  0x8b   : > { %v1929_v14 = vrot.slane %v1927_v8, 5  ;;  %v1945_v44 = vshrl.u32 %v4689_v19, 16 }
  0x8c   : > { %4532 = vmatmul.msk.bf16.gmra.mxu2 %vm676_vm3, %v1245_v25  ;;  %v2182_v25 = vunpack.c.l.b16 %v1872_v5  ;;  %v2212_v5 = vpack.c.b16 %v2185_v54, %v2184_v52 }
  0x8d   : > { %v1930_v24 = vsel %vm5274_vm2, %v1925_v13, %v1929_v14  ;;  %v1947_v49 = vrot.slane %v1945_v44, 4 }
  0x8e   : > { %v2211_v27 = vpack.c.b16 %v2183_v15, %v2182_v25  ;;  %v2187_v43 = vunpack.c.l.b16 %v1930_v24 }
  0x91   : > { %4656 = vmatmul.msk.bf16.gmra.mxu3 %vm676_vm3, %v5093_v29  ;;  %v1219_v29 = vunpack.c.l.b16 %v1125_v18  ;;  %v4688_v18 = vld [vmem:[%s5262_s29 + $0x54] sm:$0xf] }
  0x93   : > { %v1247_v41 = vpack.c.b16 %v1220_v33, %v1219_v29  ;;  %v1935_v29 = vshll.u32 %v4688_v18, 16  ;;  %v1941_v33 = vshll.u32 %v4689_v19, 16 }
  0x96   : > { %4732 = vmatmul.msk.bf16.gmra.mxu0 %vm676_vm3, %v2210_v61  ;;  %v1131_v61 = vrot.slane %v5302_v16, 5  ;;  %v1910_v16 = vrot.slane %v1908_v48, 4  ;;  %v1943_v48 = vrot.slane %v1941_v33, 5  ;;  %v1148_v33 = vrot.slane %v5409_v28, 5 }
  0x97   : > { %4489 = vmatmul.msk.bf16.gmra.mxu1 %vm676_vm3, %v5072_v45  ;;  %v1048_v45 = vld [vmem:[%s5262_s29 + $0x3c] sm:$0xe] }
  0x98   : > { %v4507_v57 = vrot.slane %v1048_v45, 9  ;;  %v1133_v58 = vrot.slane %v1131_v61, 4  ;;  %v1937_v45 = vrot.slane %v1935_v29, 5 }
  0x9a   : > { %v1132_v62 = vsel %vm5469_vm6, %v4507_v57, %v1131_v61  ;;  %v5075_v57 = vld [vmem:[%s5262_s29 + $0x48] sm:$0xff] }
  0x9c   : > { %v5553_v46 = vpop.f32.mrf.mxu1  ;;  %4533 = vmatmul.msk.bf16.gmra.mxu2 %vm676_vm3, %v1246_v59  ;;  %v1134_v59 = vrot.slane %v5307_v21, 5  ;;  %v1914_v21 = vor.u32 %v1913_v60, %v1910_v16  ;;  %v1951_v16 = vshll.u32 %v4690_v51, 16  ;;  %v5076_v51 = vld [vmem:[%s5262_s29 + $0x54] sm:$0xff] }
  0x9e   : > { %v1135_v4 = vsel %vm5469_vm6, %v1133_v58, %v1134_v59  ;;  %v1915_v12 = vrot.slane %v1914_v21, 4  ;;  %v1948_v59 = vor.u32 %v1947_v49, %v1943_v48  ;;  %v1953_v7 = vrot.slane %v1951_v16, 5 }
  0x9f   : > { %v1222_v11 = vunpack.c.l.b16 %v1135_v4 }
  0xa0   : > { %v1920_v23 = vsel %vm5274_vm2, %v1915_v12, %v1919_v63  ;;  %v1949_v21 = vrot.slane %v1948_v59, 4  ;;  %v1145_v12 = vrot.slane %v5404_v22, 5 }
  0xa1   : > { %4657 = vmatmul.msk.bf16.gmra.mxu3 %vm676_vm3, %v5094_v10  ;;  %v1221_v10 = vunpack.c.l.b16 %v1132_v62  ;;  %v2186_v42 = vunpack.c.l.b16 %v1920_v23  ;;  %v4692_v62 = vld [vmem:[%s5262_s29 + $0x64] sm:$0xf] }
  0xa2   : > { %v1969_v13 = vshrl.u32 %v4692_v62, 16  ;;  %v1954_v19 = vsel %vm5274_vm2, %v1949_v21, %v1953_v7  ;;  %v1147_v29 = vrot.slane %v1145_v12, 4 }
  0xa3   : > { %v1248_v15 = vpack.c.b16 %v1222_v11, %v1221_v10  ;;  %v2213_v54 = vpack.c.b16 %v2187_v43, %v2186_v42  ;;  %v1959_v10 = vshll.u32 %v4691_v3, 16  ;;  %v1965_v11 = vshll.u32 %v4692_v62, 16  ;;  %v4694_v62 = vld [vmem:[%s5262_s29 + $0x6c] sm:$0xf] }
  0xa4   : > { %v5569_v31 = vpop.f32.mrf.mxu1  ;;  %v1971_v44 = vrot.slane %v1969_v13, 4  ;;  %v1051_v13 = vld [vmem:[%s5262_s29 + $0x60] sm:$0xe] }
  0xa5   : > { %v1961_v24 = vrot.slane %v1959_v10, 5  ;;  %v5153_v10 = vld [vmem:[%s5262_s29 + $0x64] sm:$0xf] }
  0xa6   : > { %v5571_v34 = vpop.f32.mrf.mxu2  ;;  %4733 = vmatmul.msk.bf16.gmra.mxu0 %vm676_vm3, %v2211_v27  ;;  %v1049_v27 = vld [vmem:[%s5262_s29 + $0x48] sm:$0xe] }
  0xa7   : > { %4490 = vmatmul.msk.bf16.gmra.mxu1 %vm676_vm3, %v5073_v30  ;;  %v1932_v30 = vshrl.u32 %v4688_v18, 16  ;;  %v4508_v40 = vrot.slane %v1049_v27, 9  ;;  %v1967_v27 = vrot.slane %v1965_v11, 5  ;;  %v1152_v11 = vrot.slane %v5153_v10, 5 }
  0xa9   : > { %v5577_v39 = vpop.f32.mrf.mxu0  ;;  %v1934_v61 = vrot.slane %v1932_v30, 4  ;;  %v5097_v30 = vld [vmem:[%s5262_s29 + $0x54] sm:$0xff] }
  0xaa   : > { %v5583_v47 = vpop.f32.mrf.mxu3 }
  0xab   : > { %v1938_v58 = vor.u32 %v1937_v45, %v1934_v61  ;;  %v1149_v45 = vsel %vm5469_vm6, %v1147_v29, %v1148_v33  ;;  %v5098_v29 = vld [vmem:[%s5262_s29 + $0x60] sm:$0xff] }
  0xac   : > { %4534 = vmatmul.msk.bf16.gmra.mxu2 %vm676_vm3, %v1247_v41  ;;  %v1141_v41 = vrot.slane %v5363_v56, 5 }
  0xae   : > { %v5589_v55 = vpop.f32.mrf.mxu1  ;;  %v5592_v1 = vpop.f32.mrf.mxu2  ;;  %v1142_v56 = vsel %vm5469_vm6, %v1140_v38, %v1141_v41  ;;  %v4693_v38 = vld [vmem:[%s5262_s29 + $0x68] sm:$0x1] }
  0xaf   : > { %v1224_v63 = vunpack.c.l.b16 %v1142_v56  ;;  %v1975_v49 = vshll.u32 %v4693_v38, 16 }
  0xb1   : > { %4658 = vmatmul.msk.bf16.gmra.mxu3 %vm676_vm3, %v5095_v53  ;;  %v5600_v6 = vpop.f32.mrf.mxu0  ;;  %v1139_v53 = vsel %vm5469_vm6, %v4508_v40, %v1138_v20  ;;  %v2189_v40 = vunpack.c.l.b16 %v1954_v19 }
  0xb2   : > { %v5602_v2 = vpop.f32.mrf.mxu3  ;;  %v1223_v60 = vunpack.c.l.b16 %v1139_v53  ;;  %v5129_v53 = vld [vmem:[%s6668_s1 + $0x60] sm:$0xff] }
  0xb3   : > { %3000 = vmatpush.bf16.msra.mxu2 %v5129_v53 }
  0xb4   : > { %v1249_v8 = vpack.c.b16 %v1224_v63, %v1223_v60  ;;  %v1977_v60 = vrot.slane %v1975_v49, 5  ;;  %v5131_v63 = vld [vmem:[%s6668_s1 + $0x70] sm:$0xff] }
  0xb5   : > { %3666 = vmatpush.bf16.msra.mxu3 %v5131_v63  ;;  %v4696_v49 = vld [vmem:[%s5262_s29 + $0x74] sm:$0x1] }
  0xb6   : > { %4734 = vmatmul.msk.bf16.gmra.mxu0 %vm676_vm3, %v2212_v5  ;;  %v5606_v25 = vpop.f32.mrf.mxu1  ;;  %v1939_v5 = vrot.slane %v1938_v58, 4 }
  0xb7   : > { %4491 = vmatmul.msk.bf16.gmra.mxu1 %vm676_vm3, %v5074_v9  ;;  %v1956_v9 = vshrl.u32 %v4691_v3, 16  ;;  %v5111_v3 = vld [vmem:[%s6668_s1 + $0x50] sm:$0xff] }
  0xb8   : > { %v1944_v18 = vsel %vm5274_vm2, %v1939_v5, %v1943_v48  ;;  %v1972_v48 = vor.u32 %v1971_v44, %v1967_v27  ;;  %v4695_v5 = vld [vmem:[%s5262_s29 + $0x70] sm:$0xf]  ;;  %2701 = vmatpush.bf16.msra.mxu1 %v5111_v3 }
  0xb9   : > { %v5609_v17 = vpop.f32.mrf.mxu2  ;;  %v1958_v23 = vrot.slane %v1956_v9, 4  ;;  %v1989_v19 = vshll.u32 %v4695_v5, 16 }
  0xba   : > { %v1973_v16 = vrot.slane %v1972_v48, 4 }
  0xbb   : > { %v1962_v43 = vor.u32 %v1961_v24, %v1958_v23  ;;  %v1993_v23 = vshrl.u32 %v4695_v5, 16  ;;  %v5133_v24 = vld [vmem:[%s6668_s1 + $0x80] sm:$0xff] }
  0xbc   : > { %4535 = vmatmul.msk.bf16.gmra.mxu2 %vm676_vm3, %v1248_v15  ;;  %v1050_v15 = vld [vmem:[%s5262_s29 + $0x54] sm:$0xe]  ;;  %v1978_v9 = vsel %vm5274_vm2, %v1973_v16, %v1977_v60  ;;  %4076 = vmatpush.bf16.msra.mxu0 %v5133_v24  ;;  %v5077_v60 = vld [vmem:[%s5262_s29 + $0x60] sm:$0xff] }
  0xbd   : > { %v5619_v35 = vpop.f32.mrf.mxu0  ;;  %v4509_v22 = vrot.slane %v1050_v15, 9  ;;  %v1963_v59 = vrot.slane %v1962_v43, 4  ;;  %v1980_v15 = vshrl.u32 %v4694_v62, 16  ;;  %v2191_v44 = vunpack.c.l.b16 %v1978_v9 }
  0xbe   : > { %v5623_v37 = vpop.f32.mrf.mxu3 }
  0xbf   : > { %v1146_v61 = vsel %vm5469_vm6, %v4509_v22, %v1145_v12  ;;  %v1982_v38 = vrot.slane %v1980_v15, 4  ;;  %v4697_v15 = vld [vmem:[%s5262_s29 + $0x78] sm:$0xf] }
  0xc0   : > { %v5626_v50 = vpop.f32.mrf.mxu1 }
  0xc1   : > { %4659 = vmatmul.msk.bf16.gmra.mxu3 %vm676_vm3, %v5096_v36  ;;  %v5630_v52 = vpop.f32.mrf.mxu2  ;;  %v2188_v36 = vunpack.c.l.b16 %v1944_v18  ;;  %v1983_v18 = vshll.u32 %v4694_v62, 16 }
  0xc3   : > { %v2214_v28 = vpack.c.b16 %v2189_v40, %v2188_v36  ;;  %v4510_v36 = vrot.slane %v1051_v13, 9  ;;  %v1154_v40 = vrot.slane %v1152_v11, 4  ;;  %v1985_v43 = vrot.slane %v1983_v18, 5  ;;  %v4698_v18 = vld [vmem:[%s5262_s29 + $0x7c] sm:$0xf] }
  0xc5   : > { %v5637_v0 = vpop.f32.mrf.mxu0 }
  0xc6   : > { %4735 = vmatmul.msk.bf16.gmra.mxu0 %vm676_vm3, %v2213_v54  ;;  %v5642_v4 = vpop.f32.mrf.mxu3  ;;  %v1225_v54 = vunpack.c.l.b16 %v1146_v61  ;;  %v1991_v61 = vrot.slane %v1989_v19, 5  ;;  %v5155_v19 = vld [vmem:[%s5262_s29 + $0x70] sm:$0xf] }
  0xc7   : > { %4492 = vmatmul.msk.bf16.gmra.mxu1 %vm676_vm3, %v5075_v57  ;;  %v1226_v57 = vunpack.c.l.b16 %v1149_v45  ;;  %v1995_v45 = vrot.slane %v1993_v23, 4  ;;  %v1159_v23 = vrot.slane %v5155_v19, 5 }
  0xc8   : > { %v5646_v14 = vpop.f32.mrf.mxu1 }
  0xc9   : > { %v1250_v21 = vpack.c.b16 %v1226_v57, %v1225_v54  ;;  %v1986_v54 = vor.u32 %v1985_v43, %v1982_v38  ;;  %v1996_v57 = vor.u32 %v1995_v45, %v1991_v61  ;;  %v5156_v43 = vld [vmem:[%s5262_s29 + $0x74] sm:$0x1] }
  0xca   : > { %v1162_v45 = vrot.slane %v5156_v43, 5 }
  0xcb   : > { %v1997_v9 = vrot.slane %v1996_v57, 4 }
  0xcc   : > { %v5653_v20 = vpop.f32.mrf.mxu2  ;;  %4536 = vmatmul.msk.bf16.gmra.mxu2 %vm676_vm3, %v1249_v8  ;;  %v1968_v8 = vsel %vm5274_vm2, %v1963_v59, %v1967_v27  ;;  %v1999_v59 = vshll.u32 %v4696_v49, 16  ;;  %v5099_v49 = vld [vmem:[%s5262_s29 + $0x6c] sm:$0xff] }
  0xcd   : > { %v2190_v33 = vunpack.c.l.b16 %v1968_v8  ;;  %v1987_v8 = vrot.slane %v1986_v54, 4 }
  0xce   : > { %v2001_v10 = vrot.slane %v1999_v59, 5 }
  0xcf   : > { %v5659_v41 = vpop.f32.mrf.mxu0  ;;  %v2215_v53 = vpack.c.b16 %v2191_v44, %v2190_v33  ;;  %v1992_v24 = vsel %vm5274_vm2, %v1987_v8, %v1991_v61  ;;  %v2007_v33 = vshll.u32 %v4697_v15, 16  ;;  %v2013_v44 = vshll.u32 %v4698_v18, 16  ;;  %v4699_v8 = vld [vmem:[%s5262_s29 + $0x80] sm:$0x1] }
  0xd0   : > { %v5661_v42 = vpop.f32.mrf.mxu3 }
  0xd1   : > { %4660 = vmatmul.msk.bf16.gmra.mxu3 %vm676_vm3, %v5097_v30  ;;  %v5154_v30 = vld [vmem:[%s5262_s29 + $0x68] sm:$0x1] }
  0xd2   : > { %v1155_v22 = vrot.slane %v5154_v30, 5  ;;  %v1052_v30 = vld [vmem:[%s5262_s29 + $0x6c] sm:$0xe] }
  0xd4   : > { %v5672_v56 = vpop.f32.mrf.mxu1  ;;  %v5674_v58 = vpop.f32.mrf.mxu2 }
  0xd6   : > { %4736 = vmatmul.msk.bf16.gmra.mxu0 %vm676_vm3, %v2214_v28  ;;  %v1153_v28 = vsel %vm5469_vm6, %v4510_v36, %v1152_v11  ;;  %v2017_v36 = vshrl.u32 %v4698_v18, 16 }
  0xd7   : > { %4493 = vmatmul.msk.bf16.gmra.mxu1 %vm676_vm3, %v5076_v51  ;;  %v5686_v7 = vpop.f32.mrf.mxu0  ;;  %v1156_v51 = vsel %vm5469_vm6, %v1154_v40, %v1155_v22  ;;  %v1227_v62 = vunpack.c.l.b16 %v1153_v28  ;;  %v4511_v28 = vrot.slane %v1052_v30, 9 }
  0xd8   : > { %v5693_v12 = vpop.f32.mrf.mxu3  ;;  %v1228_v5 = vunpack.c.l.b16 %v1156_v51  ;;  %v1161_v51 = vrot.slane %v1159_v23, 4 }
  0xda   : > { %v1251_v13 = vpack.c.b16 %v1228_v5, %v1227_v62  ;;  %v2019_v62 = vrot.slane %v2017_v36, 4 }
  0xdc   : > { %4537 = vmatmul.msk.bf16.gmra.mxu2 %vm676_vm3, %v1250_v21  ;;  %v5701_v27 = vpop.f32.mrf.mxu1 }
  0xdf   : > { %v5704_v48 = vpop.f32.mrf.mxu2 }
  0xe1   : > { %4661 = vmatmul.msk.bf16.gmra.mxu3 %vm676_vm3, %v5098_v29  ;;  %v2004_v29 = vshrl.u32 %v4697_v15, 16  ;;  %v5078_v15 = vld [vmem:[%s5262_s29 + $0x6c] sm:$0xff] }
  0xe3   : > { %v5712_v16 = vpop.f32.mrf.mxu0  ;;  %v2006_v59 = vrot.slane %v2004_v29, 4 }
  0xe4   : > { %v5715_v63 = vpop.f32.mrf.mxu3  ;;  %v963_v3 = vpop.f32.mrf.mxu1 }
  0xe5   : > { %v964_v21 = vadd.f32 %v963_v3, %v5577_v39  ;;  %v2002_v39 = vsel %vm5274_vm2, %v1997_v9, %v2001_v10  ;;  %v2015_v3 = vrot.slane %v2013_v44, 5  ;;  %v1160_v9 = vsel %vm5469_vm6, %v4511_v28, %v1159_v23 }
  0xe6   : > { %4737 = vmatmul.msk.bf16.gmra.mxu0 %vm676_vm3, %v2215_v53  ;;  %v2192_v53 = vunpack.c.l.b16 %v1992_v24  ;;  %v2193_v54 = vunpack.c.l.b16 %v2002_v39  ;;  %v2023_v24 = vshll.u32 %v4699_v8, 16 }
  0xe7   : > { %v5719_v11 = vpop.f32.mrf.mxu2  ;;  %4494 = vmatmul.msk.bf16.gmra.mxu1 %vm676_vm3, %v5077_v60  ;;  %v2009_v60 = vrot.slane %v2007_v33, 5  ;;  %v2020_v19 = vor.u32 %v2019_v62, %v2015_v3 }
  0xe8   : > { %v2216_v10 = vpack.c.b16 %v2193_v54, %v2192_v53  ;;  %v2025_v43 = vrot.slane %v2023_v24, 5  ;;  %v4701_v53 = vld [vmem:[%s5262_s29 + $0x88] sm:$0xf]  ;;  %v5157_v54 = vld [vmem:[%s5262_s29 + $0x7c] sm:$0xf] }
  0xe9   : > { %v2010_v18 = vor.u32 %v2009_v60, %v2006_v59  ;;  %v1053_v59 = vld [vmem:[%s5262_s29 + $0x78] sm:$0xe] }
  0xeb   : > { %v5730_v22 = vpop.f32.mrf.mxu0  ;;  %v2011_v36 = vrot.slane %v2010_v18, 4 }
  0xec   : > { %v5732_v40 = vpop.f32.mrf.mxu3  ;;  %4538 = vmatmul.msk.bf16.gmra.mxu2 %vm676_vm3, %v1251_v13  ;;  %v965_v38 = vpop.f32.mrf.mxu1 }
  0xed   : > { %v966_v61 = vadd.f32 %v965_v38, %v5600_v6  ;;  %v1163_v6 = vsel %vm5469_vm6, %v1161_v51, %v1162_v45  ;;  %v2021_v38 = vrot.slane %v2020_v19, 4  ;;  %v4700_v45 = vld [vmem:[%s5262_s29 + $0x84] sm:$0xf]  ;;  %v5100_v19 = vld [vmem:[%s5262_s29 + $0x78] sm:$0xff] }
  0xee   : > { %v1230_v29 = vunpack.c.l.b16 %v1163_v6  ;;  %v2031_v60 = vshll.u32 %v4700_v45, 16  ;;  %v2041_v6 = vshrl.u32 %v4701_v53, 16 }
  0xef   : > { %v1328_v57 = vpop.f32.mrf.mxu2  ;;  %v2026_v8 = vsel %vm5274_vm2, %v2021_v38, %v2025_v43 }
  0xf0   : > { %v1408_v5 = vadd.f32 %v1328_v57, %v964_v21  ;;  %v1229_v21 = vunpack.c.l.b16 %v1160_v9  ;;  %v1166_v57 = vrot.slane %v5157_v54, 5  ;;  %v2037_v9 = vshll.u32 %v4701_v53, 16 }
  0xf1   : > { %4662 = vmatmul.msk.bf16.gmra.mxu3 %vm676_vm3, %v5099_v49  ;;  %v2043_v38 = vrot.slane %v2041_v6, 4 }
  0xf2   : > { %v1252_v51 = vpack.c.b16 %v1230_v29, %v1229_v21 }
  0xf3   : > { %v2293_v13 = vpop.f32.mrf.mxu0 }
  0xf4   : > { %v1627_v39 = vpop.f32.mrf.mxu3  ;;  %v968_v30 = vpop.f32.mrf.mxu1 }
  0xf5   : > { %v1707_v33 = vadd.f32 %v1627_v39, %v1408_v5  ;;  %v969_v23 = vadd.f32 %v968_v30, %v5619_v35  ;;  %v2028_v35 = vshrl.u32 %v4700_v45, 16  ;;  %v2016_v5 = vsel %vm5274_vm2, %v2011_v36, %v2015_v3 }
  0xf6   : > { %4738 = vmatmul.msk.bf16.gmra.mxu0 %vm676_vm3, %v2216_v10  ;;  %v5158_v10 = vld [vmem:[%s5262_s29 + $0x80] sm:$0x1]  ;;  %v4512_v39 = vrot.slane %v1053_v59, 9  ;;  %v1168_v30 = vrot.slane %v1166_v57, 4  ;;  %v2194_v21 = vunpack.c.l.b16 %v2016_v5  ;;  %v2195_v3 = vunpack.c.l.b16 %v2026_v8 }
  0xf7   : > { %v1330_v44 = vpop.f32.mrf.mxu2  ;;  %4495 = vmatmul.msk.bf16.gmra.mxu1 %vm676_vm3, %v5078_v15  ;;  %v5749_v49 = vadd.f32 %v2293_v13, %v1707_v33  ;;  %v1169_v13 = vrot.slane %v5158_v10, 5  ;;  %v2030_v29 = vrot.slane %v2028_v35, 4  ;;  %v2033_v33 = vrot.slane %v2031_v60, 5  ;;  %v5079_v35 = vld [vmem:[%s5262_s29 + $0x78] sm:$0xff] }
  0xf8   : > { %v1409_v28 = vadd.f32 %v1330_v44, %v966_v61  ;;  %v2039_v36 = vrot.slane %v2037_v9, 5  ;;  %v2217_v53 = vpack.c.b16 %v2195_v3, %v2194_v21  ;;  %v4704_v21 = vld [vmem:[%s5262_s29 + $0x94] sm:$0xf]  ;;  %v5159_v3 = vld [vmem:[%s5262_s29 + $0x88] sm:$0xf] }
  0xf9   : > { %v2034_v54 = vor.u32 %v2033_v33, %v2030_v29  ;;  %v1173_v29 = vrot.slane %v5159_v3, 5  ;;  %v1054_v33 = vld [vmem:[%s5262_s29 + $0x84] sm:$0xe] }
  0xfa   : > { %v2044_v60 = vor.u32 %v2043_v38, %v2039_v36 }
  0xfb   : > { %v2295_v62 = vpop.f32.mrf.mxu0  ;;  %v2035_v10 = vrot.slane %v2034_v54, 4 }
  0xfc   : > { %v1629_v61 = vpop.f32.mrf.mxu3  ;;  %4539 = vmatmul.msk.bf16.gmra.mxu2 %vm676_vm3, %v1252_v51  ;;  %v970_v15 = vpop.f32.mrf.mxu1  ;;  %v4702_v51 = vld [vmem:[%s5262_s29 + $0x8c] sm:$0x1] }
  0xfd   : > { %v1708_v18 = vadd.f32 %v1629_v61, %v1409_v28  ;;  %v971_v24 = vadd.f32 %v970_v15, %v5637_v0  ;;  %v1167_v28 = vsel %vm5469_vm6, %v4512_v39, %v1166_v57  ;;  %v1170_v0 = vsel %vm5469_vm6, %v1168_v30, %v1169_v13 }
  0xfe   : > { %v2047_v5 = vshll.u32 %v4702_v51, 16  ;;  %v1232_v9 = vunpack.c.l.b16 %v1170_v0  ;;  %v2045_v61 = vrot.slane %v2044_v60, 4  ;;  %v2065_v0 = vshrl.u32 %v4704_v21, 16  ;;  %v5101_v60 = vld [vmem:[%s5262_s29 + $0x84] sm:$0xff] }
  0xff   : > { %v1333_v44 = vpop.f32.mrf.mxu2  ;;  %v5762_v43 = vadd.f32 %v2295_v62, %v1708_v18  ;;  %v4703_v18 = vld [vmem:[%s5262_s29 + $0x90] sm:$0xf] }
 0x100   : > { %v1410_v45 = vadd.f32 %v1333_v44, %v969_v23  ;;  %v1231_v23 = vunpack.c.l.b16 %v1167_v28  ;;  %v2049_v15 = vrot.slane %v2047_v5, 5  ;;  %v2052_v44 = vshrl.u32 %v4703_v18, 16 }
 0x101   : > { %4663 = vmatmul.msk.bf16.gmra.mxu3 %vm676_vm3, %v5100_v19  ;;  %v2055_v51 = vshll.u32 %v4703_v18, 16  ;;  %v2061_v28 = vshll.u32 %v4704_v21, 16  ;;  %v4513_v5 = vrot.slane %v1054_v33, 9 }
 0x102   : > { %v1253_v30 = vpack.c.b16 %v1232_v9, %v1231_v23  ;;  %v2054_v9 = vrot.slane %v2052_v44, 4 }
 0x103   : > { %v2298_v59 = vpop.f32.mrf.mxu0 }
 0x104   : > { %v1632_v8 = vpop.f32.mrf.mxu3  ;;  %v973_v62 = vpop.f32.mrf.mxu1 }
 0x105   : > { %v1709_v6 = vadd.f32 %v1632_v8, %v1410_v45  ;;  %v974_v57 = vadd.f32 %v973_v62, %v5659_v41  ;;  %v2040_v41 = vsel %vm5274_vm2, %v2035_v10, %v2039_v36  ;;  %v2050_v45 = vsel %vm5274_vm2, %v2045_v61, %v2049_v15 }
 0x106   : > { %4739 = vmatmul.msk.bf16.gmra.mxu0 %vm676_vm3, %v2217_v53  ;;  %v5160_v53 = vld [vmem:[%s5262_s29 + $0x8c] sm:$0x1]  ;;  %v1175_v8 = vrot.slane %v1173_v29, 4  ;;  %v2196_v62 = vunpack.c.l.b16 %v2040_v41  ;;  %v2197_v23 = vunpack.c.l.b16 %v2050_v45  ;;  %v2057_v10 = vrot.slane %v2055_v51, 5  ;;  %v5080_v41 = vld [vmem:[%s5262_s29 + $0x84] sm:$0xff] }
 0x107   : > { %v1335_v13 = vpop.f32.mrf.mxu2  ;;  %4496 = vmatmul.msk.bf16.gmra.mxu1 %vm676_vm3, %v5079_v35  ;;  %v5775_v19 = vadd.f32 %v2298_v59, %v1709_v6  ;;  %v1176_v54 = vrot.slane %v5160_v53, 5  ;;  %v2067_v61 = vrot.slane %v2065_v0, 4 }
 0x108   : > { %v1411_v39 = vadd.f32 %v1335_v13, %v971_v24  ;;  %v2063_v13 = vrot.slane %v2061_v28, 5  ;;  %v2218_v21 = vpack.c.b16 %v2197_v23, %v2196_v62  ;;  %v2058_v33 = vor.u32 %v2057_v10, %v2054_v9  ;;  %v4707_v62 = vld [vmem:[%s5262_s29 + $0xa0] sm:$0xf]  ;;  %v1055_v10 = vld [vmem:[%s5262_s29 + $0x90] sm:$0xe] }
 0x10a   : > { %v2068_v44 = vor.u32 %v2067_v61, %v2063_v13 }
 0x10b   : > { %v2300_v38 = vpop.f32.mrf.mxu0 }
 0x10c   : > { %v1634_v24 = vpop.f32.mrf.mxu3  ;;  %4540 = vmatmul.msk.bf16.gmra.mxu2 %vm676_vm3, %v1253_v30  ;;  %v975_v59 = vpop.f32.mrf.mxu1  ;;  %v4705_v30 = vld [vmem:[%s5262_s29 + $0x98] sm:$0x1] }
 0x10d   : > { %v1710_v35 = vadd.f32 %v1634_v24, %v1411_v39  ;;  %v976_v36 = vadd.f32 %v975_v59, %v5686_v7  ;;  %v1174_v7 = vsel %vm5469_vm6, %v4513_v5, %v1173_v29  ;;  %v1177_v39 = vsel %vm5469_vm6, %v1175_v8, %v1176_v54  ;;  %v4706_v29 = vld [vmem:[%s5262_s29 + $0x9c] sm:$0xf] }
 0x10e   : > { %v2071_v45 = vshll.u32 %v4705_v30, 16  ;;  %v1234_v28 = vunpack.c.l.b16 %v1177_v39  ;;  %v2059_v24 = vrot.slane %v2058_v33, 4  ;;  %v2069_v59 = vrot.slane %v2068_v44, 4 }
 0x10f   : > { %v1338_v6 = vpop.f32.mrf.mxu2  ;;  %v5788_v15 = vadd.f32 %v2300_v38, %v1710_v35  ;;  %v2076_v23 = vshrl.u32 %v4706_v29, 16  ;;  %v2079_v9 = vshll.u32 %v4706_v29, 16  ;;  %v2089_v39 = vshrl.u32 %v4707_v62, 16 }
 0x110   : > { %v1412_v18 = vadd.f32 %v1338_v6, %v974_v57  ;;  %v1233_v57 = vunpack.c.l.b16 %v1174_v7  ;;  %v2073_v35 = vrot.slane %v2071_v45, 5  ;;  %v5161_v6 = vld [vmem:[%s5262_s29 + $0x94] sm:$0xf]  ;;  %v2085_v7 = vshll.u32 %v4707_v62, 16 }
 0x111   : > { %4664 = vmatmul.msk.bf16.gmra.mxu3 %vm676_vm3, %v5101_v60  ;;  %v2078_v33 = vrot.slane %v2076_v23, 4  ;;  %v2081_v44 = vrot.slane %v2079_v9, 5 }
 0x112   : > { %v1254_v8 = vpack.c.b16 %v1234_v28, %v1233_v57  ;;  %v2074_v30 = vsel %vm5274_vm2, %v2069_v59, %v2073_v35  ;;  %v4514_v57 = vrot.slane %v1055_v10, 9 }
 0x113   : > { %v2303_v3 = vpop.f32.mrf.mxu0  ;;  %v2082_v62 = vor.u32 %v2081_v44, %v2078_v33  ;;  %v4710_v33 = vld [vmem:[%s5262_s29 + $0xac] sm:$0xf] }
 0x114   : > { %v1637_v51 = vpop.f32.mrf.mxu3  ;;  %v978_v38 = vpop.f32.mrf.mxu1 }
 0x115   : > { %v1711_v0 = vadd.f32 %v1637_v51, %v1412_v18  ;;  %v979_v53 = vadd.f32 %v978_v38, %v5712_v16  ;;  %v1180_v16 = vrot.slane %v5161_v6, 5  ;;  %v2064_v18 = vsel %vm5274_vm2, %v2059_v24, %v2063_v13  ;;  %v5102_v51 = vld [vmem:[%s5262_s29 + $0x90] sm:$0xff] }
 0x116   : > { %4740 = vmatmul.msk.bf16.gmra.mxu0 %vm676_vm3, %v2218_v21  ;;  %v5162_v21 = vld [vmem:[%s5262_s29 + $0x98] sm:$0x1]  ;;  %v2198_v28 = vunpack.c.l.b16 %v2064_v18  ;;  %v2091_v24 = vrot.slane %v2089_v39, 4  ;;  %v5081_v6 = vld [vmem:[%s5262_s29 + $0x90] sm:$0xff] }
 0x117   : > { %v1340_v54 = vpop.f32.mrf.mxu2  ;;  %4497 = vmatmul.msk.bf16.gmra.mxu1 %vm676_vm3, %v5080_v41  ;;  %v5801_v60 = vadd.f32 %v2303_v3, %v1711_v0  ;;  %v1183_v3 = vrot.slane %v5162_v21, 5  ;;  %v1182_v13 = vrot.slane %v1180_v16, 4  ;;  %v2199_v0 = vunpack.c.l.b16 %v2074_v30 }
 0x118   : > { %v1413_v5 = vadd.f32 %v1340_v54, %v976_v36  ;;  %v2087_v54 = vrot.slane %v2085_v7, 5  ;;  %v2083_v21 = vrot.slane %v2082_v62, 4  ;;  %v5164_v62 = vld [vmem:[%s5262_s29 + $0xa4] sm:$0x1] }
 0x119   : > { %v2219_v23 = vpack.c.b16 %v2199_v0, %v2198_v28  ;;  %v5163_v28 = vld [vmem:[%s5262_s29 + $0xa0] sm:$0xf] }
 0x11a   : > { %v2092_v10 = vor.u32 %v2091_v24, %v2087_v54  ;;  %v1187_v0 = vrot.slane %v5163_v28, 5  ;;  %v1056_v24 = vld [vmem:[%s5262_s29 + $0x9c] sm:$0xe] }
 0x11b   : > { %v2305_v61 = vpop.f32.mrf.mxu0 }
 0x11c   : > { %v1639_v36 = vpop.f32.mrf.mxu3  ;;  %4541 = vmatmul.msk.bf16.gmra.mxu2 %vm676_vm3, %v1254_v8  ;;  %v980_v41 = vpop.f32.mrf.mxu1  ;;  %v4708_v8 = vld [vmem:[%s5262_s29 + $0xa4] sm:$0x1] }
 0x11d   : > { %v1712_v45 = vadd.f32 %v1639_v36, %v1413_v5  ;;  %v981_v38 = vadd.f32 %v980_v41, %v5730_v22  ;;  %v1181_v5 = vsel %vm5469_vm6, %v4514_v57, %v1180_v16  ;;  %v1184_v22 = vsel %vm5469_vm6, %v1182_v13, %v1183_v3  ;;  %v4709_v36 = vld [vmem:[%s5262_s29 + $0xa8] sm:$0xf] }
 0x11e   : > { %v2095_v18 = vshll.u32 %v4708_v8, 16  ;;  %v1236_v7 = vunpack.c.l.b16 %v1184_v22  ;;  %v2093_v3 = vrot.slane %v2092_v10, 4  ;;  %v2100_v57 = vshrl.u32 %v4709_v36, 16 }
 0x11f   : > { %v1343_v29 = vpop.f32.mrf.mxu2  ;;  %v5814_v59 = vadd.f32 %v2305_v61, %v1712_v45  ;;  %v2088_v13 = vsel %vm5274_vm2, %v2083_v21, %v2087_v54  ;;  %v2113_v8 = vshrl.u32 %v4710_v33, 16 }
 0x120   : > { %v1414_v35 = vadd.f32 %v1343_v29, %v979_v53  ;;  %v1235_v53 = vunpack.c.l.b16 %v1181_v5  ;;  %v2097_v41 = vrot.slane %v2095_v18, 5  ;;  %v2103_v29 = vshll.u32 %v4709_v36, 16  ;;  %v5103_v18 = vld [vmem:[%s5262_s29 + $0x9c] sm:$0xff] }
 0x121   : > { %4665 = vmatmul.msk.bf16.gmra.mxu3 %vm676_vm3, %v5102_v51  ;;  %v2102_v54 = vrot.slane %v2100_v57, 4 }
 0x122   : > { %v1255_v51 = vpack.c.b16 %v1236_v7, %v1235_v53  ;;  %v2098_v22 = vsel %vm5274_vm2, %v2093_v3, %v2097_v41  ;;  %v1189_v53 = vrot.slane %v1187_v0, 4  ;;  %v2105_v7 = vrot.slane %v2103_v29, 5  ;;  %v4711_v41 = vld [vmem:[%s5262_s29 + $0xb0] sm:$0x1] }
 0x123   : > { %v2308_v9 = vpop.f32.mrf.mxu0  ;;  %v2201_v21 = vunpack.c.l.b16 %v2098_v22 }
 0x124   : > { %v1642_v61 = vpop.f32.mrf.mxu3  ;;  %v983_v30 = vpop.f32.mrf.mxu1  ;;  %v2106_v57 = vor.u32 %v2105_v7, %v2102_v54 }
 0x125   : > { %v1713_v39 = vadd.f32 %v1642_v61, %v1414_v35  ;;  %v2109_v35 = vshll.u32 %v4710_v33, 16  ;;  %v4515_v61 = vrot.slane %v1056_v24, 9  ;;  %v5082_v24 = vld [vmem:[%s5262_s29 + $0x9c] sm:$0xff] }
 0x126   : > { %4741 = vmatmul.msk.bf16.gmra.mxu0 %vm676_vm3, %v2219_v23  ;;  %v1190_v23 = vrot.slane %v5164_v62, 5 }
 0x127   : > { %v1345_v16 = vpop.f32.mrf.mxu2  ;;  %4498 = vmatmul.msk.bf16.gmra.mxu1 %vm676_vm3, %v5081_v6  ;;  %v5827_v44 = vadd.f32 %v2308_v9, %v1713_v39  ;;  %v2200_v9 = vunpack.c.l.b16 %v2088_v13  ;;  %v984_v39 = vadd.f32 %v983_v30, %v5553_v46  ;;  %v2111_v36 = vrot.slane %v2109_v35, 5 }
 0x128   : > { %v1415_v45 = vadd.f32 %v1345_v16, %v981_v38  ;;  %v2115_v16 = vrot.slane %v2113_v8, 4  ;;  %v2119_v13 = vshll.u32 %v4711_v41, 16 }
 0x129   : > { %v2220_v46 = vpack.c.b16 %v2201_v21, %v2200_v9  ;;  %v4712_v9 = vld [vmem:[%s5262_s29 + $0xb4] sm:$0xf] }
 0x12a   : > { %v2116_v30 = vor.u32 %v2115_v16, %v2111_v36  ;;  %v2121_v54 = vrot.slane %v2119_v13, 5  ;;  %v2127_v41 = vshll.u32 %v4712_v9, 16 }
 0x12b   : > { %v2310_v5 = vpop.f32.mrf.mxu0 }
 0x12c   : > { %v1644_v38 = vpop.f32.mrf.mxu3  ;;  %4542 = vmatmul.msk.bf16.gmra.mxu2 %vm676_vm3, %v1255_v51  ;;  %v985_v6 = vpop.f32.mrf.mxu1  ;;  %v1191_v51 = vsel %vm5469_vm6, %v1189_v53, %v1190_v23  ;;  %v2117_v23 = vrot.slane %v2116_v30, 4 }
 0x12d   : > { %v1714_v10 = vadd.f32 %v1644_v38, %v1415_v45  ;;  %v1188_v45 = vsel %vm5469_vm6, %v4515_v61, %v1187_v0  ;;  %v1238_v22 = vunpack.c.l.b16 %v1191_v51  ;;  %v2107_v38 = vrot.slane %v2106_v57, 4  ;;  %v5166_v57 = vld [vmem:[%s5262_s29 + $0xb0] sm:$0x1] }
 0x12e   : > { %v986_v0 = vadd.f32 %v985_v6, %v5569_v31  ;;  %v2124_v31 = vshrl.u32 %v4712_v9, 16  ;;  %v2122_v6 = vsel %vm5274_vm2, %v2117_v23, %v2121_v54 }
 0x12f   : > { %v1348_v3 = vpop.f32.mrf.mxu2  ;;  %v5840_v33 = vadd.f32 %v2310_v5, %v1714_v10  ;;  %v1237_v5 = vunpack.c.l.b16 %v1188_v45  ;;  %v2112_v16 = vsel %vm5274_vm2, %v2107_v38, %v2111_v36 }
 0x130   : > { %v1416_v28 = vadd.f32 %v1348_v3, %v984_v39  ;;  %v5165_v39 = vld [vmem:[%s5262_s29 + $0xac] sm:$0xf]  ;;  %v1057_v3 = vld [vmem:[%s5262_s29 + $0xa8] sm:$0xe] }
 0x131   : > { %4666 = vmatmul.msk.bf16.gmra.mxu3 %vm676_vm3, %v5103_v18  ;;  %v4713_v18 = vld [vmem:[%s5262_s29 + $0xb8] sm:$0xf]  ;;  %v1256_v7 = vpack.c.b16 %v1238_v22, %v1237_v5  ;;  %v1194_v21 = vrot.slane %v5165_v39, 5  ;;  %v2202_v5 = vunpack.c.l.b16 %v2112_v16  ;;  %v2203_v22 = vunpack.c.l.b16 %v2122_v6  ;;  %v4714_v39 = vld [vmem:[%s5262_s29 + $0xbc] sm:$0x1] }
 0x132   : > { %v2137_v45 = vshrl.u32 %v4713_v18, 16 }
 0x133   : > { %v2313_v29 = vpop.f32.mrf.mxu0 }
 0x134   : > { %v1647_v35 = vpop.f32.mrf.mxu3  ;;  %v988_v8 = vpop.f32.mrf.mxu1  ;;  %v2139_v54 = vrot.slane %v2137_v45, 4 }
 0x135   : > { %v1715_v62 = vadd.f32 %v1647_v35, %v1416_v28  ;;  %v2133_v28 = vshll.u32 %v4713_v18, 16  ;;  %v5104_v35 = vld [vmem:[%s5262_s29 + $0xa8] sm:$0xff]  ;;  %v989_v38 = vadd.f32 %v988_v8, %v5589_v55  ;;  %v2221_v55 = vpack.c.b16 %v2203_v22, %v2202_v5 }
 0x136   : > { %4742 = vmatmul.msk.bf16.gmra.mxu0 %vm676_vm3, %v2220_v46  ;;  %v1197_v46 = vrot.slane %v5166_v57, 5 }
 0x137   : > { %v1350_v10 = vpop.f32.mrf.mxu2  ;;  %4499 = vmatmul.msk.bf16.gmra.mxu1 %vm676_vm3, %v5082_v24  ;;  %v5853_v61 = vadd.f32 %v2313_v29, %v1715_v62  ;;  %v4516_v29 = vrot.slane %v1057_v3, 9  ;;  %v1196_v24 = vrot.slane %v1194_v21, 4  ;;  %v2126_v62 = vrot.slane %v2124_v31, 4  ;;  %v5083_v31 = vld [vmem:[%s5262_s29 + $0xa8] sm:$0xff] }
 0x138   : > { %v1417_v53 = vadd.f32 %v1350_v10, %v986_v0  ;;  %v2129_v0 = vrot.slane %v2127_v41, 5  ;;  %v5865_v23 = vrot.slane %v2133_v28, 5  ;;  %v2143_v28 = vshll.u32 %v4714_v39, 16 }
 0x13a   : > { %v2130_v8 = vor.u32 %v2129_v0, %v2126_v62  ;;  %v2140_v16 = vor.u32 %v2139_v54, %v5865_v23  ;;  %v2145_v62 = vrot.slane %v2143_v28, 5 }
 0x13b   : > { %v2315_v51 = vpop.f32.mrf.mxu0 }
 0x13c   : > { %v1649_v30 = vpop.f32.mrf.mxu3  ;;  %4543 = vmatmul.msk.bf16.gmra.mxu2 %vm676_vm3, %v1256_v7  ;;  %v990_v13 = vpop.f32.mrf.mxu1  ;;  %v1195_v7 = vsel %vm5469_vm6, %v4516_v29, %v1194_v21  ;;  %v4715_v21 = vld [vmem:[%s5262_s29 + $0xc0] sm:$0xf]  ;;  %v5167_v29 = vld [vmem:[%s5262_s29 + $0x10] sm:$0xf] }
 0x13d   : > { %v1716_v36 = vadd.f32 %v1649_v30, %v1417_v53  ;;  %v1198_v53 = vsel %vm5469_vm6, %v1196_v24, %v1197_v46  ;;  %v1239_v6 = vunpack.c.l.b16 %v1195_v7  ;;  %v4716_v30 = vld [vmem:[%s5262_s29 + $0xc4] sm:$0xf]  ;;  %v2471_v46 = vrot.slane %v5167_v29, 5 }
 0x13e   : > { %v1240_v41 = vunpack.c.l.b16 %v1198_v53  ;;  %v991_v24 = vadd.f32 %v990_v13, %v5606_v25  ;;  %v2151_v0 = vshll.u32 %v4715_v21, 16  ;;  %v5168_v53 = vld [vmem:[%s5262_s29 + $0xb8] sm:$0xf]  ;;  %v1058_v13 = vld [vmem:[%s5262_s29 + $0xb4] sm:$0xe] }
 0x13f   : > { %v1353_v9 = vpop.f32.mrf.mxu2  ;;  %v5867_v10 = vadd.f32 %v2315_v51, %v1716_v36  ;;  %v2131_v36 = vrot.slane %v2130_v8, 4  ;;  %v1201_v39 = vrot.slane %v5168_v53, 5  ;;  %v2473_v8 = vrot.slane %v2471_v46, 4  ;;  %v5105_v53 = vld [vmem:[%s5262_s29 + $0xb4] sm:$0xff] }
 0x140   : > { %v1418_v18 = vadd.f32 %v1353_v9, %v989_v38  ;;  %v1257_v22 = vpack.c.b16 %v1240_v41, %v1239_v6  ;;  %v2148_v38 = vshrl.u32 %v4715_v21, 16  ;;  %v2157_v9 = vshll.u32 %v4716_v30, 16 }
 0x141   : > { %6675 = vst [vmem:[#allocation2_spill] sm:$0xff] %v5867_v10  ;;  %4667 = vmatmul.msk.bf16.gmra.mxu3 %vm676_vm3, %v5104_v35  ;;  %v2141_v35 = vrot.slane %v2140_v16, 4  ;;  %v5170_v16 = vld [vmem:[%s5262_s29 + $0x14] sm:$0x1]  ;;  %v2136_v6 = vsel %vm5274_vm2, %v2131_v36, %v5865_v23 }
 0x142   : > { %v2150_v21 = vrot.slane %v2148_v38, 4  ;;  %v2204_v36 = vunpack.c.l.b16 %v2136_v6 }
 0x143   : > { %v2318_v3 = vpop.f32.mrf.mxu0  ;;  %v2146_v41 = vsel %vm5274_vm2, %v2141_v35, %v2145_v62  ;;  %v4717_v62 = vld [vmem:[%s5262_s29 + $0xc8] sm:$0x1] }
 0x144   : > { %v1652_v45 = vpop.f32.mrf.mxu3  ;;  %v993_v51 = vpop.f32.mrf.mxu1  ;;  %v2205_v35 = vunpack.c.l.b16 %v2146_v41  ;;  %v5084_v41 = vld [vmem:[%s5262_s29 + $0xb4] sm:$0xff] }
 0x145   : > { %v1717_v57 = vadd.f32 %v1652_v45, %v1418_v18  ;;  %v2161_v18 = vshrl.u32 %v4716_v30, 16  ;;  %v2474_v45 = vrot.slane %v5170_v16, 5  ;;  %v5895_v30 = vrot.slane %v2157_v9, 5 }
 0x146   : > { %4743 = vmatmul.msk.bf16.gmra.mxu0 %vm676_vm3, %v2221_v55  ;;  %v5169_v55 = vld [vmem:[%s5262_s29 + $0xbc] sm:$0x1]  ;;  %v1203_v16 = vrot.slane %v1201_v39, 4  ;;  %v994_v23 = vadd.f32 %v993_v51, %v5626_v50 }
 0x147   : > { %v1355_v5 = vpop.f32.mrf.mxu2  ;;  %4500 = vmatmul.msk.bf16.gmra.mxu1 %vm676_vm3, %v5083_v31  ;;  %v5883_v7 = vadd.f32 %v2318_v3, %v1717_v57  ;;  %v1204_v25 = vrot.slane %v5169_v55, 5  ;;  %v2153_v57 = vrot.slane %v2151_v0, 5  ;;  %v2163_v29 = vrot.slane %v2161_v18, 4 }
 0x148   : > { %v1419_v54 = vadd.f32 %v1355_v5, %v991_v24  ;;  %v4746_v24 = vld [vmem:[%s5262_s29 + $0xc] sm:$0xe]  ;;  %v4517_v55 = vrot.slane %v1058_v13, 9  ;;  %v2475_v38 = vsel %vm5469_vm6, %v2473_v8, %v2474_v45  ;;  %v4930_v8 = vld [vmem:[%s5262_s29 + $0x18] sm:$0xf] }
 0x149   : > { %6676 = vst [vmem:[#allocation3_spill] sm:$0xff] %v5883_v7  ;;  %v4762_v7 = vrot.slane %v4746_v24, 9  ;;  %v2587_v18 = vunpack.c.l.b16 %v2475_v38  ;;  %v1205_v51 = vsel %vm5469_vm6, %v1203_v16, %v1204_v25  ;;  %v2164_v13 = vor.u32 %v2163_v29, %v5895_v30 }
 0x14a   : > { %v1202_v50 = vsel %vm5469_vm6, %v4517_v55, %v1201_v39  ;;  %v1242_v39 = vunpack.c.l.b16 %v1205_v51  ;;  %v3163_v29 = vshrl.u32 %v4930_v8, 16  ;;  %v4932_v51 = vld [vmem:[%s5262_s29 + $0x20] sm:$0x1] }
 0x14b   : > { %v2320_v31 = vpop.f32.mrf.mxu0  ;;  %v1241_v24 = vunpack.c.l.b16 %v1202_v50  ;;  %v2165_v25 = vrot.slane %v2164_v13, 4 }
 0x14c   : > { %v1654_v3 = vpop.f32.mrf.mxu3  ;;  %4544 = vmatmul.msk.bf16.gmra.mxu2 %vm676_vm3, %v1257_v22  ;;  %v995_v28 = vpop.f32.mrf.mxu1  ;;  %v2472_v22 = vsel %vm5469_vm6, %v4762_v7, %v2471_v46  ;;  %v2167_v46 = vshll.u32 %v4717_v62, 16  ;;  %v2222_v7 = vpack.c.b16 %v2205_v35, %v2204_v36 }
 0x14d   : > { %v1718_v5 = vadd.f32 %v1654_v3, %v1419_v54  ;;  %v2154_v54 = vor.u32 %v2153_v57, %v2150_v21  ;;  %v2586_v9 = vunpack.c.l.b16 %v2472_v22  ;;  %v5918_v3 = vld [vmem:[%s5262_s29 + $0x1c] sm:$0xf]  ;;  %v1258_v22 = vpack.c.b16 %v1242_v39, %v1241_v24 }
 0x14e   : > { %v2169_v16 = vrot.slane %v2167_v46, 5  ;;  %v3176_v36 = vshrl.u32 %v5918_v3, 16  ;;  %v3182_v39 = vshll.u32 %v4932_v51, 16 }
 0x14f   : > { %v1358_v10 = vpop.f32.mrf.mxu2  ;;  %v5911_v6 = vpack.c.b16 %v2587_v18, %v2586_v9  ;;  %v5914_v45 = vadd.f32 %v2320_v31, %v1718_v5  ;;  %v3166_v31 = vshll.u32 %v4930_v8, 16  ;;  %v3172_v5 = vshll.u32 %v5918_v3, 16  ;;  %v5106_v8 = vld [vmem:[%s5262_s29 + $0xc0] sm:$0xff] }
 0x150   : > { %v1420_v0 = vadd.f32 %v1358_v10, %v994_v23  ;;  %v996_v23 = vadd.f32 %v995_v28, %v5646_v14  ;;  %v2170_v14 = vsel %vm5274_vm2, %v2165_v25, %v2169_v16  ;;  %v3165_v28 = vrot.slane %v3163_v29, 4  ;;  %v4933_v25 = vld [vmem:[%s5262_s29 + $0x24] sm:$0xf] }
 0x151   : > { %4668 = vmatmul.msk.bf16.gmra.mxu3 %vm676_vm3, %v5105_v53  ;;  %v2155_v53 = vrot.slane %v2154_v54, 4  ;;  %v3168_v54 = vrot.slane %v3166_v31, 5  ;;  %v3174_v9 = vrot.slane %v3172_v5, 5  ;;  %v3178_v18 = vrot.slane %v3176_v36, 4  ;;  %v5939_v5 = vld [vmem:[%s5262_s29 + $0x28] sm:$0xf] }
 0x152   : > { %v3184_v31 = vrot.slane %v3182_v39, 5 }
 0x153   : > { %v2323_v10 = vpop.f32.mrf.mxu0  ;;  %v3179_v24 = vor.u32 %v3178_v18, %v3174_v9  ;;  %v5172_v18 = vld [vmem:[%s5262_s29 + $0x20] sm:$0x1] }
 0x154   : > { %v1657_v21 = vpop.f32.mrf.mxu3  ;;  %v998_v57 = vpop.f32.mrf.mxu1 }
 0x155   : > { %v1719_v55 = vadd.f32 %v1657_v21, %v1420_v0  ;;  %v2160_v0 = vsel %vm5274_vm2, %v2155_v53, %v5895_v30  ;;  %v999_v30 = vadd.f32 %v998_v57, %v5672_v56  ;;  %v3169_v21 = vor.u32 %v3168_v54, %v3165_v28  ;;  %v5006_v57 = vld [vmem:[%s5262_s29 + $0x18] sm:$0xe]  ;;  %v5171_v28 = vld [vmem:[%s5262_s29 + $0x1c] sm:$0xf] }
 0x156   : > { %4744 = vmatmul.msk.bf16.gmra.mxu0 %vm676_vm3, %v2222_v7  ;;  %v2478_v54 = vrot.slane %v5171_v28, 5 }
 0x157   : > { %v1360_v35 = vpop.f32.mrf.mxu2  ;;  %4501 = vmatmul.msk.bf16.gmra.mxu1 %vm676_vm3, %v5084_v41  ;;  %v5925_v38 = vadd.f32 %v2323_v10, %v1719_v55  ;;  %v2206_v10 = vunpack.c.l.b16 %v2160_v0  ;;  %v2207_v41 = vunpack.c.l.b16 %v2170_v14  ;;  %v3170_v29 = vrot.slane %v3169_v21, 4 }
 0x158   : > { %v1421_v62 = vadd.f32 %v1360_v35, %v996_v23  ;;  %v3180_v23 = vrot.slane %v3179_v24, 4  ;;  %v3846_v35 = vrot.slane %v5918_v3, 5  ;;  %v5022_v21 = vrot.slane %v5006_v57, 9 }
 0x159   : > { %v2223_v16 = vpack.c.b16 %v2207_v41, %v2206_v10  ;;  %v4747_v10 = vld [vmem:[%s5262_s29 + $0x18] sm:$0xe]  ;;  %v3196_v41 = vshll.u32 %v5939_v5, 16  ;;  %v3175_v3 = vsel %vm5274_vm2, %v3170_v29, %v3174_v9 }
 0x15a   : > { %v3848_v39 = vrot.slane %v3846_v35, 4  ;;  %v4763_v28 = vrot.slane %v4747_v10, 9  ;;  %v3551_v9 = vunpack.c.l.b16 %v3175_v3 }
 0x15b   : > { %v2325_v50 = vpop.f32.mrf.mxu0 }
 0x15c   : > { %v1659_v13 = vpop.f32.mrf.mxu3  ;;  %4545 = vmatmul.msk.bf16.gmra.mxu2 %vm676_vm3, %v1258_v22  ;;  %v1000_v46 = vpop.f32.mrf.mxu1  ;;  %v3190_v22 = vshll.u32 %v4933_v25, 16 }
 0x15d   : > { %v1720_v7 = vadd.f32 %v1659_v13, %v1421_v62  ;;  %v3187_v62 = vshrl.u32 %v4933_v25, 16  ;;  %v2481_v13 = vrot.slane %v5172_v18, 5  ;;  %v3198_v18 = vrot.slane %v3196_v41, 5 }
 0x15e   : > { %v3192_v25 = vrot.slane %v3190_v22, 5 }
 0x15f   : > { %v1363_v53 = vpop.f32.mrf.mxu2  ;;  %v5941_v36 = vadd.f32 %v2325_v50, %v1720_v7  ;;  %v3200_v50 = vshrl.u32 %v5939_v5, 16  ;;  %v1001_v7 = vadd.f32 %v1000_v46, %v5701_v27  ;;  %v2480_v27 = vrot.slane %v2478_v54, 4 }
 0x160   : > { %v1422_v55 = vadd.f32 %v1363_v53, %v999_v30  ;;  %v3185_v30 = vsel %vm5274_vm2, %v3180_v23, %v3184_v31  ;;  %v3849_v53 = vrot.slane %v4932_v51, 5  ;;  %v5962_v31 = vld [vmem:[%s5262_s29 + $0x2c] sm:$0x1] }
 0x161   : > { %4669 = vmatmul.msk.bf16.gmra.mxu3 %vm676_vm3, %v5106_v8  ;;  %v3552_v29 = vunpack.c.l.b16 %v3185_v30  ;;  %v3202_v23 = vrot.slane %v3200_v50, 4 }
 0x162   : > { %v3850_v51 = vsel %vm5469_vm6, %v3848_v39, %v3849_v53 }
 0x163   : > { %v2328_v56 = vpop.f32.mrf.mxu0  ;;  %v3583_v50 = vpack.c.b16 %v3552_v29, %v3551_v9  ;;  %v5982_v29 = vld [vmem:[%s5262_s29 + $0x34] sm:$0xf] }
 0x164   : > { %v1662_v0 = vpop.f32.mrf.mxu3  ;;  %v1003_v14 = vpop.f32.mrf.mxu1 }
 0x165   : > { %v1721_v8 = vadd.f32 %v1662_v0, %v1422_v55  ;;  %v3189_v55 = vrot.slane %v3187_v62, 4  ;;  %v1004_v3 = vadd.f32 %v1003_v14, %v5571_v34 }
 0x166   : > { %4745 = vmatmul.msk.bf16.gmra.mxu0 %vm676_vm3, %v2223_v16  ;;  %v5113_v16 = vld [vmem:[%s5262_s29 + $0x18] sm:$0xff] }
 0x167   : > { %v1365_v24 = vpop.f32.mrf.mxu2  ;;  %4790 = vmatmul.msk.bf16.vlgmr.msra.gmra.mxu1 %vm676_vm3, %v5911_v6  ;;  %v5959_v46 = vadd.f32 %v2328_v56, %v1721_v8  ;;  %v3847_v6 = vsel %vm5469_vm6, %v5022_v21, %v3846_v35  ;;  %v2479_v56 = vsel %vm5469_vm6, %v4763_v28, %v2478_v54  ;;  %v2482_v8 = vsel %vm5469_vm6, %v2480_v27, %v2481_v13  ;;  %v4936_v27 = vld [vmem:[%s5262_s29 + $0x30] sm:$0xf] }
 0x168   : > { %v1423_v0 = vadd.f32 %v1365_v24, %v1001_v7  ;;  %v3193_v10 = vor.u32 %v3192_v25, %v3189_v55  ;;  %v3203_v7 = vor.u32 %v3202_v23, %v3198_v18  ;;  %v3206_v35 = vshll.u32 %v5962_v31, 16  ;;  %v5007_v25 = vld [vmem:[%s5262_s29 + $0x24] sm:$0xe] }
 0x169   : > { %v3961_v30 = vunpack.c.l.b16 %v3847_v6  ;;  %v3962_v21 = vunpack.c.l.b16 %v3850_v51  ;;  %v2588_v39 = vunpack.c.l.b16 %v2479_v56  ;;  %v2589_v53 = vunpack.c.l.b16 %v2482_v8  ;;  %v5173_v8 = vld [vmem:[%s5262_s29 + $0x28] sm:$0xf] }
 0x16a   : > { %v3204_v13 = vrot.slane %v3203_v7, 4  ;;  %v3208_v55 = vrot.slane %v3206_v35, 5  ;;  %v3856_v56 = vrot.slane %v5962_v31, 5  ;;  %v3211_v7 = vshrl.u32 %v4936_v27, 16  ;;  %v5174_v31 = vld [vmem:[%s5262_s29 + $0x2c] sm:$0x1] }
 0x16b   : > { %v2330_v57 = vpop.f32.mrf.mxu0  ;;  %v3993_v28 = vpack.c.b16 %v3962_v21, %v3961_v30  ;;  %v2619_v9 = vpack.c.b16 %v2589_v53, %v2588_v39  ;;  %v3224_v30 = vshrl.u32 %v5982_v29, 16  ;;  %v2488_v21 = vrot.slane %v5174_v31, 5  ;;  %v5114_v53 = vld [vmem:[%s5262_s29 + $0x24] sm:$0xff] }
 0x16c   : > { %v1664_v62 = vpop.f32.mrf.mxu3  ;;  %4914 = vmatmul.msk.bf16.vlgmr.msra.gmra.mxu2 %vm676_vm3, %v5113_v16  ;;  %v1005_v22 = vpop.f32.mrf.mxu1  ;;  %v3194_v16 = vrot.slane %v3193_v10, 4 }
 0x16d   : > { %v1722_v41 = vadd.f32 %v1664_v62, %v1423_v0  ;;  %v3853_v0 = vrot.slane %v5939_v5, 5  ;;  %v5023_v62 = vrot.slane %v5007_v25, 9  ;;  %v2485_v5 = vrot.slane %v5173_v8, 5 }
 0x16e   : > { %v3199_v51 = vsel %vm5274_vm2, %v3194_v16, %v3198_v18  ;;  %v1006_v35 = vadd.f32 %v1005_v22, %v5592_v1  ;;  %v3220_v18 = vshll.u32 %v5982_v29, 16  ;;  %v3226_v8 = vrot.slane %v3224_v30, 4 }
 0x16f   : > { %v1368_v24 = vpop.f32.mrf.mxu2  ;;  %v5979_v34 = vadd.f32 %v2330_v57, %v1722_v41  ;;  %v3209_v57 = vsel %vm5274_vm2, %v3204_v13, %v3208_v55  ;;  %v3855_v41 = vrot.slane %v3853_v0, 4  ;;  %v2487_v16 = vrot.slane %v2485_v5, 4 }
 0x170   : > { %v1424_v54 = vadd.f32 %v1368_v24, %v1004_v3  ;;  %v3214_v3 = vshll.u32 %v4936_v27, 16  ;;  %v3553_v55 = vunpack.c.l.b16 %v3199_v51  ;;  %v3554_v25 = vunpack.c.l.b16 %v3209_v57 }
 0x171   : > { %4990 = vmatmul.msk.bf16.vlgmr.msra.gmra.mxu3 %vm676_vm3, %v3583_v50  ;;  %v4748_v50 = vld [vmem:[%s5262_s29 + $0x24] sm:$0xe]  ;;  %v3854_v1 = vsel %vm5469_vm6, %v5023_v62, %v3853_v0  ;;  %v3857_v22 = vsel %vm5469_vm6, %v3855_v41, %v3856_v56  ;;  %v2489_v0 = vsel %vm5469_vm6, %v2487_v16, %v2488_v21 }
 0x172   : > { %v3216_v27 = vrot.slane %v3214_v3, 5  ;;  %v3584_v56 = vpack.c.b16 %v3554_v25, %v3553_v55  ;;  %v3964_v57 = vunpack.c.l.b16 %v3857_v22  ;;  %v3860_v22 = vrot.slane %v5982_v29, 5 }
 0x173   : > { %v2333_v14 = vpop.f32.mrf.mxu0 }
 0x174   : > { %v1667_v23 = vpop.f32.mrf.mxu3  ;;  %v1008_v6 = vpop.f32.mrf.mxu1 }
 0x175   : > { %v1723_v10 = vadd.f32 %v1667_v23, %v1424_v54  ;;  %v4764_v54 = vrot.slane %v4748_v50, 9  ;;  %v3222_v23 = vrot.slane %v3220_v18, 5  ;;  %v1009_v41 = vadd.f32 %v1008_v6, %v5609_v17  ;;  %v6017_v17 = vld [vmem:[%s5262_s29 + $0x40] sm:$0xf] }
 0x176   : > { %5050 = vmatmul.msk.bf16.vlgmr.msra.gmra.mxu0 %vm676_vm3, %v3993_v28  ;;  %v3213_v28 = vrot.slane %v3211_v7, 4 }
 0x177   : > { %v1370_v24 = vpop.f32.mrf.mxu2  ;;  %4791 = vmatmul.msk.bf16.gmra.mxu1 %vm676_vm3, %v2619_v9  ;;  %v5998_v13 = vadd.f32 %v2333_v14, %v1723_v10  ;;  %v6005_v9 = vld [vmem:[%s5262_s29 + $0x38] sm:$0x1]  ;;  %v2486_v51 = vsel %vm5469_vm6, %v4764_v54, %v2485_v5  ;;  %v3963_v10 = vunpack.c.l.b16 %v3854_v1  ;;  %v3227_v7 = vor.u32 %v3226_v8, %v3222_v23  ;;  %v4939_v5 = vld [vmem:[%s5262_s29 + $0x3c] sm:$0xf]  ;;  %v5008_v1 = vld [vmem:[%s5262_s29 + $0x30] sm:$0xe] }
 0x178   : > { %v1425_v39 = vadd.f32 %v1370_v24, %v1006_v35  ;;  %v3217_v50 = vor.u32 %v3216_v27, %v3213_v28  ;;  %v3230_v3 = vshll.u32 %v6005_v9, 16  ;;  %v2590_v30 = vunpack.c.l.b16 %v2486_v51  ;;  %v5175_v51 = vld [vmem:[%s5262_s29 + $0x34] sm:$0xf] }
 0x179   : > { %v2591_v24 = vunpack.c.l.b16 %v2489_v0  ;;  %v3994_v21 = vpack.c.b16 %v3964_v57, %v3963_v10  ;;  %v3228_v54 = vrot.slane %v3227_v7, 4  ;;  %v3235_v28 = vshrl.u32 %v4939_v5, 16 }
 0x17a   : > { %v3232_v16 = vrot.slane %v3230_v3, 5  ;;  %v3238_v27 = vshll.u32 %v4939_v5, 16  ;;  %v2492_v0 = vrot.slane %v5175_v51, 5  ;;  %v5024_v3 = vrot.slane %v5008_v1, 9 }
 0x17b   : > { %v2335_v31 = vpop.f32.mrf.mxu0  ;;  %v2620_v25 = vpack.c.b16 %v2591_v24, %v2590_v30  ;;  %v3862_v30 = vrot.slane %v3860_v22, 4  ;;  %v3863_v24 = vrot.slane %v6005_v9, 5 }
 0x17c   : > { %v1669_v35 = vpop.f32.mrf.mxu3  ;;  %4915 = vmatmul.msk.bf16.gmra.mxu2 %vm676_vm3, %v5114_v53  ;;  %v1010_v14 = vpop.f32.mrf.mxu1  ;;  %v3233_v7 = vsel %vm5274_vm2, %v3228_v54, %v3232_v16  ;;  %v3240_v5 = vrot.slane %v3238_v27, 5  ;;  %v6040_v16 = vld [vmem:[%s5262_s29 + $0x44] sm:$0x1] }
 0x17d   : > { %v1724_v62 = vadd.f32 %v1669_v35, %v1425_v39  ;;  %v3218_v39 = vrot.slane %v3217_v50, 4  ;;  %v3244_v50 = vshll.u32 %v6017_v17, 16  ;;  %v3864_v9 = vsel %vm5469_vm6, %v3862_v30, %v3863_v24 }
 0x17f   : > { %v1373_v18 = vpop.f32.mrf.mxu2  ;;  %v6019_v6 = vadd.f32 %v2335_v31, %v1724_v62  ;;  %v3248_v31 = vshrl.u32 %v6017_v17, 16  ;;  %v1011_v62 = vadd.f32 %v1010_v14, %v5630_v52  ;;  %v3223_v29 = vsel %vm5274_vm2, %v3218_v39, %v3222_v23 }
 0x180   : > { %v1426_v53 = vadd.f32 %v1373_v18, %v1009_v41  ;;  %v4749_v41 = vld [vmem:[%s5262_s29 + $0x30] sm:$0xe]  ;;  %v2494_v52 = vrot.slane %v2492_v0, 4  ;;  %v3555_v23 = vunpack.c.l.b16 %v3223_v29  ;;  %v3556_v39 = vunpack.c.l.b16 %v3233_v7 }
 0x181   : > { %4991 = vmatmul.msk.bf16.gmra.mxu3 %vm676_vm3, %v3584_v56  ;;  %v5176_v56 = vld [vmem:[%s5262_s29 + $0x38] sm:$0x1]  ;;  %v4765_v51 = vrot.slane %v4749_v41, 9  ;;  %v3250_v54 = vrot.slane %v3248_v31, 4 }
 0x182   : > { %v2495_v10 = vrot.slane %v5176_v56, 5  ;;  %v3246_v56 = vrot.slane %v3244_v50, 5  ;;  %v3585_v31 = vpack.c.b16 %v3556_v39, %v3555_v23  ;;  %v6060_v39 = vld [vmem:[%s5262_s29 + $0x4c] sm:$0xf] }
 0x183   : > { %v2338_v55 = vpop.f32.mrf.mxu0 }
 0x184   : > { %v1672_v8 = vpop.f32.mrf.mxu3  ;;  %v1013_v35 = vpop.f32.mrf.mxu1 }
 0x185   : > { %v1725_v57 = vadd.f32 %v1672_v8, %v1426_v53  ;;  %v3237_v53 = vrot.slane %v3235_v28, 4  ;;  %v1014_v29 = vadd.f32 %v1013_v35, %v5653_v20 }
 0x186   : > { %5051 = vmatmul.msk.bf16.gmra.mxu0 %vm676_vm3, %v3994_v21  ;;  %v5115_v21 = vld [vmem:[%s5262_s29 + $0x30] sm:$0xff] }
 0x187   : > { %v1375_v18 = vpop.f32.mrf.mxu2  ;;  %4792 = vmatmul.msk.bf16.gmra.mxu1 %vm676_vm3, %v2620_v25  ;;  %v6037_v14 = vadd.f32 %v2338_v55, %v1725_v57  ;;  %v3861_v25 = vsel %vm5469_vm6, %v5024_v3, %v3860_v22  ;;  %v2493_v55 = vsel %vm5469_vm6, %v4765_v51, %v2492_v0  ;;  %v2496_v57 = vsel %vm5469_vm6, %v2494_v52, %v2495_v10  ;;  %v4942_v52 = vld [vmem:[%s5262_s29 + $0x48] sm:$0xf] }
 0x188   : > { %v1427_v8 = vadd.f32 %v1375_v18, %v1011_v62  ;;  %v3241_v41 = vor.u32 %v3240_v5, %v3237_v53  ;;  %v3251_v62 = vor.u32 %v3250_v54, %v3246_v56  ;;  %v3254_v22 = vshll.u32 %v6040_v16, 16  ;;  %v5009_v5 = vld [vmem:[%s5262_s29 + $0x3c] sm:$0xe] }
 0x189   : > { %v3965_v7 = vunpack.c.l.b16 %v3861_v25  ;;  %v3966_v3 = vunpack.c.l.b16 %v3864_v9  ;;  %v2592_v30 = vunpack.c.l.b16 %v2493_v55  ;;  %v2593_v24 = vunpack.c.l.b16 %v2496_v57  ;;  %v5177_v57 = vld [vmem:[%s5262_s29 + $0x40] sm:$0xf] }
 0x18a   : > { %v3252_v10 = vrot.slane %v3251_v62, 4  ;;  %v3256_v53 = vrot.slane %v3254_v22, 5  ;;  %v3870_v55 = vrot.slane %v6040_v16, 5  ;;  %v3259_v62 = vshrl.u32 %v4942_v52, 16  ;;  %v5178_v16 = vld [vmem:[%s5262_s29 + $0x44] sm:$0x1] }
 0x18b   : > { %v2340_v1 = vpop.f32.mrf.mxu0  ;;  %v3995_v51 = vpack.c.b16 %v3966_v3, %v3965_v7  ;;  %v2621_v23 = vpack.c.b16 %v2593_v24, %v2592_v30  ;;  %v3272_v7 = vshrl.u32 %v6060_v39, 16  ;;  %v2502_v3 = vrot.slane %v5178_v16, 5  ;;  %v5116_v24 = vld [vmem:[%s5262_s29 + $0x3c] sm:$0xff] }
 0x18c   : > { %v1674_v28 = vpop.f32.mrf.mxu3  ;;  %4916 = vmatmul.msk.bf16.gmra.mxu2 %vm676_vm3, %v5115_v21  ;;  %v1015_v27 = vpop.f32.mrf.mxu1  ;;  %v3242_v21 = vrot.slane %v3241_v41, 4 }
 0x18d   : > { %v1726_v50 = vadd.f32 %v1674_v28, %v1427_v8  ;;  %v3867_v8 = vrot.slane %v6017_v17, 5  ;;  %v5025_v28 = vrot.slane %v5009_v5, 9  ;;  %v2499_v17 = vrot.slane %v5177_v57, 5 }
 0x18e   : > { %v3247_v9 = vsel %vm5274_vm2, %v3242_v21, %v3246_v56  ;;  %v1016_v22 = vadd.f32 %v1015_v27, %v5674_v58  ;;  %v3268_v56 = vshll.u32 %v6060_v39, 16  ;;  %v3274_v57 = vrot.slane %v3272_v7, 4 }
 0x18f   : > { %v1378_v18 = vpop.f32.mrf.mxu2  ;;  %v6057_v20 = vadd.f32 %v2340_v1, %v1726_v50  ;;  %v3257_v1 = vsel %vm5274_vm2, %v3252_v10, %v3256_v53  ;;  %v3869_v50 = vrot.slane %v3867_v8, 4  ;;  %v2501_v21 = vrot.slane %v2499_v17, 4 }
 0x190   : > { %v1428_v0 = vadd.f32 %v1378_v18, %v1014_v29  ;;  %v3262_v29 = vshll.u32 %v4942_v52, 16  ;;  %v3557_v53 = vunpack.c.l.b16 %v3247_v9  ;;  %v3558_v5 = vunpack.c.l.b16 %v3257_v1 }
 0x191   : > { %4992 = vmatmul.msk.bf16.gmra.mxu3 %vm676_vm3, %v3585_v31  ;;  %v4750_v31 = vld [vmem:[%s5262_s29 + $0x3c] sm:$0xe]  ;;  %v3868_v58 = vsel %vm5469_vm6, %v5025_v28, %v3867_v8  ;;  %v3871_v27 = vsel %vm5469_vm6, %v3869_v50, %v3870_v55  ;;  %v2503_v8 = vsel %vm5469_vm6, %v2501_v21, %v2502_v3 }
 0x192   : > { %v3264_v52 = vrot.slane %v3262_v29, 5  ;;  %v3586_v55 = vpack.c.b16 %v3558_v5, %v3557_v53  ;;  %v3968_v1 = vunpack.c.l.b16 %v3871_v27  ;;  %v3874_v27 = vrot.slane %v6060_v39, 5 }
 0x193   : > { %v2343_v35 = vpop.f32.mrf.mxu0 }
 0x194   : > { %v1677_v54 = vpop.f32.mrf.mxu3  ;;  %v1018_v25 = vpop.f32.mrf.mxu1 }
 0x195   : > { %v1727_v41 = vadd.f32 %v1677_v54, %v1428_v0  ;;  %v4766_v0 = vrot.slane %v4750_v31, 9  ;;  %v3270_v54 = vrot.slane %v3268_v56, 5  ;;  %v1019_v50 = vadd.f32 %v1018_v25, %v5704_v48  ;;  %v6095_v48 = vld [vmem:[%s5262_s29 + $0x58] sm:$0xf] }
 0x196   : > { %5052 = vmatmul.msk.bf16.gmra.mxu0 %vm676_vm3, %v3995_v51  ;;  %v3261_v51 = vrot.slane %v3259_v62, 4 }
 0x197   : > { %v1380_v18 = vpop.f32.mrf.mxu2  ;;  %4793 = vmatmul.msk.bf16.gmra.mxu1 %vm676_vm3, %v2621_v23  ;;  %v6076_v10 = vadd.f32 %v2343_v35, %v1727_v41  ;;  %v6083_v23 = vld [vmem:[%s5262_s29 + $0x50] sm:$0x1]  ;;  %v2500_v9 = vsel %vm5469_vm6, %v4766_v0, %v2499_v17  ;;  %v3967_v41 = vunpack.c.l.b16 %v3868_v58  ;;  %v3275_v62 = vor.u32 %v3274_v57, %v3270_v54  ;;  %v4945_v17 = vld [vmem:[%s5262_s29 + $0x54] sm:$0xf]  ;;  %v5010_v58 = vld [vmem:[%s5262_s29 + $0x48] sm:$0xe] }
 0x198   : > { %v1429_v30 = vadd.f32 %v1380_v18, %v1016_v22  ;;  %v3265_v31 = vor.u32 %v3264_v52, %v3261_v51  ;;  %v3278_v29 = vshll.u32 %v6083_v23, 16  ;;  %v2594_v7 = vunpack.c.l.b16 %v2500_v9  ;;  %v5179_v9 = vld [vmem:[%s5262_s29 + $0x4c] sm:$0xf] }
 0x199   : > { %v2595_v18 = vunpack.c.l.b16 %v2503_v8  ;;  %v3996_v3 = vpack.c.b16 %v3968_v1, %v3967_v41  ;;  %v3276_v0 = vrot.slane %v3275_v62, 4  ;;  %v3283_v51 = vshrl.u32 %v4945_v17, 16 }
 0x19a   : > { %v3280_v21 = vrot.slane %v3278_v29, 5  ;;  %v3286_v52 = vshll.u32 %v4945_v17, 16  ;;  %v2506_v8 = vrot.slane %v5179_v9, 5  ;;  %v5026_v29 = vrot.slane %v5010_v58, 9 }
 0x19b   : > { %v2345_v16 = vpop.f32.mrf.mxu0  ;;  %v2622_v5 = vpack.c.b16 %v2595_v18, %v2594_v7  ;;  %v3876_v7 = vrot.slane %v3874_v27, 4  ;;  %v3877_v18 = vrot.slane %v6083_v23, 5 }
 0x19c   : > { %v1679_v22 = vpop.f32.mrf.mxu3  ;;  %4917 = vmatmul.msk.bf16.gmra.mxu2 %vm676_vm3, %v5116_v24  ;;  %v1020_v35 = vpop.f32.mrf.mxu1  ;;  %v3281_v62 = vsel %vm5274_vm2, %v3276_v0, %v3280_v21  ;;  %v3288_v17 = vrot.slane %v3286_v52, 5  ;;  %v6118_v21 = vld [vmem:[%s5262_s29 + $0x5c] sm:$0x1] }
 0x19d   : > { %v1728_v28 = vadd.f32 %v1679_v22, %v1429_v30  ;;  %v3266_v30 = vrot.slane %v3265_v31, 4  ;;  %v3292_v31 = vshll.u32 %v6095_v48, 16  ;;  %v3878_v23 = vsel %vm5469_vm6, %v3876_v7, %v3877_v18 }
 0x19f   : > { %v1383_v56 = vpop.f32.mrf.mxu2  ;;  %v6097_v25 = vadd.f32 %v2345_v16, %v1728_v28  ;;  %v3296_v16 = vshrl.u32 %v6095_v48, 16  ;;  %v1021_v28 = vadd.f32 %v1020_v35, %v5719_v11  ;;  %v3271_v39 = vsel %vm5274_vm2, %v3266_v30, %v3270_v54 }
 0x1a0   : > { %v1430_v24 = vadd.f32 %v1383_v56, %v1019_v50  ;;  %v4751_v50 = vld [vmem:[%s5262_s29 + $0x48] sm:$0xe]  ;;  %v2508_v11 = vrot.slane %v2506_v8, 4  ;;  %v3559_v54 = vunpack.c.l.b16 %v3271_v39  ;;  %v3560_v30 = vunpack.c.l.b16 %v3281_v62 }
 0x1a1   : > { %4993 = vmatmul.msk.bf16.gmra.mxu3 %vm676_vm3, %v3586_v55  ;;  %v5180_v55 = vld [vmem:[%s5262_s29 + $0x50] sm:$0x1]  ;;  %v4767_v9 = vrot.slane %v4751_v50, 9  ;;  %v3298_v0 = vrot.slane %v3296_v16, 4 }
 0x1a2   : > { %v2509_v41 = vrot.slane %v5180_v55, 5  ;;  %v3294_v55 = vrot.slane %v3292_v31, 5  ;;  %v3587_v16 = vpack.c.b16 %v3560_v30, %v3559_v54  ;;  %v6138_v30 = vld [vmem:[%s5262_s29 + $0x64] sm:$0xf] }
 0x1a3   : > { %v2348_v53 = vpop.f32.mrf.mxu0 }
 0x1a4   : > { %v1682_v57 = vpop.f32.mrf.mxu3  ;;  %v1023_v22 = vpop.f32.mrf.mxu1 }
 0x1a5   : > { %v1729_v1 = vadd.f32 %v1682_v57, %v1430_v24  ;;  %v3285_v24 = vrot.slane %v3283_v51, 4  ;;  %v1024_v39 = vadd.f32 %v1023_v22, %v5583_v47 }
 0x1a6   : > { %5053 = vmatmul.msk.bf16.gmra.mxu0 %vm676_vm3, %v3996_v3  ;;  %v5117_v3 = vld [vmem:[%s5262_s29 + $0x48] sm:$0xff] }
 0x1a7   : > { %v1385_v56 = vpop.f32.mrf.mxu2  ;;  %4794 = vmatmul.msk.bf16.gmra.mxu1 %vm676_vm3, %v2622_v5  ;;  %v6115_v35 = vadd.f32 %v2348_v53, %v1729_v1  ;;  %v3875_v5 = vsel %vm5469_vm6, %v5026_v29, %v3874_v27  ;;  %v2507_v53 = vsel %vm5469_vm6, %v4767_v9, %v2506_v8  ;;  %v2510_v1 = vsel %vm5469_vm6, %v2508_v11, %v2509_v41  ;;  %v4948_v11 = vld [vmem:[%s5262_s29 + $0x60] sm:$0xf] }
 0x1a8   : > { %v1431_v57 = vadd.f32 %v1385_v56, %v1021_v28  ;;  %v3289_v50 = vor.u32 %v3288_v17, %v3285_v24  ;;  %v3299_v28 = vor.u32 %v3298_v0, %v3294_v55  ;;  %v3302_v27 = vshll.u32 %v6118_v21, 16  ;;  %v5011_v17 = vld [vmem:[%s5262_s29 + $0x54] sm:$0xe] }
 0x1a9   : > { %v3969_v62 = vunpack.c.l.b16 %v3875_v5  ;;  %v3970_v29 = vunpack.c.l.b16 %v3878_v23  ;;  %v2596_v7 = vunpack.c.l.b16 %v2507_v53  ;;  %v2597_v18 = vunpack.c.l.b16 %v2510_v1  ;;  %v5181_v1 = vld [vmem:[%s5262_s29 + $0x58] sm:$0xf] }
 0x1aa   : > { %v3300_v41 = vrot.slane %v3299_v28, 4  ;;  %v3304_v24 = vrot.slane %v3302_v27, 5  ;;  %v3884_v53 = vrot.slane %v6118_v21, 5  ;;  %v3307_v28 = vshrl.u32 %v4948_v11, 16  ;;  %v5182_v21 = vld [vmem:[%s5262_s29 + $0x5c] sm:$0x1] }
 0x1ab   : > { %v2350_v58 = vpop.f32.mrf.mxu0  ;;  %v3997_v9 = vpack.c.b16 %v3970_v29, %v3969_v62  ;;  %v2623_v54 = vpack.c.b16 %v2597_v18, %v2596_v7  ;;  %v3320_v62 = vshrl.u32 %v6138_v30, 16  ;;  %v2516_v29 = vrot.slane %v5182_v21, 5  ;;  %v5118_v18 = vld [vmem:[%s5262_s29 + $0x54] sm:$0xff] }
 0x1ac   : > { %v1684_v51 = vpop.f32.mrf.mxu3  ;;  %4918 = vmatmul.msk.bf16.gmra.mxu2 %vm676_vm3, %v5117_v3  ;;  %v1025_v52 = vpop.f32.mrf.mxu1  ;;  %v3290_v3 = vrot.slane %v3289_v50, 4 }
 0x1ad   : > { %v1730_v31 = vadd.f32 %v1684_v51, %v1431_v57  ;;  %v3881_v57 = vrot.slane %v6095_v48, 5  ;;  %v5027_v51 = vrot.slane %v5011_v17, 9  ;;  %v2513_v48 = vrot.slane %v5181_v1, 5 }
 0x1ae   : > { %v3295_v23 = vsel %vm5274_vm2, %v3290_v3, %v3294_v55  ;;  %v1026_v27 = vadd.f32 %v1025_v52, %v5602_v2  ;;  %v3316_v55 = vshll.u32 %v6138_v30, 16  ;;  %v3322_v1 = vrot.slane %v3320_v62, 4 }
 0x1af   : > { %v1388_v56 = vpop.f32.mrf.mxu2  ;;  %v6135_v47 = vadd.f32 %v2350_v58, %v1730_v31  ;;  %v3305_v58 = vsel %vm5274_vm2, %v3300_v41, %v3304_v24  ;;  %v3883_v31 = vrot.slane %v3881_v57, 4  ;;  %v2515_v3 = vrot.slane %v2513_v48, 4 }
 0x1b0   : > { %v1432_v8 = vadd.f32 %v1388_v56, %v1024_v39  ;;  %v3310_v39 = vshll.u32 %v4948_v11, 16  ;;  %v3561_v24 = vunpack.c.l.b16 %v3295_v23  ;;  %v3562_v17 = vunpack.c.l.b16 %v3305_v58 }
 0x1b1   : > { %4994 = vmatmul.msk.bf16.gmra.mxu3 %vm676_vm3, %v3587_v16  ;;  %v4752_v16 = vld [vmem:[%s5262_s29 + $0x54] sm:$0xe]  ;;  %v3882_v2 = vsel %vm5469_vm6, %v5027_v51, %v3881_v57  ;;  %v3885_v52 = vsel %vm5469_vm6, %v3883_v31, %v3884_v53  ;;  %v2517_v57 = vsel %vm5469_vm6, %v2515_v3, %v2516_v29 }
 0x1b2   : > { %v3312_v11 = vrot.slane %v3310_v39, 5  ;;  %v3588_v53 = vpack.c.b16 %v3562_v17, %v3561_v24  ;;  %v3972_v58 = vunpack.c.l.b16 %v3885_v52  ;;  %v3888_v52 = vrot.slane %v6138_v30, 5 }
 0x1b3   : > { %v2353_v22 = vpop.f32.mrf.mxu0 }
 0x1b4   : > { %v1687_v0 = vpop.f32.mrf.mxu3  ;;  %v1028_v5 = vpop.f32.mrf.mxu1 }
 0x1b5   : > { %v1731_v50 = vadd.f32 %v1687_v0, %v1432_v8  ;;  %v4768_v8 = vrot.slane %v4752_v16, 9  ;;  %v3318_v0 = vrot.slane %v3316_v55, 5  ;;  %v1029_v31 = vadd.f32 %v1028_v5, %v5623_v37  ;;  %v6173_v37 = vld [vmem:[%s5262_s29 + $0x70] sm:$0xf] }
 0x1b6   : > { %5054 = vmatmul.msk.bf16.gmra.mxu0 %vm676_vm3, %v3997_v9  ;;  %v3309_v9 = vrot.slane %v3307_v28, 4 }
 0x1b7   : > { %v1390_v56 = vpop.f32.mrf.mxu2  ;;  %4795 = vmatmul.msk.bf16.gmra.mxu1 %vm676_vm3, %v2623_v54  ;;  %v6154_v41 = vadd.f32 %v2353_v22, %v1731_v50  ;;  %v6161_v54 = vld [vmem:[%s5262_s29 + $0x68] sm:$0x1]  ;;  %v2514_v23 = vsel %vm5469_vm6, %v4768_v8, %v2513_v48  ;;  %v3971_v50 = vunpack.c.l.b16 %v3882_v2  ;;  %v3323_v28 = vor.u32 %v3322_v1, %v3318_v0  ;;  %v4951_v48 = vld [vmem:[%s5262_s29 + $0x6c] sm:$0xf]  ;;  %v5012_v2 = vld [vmem:[%s5262_s29 + $0x60] sm:$0xe] }
 0x1b8   : > { %v1433_v7 = vadd.f32 %v1390_v56, %v1026_v27  ;;  %v3313_v16 = vor.u32 %v3312_v11, %v3309_v9  ;;  %v3326_v39 = vshll.u32 %v6161_v54, 16  ;;  %v2598_v62 = vunpack.c.l.b16 %v2514_v23  ;;  %v5183_v23 = vld [vmem:[%s5262_s29 + $0x64] sm:$0xf] }
 0x1b9   : > { %v2599_v56 = vunpack.c.l.b16 %v2517_v57  ;;  %v3998_v29 = vpack.c.b16 %v3972_v58, %v3971_v50  ;;  %v3324_v8 = vrot.slane %v3323_v28, 4  ;;  %v3331_v9 = vshrl.u32 %v4951_v48, 16 }
 0x1ba   : > { %v3328_v3 = vrot.slane %v3326_v39, 5  ;;  %v3334_v11 = vshll.u32 %v4951_v48, 16  ;;  %v2520_v57 = vrot.slane %v5183_v23, 5  ;;  %v5028_v39 = vrot.slane %v5012_v2, 9 }
 0x1bb   : > { %v2355_v21 = vpop.f32.mrf.mxu0  ;;  %v2624_v17 = vpack.c.b16 %v2599_v56, %v2598_v62  ;;  %v3890_v62 = vrot.slane %v3888_v52, 4  ;;  %v3891_v56 = vrot.slane %v6161_v54, 5 }
 0x1bc   : > { %v1689_v27 = vpop.f32.mrf.mxu3  ;;  %4919 = vmatmul.msk.bf16.gmra.mxu2 %vm676_vm3, %v5118_v18  ;;  %v1030_v22 = vpop.f32.mrf.mxu1  ;;  %v3329_v28 = vsel %vm5274_vm2, %v3324_v8, %v3328_v3  ;;  %v3336_v48 = vrot.slane %v3334_v11, 5  ;;  %v6198_v3 = vld [vmem:[%s5262_s29 + $0x74] sm:$0x1] }
 0x1bd   : > { %v1732_v51 = vadd.f32 %v1689_v27, %v1433_v7  ;;  %v3314_v7 = vrot.slane %v3313_v16, 4  ;;  %v3340_v16 = vshll.u32 %v6173_v37, 16  ;;  %v3892_v54 = vsel %vm5469_vm6, %v3890_v62, %v3891_v56 }
 0x1bf   : > { %v1393_v55 = vpop.f32.mrf.mxu2  ;;  %v6175_v5 = vadd.f32 %v2355_v21, %v1732_v51  ;;  %v3344_v21 = vshrl.u32 %v6173_v37, 16  ;;  %v1031_v51 = vadd.f32 %v1030_v22, %v5642_v4  ;;  %v3319_v30 = vsel %vm5274_vm2, %v3314_v7, %v3318_v0 }
 0x1c0   : > { %v1434_v18 = vadd.f32 %v1393_v55, %v1029_v31  ;;  %v4753_v31 = vld [vmem:[%s5262_s29 + $0x60] sm:$0xe]  ;;  %v2522_v4 = vrot.slane %v2520_v57, 4  ;;  %v3563_v0 = vunpack.c.l.b16 %v3319_v30  ;;  %v3564_v7 = vunpack.c.l.b16 %v3329_v28 }
 0x1c1   : > { %4995 = vmatmul.msk.bf16.gmra.mxu3 %vm676_vm3, %v3588_v53  ;;  %v5184_v53 = vld [vmem:[%s5262_s29 + $0x68] sm:$0x1]  ;;  %v4769_v23 = vrot.slane %v4753_v31, 9  ;;  %v3346_v8 = vrot.slane %v3344_v21, 4 }
 0x1c2   : > { %v2523_v50 = vrot.slane %v5184_v53, 5  ;;  %v6195_v53 = vrot.slane %v3340_v16, 5  ;;  %v3589_v21 = vpack.c.b16 %v3564_v7, %v3563_v0  ;;  %v6217_v0 = vld [vmem:[%s5262_s29 + $0x7c] sm:$0xf] }
 0x1c3   : > { %v2358_v24 = vpop.f32.mrf.mxu0  ;;  %v2521_v11 = vsel %vm5469_vm6, %v4769_v23, %v2520_v57  ;;  %v4954_v57 = vld [vmem:[%s5262_s29 + $0x78] sm:$0xf] }
 0x1c4   : > { %v1692_v1 = vpop.f32.mrf.mxu3  ;;  %v1033_v27 = vpop.f32.mrf.mxu1  ;;  %v2600_v62 = vunpack.c.l.b16 %v2521_v11 }
 0x1c5   : > { %v1733_v58 = vadd.f32 %v1692_v1, %v1434_v18  ;;  %v3333_v18 = vrot.slane %v3331_v9, 4  ;;  %v1034_v30 = vadd.f32 %v1033_v27, %v5661_v42  ;;  %v3355_v42 = vshrl.u32 %v4954_v57, 16 }
 0x1c6   : > { %5055 = vmatmul.msk.bf16.gmra.mxu0 %vm676_vm3, %v3998_v29  ;;  %v5119_v29 = vld [vmem:[%s5262_s29 + $0x60] sm:$0xff]  ;;  %v3358_v27 = vshll.u32 %v4954_v57, 16  ;;  %v5120_v57 = vld [vmem:[%s5262_s29 + $0x6c] sm:$0xff] }
 0x1c7   : > { %v1395_v55 = vpop.f32.mrf.mxu2  ;;  %4796 = vmatmul.msk.bf16.gmra.mxu1 %vm676_vm3, %v2624_v17  ;;  %v6193_v22 = vadd.f32 %v2358_v24, %v1733_v58  ;;  %v3889_v17 = vsel %vm5469_vm6, %v5028_v39, %v3888_v52  ;;  %v2524_v58 = vsel %vm5469_vm6, %v2522_v4, %v2523_v50  ;;  %v3337_v31 = vor.u32 %v3336_v48, %v3333_v18  ;;  %v5013_v48 = vld [vmem:[%s5262_s29 + $0x6c] sm:$0xe] }
 0x1c8   : > { %v1435_v1 = vadd.f32 %v1395_v55, %v1031_v51  ;;  %v3347_v52 = vor.u32 %v3346_v8, %v6195_v53  ;;  %v3350_v51 = vshll.u32 %v6198_v3, 16  ;;  %v3973_v28 = vunpack.c.l.b16 %v3889_v17 }
 0x1c9   : > { %v3974_v39 = vunpack.c.l.b16 %v3892_v54  ;;  %v2601_v56 = vunpack.c.l.b16 %v2524_v58  ;;  %v3338_v23 = vrot.slane %v3337_v31, 4  ;;  %v5029_v58 = vrot.slane %v5013_v48, 9 }
 0x1ca   : > { %v3348_v50 = vrot.slane %v3347_v52, 4  ;;  %v3352_v18 = vrot.slane %v3350_v51, 5  ;;  %v3898_v31 = vrot.slane %v6198_v3, 5  ;;  %v3368_v3 = vshrl.u32 %v6217_v0, 16 }
 0x1cb   : > { %v2360_v2 = vpop.f32.mrf.mxu0  ;;  %v3999_v4 = vpack.c.b16 %v3974_v39, %v3973_v28  ;;  %v2625_v17 = vpack.c.b16 %v2601_v56, %v2600_v62  ;;  %v3343_v11 = vsel %vm5274_vm2, %v3338_v23, %v6195_v53  ;;  %v3357_v53 = vrot.slane %v3355_v42, 4  ;;  %v5186_v23 = vld [vmem:[%s5262_s29 + $0x74] sm:$0x1] }
 0x1cc   : > { %v1694_v9 = vpop.f32.mrf.mxu3  ;;  %4920 = vmatmul.msk.bf16.gmra.mxu2 %vm676_vm3, %v5119_v29  ;;  %v1035_v24 = vpop.f32.mrf.mxu1  ;;  %v3360_v39 = vrot.slane %v3358_v27, 5  ;;  %v3565_v48 = vunpack.c.l.b16 %v3343_v11 }
 0x1cd   : > { %v1734_v16 = vadd.f32 %v1694_v9, %v1435_v1  ;;  %v3895_v1 = vrot.slane %v6173_v37, 5  ;;  %v5185_v37 = vld [vmem:[%s5262_s29 + $0x70] sm:$0xf]  ;;  %v1036_v28 = vadd.f32 %v1035_v24, %v5693_v12 }
 0x1ce   : > { %v2527_v52 = vrot.slane %v5185_v37, 5  ;;  %v3361_v42 = vor.u32 %v3360_v39, %v3357_v53 }
 0x1cf   : > { %v1398_v55 = vpop.f32.mrf.mxu2  ;;  %v6219_v7 = vadd.f32 %v2360_v2, %v1734_v16  ;;  %v3353_v2 = vsel %vm5274_vm2, %v3348_v50, %v3352_v18  ;;  %v3897_v16 = vrot.slane %v3895_v1, 4  ;;  %v2530_v50 = vrot.slane %v5186_v23, 5 }
 0x1d0   : > { %v1436_v29 = vadd.f32 %v1398_v55, %v1034_v30  ;;  %v3364_v30 = vshll.u32 %v6217_v0, 16  ;;  %v3896_v12 = vsel %vm5469_vm6, %v5029_v58, %v3895_v1 }
 0x1d1   : > { %4996 = vmatmul.msk.bf16.gmra.mxu3 %vm676_vm3, %v3589_v21  ;;  %v4754_v21 = vld [vmem:[%s5262_s29 + $0x6c] sm:$0xe]  ;;  %v3899_v24 = vsel %vm5469_vm6, %v3897_v16, %v3898_v31  ;;  %v3975_v31 = vunpack.c.l.b16 %v3896_v12  ;;  %v3362_v16 = vrot.slane %v3361_v42, 4 }
 0x1d2   : > { %v4770_v62 = vrot.slane %v4754_v21, 9  ;;  %v3366_v27 = vrot.slane %v3364_v30, 5  ;;  %v4956_v21 = vld [vmem:[%s5262_s29 + $0x80] sm:$0x1] }
 0x1d3   : > { %v2363_v8 = vpop.f32.mrf.mxu0  ;;  %v3374_v53 = vshll.u32 %v4956_v21, 16 }
 0x1d4   : > { %v1697_v54 = vpop.f32.mrf.mxu3  ;;  %v1038_v9 = vpop.f32.mrf.mxu1 }
 0x1d5   : > { %v1735_v51 = vadd.f32 %v1697_v54, %v1436_v29  ;;  %v2529_v29 = vrot.slane %v2527_v52, 4 }
 0x1d6   : > { %5056 = vmatmul.msk.bf16.gmra.mxu0 %vm676_vm3, %v3999_v4  ;;  %v3566_v4 = vunpack.c.l.b16 %v3353_v2  ;;  %v1039_v2 = vadd.f32 %v1038_v9, %v5715_v63  ;;  %v3367_v63 = vsel %vm5274_vm2, %v3362_v16, %v3366_v27 }
 0x1d7   : > { %v1400_v55 = vpop.f32.mrf.mxu2  ;;  %4797 = vmatmul.msk.bf16.gmra.mxu1 %vm676_vm3, %v2625_v17  ;;  %v6236_v18 = vadd.f32 %v2363_v8, %v1735_v51  ;;  %v3370_v17 = vrot.slane %v3368_v3, 4  ;;  %v2528_v8 = vsel %vm5469_vm6, %v4770_v62, %v2527_v52  ;;  %v2531_v1 = vsel %vm5469_vm6, %v2529_v29, %v2530_v50  ;;  %v6256_v50 = vld [vmem:[%s5262_s29 + $0x88] sm:$0xf] }
 0x1d8   : > { %v1437_v56 = vadd.f32 %v1400_v55, %v1036_v28  ;;  %v3590_v58 = vpack.c.b16 %v3566_v4, %v3565_v48  ;;  %v3976_v51 = vunpack.c.l.b16 %v3899_v24  ;;  %v2602_v3 = vunpack.c.l.b16 %v2528_v8 }
 0x1d9   : > { %6677 = vst [vmem:[#allocation4_spill] sm:$0xff] %v6236_v18  ;;  %v3371_v30 = vor.u32 %v3370_v17, %v3366_v27  ;;  %v2603_v55 = vunpack.c.l.b16 %v2531_v1  ;;  %v4957_v18 = vld [vmem:[%s5262_s29 + $0x84] sm:$0xf]  ;;  %v3902_v62 = vrot.slane %v6217_v0, 5  ;;  %v3905_v8 = vrot.slane %v4956_v21, 5 }
 0x1da   : > { %v4000_v52 = vpack.c.b16 %v3976_v51, %v3975_v31  ;;  %v3379_v12 = vshrl.u32 %v4957_v18, 16  ;;  %v3382_v24 = vshll.u32 %v4957_v18, 16  ;;  %v4755_v1 = vld [vmem:[%s5262_s29 + $0x78] sm:$0xe]  ;;  %v3388_v51 = vshll.u32 %v6256_v50, 16 }
 0x1db   : > { %v2365_v54 = vpop.f32.mrf.mxu0  ;;  %v3372_v9 = vrot.slane %v3371_v30, 4  ;;  %v2626_v4 = vpack.c.b16 %v2603_v55, %v2602_v3  ;;  %v3904_v27 = vrot.slane %v3902_v62, 4  ;;  %v4771_v30 = vrot.slane %v4755_v1, 9  ;;  %v5121_v55 = vld [vmem:[%s5262_s29 + $0x78] sm:$0xff] }
 0x1dc   : > { %v1699_v37 = vpop.f32.mrf.mxu3  ;;  %4921 = vmatmul.msk.bf16.gmra.mxu2 %vm676_vm3, %v5120_v57  ;;  %v1040_v28 = vpop.f32.mrf.mxu1  ;;  %v5014_v57 = vld [vmem:[%s5262_s29 + $0x78] sm:$0xe] }
 0x1dd   : > { %v1736_v11 = vadd.f32 %v1699_v37, %v1437_v56  ;;  %v3376_v56 = vrot.slane %v3374_v53, 5  ;;  %v5030_v29 = vrot.slane %v5014_v57, 9  ;;  %v1041_v18 = vadd.f32 %v1040_v28, %v5732_v40 }
 0x1de   : > { %v3381_v53 = vrot.slane %v3379_v12, 4 }
 0x1df   : > { %v1403_v39 = vpop.f32.mrf.mxu2  ;;  %v6258_v42 = vadd.f32 %v2365_v54, %v1736_v11  ;;  %v3377_v54 = vsel %vm5274_vm2, %v3372_v9, %v3376_v56  ;;  %v3567_v11 = vunpack.c.l.b16 %v3367_v63  ;;  %v3903_v16 = vsel %vm5469_vm6, %v5030_v29, %v3902_v62 }
 0x1e0   : > { %v1438_v23 = vadd.f32 %v1403_v39, %v1039_v2  ;;  %v3392_v2 = vshrl.u32 %v6256_v50, 16  ;;  %v3384_v39 = vrot.slane %v3382_v24, 5  ;;  %v3568_v28 = vunpack.c.l.b16 %v3377_v54 }
 0x1e1   : > { %4997 = vmatmul.msk.bf16.gmra.mxu3 %vm676_vm3, %v3590_v58  ;;  %v5187_v58 = vld [vmem:[%s5262_s29 + $0x7c] sm:$0xf]  ;;  %v3906_v63 = vsel %vm5469_vm6, %v3904_v27, %v3905_v8  ;;  %v6277_v9 = vrot.slane %v3388_v51, 5  ;;  %v3977_v29 = vunpack.c.l.b16 %v3903_v16 }
 0x1e2   : > { %v2534_v0 = vrot.slane %v5187_v58, 5  ;;  %v3394_v56 = vrot.slane %v3392_v2, 4  ;;  %v3978_v24 = vunpack.c.l.b16 %v3906_v63  ;;  %v3385_v1 = vor.u32 %v3384_v39, %v3381_v53  ;;  %v5015_v2 = vld [vmem:[%s5262_s29 + $0x84] sm:$0xe]  ;;  %v6291_v63 = vld [vmem:[%s5262_s29 + $0x94] sm:$0xf] }
 0x1e3   : > { %v2368_v48 = vpop.f32.mrf.mxu0 }
 0x1e4   : > { %v1702_v17 = vpop.f32.mrf.mxu3  ;;  %v2703_v37 = vpop.f32.mrf.mxu1  ;;  %v2536_v57 = vrot.slane %v2534_v0, 4  ;;  %v3395_v27 = vor.u32 %v3394_v56, %v6277_v9 }
 0x1e5   : > { %v1737_v31 = vadd.f32 %v1702_v17, %v1438_v23  ;;  %v5188_v23 = vld [vmem:[%s5262_s29 + $0x80] sm:$0x1]  ;;  %v2783_v54 = vadd.f32 %v2703_v37, %v5749_v49 }
 0x1e6   : > { %5057 = vmatmul.msk.bf16.gmra.mxu0 %vm676_vm3, %v4000_v52  ;;  %v2537_v52 = vrot.slane %v5188_v23, 5  ;;  %v4960_v23 = vld [vmem:[%s5262_s29 + $0x90] sm:$0xf]  ;;  %v3396_v53 = vrot.slane %v3395_v27, 4 }
 0x1e7   : > { %v1405_v21 = vpop.f32.mrf.mxu2  ;;  %4798 = vmatmul.msk.bf16.gmra.mxu1 %vm676_vm3, %v2626_v4  ;;  %v6273_v40 = vadd.f32 %v2368_v48, %v1737_v31  ;;  %v4959_v4 = vld [vmem:[%s5262_s29 + $0x8c] sm:$0x1]  ;;  %v2535_v48 = vsel %vm5469_vm6, %v4771_v30, %v2534_v0  ;;  %v3591_v31 = vpack.c.b16 %v3568_v28, %v3567_v11  ;;  %v4001_v0 = vpack.c.b16 %v3978_v24, %v3977_v29 }
 0x1e8   : > { %v1439_v3 = vadd.f32 %v1405_v21, %v1041_v18  ;;  %v2538_v8 = vsel %vm5469_vm6, %v2536_v57, %v2537_v52  ;;  %v3398_v51 = vshll.u32 %v4959_v4, 16  ;;  %v3909_v18 = vrot.slane %v6256_v50, 5 }
 0x1e9   : > { %v2604_v16 = vunpack.c.l.b16 %v2535_v48  ;;  %v3386_v30 = vrot.slane %v3385_v1, 4  ;;  %v3912_v50 = vrot.slane %v4959_v4, 5  ;;  %v3403_v52 = vshrl.u32 %v4960_v23, 16  ;;  %v5189_v48 = vld [vmem:[%s5262_s29 + $0x88] sm:$0xf] }
 0x1ea   : > { %v3400_v39 = vrot.slane %v3398_v51, 5  ;;  %v3911_v57 = vrot.slane %v3909_v18, 4  ;;  %v3406_v56 = vshll.u32 %v4960_v23, 16  ;;  %v3412_v29 = vshll.u32 %v6291_v63, 16  ;;  %v6302_v4 = vld [vmem:[%s6669_s2] ss:$0 sm:$0xff] }
 0x1eb   : > { %v2370_v62 = vpop.f32.mrf.mxu0  ;;  %v3416_v1 = vshrl.u32 %v6291_v63, 16 }
 0x1ec   : > { %v1704_v12 = vpop.f32.mrf.mxu3  ;;  %4922 = vmatmul.msk.bf16.gmra.mxu2 %vm676_vm3, %v5121_v55  ;;  %v2705_v17 = vpop.f32.mrf.mxu1  ;;  %v2605_v55 = vunpack.c.l.b16 %v2538_v8  ;;  %v2541_v8 = vrot.slane %v5189_v48, 5  ;;  %v3401_v27 = vsel %vm5274_vm2, %v3396_v53, %v3400_v39  ;;  %v6317_v23 = vrot.slane %v3412_v29, 5  ;;  %v5190_v53 = vld [vmem:[%s5262_s29 + $0x8c] sm:$0x1] }
 0x1ed   : > { %v1738_v58 = vadd.f32 %v1704_v12, %v1439_v3  ;;  %v5031_v3 = vrot.slane %v5015_v2, 9  ;;  %v3913_v2 = vsel %vm5469_vm6, %v3911_v57, %v3912_v50  ;;  %v2544_v39 = vrot.slane %v5190_v53, 5  ;;  %v6343_v53 = vld [vmem:[%s5262_s29 + $0xa0] sm:$0xf] }
 0x1ee   : > { %v2627_v28 = vpack.c.b16 %v2605_v55, %v2604_v16  ;;  %v2784_v16 = vadd.f32 %v2705_v17, %v5762_v43  ;;  %v3408_v55 = vrot.slane %v3406_v56, 5  ;;  %v6324_v43 = vld [vmem:[%s5262_s29 + $0x98] sm:$0x1]  ;;  %v3980_v56 = vunpack.c.l.b16 %v3913_v2 }
 0x1ef   : > { %v3002_v21 = vpop.f32.mrf.mxu2  ;;  %v6294_v49 = vadd.f32 %v2370_v62, %v1738_v58  ;;  %v3391_v62 = vsel %vm5274_vm2, %v3386_v30, %v6277_v9  ;;  %v4756_v58 = vld [vmem:[%s5262_s29 + $0x84] sm:$0xe]  ;;  %v3910_v51 = vsel %vm5469_vm6, %v5031_v3, %v3909_v18  ;;  %v3418_v18 = vrot.slane %v3416_v1, 4 }
 0x1f0   : > { %v3082_v11 = vadd.f32 %v3002_v21, %v2783_v54  ;;  %v3405_v54 = vrot.slane %v3403_v52, 4  ;;  %v4772_v30 = vrot.slane %v4756_v58, 9  ;;  %v3569_v50 = vunpack.c.l.b16 %v3391_v62 }
 0x1f1   : > { %4998 = vmatmul.msk.bf16.gmra.mxu3 %vm676_vm3, %v3591_v31  ;;  %v3570_v52 = vunpack.c.l.b16 %v3401_v27  ;;  %v3419_v62 = vor.u32 %v3418_v18, %v6317_v23  ;;  %v3422_v2 = vshll.u32 %v6324_v43, 16 }
 0x1f2   : > { %v2542_v48 = vsel %vm5469_vm6, %v4772_v30, %v2541_v8  ;;  %v4963_v30 = vld [vmem:[%s5262_s29 + $0x9c] sm:$0xf] }
 0x1f3   : > { %v4078_v37 = vpop.f32.mrf.mxu0 }
 0x1f4   : > { %v3668_v12 = vpop.f32.mrf.mxu3  ;;  %v2708_v24 = vpop.f32.mrf.mxu1 }
 0x1f5   : > { %v3748_v31 = vadd.f32 %v3668_v12, %v3082_v11  ;;  %v2543_v11 = vrot.slane %v2541_v8, 4 }
 0x1f6   : > { %5058 = vmatmul.msk.bf16.gmra.mxu0 %vm676_vm3, %v4001_v0  ;;  %v5122_v0 = vld [vmem:[%s5262_s29 + $0x84] sm:$0xff] }
 0x1f7   : > { %v4158_v21 = vadd.f32 %v4078_v37, %v3748_v31  ;;  %v3004_v9 = vpop.f32.mrf.mxu2  ;;  %4799 = vmatmul.msk.bf16.gmra.mxu1 %vm676_vm3, %v2627_v28  ;;  %v3979_v28 = vunpack.c.l.b16 %v3910_v51  ;;  %v2545_v1 = vsel %vm5469_vm6, %v2543_v11, %v2544_v39  ;;  %v3409_v31 = vor.u32 %v3408_v55, %v3405_v54 }
 0x1f8   : > { %v3083_v57 = vadd.f32 %v3004_v9, %v2784_v16  ;;  %v3592_v51 = vpack.c.b16 %v3570_v52, %v3569_v50  ;;  %v2785_v16 = vadd.f32 %v2708_v24, %v5775_v19  ;;  %v2607_v8 = vunpack.c.l.b16 %v2545_v1 }
 0x1f9   : > { %v4194_v3 = vadd.f32 %v6302_v4, %v4158_v21  ;;  %v4002_v54 = vpack.c.b16 %v3980_v56, %v3979_v28  ;;  %v3410_v55 = vrot.slane %v3409_v31, 4  ;;  %v3420_v11 = vrot.slane %v3419_v62, 4 }
 0x1fa   : > { %v3916_v19 = vrot.slane %v6291_v63, 5  ;;  %v3427_v24 = vshrl.u32 %v4963_v30, 16  ;;  %v3430_v50 = vshll.u32 %v4963_v30, 16  ;;  %v3436_v52 = vshll.u32 %v6343_v53, 16  ;;  %v4757_v63 = vld [vmem:[%s5262_s29 + $0x90] sm:$0xe] }
 0x1fb   : > { %v4226_v17 = vmax.f32 %v4194_v3, 0.0  ;;  %v4080_v37 = vpop.f32.mrf.mxu0  ;;  %v3424_v3 = vrot.slane %v3422_v2, 5  ;;  %v3415_v1 = vsel %vm5274_vm2, %v3410_v55, %v6317_v23  ;;  %v3919_v62 = vrot.slane %v6324_v43, 5 }
 0x1fc   : > { %v3670_v29 = vpop.f32.mrf.mxu3  ;;  %4923 = vmatmul.msk.bf16.gmra.mxu2 %vm676_vm3, %v5122_v0  ;;  %v2710_v12 = vpop.f32.mrf.mxu1  ;;  %v2606_v0 = vunpack.c.l.b16 %v2542_v48  ;;  %v6360_v23 = vrot.slane %v3436_v52, 5 }
 0x1fd   : > { %v4258_v58 = vpack.c.bf16 %v4226_v17, %v4226_v17  ;;  %v3749_v27 = vadd.f32 %v3670_v29, %v3083_v57  ;;  %v5016_v57 = vld [vmem:[%s5262_s29 + $0x90] sm:$0xe]  ;;  %v3440_v17 = vshrl.u32 %v6343_v53, 16  ;;  %v2786_v30 = vadd.f32 %v2710_v12, %v5788_v15 }
 0x1fe   : > { %v2628_v56 = vpack.c.b16 %v2607_v8, %v2606_v0  ;;  %v5032_v31 = vrot.slane %v5016_v57, 9  ;;  %v3432_v0 = vrot.slane %v3430_v50, 5 }
 0x1ff   : > { %4291 = vst.msk [vmem:[%s6329_s8] sm:$0xf] %vm4290_vm7, %v4258_v58  ;;  %v4159_v21 = vadd.f32 %v4080_v37, %v3749_v27  ;;  %v3007_v9 = vpop.f32.mrf.mxu2  ;;  %v5191_v58 = vld [vmem:[%s5262_s29 + $0x94] sm:$0xf]  ;;  %v3442_v8 = vrot.slane %v3440_v17, 4 }
 0x200   : > { %v3084_v18 = vadd.f32 %v3007_v9, %v2785_v16  ;;  %v2548_v27 = vrot.slane %v5191_v58, 5  ;;  %v3918_v16 = vrot.slane %v3916_v19, 4  ;;  %v3429_v9 = vrot.slane %v3427_v24, 4 }
 0x201   : > { %v4195_v39 = vadd.f32 %v6302_v4, %v4159_v21  ;;  %4999 = vmatmul.msk.bf16.gmra.mxu3 %vm676_vm3, %v3592_v51  ;;  %v3425_v21 = vsel %vm5274_vm2, %v3420_v11, %v3424_v3  ;;  %v5123_v11 = vld [vmem:[%s5262_s29 + $0x90] sm:$0xff]  ;;  %v3571_v3 = vunpack.c.l.b16 %v3415_v1 }
 0x202   : > { %v2550_v57 = vrot.slane %v2548_v27, 4  ;;  %v3572_v17 = vunpack.c.l.b16 %v3425_v21  ;;  %v3920_v15 = vsel %vm5469_vm6, %v3918_v16, %v3919_v62  ;;  %v3433_v12 = vor.u32 %v3432_v0, %v3429_v9 }
 0x203   : > { %v4227_v37 = vmax.f32 %v4195_v39, 0.0  ;;  %v4083_v28 = vpop.f32.mrf.mxu0  ;;  %v4773_v39 = vrot.slane %v4757_v63, 9  ;;  %v3982_v16 = vunpack.c.l.b16 %v3920_v15 }
 0x204   : > { %v3673_v29 = vpop.f32.mrf.mxu3  ;;  %v2713_v48 = vpop.f32.mrf.mxu1  ;;  %v3593_v21 = vpack.c.b16 %v3572_v17, %v3571_v3  ;;  %v3434_v0 = vrot.slane %v3433_v12, 4 }
 0x205   : > { %v4259_v51 = vpack.c.bf16 %v4227_v37, %v4227_v37  ;;  %v3750_v2 = vadd.f32 %v3673_v29, %v3084_v18  ;;  %v6367_v18 = vld [vmem:[%s5262_s29 + $0xa4] sm:$0x1]  ;;  %v3917_v37 = vsel %vm5469_vm6, %v5032_v31, %v3916_v19  ;;  %v2549_v63 = vsel %vm5469_vm6, %v4773_v39, %v2548_v27 }
 0x206   : > { %5059 = vmatmul.msk.bf16.gmra.mxu0 %vm676_vm3, %v4002_v54  ;;  %v5192_v54 = vld [vmem:[%s5262_s29 + $0x98] sm:$0x1]  ;;  %v2608_v9 = vunpack.c.l.b16 %v2549_v63  ;;  %v3926_v17 = vrot.slane %v6367_v18, 5  ;;  %v5193_v63 = vld [vmem:[%s5262_s29 + $0xa0] sm:$0xf] }
 0x207   : > { %4292 = vst.msk [vmem:[%s6329_s8 + $0x4] sm:$0xf] %vm4290_vm7, %v4259_v51  ;;  %v4160_v43 = vadd.f32 %v4083_v28, %v3750_v2  ;;  %v3009_v55 = vpop.f32.mrf.mxu2  ;;  %4800 = vmatmul.msk.bf16.gmra.mxu1 %vm676_vm3, %v2628_v56  ;;  %v2551_v24 = vrot.slane %v5192_v54, 5  ;;  %v3443_v28 = vor.u32 %v3442_v8, %v6360_v23  ;;  %v3446_v56 = vshll.u32 %v6367_v18, 16  ;;  %v4966_v54 = vld [vmem:[%s5262_s29 + $0xa8] sm:$0xf] }
 0x208   : > { %v3085_v52 = vadd.f32 %v3009_v55, %v2786_v30  ;;  %v3981_v51 = vunpack.c.l.b16 %v3917_v37  ;;  %v2787_v30 = vadd.f32 %v2713_v48, %v5801_v60 }
 0x209   : > { %v4196_v50 = vadd.f32 %v6302_v4, %v4160_v43  ;;  %v2552_v31 = vsel %vm5469_vm6, %v2550_v57, %v2551_v24  ;;  %v3444_v8 = vrot.slane %v3443_v28, 4  ;;  %v3448_v43 = vrot.slane %v3446_v56, 5 }
 0x20a   : > { %v2609_v39 = vunpack.c.l.b16 %v2552_v31  ;;  %v3923_v57 = vrot.slane %v6343_v53, 5  ;;  %v4003_v3 = vpack.c.b16 %v3982_v16, %v3981_v51  ;;  %v6398_v53 = vld [vmem:[%s5262_s29 + $0xac] sm:$0xf]  ;;  %v3451_v56 = vshrl.u32 %v4966_v54, 16 }
 0x20b   : > { %v4228_v29 = vmax.f32 %v4196_v50, 0.0  ;;  %v4085_v1 = vpop.f32.mrf.mxu0  ;;  %v3449_v60 = vsel %vm5274_vm2, %v3444_v8, %v3448_v43  ;;  %v3464_v18 = vshrl.u32 %v6398_v53, 16 }
 0x20c   : > { %v3675_v58 = vpop.f32.mrf.mxu3  ;;  %4924 = vmatmul.msk.bf16.gmra.mxu2 %vm676_vm3, %v5123_v11  ;;  %v2715_v19 = vpop.f32.mrf.mxu1  ;;  %v5017_v11 = vld [vmem:[%s5262_s29 + $0x9c] sm:$0xe]  ;;  %v2629_v12 = vpack.c.b16 %v2609_v39, %v2608_v9  ;;  %v3925_v28 = vrot.slane %v3923_v57, 4  ;;  %v3574_v16 = vunpack.c.l.b16 %v3449_v60 }
 0x20d   : > { %v4260_v62 = vpack.c.bf16 %v4228_v29, %v4228_v29  ;;  %v3751_v2 = vadd.f32 %v3675_v58, %v3085_v52  ;;  %v3439_v52 = vsel %vm5274_vm2, %v3434_v0, %v6360_v23  ;;  %v5033_v48 = vrot.slane %v5017_v11, 9 }
 0x20e   : > { %v2555_v58 = vrot.slane %v5193_v63, 5  ;;  %v3454_v23 = vshll.u32 %v4966_v54, 16  ;;  %v2788_v8 = vadd.f32 %v2715_v19, %v5814_v59  ;;  %v5194_v54 = vld [vmem:[%s5262_s29 + $0xa4] sm:$0x1]  ;;  %v3466_v60 = vrot.slane %v3464_v18, 4 }
 0x20f   : > { %4293 = vst.msk [vmem:[%s6329_s8 + $0x8] sm:$0xf] %vm4290_vm7, %v4260_v62  ;;  %v4161_v27 = vadd.f32 %v4085_v1, %v3751_v2  ;;  %v3012_v55 = vpop.f32.mrf.mxu2  ;;  %v4758_v62 = vld [vmem:[%s5262_s29 + $0x9c] sm:$0xe]  ;;  %v3460_v2 = vshll.u32 %v6398_v53, 16  ;;  %v3924_v9 = vsel %vm5469_vm6, %v5033_v48, %v3923_v57 }
 0x210   : > { %v3086_v50 = vadd.f32 %v3012_v55, %v2787_v30  ;;  %v3453_v30 = vrot.slane %v3451_v56, 4  ;;  %v5124_v55 = vld [vmem:[%s5262_s29 + $0x9c] sm:$0xff]  ;;  %v4774_v39 = vrot.slane %v4758_v62, 9  ;;  %v2557_v11 = vrot.slane %v2555_v58, 4  ;;  %v6419_v59 = vld [vmem:[%s5262_s29 + $0xb0] sm:$0x1] }
 0x211   : > { %v4197_v24 = vadd.f32 %v6302_v4, %v4161_v27  ;;  %5000 = vmatmul.msk.bf16.gmra.mxu3 %vm676_vm3, %v3593_v21  ;;  %v3573_v21 = vunpack.c.l.b16 %v3439_v52  ;;  %v3927_v27 = vsel %vm5469_vm6, %v3925_v28, %v3926_v17  ;;  %v6416_v52 = vrot.slane %v3460_v2, 5 }
 0x212   : > { %v3983_v17 = vunpack.c.l.b16 %v3924_v9  ;;  %v2556_v56 = vsel %vm5469_vm6, %v4774_v39, %v2555_v58  ;;  %v3470_v62 = vshll.u32 %v6419_v59, 16  ;;  %v4969_v58 = vld [vmem:[%s5262_s29 + $0xb4] sm:$0xf] }
 0x213   : > { %v4229_v37 = vmax.f32 %v4197_v24, 0.0  ;;  %v4088_v15 = vpop.f32.mrf.mxu0  ;;  %v2558_v24 = vrot.slane %v5194_v54, 5  ;;  %v3475_v54 = vshrl.u32 %v4969_v58, 16 }
 0x214   : > { %v3678_v29 = vpop.f32.mrf.mxu3  ;;  %v2718_v1 = vpop.f32.mrf.mxu1  ;;  %v3472_v39 = vrot.slane %v3470_v62, 5 }
 0x215   : > { %v4261_v51 = vpack.c.bf16 %v4229_v37, %v4229_v37  ;;  %v3752_v31 = vadd.f32 %v3678_v29, %v3086_v50  ;;  %v3594_v37 = vpack.c.b16 %v3574_v16, %v3573_v21  ;;  %v2559_v29 = vsel %vm5469_vm6, %v2557_v11, %v2558_v24  ;;  %v5018_v11 = vld [vmem:[%s5262_s29 + $0xa8] sm:$0xe] }
 0x216   : > { %5060 = vmatmul.msk.bf16.gmra.mxu0 %vm676_vm3, %v4003_v3  ;;  %v3456_v3 = vrot.slane %v3454_v23, 5  ;;  %v2789_v18 = vadd.f32 %v2718_v1, %v5827_v44  ;;  %v2610_v16 = vunpack.c.l.b16 %v2556_v56  ;;  %v2611_v9 = vunpack.c.l.b16 %v2559_v29 }
 0x217   : > { %4294 = vst.msk [vmem:[%s6329_s8 + $0xc] sm:$0xf] %vm4290_vm7, %v4261_v51  ;;  %v4162_v0 = vadd.f32 %v4088_v15, %v3752_v31  ;;  %v3014_v43 = vpop.f32.mrf.mxu2  ;;  %4801 = vmatmul.msk.bf16.gmra.mxu1 %vm676_vm3, %v2629_v12  ;;  %v3984_v12 = vunpack.c.l.b16 %v3927_v27  ;;  %v3467_v31 = vor.u32 %v3466_v60, %v6416_v52  ;;  %v3478_v24 = vshll.u32 %v4969_v58, 16  ;;  %v5125_v58 = vld [vmem:[%s5262_s29 + $0xa8] sm:$0xff] }
 0x218   : > { %v3087_v50 = vadd.f32 %v3014_v43, %v2788_v8  ;;  %v3457_v63 = vor.u32 %v3456_v3, %v3453_v30  ;;  %v3930_v60 = vrot.slane %v6398_v53, 5  ;;  %v3477_v53 = vrot.slane %v3475_v54, 4 }
 0x219   : > { %v4198_v57 = vadd.f32 %v6302_v4, %v4162_v0  ;;  %v6433_v0 = vld [vmem:[%s5262_s29 + $0xb8] sm:$0xf]  ;;  %v4004_v8 = vpack.c.b16 %v3984_v12, %v3983_v17  ;;  %v5195_v17 = vld [vmem:[%s5262_s29 + $0xac] sm:$0xf] }
 0x21a   : > { %v3458_v43 = vrot.slane %v3457_v63, 4  ;;  %v3484_v44 = vshll.u32 %v6433_v0, 16  ;;  %v3488_v1 = vshrl.u32 %v6433_v0, 16 }
 0x21b   : > { %v4230_v19 = vmax.f32 %v4198_v57, 0.0  ;;  %v4090_v48 = vpop.f32.mrf.mxu0 }
 0x21c   : > { %v3680_v15 = vpop.f32.mrf.mxu3  ;;  %4925 = vmatmul.msk.bf16.gmra.mxu2 %vm676_vm3, %v5124_v55  ;;  %v2720_v28 = vpop.f32.mrf.mxu1  ;;  %v3468_v55 = vrot.slane %v3467_v31, 4  ;;  %v3463_v29 = vsel %vm5274_vm2, %v3458_v43, %v6416_v52  ;;  %v6449_v31 = vrot.slane %v3484_v44, 5  ;;  %v3490_v62 = vrot.slane %v3488_v1, 4 }
 0x21d   : > { %v4262_v23 = vpack.c.bf16 %v4230_v19, %v4230_v19  ;;  %v3753_v51 = vadd.f32 %v3680_v15, %v3087_v50  ;;  %v2630_v50 = vpack.c.b16 %v2611_v9, %v2610_v16  ;;  %v2562_v15 = vrot.slane %v5195_v17, 5  ;;  %v6457_v9 = vld [vmem:[%s5262_s29 + $0xbc] sm:$0x1] }
 0x21e   : > { %v3473_v63 = vsel %vm5274_vm2, %v3468_v55, %v3472_v39  ;;  %v3932_v52 = vrot.slane %v3930_v60, 4  ;;  %v3933_v16 = vrot.slane %v6419_v59, 5  ;;  %v3494_v59 = vshll.u32 %v6457_v9, 16 }
 0x21f   : > { %4295 = vst.msk [vmem:[%s6329_s8 + $0x10] sm:$0xf] %vm4290_vm7, %v4262_v23  ;;  %v4163_v2 = vadd.f32 %v4090_v48, %v3753_v51  ;;  %v3017_v21 = vpop.f32.mrf.mxu2  ;;  %v4759_v23 = vld [vmem:[%s5262_s29 + $0xa8] sm:$0xe]  ;;  %v3480_v51 = vrot.slane %v3478_v24, 5  ;;  %v2564_v43 = vrot.slane %v2562_v15, 4  ;;  %v3576_v54 = vunpack.c.l.b16 %v3473_v63 }
 0x220   : > { %v3088_v30 = vadd.f32 %v3017_v21, %v2789_v18  ;;  %v2790_v18 = vadd.f32 %v2720_v28, %v5840_v33  ;;  %v3491_v24 = vor.u32 %v3490_v62, %v6449_v31 }
 0x221   : > { %v4199_v27 = vadd.f32 %v6302_v4, %v4163_v2  ;;  %5001 = vmatmul.msk.bf16.gmra.mxu3 %vm676_vm3, %v3594_v37  ;;  %v5034_v37 = vrot.slane %v5018_v11, 9  ;;  %v3575_v11 = vunpack.c.l.b16 %v3463_v29  ;;  %v3481_v28 = vor.u32 %v3480_v51, %v3477_v53 }
 0x222   : > { %v3496_v53 = vrot.slane %v3494_v59, 5 }
 0x223   : > { %v4231_v3 = vmax.f32 %v4199_v27, 0.0  ;;  %v4093_v57 = vpop.f32.mrf.mxu0  ;;  %v5196_v27 = vld [vmem:[%s5262_s29 + $0xb0] sm:$0x1]  ;;  %v3931_v33 = vsel %vm5469_vm6, %v5034_v37, %v3930_v60  ;;  %v3482_v63 = vrot.slane %v3481_v28, 4  ;;  %v5197_v28 = vld [vmem:[%s5262_s29 + $0xb8] sm:$0xf] }
 0x224   : > { %v3683_v19 = vpop.f32.mrf.mxu3  ;;  %v2723_v48 = vpop.f32.mrf.mxu1 }
 0x225   : > { %v4263_v12 = vpack.c.bf16 %v4231_v3, %v4231_v3  ;;  %v3754_v56 = vadd.f32 %v3683_v19, %v3088_v30  ;;  %v2565_v30 = vrot.slane %v5196_v27, 5  ;;  %v3934_v3 = vsel %vm5469_vm6, %v3932_v52, %v3933_v16 }
 0x226   : > { %5061 = vmatmul.msk.bf16.gmra.mxu0 %vm676_vm3, %v4004_v8  ;;  %v4775_v8 = vrot.slane %v4759_v23, 9  ;;  %v3986_v29 = vunpack.c.l.b16 %v3934_v3  ;;  %v3492_v23 = vrot.slane %v3491_v24, 4  ;;  %v2791_v62 = vadd.f32 %v2723_v48, %v5853_v61  ;;  %v6485_v61 = vld [vmem:[%s5262_s29 + $0xc4] sm:$0xf] }
 0x227   : > { %4296 = vst.msk [vmem:[%s6329_s8 + $0x14] sm:$0xf] %vm4290_vm7, %v4263_v12  ;;  %v4164_v2 = vadd.f32 %v4093_v57, %v3754_v56  ;;  %v3019_v21 = vpop.f32.mrf.mxu2  ;;  %4802 = vmatmul.msk.bf16.gmra.mxu1 %vm676_vm3, %v2630_v50  ;;  %v2566_v60 = vsel %vm5469_vm6, %v2564_v43, %v2565_v30  ;;  %v3595_v12 = vpack.c.b16 %v3576_v54, %v3575_v11  ;;  %v3985_v56 = vunpack.c.l.b16 %v3931_v33 }
 0x228   : > { %v3089_v39 = vadd.f32 %v3019_v21, %v2790_v18  ;;  %v2563_v19 = vsel %vm5469_vm6, %v4775_v8, %v2562_v15  ;;  %v2613_v18 = vunpack.c.l.b16 %v2566_v60  ;;  %v4972_v21 = vld [vmem:[%s5262_s29 + $0xc0] sm:$0xf]  ;;  %v3487_v8 = vsel %vm5274_vm2, %v3482_v63, %v6449_v31 }
 0x229   : > { %v4200_v55 = vadd.f32 %v6302_v4, %v4164_v2  ;;  %v2612_v2 = vunpack.c.l.b16 %v2563_v19  ;;  %v3497_v43 = vsel %vm5274_vm2, %v3492_v23, %v3496_v53  ;;  %v3499_v11 = vshrl.u32 %v4972_v21, 16  ;;  %v5126_v53 = vld [vmem:[%s5262_s29 + $0xb4] sm:$0xff] }
 0x22a   : > { %v2569_v24 = vrot.slane %v5197_v28, 5  ;;  %v3502_v59 = vshll.u32 %v4972_v21, 16  ;;  %v3508_v3 = vshll.u32 %v6485_v61, 16  ;;  %v3577_v19 = vunpack.c.l.b16 %v3487_v8 }
 0x22b   : > { %v4232_v44 = vmax.f32 %v4200_v55, 0.0  ;;  %v4095_v1 = vpop.f32.mrf.mxu0  ;;  %v2631_v30 = vpack.c.b16 %v2613_v18, %v2612_v2  ;;  %v5019_v55 = vld [vmem:[%s5262_s29 + $0xb4] sm:$0xe]  ;;  %v3501_v23 = vrot.slane %v3499_v11, 4 }
 0x22c   : > { %v3685_v57 = vpop.f32.mrf.mxu3  ;;  %4926 = vmatmul.msk.bf16.gmra.mxu2 %vm676_vm3, %v5125_v58  ;;  %v2725_v50 = vpop.f32.mrf.mxu1  ;;  %v4005_v58 = vpack.c.b16 %v3986_v29, %v3985_v56  ;;  %v5035_v60 = vrot.slane %v5019_v55, 9  ;;  %v3504_v18 = vrot.slane %v3502_v59, 5 }
 0x22d   : > { %v4264_v37 = vpack.c.bf16 %v4232_v44, %v4232_v44  ;;  %v3755_v17 = vadd.f32 %v3685_v57, %v3089_v39  ;;  %v3937_v39 = vrot.slane %v6433_v0, 5  ;;  %v3512_v57 = vshrl.u32 %v6485_v61, 16 }
 0x22e   : > { %v3578_v0 = vunpack.c.l.b16 %v3497_v43  ;;  %v3505_v28 = vor.u32 %v3504_v18, %v3501_v23  ;;  %v5020_v23 = vld [vmem:[%s5262_s29 + $0xc0] sm:$0xe]  ;;  %v6527_v18 = vld [vmem:[%s5262_s29 + $0xd0] sm:$0xf] }
 0x22f   : > { %4297 = vst.msk [vmem:[%s6329_s8 + $0x18] sm:$0xf] %vm4290_vm7, %v4264_v37  ;;  %v4165_v51 = vadd.f32 %v4095_v1, %v3755_v17  ;;  %v3022_v15 = vpop.f32.mrf.mxu2  ;;  %v4760_v1 = vld [vmem:[%s5262_s29 + $0xb4] sm:$0xe]  ;;  %v3940_v37 = vrot.slane %v6457_v9, 5  ;;  %v3939_v63 = vrot.slane %v3937_v39, 4  ;;  %v3938_v43 = vsel %vm5469_vm6, %v5035_v60, %v3937_v39 }
 0x230   : > { %v3090_v16 = vadd.f32 %v3022_v15, %v2791_v62  ;;  %v2571_v62 = vrot.slane %v2569_v24, 4  ;;  %v5198_v15 = vld [vmem:[%s5262_s29 + $0xbc] sm:$0x1] }
 0x231   : > { %v4201_v52 = vadd.f32 %v6302_v4, %v4165_v51  ;;  %5002 = vmatmul.msk.bf16.gmra.mxu3 %vm676_vm3, %v3595_v12  ;;  %v6678_v12 = vld [vmem:[#allocation2_spill] sm:$0xff]  ;;  %v4776_v51 = vrot.slane %v4760_v1, 9  ;;  %v2572_v2 = vrot.slane %v5198_v15, 5  ;;  %v3987_v1 = vunpack.c.l.b16 %v3938_v43 }
 0x232   : > { %v2792_v56 = vadd.f32 %v2725_v50, %v6678_v12  ;;  %v3944_v15 = vrot.slane %v6485_v61, 5  ;;  %v4761_v61 = vld [vmem:[%s5262_s29 + $0xc0] sm:$0xe] }
 0x233   : > { %v4233_v48 = vmax.f32 %v4201_v52, 0.0  ;;  %v4098_v27 = vpop.f32.mrf.mxu0  ;;  %v6502_v52 = vrot.slane %v3508_v3, 5  ;;  %v2570_v11 = vsel %vm5469_vm6, %v4776_v51, %v2569_v24 }
 0x234   : > { %v3688_v54 = vpop.f32.mrf.mxu3  ;;  %v2728_v33 = vpop.f32.mrf.mxu1  ;;  %v2614_v60 = vunpack.c.l.b16 %v2570_v11 }
 0x235   : > { %v4265_v31 = vpack.c.bf16 %v4233_v48, %v4233_v48  ;;  %v3756_v44 = vadd.f32 %v3688_v54, %v3090_v16  ;;  %v3514_v16 = vrot.slane %v3512_v57, 4  ;;  %v3941_v48 = vsel %vm5469_vm6, %v3939_v63, %v3940_v37 }
 0x236   : > { %5062 = vmatmul.msk.bf16.gmra.mxu0 %vm676_vm3, %v4005_v58  ;;  %v6505_v58 = vld [vmem:[%s5262_s29 + $0xc8] sm:$0x1]  ;;  %v2573_v54 = vsel %vm5469_vm6, %v2571_v62, %v2572_v2  ;;  %v3988_v3 = vunpack.c.l.b16 %v3941_v48  ;;  %v4975_v2 = vld [vmem:[%s5262_s29 + $0xcc] sm:$0xf] }
 0x237   : > { %4298 = vst.msk [vmem:[%s6329_s8 + $0x1c] sm:$0xf] %vm4290_vm7, %v4265_v31  ;;  %v4166_v17 = vadd.f32 %v4098_v27, %v3756_v44  ;;  %v3024_v29 = vpop.f32.mrf.mxu2  ;;  %4803 = vmatmul.msk.bf16.gmra.mxu1 %vm676_vm3, %v2631_v30  ;;  %v3596_v30 = vpack.c.b16 %v3578_v0, %v3577_v19  ;;  %v3515_v44 = vor.u32 %v3514_v16, %v6502_v52  ;;  %v3518_v39 = vshll.u32 %v6505_v58, 16  ;;  %v6679_v19 = vld [vmem:[#allocation3_spill] sm:$0xff] }
 0x238   : > { %v3091_v9 = vadd.f32 %v3024_v29, %v2792_v56  ;;  %v2793_v0 = vadd.f32 %v2728_v33, %v6679_v19  ;;  %v2615_v37 = vunpack.c.l.b16 %v2573_v54  ;;  %v5036_v16 = vrot.slane %v5020_v23, 9 }
 0x239   : > { %v4202_v21 = vadd.f32 %v6302_v4, %v4166_v17  ;;  %v3506_v17 = vrot.slane %v3505_v28, 4  ;;  %v3516_v29 = vrot.slane %v3515_v44, 4  ;;  %v3520_v63 = vrot.slane %v3518_v39, 5 }
 0x23a   : > { %v2632_v33 = vpack.c.b16 %v2615_v37, %v2614_v60  ;;  %v3523_v11 = vshrl.u32 %v4975_v2, 16  ;;  %v3526_v54 = vshll.u32 %v4975_v2, 16  ;;  %v3532_v28 = vshll.u32 %v6527_v18, 16 }
 0x23b   : > { %v4234_v50 = vmax.f32 %v4202_v21, 0.0  ;;  %v4100_v8 = vpop.f32.mrf.mxu0  ;;  %v4777_v19 = vrot.slane %v4761_v61, 9 }
 0x23c   : > { %v3690_v27 = vpop.f32.mrf.mxu3  ;;  %4927 = vmatmul.msk.bf16.gmra.mxu2 %vm676_vm3, %v5126_v53  ;;  %v2730_v55 = vpop.f32.mrf.mxu1  ;;  %v4006_v53 = vpack.c.b16 %v3988_v3, %v3987_v1  ;;  %v3947_v1 = vrot.slane %v6505_v58, 5  ;;  %v5127_v3 = vld [vmem:[%s5262_s29 + $0xc0] sm:$0xff] }
 0x23d   : > { %v4266_v59 = vpack.c.bf16 %v4234_v50, %v4234_v50  ;;  %v3757_v31 = vadd.f32 %v3690_v27, %v3091_v9  ;;  %v5199_v50 = vld [vmem:[%s5262_s29 + $0xc4] sm:$0xf]  ;;  %v3511_v27 = vsel %vm5274_vm2, %v3506_v17, %v6502_v52  ;;  %v2794_v44 = vadd.f32 %v2730_v55, %v5914_v45 }
 0x23e   : > { %v3946_v52 = vrot.slane %v3944_v15, 4  ;;  %v3945_v45 = vsel %vm5469_vm6, %v5036_v16, %v3944_v15  ;;  %v3525_v55 = vrot.slane %v3523_v11, 4 }
 0x23f   : > { %4299 = vst.msk [vmem:[%s6329_s8 + $0x20] sm:$0xf] %vm4290_vm7, %v4266_v59  ;;  %v4167_v57 = vadd.f32 %v4100_v8, %v3757_v31  ;;  %v3027_v24 = vpop.f32.mrf.mxu2  ;;  %v2576_v8 = vrot.slane %v5199_v50, 5  ;;  %v3536_v59 = vshrl.u32 %v6527_v18, 16 }
 0x240   : > { %v3092_v56 = vadd.f32 %v3027_v24, %v2793_v0  ;;  %v5200_v24 = vld [vmem:[%s5262_s29 + $0xc8] sm:$0x1] }
 0x241   : > { %v4203_v12 = vadd.f32 %v6302_v4, %v4167_v57  ;;  %5003 = vmatmul.msk.bf16.gmra.mxu3 %vm676_vm3, %v3596_v30  ;;  %v3521_v30 = vsel %vm5274_vm2, %v3516_v29, %v3520_v63  ;;  %v3579_v57 = vunpack.c.l.b16 %v3511_v27  ;;  %v2578_v0 = vrot.slane %v2576_v8, 4 }
 0x242   : > { %v2579_v60 = vrot.slane %v5200_v24, 5  ;;  %v3534_v29 = vrot.slane %v3532_v28, 5  ;;  %v3538_v63 = vrot.slane %v3536_v59, 4  ;;  %v2577_v2 = vsel %vm5469_vm6, %v4777_v19, %v2576_v8  ;;  %v5021_v24 = vld [vmem:[%s5262_s29 + $0xcc] sm:$0xe] }
 0x243   : > { %v4235_v51 = vmax.f32 %v4203_v12, 0.0  ;;  %v4103_v62 = vpop.f32.mrf.mxu0  ;;  %v3580_v12 = vunpack.c.l.b16 %v3521_v30  ;;  %v2616_v59 = vunpack.c.l.b16 %v2577_v2 }
 0x244   : > { %v3693_v21 = vpop.f32.mrf.mxu3  ;;  %v2733_v9 = vpop.f32.mrf.mxu1  ;;  %v2580_v15 = vsel %vm5469_vm6, %v2578_v0, %v2579_v60  ;;  %v3539_v30 = vor.u32 %v3538_v63, %v3534_v29  ;;  %v3951_v60 = vrot.slane %v6527_v18, 5 }
 0x245   : > { %v4267_v43 = vpack.c.bf16 %v4235_v51, %v4235_v51  ;;  %v3758_v48 = vadd.f32 %v3693_v21, %v3092_v56  ;;  %v3528_v56 = vrot.slane %v3526_v54, 5  ;;  %v4977_v51 = vld [vmem:[%s5262_s29 + $0xd4] sm:$0x1]  ;;  %v3597_v50 = vpack.c.b16 %v3580_v12, %v3579_v57 }
 0x246   : > { %5063 = vmatmul.msk.bf16.gmra.mxu0 %vm676_vm3, %v4006_v53  ;;  %v3948_v53 = vsel %vm5469_vm6, %v3946_v52, %v3947_v1  ;;  %v3542_v61 = vshll.u32 %v4977_v51, 16  ;;  %v2795_v54 = vadd.f32 %v2733_v9, %v5925_v38  ;;  %v2617_v8 = vunpack.c.l.b16 %v2580_v15 }
 0x247   : > { %4300 = vst.msk [vmem:[%s6329_s8 + $0x24] sm:$0xf] %vm4290_vm7, %v4267_v43  ;;  %v4168_v31 = vadd.f32 %v4103_v62, %v3758_v48  ;;  %v3029_v39 = vpop.f32.mrf.mxu2  ;;  %4804 = vmatmul.msk.bf16.gmra.mxu1 %vm676_vm3, %v2632_v33  ;;  %v3989_v43 = vunpack.c.l.b16 %v3945_v45  ;;  %v3990_v48 = vunpack.c.l.b16 %v3948_v53  ;;  %v3529_v27 = vor.u32 %v3528_v56, %v3525_v55  ;;  %v5128_v53 = vld [vmem:[%s5262_s29 + $0xcc] sm:$0xff] }
 0x248   : > { %v3093_v17 = vadd.f32 %v3029_v39, %v2794_v44  ;;  %v3540_v1 = vrot.slane %v3539_v30, 4  ;;  %v2633_v0 = vpack.c.b16 %v2617_v8, %v2616_v59  ;;  %v5037_v55 = vrot.slane %v5021_v24, 9 }
 0x249   : > { %v4204_v37 = vadd.f32 %v6302_v4, %v4168_v31  ;;  %v4007_v39 = vpack.c.b16 %v3990_v48, %v3989_v43  ;;  %v3530_v52 = vrot.slane %v3529_v27, 4 }
 0x24b   : > { %v4236_v23 = vmax.f32 %v4204_v37, 0.0  ;;  %v4105_v58 = vpop.f32.mrf.mxu0  ;;  %v3535_v12 = vsel %vm5274_vm2, %v3530_v52, %v3534_v29 }
 0x24c   : > { %v3695_v62 = vpop.f32.mrf.mxu3  ;;  %4928 = vmatmul.msk.bf16.gmra.mxu2 %vm676_vm3, %v5127_v3  ;;  %v2735_v33 = vpop.f32.mrf.mxu1  ;;  %v3544_v3 = vrot.slane %v3542_v61, 5  ;;  %v3581_v29 = vunpack.c.l.b16 %v3535_v12 }
 0x24d   : > { %v4268_v21 = vpack.c.bf16 %v4236_v23, %v4236_v23  ;;  %v3759_v16 = vadd.f32 %v3695_v62, %v3093_v17  ;;  %v2796_v63 = vadd.f32 %v2735_v33, %v5941_v36  ;;  %v3953_v23 = vrot.slane %v3951_v60, 4 }
 0x24e   : > { %v3545_v45 = vsel %vm5274_vm2, %v3540_v1, %v3544_v3 }
 0x24f   : > { %4301 = vst.msk [vmem:[%s6329_s8 + $0x28] sm:$0xf] %vm4290_vm7, %v4268_v21  ;;  %v4169_v11 = vadd.f32 %v4105_v58, %v3759_v16  ;;  %v3032_v28 = vpop.f32.mrf.mxu2  ;;  %v3954_v58 = vrot.slane %v4977_v51, 5  ;;  %v3582_v15 = vunpack.c.l.b16 %v3545_v45  ;;  %v3952_v16 = vsel %vm5469_vm6, %v5037_v55, %v3951_v60 }
 0x250   : > { %v3094_v44 = vadd.f32 %v3032_v28, %v2795_v54  ;;  %v3991_v27 = vunpack.c.l.b16 %v3952_v16 }
 0x251   : > { %v4205_v31 = vadd.f32 %v6302_v4, %v4169_v11  ;;  %5004 = vmatmul.msk.bf16.gmra.mxu3 %vm676_vm3, %v3597_v50  ;;  %v3955_v36 = vsel %vm5469_vm6, %v3953_v23, %v3954_v58  ;;  %v3598_v48 = vpack.c.b16 %v3582_v15, %v3581_v29 }
 0x252   : > { %v3992_v30 = vunpack.c.l.b16 %v3955_v36 }
 0x253   : > { %v4237_v57 = vmax.f32 %v4205_v31, 0.0  ;;  %v4108_v19 = vpop.f32.mrf.mxu0 }
 0x254   : > { %v3698_v38 = vpop.f32.mrf.mxu3  ;;  %v2738_v9 = vpop.f32.mrf.mxu1  ;;  %v4008_v59 = vpack.c.b16 %v3992_v30, %v3991_v27 }
 0x255   : > { %v4269_v37 = vpack.c.bf16 %v4237_v57, %v4237_v57  ;;  %v3760_v17 = vadd.f32 %v3698_v38, %v3094_v44  ;;  %v2797_v11 = vadd.f32 %v2738_v9, %v5959_v46 }
 0x256   : > { %5064 = vmatmul.msk.bf16.gmra.mxu0 %vm676_vm3, %v4007_v39 }
 0x257   : > { %4302 = vst.msk [vmem:[%s6329_s8 + $0x2c] sm:$0xf] %vm4290_vm7, %v4269_v37  ;;  %v4170_v56 = vadd.f32 %v4108_v19, %v3760_v17  ;;  %v3034_v18 = vpop.f32.mrf.mxu2  ;;  %4805 = vmatmul.msk.bf16.gmra.mxu1 %vm676_vm3, %v2633_v0 }
 0x258   : > { %v3095_v2 = vadd.f32 %v3034_v18, %v2796_v63 }
 0x259   : > { %v4206_v62 = vadd.f32 %v6302_v4, %v4170_v56 }
 0x25b   : > { %v4238_v32 = vmax.f32 %v4206_v62, 0.0  ;;  %v4110_v21 = vpop.f32.mrf.mxu0 }
 0x25c   : > { %v3700_v33 = vpop.f32.mrf.mxu3  ;;  %4929 = vmatmul.msk.bf16.gmra.mxu2 %vm676_vm3, %v5128_v53  ;;  %v2740_v50 = vpop.f32.mrf.mxu1 }
 0x25d   : > { %v4270_v51 = vpack.c.bf16 %v4238_v32, %v4238_v32  ;;  %v3761_v43 = vadd.f32 %v3700_v33, %v3095_v2  ;;  %v2798_v46 = vadd.f32 %v2740_v50, %v5979_v34 }
 0x25f   : > { %4303 = vst.msk [vmem:[%s6329_s8 + $0x30] sm:$0xf] %vm4290_vm7, %v4270_v51  ;;  %v4171_v61 = vadd.f32 %v4110_v21, %v3761_v43  ;;  %v3037_v54 = vpop.f32.mrf.mxu2 }
 0x260   : > { %v3096_v26 = vadd.f32 %v3037_v54, %v2797_v11 }
 0x261   : > { %v4207_v28 = vadd.f32 %v6302_v4, %v4171_v61  ;;  %5005 = vmatmul.msk.bf16.gmra.mxu3 %vm676_vm3, %v3598_v48 }
 0x263   : > { %v4239_v8 = vmax.f32 %v4207_v28, 0.0  ;;  %v4113_v31 = vpop.f32.mrf.mxu0 }
 0x264   : > { %v3703_v44 = vpop.f32.mrf.mxu3  ;;  %v2743_v39 = vpop.f32.mrf.mxu1 }
 0x265   : > { %v4271_v52 = vpack.c.bf16 %v4239_v8, %v4239_v8  ;;  %v3762_v1 = vadd.f32 %v3703_v44, %v3096_v26  ;;  %v2799_v45 = vadd.f32 %v2743_v39, %v5998_v13 }
 0x266   : > { %5065 = vmatmul.msk.bf16.gmra.mxu0 %vm676_vm3, %v4008_v59 }
 0x267   : > { %4304 = vst.msk [vmem:[%s6329_s8 + $0x34] sm:$0xf] %vm4290_vm7, %v4271_v52  ;;  %v4172_v3 = vadd.f32 %v4113_v31, %v3762_v1  ;;  %v3039_v57 = vpop.f32.mrf.mxu2 }
 0x268   : > { %v3097_v0 = vadd.f32 %v3039_v57, %v2798_v46 }
 0x269   : > { %v4208_v19 = vadd.f32 %v6302_v4, %v4172_v3 }
 0x26b   : > { %v4240_v24 = vmax.f32 %v4208_v19, 0.0  ;;  %v4115_v60 = vpop.f32.mrf.mxu0 }
 0x26c   : > { %v3705_v38 = vpop.f32.mrf.mxu3  ;;  %v2745_v9 = vpop.f32.mrf.mxu1 }
 0x26d   : > { %v4272_v37 = vpack.c.bf16 %v4240_v24, %v4240_v24  ;;  %v3763_v17 = vadd.f32 %v3705_v38, %v3097_v0  ;;  %v2800_v29 = vadd.f32 %v2745_v9, %v6019_v6 }
 0x26f   : > { %4305 = vst.msk [vmem:[%s6329_s8 + $0x38] sm:$0xf] %vm4290_vm7, %v4272_v37  ;;  %v4173_v12 = vadd.f32 %v4115_v60, %v3763_v17  ;;  %v3042_v55 = vpop.f32.mrf.mxu2 }
 0x270   : > { %v3098_v34 = vadd.f32 %v3042_v55, %v2799_v45 }
 0x271   : > { %v4209_v56 = vadd.f32 %v6302_v4, %v4173_v12 }
 0x273   : > { %v4241_v63 = vmax.f32 %v4209_v56, 0.0  ;;  %v4118_v18 = vpop.f32.mrf.mxu0 }
 0x274   : > { %v3708_v23 = vpop.f32.mrf.mxu3  ;;  %v2748_v58 = vpop.f32.mrf.mxu1 }
 0x275   : > { %v4273_v53 = vpack.c.bf16 %v4241_v63, %v4241_v63  ;;  %v3764_v62 = vadd.f32 %v3708_v23, %v3098_v34  ;;  %v2801_v48 = vadd.f32 %v2748_v58, %v6037_v14  ;;  %v6608_v14 = vld [vmem:[%s6669_s2] ss:$0 sm:$0xff] }
 0x277   : > { %4306 = vst.msk [vmem:[%s6329_s8 + $0x3c] sm:$0xf] %vm4290_vm7, %v4273_v53  ;;  %v4174_v2 = vadd.f32 %v4118_v18, %v3764_v62  ;;  %v3044_v15 = vpop.f32.mrf.mxu2 }
 0x278   : > { %v3099_v13 = vadd.f32 %v3044_v15, %v2800_v29 }
 0x279   : > { %v4210_v32 = vadd.f32 %v6302_v4, %v4174_v2 }
 0x27b   : > { %v4242_v21 = vmax.f32 %v4210_v32, 0.0  ;;  %v4120_v16 = vpop.f32.mrf.mxu0 }
 0x27c   : > { %v3710_v36 = vpop.f32.mrf.mxu3  ;;  %v2750_v33 = vpop.f32.mrf.mxu1 }
 0x27d   : > { %v4274_v50 = vpack.c.bf16 %v4242_v21, %v4242_v21  ;;  %v3765_v51 = vadd.f32 %v3710_v36, %v3099_v13  ;;  %v2802_v31 = vadd.f32 %v2750_v33, %v6057_v20 }
 0x27f   : > { %4307 = vst.msk [vmem:[%s6329_s8 + $0x40] sm:$0xf] %vm4290_vm7, %v4274_v50  ;;  %v4175_v43 = vadd.f32 %v4120_v16, %v3765_v51  ;;  %v3047_v27 = vpop.f32.mrf.mxu2 }
 0x280   : > { %v3100_v6 = vadd.f32 %v3047_v27, %v2801_v48 }
 0x281   : > { %v4211_v30 = vadd.f32 %v6302_v4, %v4175_v43 }
 0x283   : > { %v4243_v61 = vmax.f32 %v4211_v30, 0.0  ;;  %v4123_v11 = vpop.f32.mrf.mxu0 }
 0x284   : > { %v3713_v54 = vpop.f32.mrf.mxu3  ;;  %v2753_v28 = vpop.f32.mrf.mxu1 }
 0x285   : > { %v4275_v26 = vpack.c.bf16 %v4243_v61, %v4243_v61  ;;  %v3766_v59 = vadd.f32 %v3713_v54, %v3100_v6  ;;  %v2803_v20 = vadd.f32 %v2753_v28, %v6076_v10 }
 0x287   : > { %4308 = vst.msk [vmem:[%s6329_s8 + $0x44] sm:$0xf] %vm4290_vm7, %v4275_v26  ;;  %v4176_v8 = vadd.f32 %v4123_v11, %v3766_v59  ;;  %v3049_v44 = vpop.f32.mrf.mxu2 }
 0x288   : > { %v3101_v39 = vadd.f32 %v3049_v44, %v2802_v31 }
 0x289   : > { %v4212_v4 = vadd.f32 %v6608_v14, %v4176_v8 }
 0x28b   : > { %v4244_v52 = vmax.f32 %v4212_v4, 0.0  ;;  %v4125_v1 = vpop.f32.mrf.mxu0 }
 0x28c   : > { %v3715_v3 = vpop.f32.mrf.mxu3  ;;  %v2755_v46 = vpop.f32.mrf.mxu1 }
 0x28d   : > { %v4276_v57 = vpack.c.bf16 %v4244_v52, %v4244_v52  ;;  %v3767_v19 = vadd.f32 %v3715_v3, %v3101_v39  ;;  %v2804_v34 = vadd.f32 %v2755_v46, %v6097_v25 }
 0x28f   : > { %4309 = vst.msk [vmem:[%s6329_s8 + $0x48] sm:$0xf] %vm4290_vm7, %v4276_v57  ;;  %v4177_v0 = vadd.f32 %v4125_v1, %v3767_v19  ;;  %v3052_v24 = vpop.f32.mrf.mxu2 }
 0x290   : > { %v3102_v38 = vadd.f32 %v3052_v24, %v2803_v20 }
 0x291   : > { %v4213_v60 = vadd.f32 %v6608_v14, %v4177_v0 }
 0x293   : > { %v4245_v9 = vmax.f32 %v4213_v60, 0.0  ;;  %v4128_v37 = vpop.f32.mrf.mxu0 }
 0x294   : > { %v3718_v17 = vpop.f32.mrf.mxu3  ;;  %v2758_v12 = vpop.f32.mrf.mxu1 }
 0x295   : > { %v4277_v45 = vpack.c.bf16 %v4245_v9, %v4245_v9  ;;  %v3768_v55 = vadd.f32 %v3718_v17, %v3102_v38  ;;  %v2805_v32 = vadd.f32 %v2758_v12, %v6115_v35 }
 0x297   : > { %4310 = vst.msk [vmem:[%s6329_s8 + $0x4c] sm:$0xf] %vm4290_vm7, %v4277_v45  ;;  %v4178_v56 = vadd.f32 %v4128_v37, %v3768_v55  ;;  %v3054_v63 = vpop.f32.mrf.mxu2 }
 0x298   : > { %v3103_v10 = vadd.f32 %v3054_v63, %v2804_v34 }
 0x299   : > { %v4214_v18 = vadd.f32 %v6608_v14, %v4178_v56 }
 0x29b   : > { %v4246_v23 = vmax.f32 %v4214_v18, 0.0  ;;  %v4130_v58 = vpop.f32.mrf.mxu0 }
 0x29c   : > { %v3720_v53 = vpop.f32.mrf.mxu3  ;;  %v2760_v62 = vpop.f32.mrf.mxu1 }
 0x29d   : > { %v4278_v2 = vpack.c.bf16 %v4246_v23, %v4246_v23  ;;  %v3769_v29 = vadd.f32 %v3720_v53, %v3103_v10  ;;  %v2806_v27 = vadd.f32 %v2760_v62, %v6135_v47 }
 0x29f   : > { %4311 = vst.msk [vmem:[%s6329_s8 + $0x50] sm:$0xf] %vm4290_vm7, %v4278_v2  ;;  %v4179_v15 = vadd.f32 %v4130_v58, %v3769_v29  ;;  %v3057_v13 = vpop.f32.mrf.mxu2 }
 0x2a0   : > { %v3104_v25 = vadd.f32 %v3057_v13, %v2805_v32 }
 0x2a1   : > { %v4215_v21 = vadd.f32 %v6608_v14, %v4179_v15 }
 0x2a3   : > { %v4247_v16 = vmax.f32 %v4215_v21, 0.0  ;;  %v4133_v36 = vpop.f32.mrf.mxu0 }
 0x2a4   : > { %v3723_v33 = vpop.f32.mrf.mxu3  ;;  %v2763_v50 = vpop.f32.mrf.mxu1 }
 0x2a5   : > { %v4279_v51 = vpack.c.bf16 %v4247_v16, %v4247_v16  ;;  %v3770_v43 = vadd.f32 %v3723_v33, %v3104_v25  ;;  %v2807_v31 = vadd.f32 %v2763_v50, %v6154_v41  ;;  %v6680_v33 = vld [vmem:[#allocation4_spill] sm:$0xff] }
 0x2a7   : > { %4312 = vst.msk [vmem:[%s6329_s8 + $0x54] sm:$0xf] %vm4290_vm7, %v4279_v51  ;;  %v4180_v48 = vadd.f32 %v4133_v36, %v3770_v43  ;;  %v3059_v30 = vpop.f32.mrf.mxu2 }
 0x2a8   : > { %v3105_v35 = vadd.f32 %v3059_v30, %v2806_v27 }
 0x2a9   : > { %v4216_v6 = vadd.f32 %v6608_v14, %v4180_v48 }
 0x2ab   : > { %v4248_v61 = vmax.f32 %v4216_v6, 0.0  ;;  %v4135_v11 = vpop.f32.mrf.mxu0 }
 0x2ac   : > { %v3725_v54 = vpop.f32.mrf.mxu3  ;;  %v2765_v28 = vpop.f32.mrf.mxu1 }
 0x2ad   : > { %v4280_v26 = vpack.c.bf16 %v4248_v61, %v4248_v61  ;;  %v3771_v59 = vadd.f32 %v3725_v54, %v3105_v35  ;;  %v2808_v0 = vadd.f32 %v2765_v28, %v6175_v5 }
 0x2af   : > { %4313 = vst.msk [vmem:[%s6329_s8 + $0x58] sm:$0xf] %vm4290_vm7, %v4280_v26  ;;  %v4181_v8 = vadd.f32 %v4135_v11, %v3771_v59  ;;  %v3062_v44 = vpop.f32.mrf.mxu2 }
 0x2b0   : > { %v3106_v47 = vadd.f32 %v3062_v44, %v2807_v31 }
 0x2b1   : > { %v4217_v4 = vadd.f32 %v6608_v14, %v4181_v8 }
 0x2b3   : > { %v4249_v39 = vmax.f32 %v4217_v4, 0.0  ;;  %v4138_v52 = vpop.f32.mrf.mxu0 }
 0x2b4   : > { %v3728_v1 = vpop.f32.mrf.mxu3  ;;  %v2768_v3 = vpop.f32.mrf.mxu1 }
 0x2b5   : > { %v4281_v46 = vpack.c.bf16 %v4249_v39, %v4249_v39  ;;  %v3772_v57 = vadd.f32 %v3728_v1, %v3106_v47  ;;  %v2809_v55 = vadd.f32 %v2768_v3, %v6193_v22 }
 0x2b7   : > { %4314 = vst.msk [vmem:[%s6329_s8 + $0x5c] sm:$0xf] %vm4290_vm7, %v4281_v46  ;;  %v4182_v19 = vadd.f32 %v4138_v52, %v3772_v57  ;;  %v3064_v20 = vpop.f32.mrf.mxu2 }
 0x2b8   : > { %v3107_v41 = vadd.f32 %v3064_v20, %v2808_v0 }
 0x2b9   : > { %v4218_v24 = vadd.f32 %v6608_v14, %v4182_v19 }
 0x2bb   : > { %v4250_v60 = vmax.f32 %v4218_v24, 0.0  ;;  %v4140_v38 = vpop.f32.mrf.mxu0 }
 0x2bc   : > { %v3730_v9 = vpop.f32.mrf.mxu3  ;;  %v2770_v37 = vpop.f32.mrf.mxu1 }
 0x2bd   : > { %v4282_v17 = vpack.c.bf16 %v4250_v60, %v4250_v60  ;;  %v3773_v12 = vadd.f32 %v3730_v9, %v3107_v41  ;;  %v2810_v2 = vadd.f32 %v2770_v37, %v6219_v7 }
 0x2bf   : > { %4315 = vst.msk [vmem:[%s6329_s8 + $0x60] sm:$0xf] %vm4290_vm7, %v4282_v17  ;;  %v4183_v45 = vadd.f32 %v4140_v38, %v3773_v12  ;;  %v3067_v56 = vpop.f32.mrf.mxu2 }
 0x2c0   : > { %v3108_v5 = vadd.f32 %v3067_v56, %v2809_v55 }
 0x2c1   : > { %v4219_v34 = vadd.f32 %v6608_v14, %v4183_v45 }
 0x2c3   : > { %v4251_v63 = vmax.f32 %v4219_v34, 0.0  ;;  %v4143_v18 = vpop.f32.mrf.mxu0 }
 0x2c4   : > { %v3733_v10 = vpop.f32.mrf.mxu3  ;;  %v2773_v53 = vpop.f32.mrf.mxu1 }
 0x2c5   : > { %v4283_v23 = vpack.c.bf16 %v4251_v63, %v4251_v63  ;;  %v3774_v58 = vadd.f32 %v3733_v10, %v3108_v5  ;;  %v2811_v50 = vadd.f32 %v2773_v53, %v6680_v33 }
 0x2c7   : > { %4316 = vst.msk [vmem:[%s6329_s8 + $0x64] sm:$0xf] %vm4290_vm7, %v4283_v23  ;;  %v4184_v62 = vadd.f32 %v4143_v18, %v3774_v58  ;;  %v3069_v29 = vpop.f32.mrf.mxu2 }
 0x2c8   : > { %v3109_v22 = vadd.f32 %v3069_v29, %v2810_v2 }
 0x2c9   : > { %v4220_v15 = vadd.f32 %v6608_v14, %v4184_v62 }
 0x2cb   : > { %v4252_v32 = vmax.f32 %v4220_v15, 0.0  ;;  %v4145_v13 = vpop.f32.mrf.mxu0 }
 0x2cc   : > { %v3735_v21 = vpop.f32.mrf.mxu3  ;;  %v2775_v43 = vpop.f32.mrf.mxu1 }
 0x2cd   : > { %v4284_v25 = vpack.c.bf16 %v4252_v32, %v4252_v32  ;;  %v3775_v16 = vadd.f32 %v3735_v21, %v3109_v22  ;;  %v2812_v54 = vadd.f32 %v2775_v43, %v6258_v42 }
 0x2cf   : > { %4317 = vst.msk [vmem:[%s6329_s8 + $0x68] sm:$0xf] %vm4290_vm7, %v4284_v25  ;;  %v4185_v36 = vadd.f32 %v4145_v13, %v3775_v16  ;;  %v3072_v51 = vpop.f32.mrf.mxu2 }
 0x2d0   : > { %v3110_v7 = vadd.f32 %v3072_v51, %v2811_v50 }
 0x2d1   : > { %v4221_v48 = vadd.f32 %v6608_v14, %v4185_v36 }
 0x2d3   : > { %v4253_v27 = vmax.f32 %v4221_v48, 0.0  ;;  %v4148_v30 = vpop.f32.mrf.mxu0 }
 0x2d4   : > { %v3738_v6 = vpop.f32.mrf.mxu3  ;;  %v2778_v8 = vpop.f32.mrf.mxu1 }
 0x2d5   : > { %v4285_v35 = vpack.c.bf16 %v4253_v27, %v4253_v27  ;;  %v3776_v61 = vadd.f32 %v3738_v6, %v3110_v7  ;;  %v2813_v1 = vadd.f32 %v2778_v8, %v6273_v40 }
 0x2d7   : > { %4318 = vst.msk [vmem:[%s6329_s8 + $0x6c] sm:$0xf] %vm4290_vm7, %v4285_v35  ;;  %v4186_v11 = vadd.f32 %v4148_v30, %v3776_v61  ;;  %v3074_v28 = vpop.f32.mrf.mxu2 }
 0x2d8   : > { %v3111_v59 = vadd.f32 %v3074_v28, %v2812_v54 }
 0x2d9   : > { %v4222_v26 = vadd.f32 %v6608_v14, %v4186_v11 }
 0x2db   : > { %v4254_v31 = vmax.f32 %v4222_v26, 0.0  ;;  %v4150_v44 = vpop.f32.mrf.mxu0 }
 0x2dc   : > { %v3740_v4 = vpop.f32.mrf.mxu3  ;;  %v2780_v19 = vpop.f32.mrf.mxu1 }
 0x2dd   : > { %v4286_v47 = vpack.c.bf16 %v4254_v31, %v4254_v31  ;;  %v3777_v39 = vadd.f32 %v3740_v4, %v3111_v59  ;;  %v2814_v38 = vadd.f32 %v2780_v19, %v6294_v49 }
 0x2df   : > { %4319 = vst.msk [vmem:[%s6329_s8 + $0x70] sm:$0xf] %vm4290_vm7, %v4286_v47  ;;  %v4187_v52 = vadd.f32 %v4150_v44, %v3777_v39  ;;  %v3077_v3 = vpop.f32.mrf.mxu2 }
 0x2e0   : > { %v3112_v42 = vadd.f32 %v3077_v3, %v2813_v1 }
 0x2e1   : > { %v4223_v46 = vadd.f32 %v6608_v14, %v4187_v52 }
 0x2e3   : > { %v4255_v57 = vmax.f32 %v4223_v46, 0.0  ;;  %v4153_v0 = vpop.f32.mrf.mxu0 }
 0x2e4   : > { %v3743_v20 = vpop.f32.mrf.mxu3 }
 0x2e5   : > { %v4287_v24 = vpack.c.bf16 %v4255_v57, %v4255_v57  ;;  %v3778_v41 = vadd.f32 %v3743_v20, %v3112_v42 }
 0x2e7   : > { %4320 = vst.msk [vmem:[%s6329_s8 + $0x74] sm:$0xf] %vm4290_vm7, %v4287_v24  ;;  %v4188_v60 = vadd.f32 %v4153_v0, %v3778_v41  ;;  %v3079_v9 = vpop.f32.mrf.mxu2 }
 0x2e8   : > { %v3113_v37 = vadd.f32 %v3079_v9, %v2814_v38 }
 0x2e9   : > { %v4224_v40 = vadd.f32 %v6608_v14, %v4188_v60 }
 0x2eb   : > { %v4256_v17 = vmax.f32 %v4224_v40, 0.0  ;;  %v4155_v56 = vpop.f32.mrf.mxu0 }
 0x2ec   : > { %v3745_v12 = vpop.f32.mrf.mxu3 }
 0x2ed   : > { %v4288_v45 = vpack.c.bf16 %v4256_v17, %v4256_v17  ;;  %v3779_v55 = vadd.f32 %v3745_v12, %v3113_v37 }
 0x2ef   : > { %4321 = vst.msk [vmem:[%s6329_s8 + $0x78] sm:$0xf] %vm4290_vm7, %v4288_v45  ;;  %v4189_v34 = vadd.f32 %v4155_v56, %v3779_v55 }
 0x2f1   : > { %v4225_v5 = vadd.f32 %v6608_v14, %v4189_v34 }
 0x2f3   : > { %v4257_v63 = vmax.f32 %v4225_v5, 0.0 }
 0x2f5   : > { %v4289_v18 = vpack.c.bf16 %v4257_v63, %v4257_v63 }
 0x2f7   : > { %4322 = vst.msk [vmem:[%s6329_s8 + $0x7c] sm:$0xf] %vm4290_vm7, %v4289_v18 }
 0x2f8 PF: > { %s13_s12 = sadd.s32 1, %s5208_s12  }
 0x2f9   : > { %p10_p4 = scmp.ge.s32.totalorder %s13_s12, 4  }
 0x2fb   :  { %12 = sbr.rel (!%p10_p4) target bundleno = 1 (0x1), region = 72 }

// kernel: deeplab_forward.4
= control target key start
LH: loop header
LB: loop body
LE: loop exit
PB: predicated region body
PF: predicated region fallthrough
CT: control target
= control target key end

     0   :  { %s5387_s12 = smov 0   ;;  %s6887_s0 = inlined_call_operand.vmem [shape: bf16[2,18,18,44], index: 0, kind: input, shape index: {}]   ;;  %s6888_s1 = inlined_call_operand.vmem [shape: bf16[9,44,32], index: 1, kind: input, shape index: {}]   ;;  %s6889_s2 = inlined_call_operand.vmem [shape: f32[1,32], index: 2, kind: input, shape index: {}]   ;;  %s6890_s3 = inlined_call_operand.vmem [shape: bf16[2,256,32], index: 3, kind: output, shape index: {}]  }
   0x1 LB: > { %s4469_s13 = sadd.s32 4294967295, %s5365_s12   ;;  %p4473_p0 = scmp.ge.s32.totalorder %s5365_s12, 1  ;;  %s5365_s12 = sphi %s5387_s12, %s13_s12  }
   0x2   : > { %p137_p1 = scmp.lt.s32.totalorder %s5365_s12, 3 }
   0x4   : > { %p138_p2 = pnand %p4473_p0, %p137_p1 }
   0x6   : > { %141 = sbr.rel (%p138_p2) target bundleno = 761 (0x2f9), region = 32 }
   0xb   : > { %v4493_v0 = vld [vmem:[%s6888_s1 + $0x28] sm:$0xf]  ;;  %v5233_v1 = vld [vmem:[%s6888_s1 + $0x28] sm:$0x30]  ;;  %vm734_vm0 = vcmask 1045504   ;;  %p161_p3 = scmp.lt.s32.totalorder %s4469_s13, 1 }
   0xc   : > { %v4494_v2 = vor.u32 %v5233_v1, %v4493_v0  ;;  %v4635_v3 = vld [vmem:[%s6888_s1 + $0x40] sm:$0xf]  ;;  %v5236_v4 = vld [vmem:[%s6888_s1 + $0x40] sm:$0x30]  ;;  %v4765_v8 = vld [vmem:[%s6888_s1 + $0x58] sm:$0xf] }
   0xd   : > { %s6902_s13 = smov (!%p161_p3, %s4469_s13), 1  ;;  %v4636_v6 = vor.u32 %v5236_v4, %v4635_v3  ;;  %v5232_v7 = vld [vmem:[%s6888_s1 + $0x20] sm:$0xff]  ;;  %v5255_v9 = vld [vmem:[%s6888_s1 + $0x58] sm:$0x30]  ;;  %vm226_vm1 = vsmask.f32 3328 }
   0xe   : > { %v736_v5 = vsel %vm734_vm0, %v4494_v2, 0  ;;  %s5296_s28 = smul.u32 216, %s6902_s13  ;;  %v4766_v10 = vor.u32 %v5255_v9, %v4765_v8  ;;  %v5231_v11 = vld [vmem:[%s6888_s1 + $0x18] sm:$0xff]  ;;  %vm227_vm2 = vsmask.f32 7440  ;;  %vm685_vm3 = vcmask 359424  }
   0xf   : > { %5287 = vmatpush.bf16.msra.mxu1 %v736_v5  ;;  %5288 = vmatpush.bf16.msra.mxu2 %v736_v5  ;;  %v1348_v12 = vsel %vm734_vm0, %v4636_v6, 0  ;;  %v5437_v22 = vld [vmem:[%s6888_s1 + $0x10] sm:$0xf]  ;;  %v5442_v23 = vld [vmem:[%s6888_s1 + $0x10] sm:$0x30]  ;;  %vm5450_vm4 = vmor %vm226_vm1, %vm227_vm2  ;;  %vm1112_vm5 = vcmask 1042432  }
  0x10   : > { %5289 = vmatpush.bf16.msra.mxu3 %v736_v5  ;;  %743 = vmatpush.bf16.msra.mxu0 %v736_v5  ;;  %s5426_s6 = scalar_lea.vmem %s6887_s0, %s5296_s28  ;;  %v1657_v13 = vsel %vm734_vm0, %v4766_v10, 0  ;;  %v4586_v46 = vor.u32 %v5442_v23, %v5437_v22  ;;  %v4847_v60 = vld [vmem:[%s6888_s1 + $0x70] sm:$0xf]  ;;  %v5258_v61 = vld [vmem:[%s6888_s1 + $0x70] sm:$0x30]  ;;  %vm1113_vm6 = vcmask 1046532  }
  0x11   : > { %v180_v14 = vld [vmem:[%s5426_s6 + $0x30] sm:$0xf]  ;;  %v181_v15 = vld [vmem:[%s5426_s6 + $0x34] sm:$0xf]  ;;  %v214_v16 = vld [vmem:[%s5426_s6 + $0x38] sm:$0x1] }
  0x12   : > { %v326_v17 = vshrl.u32 %v180_v14, 16  ;;  %v329_v18 = vshll.u32 %v180_v14, 16  ;;  %v335_v19 = vshll.u32 %v181_v15, 16  ;;  %v339_v20 = vshrl.u32 %v181_v15, 16  ;;  %v188_v21 = vld [vmem:[%s5426_s6 + $0x60] sm:$0xf]  ;;  %vm5657_vm7 = vmor %vm1112_vm5, %vm1113_vm6 }
  0x13   : > { %5290 = vmatpush.bf16.msra.mxu1 %v5232_v7  ;;  %5291 = vmatpush.bf16.msra.mxu2 %v5232_v7  ;;  %v345_v24 = vshll.u32 %v214_v16, 16  ;;  %v189_v25 = vld [vmem:[%s5426_s6 + $0x64] sm:$0xf]  ;;  %v218_v26 = vld [vmem:[%s5426_s6 + $0x68] sm:$0x1]  ;;  %v422_v27 = vshrl.u32 %v188_v21, 16 }
  0x14   : > { %5292 = vmatpush.bf16.msra.mxu3 %v5232_v7  ;;  %744 = vmatpush.bf16.msra.mxu0 %v5232_v7  ;;  %v328_v28 = vrot.slane %v326_v17, 4  ;;  %v331_v29 = vrot.slane %v329_v18, 5  ;;  %v337_v30 = vrot.slane %v335_v19, 5  ;;  %v341_v31 = vrot.slane %v339_v20, 4  ;;  %v196_v32 = vld [vmem:[%s5426_s6 + $0x90] sm:$0xf] }
  0x15   : > { %v347_v33 = vrot.slane %v345_v24, 5  ;;  %v424_v34 = vrot.slane %v422_v27, 4  ;;  %v425_v35 = vshll.u32 %v188_v21, 16  ;;  %v431_v36 = vshll.u32 %v189_v25, 16  ;;  %v197_v41 = vld [vmem:[%s5426_s6 + $0x94] sm:$0xf] }
  0x16   : > { %v332_v37 = vor.u32 %v331_v29, %v328_v28  ;;  %v342_v38 = vor.u32 %v341_v31, %v337_v30  ;;  %v435_v39 = vshrl.u32 %v189_v25, 16  ;;  %v441_v40 = vshll.u32 %v218_v26, 16  ;;  %v222_v52 = vld [vmem:[%s5426_s6 + $0x98] sm:$0x1]  ;;  %v172_v6 = vld [vmem:[%s5426_s6] sm:$0xf] }
  0x17   : > { %5293 = vmatpush.bf16.msra.mxu1 %v5231_v11  ;;  %5294 = vmatpush.bf16.msra.mxu2 %v5231_v11  ;;  %v427_v43 = vrot.slane %v425_v35, 5  ;;  %v433_v44 = vrot.slane %v431_v36, 5  ;;  %v518_v45 = vshrl.u32 %v196_v32, 16  ;;  %v521_v54 = vshll.u32 %v196_v32, 16  ;;  %v5471_v10 = vld [vmem:[%s5426_s6 + $0x4] sm:$0xf] }
  0x18   : > { %5295 = vmatpush.bf16.msra.mxu3 %v5231_v11  ;;  %745 = vmatpush.bf16.msra.mxu0 %v5231_v11  ;;  %v333_v47 = vrot.slane %v332_v37, 4  ;;  %v343_v48 = vrot.slane %v342_v38, 4  ;;  %v437_v49 = vrot.slane %v435_v39, 4  ;;  %v443_v50 = vrot.slane %v441_v40, 5  ;;  %v5474_v11 = vld [vmem:[%s5426_s6 + $0x8] sm:$0x1] }
  0x19   : > { %v428_v51 = vor.u32 %v427_v43, %v424_v34  ;;  %v520_v53 = vrot.slane %v518_v45, 4  ;;  %v527_v55 = vshll.u32 %v197_v41, 16  ;;  %v531_v59 = vshrl.u32 %v197_v41, 16  ;;  %v182_v31 = vld [vmem:[%s5426_s6 + $0x3c] sm:$0xf]  ;;  %s5211_s19 = sshll.u32 %s6902_s13, 7 }
  0x1a   : > { %v338_v56 = vsel %vm5450_vm4, %v333_v47, %v337_v30  ;;  %v348_v57 = vsel %vm5450_vm4, %v343_v48, %v347_v33  ;;  %v438_v58 = vor.u32 %v437_v49, %v433_v44  ;;  %v523_v1 = vrot.slane %v521_v54, 5  ;;  %v5235_v32 = vld [vmem:[%s6888_s1 + $0x38] sm:$0xff]  ;;  %v5254_v33 = vld [vmem:[%s6888_s1 + $0x50] sm:$0xff]  ;;  %v183_v38 = vld [vmem:[%s5426_s6 + $0x40] sm:$0xf]  ;;  %s6549_s22 = scalar_lea.vmem %s6890_s3, %s5211_s19 }
  0x1b   : > { %1355 = vmatpush.bf16.msrb.mxu2 %v1348_v12  ;;  %v628_v62 = vunpack.c.l.b16 %v338_v56  ;;  %v629_v63 = vunpack.c.l.b16 %v348_v57  ;;  %v429_v0 = vrot.slane %v428_v51, 4  ;;  %v529_v3 = vrot.slane %v527_v55, 5  ;;  %v215_v43 = vld [vmem:[%s5426_s6 + $0x44] sm:$0x1]  ;;  %v190_v49 = vld [vmem:[%s5426_s6 + $0x6c] sm:$0xf] }
  0x1c   : > { %1664 = vmatpush.bf16.msrb.mxu3 %v1657_v13  ;;  %v439_v2 = vrot.slane %v438_v58, 4  ;;  %v533_v4 = vrot.slane %v531_v59, 4  ;;  %v537_v5 = vshll.u32 %v222_v52, 16  ;;  %v524_v9 = vor.u32 %v523_v1, %v520_v53  ;;  %v5229_v54 = vld [vmem:[%s6888_s1 + $0x8] sm:$0xff]  ;;  %v191_v56 = vld [vmem:[%s5426_s6 + $0x70] sm:$0xf] }
  0x1d   : > { %v656_v7 = vpack.c.b16 %v629_v63, %v628_v62  ;;  %v434_v8 = vsel %vm5450_vm4, %v429_v0, %v433_v44  ;;  %v4848_v12 = vor.u32 %v5258_v61, %v4847_v60  ;;  %v230_v19 = vshrl.u32 %v172_v6, 16  ;;  %v219_v60 = vld [vmem:[%s5426_s6 + $0x74] sm:$0x1] }
  0x1e   : > { %v444_v13 = vsel %vm5450_vm4, %v439_v2, %v443_v50  ;;  %v636_v14 = vunpack.c.l.b16 %v434_v8  ;;  %v534_v15 = vor.u32 %v533_v4, %v529_v3  ;;  %v539_v16 = vrot.slane %v537_v5, 5 }
  0x1f   : > { %4499 = vmatmul.msk.bf16.vlgmr.msra.gmra.mxu1 %vm685_vm3, %v656_v7  ;;  %v637_v17 = vunpack.c.l.b16 %v444_v13  ;;  %v525_v18 = vrot.slane %v524_v9, 4  ;;  %v233_v20 = vshll.u32 %v172_v6, 16  ;;  %v239_v24 = vshll.u32 %v5471_v10, 16  ;;  %1356 = vmatpush.bf16.msrb.mxu2 %v5235_v32 }
  0x20   : > { %v535_v21 = vrot.slane %v534_v15, 4  ;;  %v243_v25 = vshrl.u32 %v5471_v10, 16  ;;  %v249_v26 = vshll.u32 %v5474_v11, 16  ;;  %v232_v29 = vrot.slane %v230_v19, 4  ;;  %1665 = vmatpush.bf16.msrb.mxu3 %v5254_v33 }
  0x21   : > { %v660_v27 = vpack.c.b16 %v637_v17, %v636_v14  ;;  %v530_v28 = vsel %vm5450_vm4, %v525_v18, %v529_v3  ;;  %v235_v30 = vrot.slane %v233_v20, 5  ;;  %v241_v36 = vrot.slane %v239_v24, 5 }
  0x22   : > { %v540_v34 = vsel %vm5450_vm4, %v535_v21, %v539_v16  ;;  %v644_v35 = vunpack.c.l.b16 %v530_v28  ;;  %v245_v37 = vrot.slane %v243_v25, 4  ;;  %v251_v41 = vrot.slane %v249_v26, 5  ;;  %v199_v16 = vld [vmem:[%s5426_s6 + $0xa0] sm:$0xf]  ;;  %v223_v25 = vld [vmem:[%s5426_s6 + $0xa4] sm:$0x1] }
  0x23   : > { %4503 = vmatmul.msk.bf16.vlgmr.msra.gmra.mxu2 %vm685_vm3, %v660_v27  ;;  %v645_v39 = vunpack.c.l.b16 %v540_v34  ;;  %v236_v40 = vor.u32 %v235_v30, %v232_v29  ;;  %v973_v45 = vsel %vm734_vm0, %v4586_v46, 0  ;;  %v2333_v47 = vsel %vm734_vm0, %v4848_v12, 0  ;;  %v198_v12 = vld [vmem:[%s5426_s6 + $0x9c] sm:$0xf] }
  0x24   : > { %v246_v44 = vor.u32 %v245_v37, %v241_v36  ;;  %v350_v48 = vshrl.u32 %v182_v31, 16  ;;  %980 = vmatpush.bf16.msrb.mxu1 %v973_v45  ;;  %2340 = vmatpush.bf16.msrb.mxu0 %v2333_v47  ;;  %v353_v52 = vshll.u32 %v182_v31, 16  ;;  %v359_v53 = vshll.u32 %v183_v38, 16  ;;  %v5527_v47 = vld [vmem:[%s5426_s6 + $0x10] sm:$0xf] }
  0x25   : > { %v664_v50 = vpack.c.b16 %v645_v39, %v644_v35  ;;  %v237_v51 = vrot.slane %v236_v40, 4  ;;  %v363_v46 = vshrl.u32 %v183_v38, 16  ;;  %v369_v55 = vshll.u32 %v215_v43, 16 }
  0x26   : > { %v247_v22 = vrot.slane %v246_v44, 4  ;;  %v352_v23 = vrot.slane %v350_v48, 4  ;;  %v355_v58 = vrot.slane %v353_v52, 5  ;;  %v361_v59 = vrot.slane %v359_v53, 5  ;;  %v5530_v48 = vld [vmem:[%s5426_s6 + $0x14] sm:$0x1] }
  0x27   : > { %4507 = vmatmul.msk.bf16.vlgmr.msra.gmra.mxu3 %vm685_vm3, %v664_v50  ;;  %v242_v57 = vsel %vm5450_vm4, %v237_v51, %v241_v36  ;;  %v446_v61 = vshrl.u32 %v190_v49, 16  ;;  %v365_v0 = vrot.slane %v363_v46, 4  ;;  %v371_v1 = vrot.slane %v369_v55, 5  ;;  %v5257_v36 = vld [vmem:[%s6888_s1 + $0x68] sm:$0xff] }
  0x28   : > { %v252_v62 = vsel %vm5450_vm4, %v247_v22, %v251_v41  ;;  %v620_v63 = vunpack.c.l.b16 %v242_v57  ;;  %v356_v3 = vor.u32 %v355_v58, %v352_v23  ;;  %v449_v5 = vshll.u32 %v190_v49, 16  ;;  %981 = vmatpush.bf16.msrb.mxu1 %v5229_v54  ;;  %v174_v41 = vld [vmem:[%s5426_s6 + $0xc] sm:$0xf]  ;;  %2341 = vmatpush.bf16.msrb.mxu0 %v5257_v36  ;;  %v184_v46 = vld [vmem:[%s5426_s6 + $0x48] sm:$0xf] }
  0x29   : > { %v621_v2 = vunpack.c.l.b16 %v252_v62  ;;  %v448_v4 = vrot.slane %v446_v61, 4  ;;  %v366_v6 = vor.u32 %v365_v0, %v361_v59  ;;  %v455_v7 = vshll.u32 %v191_v56, 16  ;;  %v5234_v0 = vld [vmem:[%s6888_s1 + $0x30] sm:$0xff] }
  0x2a   : > { %v459_v8 = vshrl.u32 %v191_v56, 16  ;;  %v465_v9 = vshll.u32 %v219_v60, 16  ;;  %v357_v14 = vrot.slane %v356_v3, 4  ;;  %v451_v15 = vrot.slane %v449_v5, 5  ;;  %1357 = vmatpush.bf16.msrb.mxu2 %v5234_v0 }
  0x2b   : > { %v652_v13 = vpack.c.b16 %v621_v2, %v620_v63  ;;  %v367_v17 = vrot.slane %v366_v6, 4  ;;  %v457_v18 = vrot.slane %v455_v7, 5  ;;  %v542_v26 = vshrl.u32 %v198_v12, 16  ;;  %v5228_v2 = vld [vmem:[%s6888_s1] sm:$0xff] }
  0x2c   : > { %v461_v19 = vrot.slane %v459_v8, 4  ;;  %v467_v20 = vrot.slane %v465_v9, 5  ;;  %v362_v21 = vsel %vm5450_vm4, %v357_v14, %v361_v59  ;;  %v452_v24 = vor.u32 %v451_v15, %v448_v4  ;;  %v5540_v59 = vld [vmem:[%s5426_s6 + $0x4c] sm:$0xf]  ;;  %v5555_v9 = vld [vmem:[%s5426_s6 + $0x50] sm:$0x1]  ;;  %982 = vmatpush.bf16.msrb.mxu1 %v5228_v2 }
  0x2d   : > { %4495 = vmatmul.msk.bf16.vlgmr.msra.gmra.mxu0 %vm685_vm3, %v652_v13  ;;  %v545_v27 = vshll.u32 %v198_v12, 16  ;;  %v372_v28 = vsel %vm5450_vm4, %v367_v17, %v371_v1  ;;  %v630_v29 = vunpack.c.l.b16 %v362_v21  ;;  %v551_v31 = vshll.u32 %v199_v16, 16  ;;  %v5253_v1 = vld [vmem:[%s6888_s1 + $0x48] sm:$0xff] }
  0x2e   : > { %v462_v30 = vor.u32 %v461_v19, %v457_v18  ;;  %v631_v32 = vunpack.c.l.b16 %v372_v28  ;;  %v453_v33 = vrot.slane %v452_v24, 4  ;;  %v544_v34 = vrot.slane %v542_v26, 4  ;;  %1666 = vmatpush.bf16.msrb.mxu3 %v5253_v1 }
  0x2f   : > { %v547_v35 = vrot.slane %v545_v27, 5  ;;  %v553_v38 = vrot.slane %v551_v31, 5  ;;  %v555_v39 = vshrl.u32 %v199_v16, 16  ;;  %v561_v40 = vshll.u32 %v223_v25, 16 }
  0x30   : > { %v463_v37 = vrot.slane %v462_v30, 4  ;;  %v657_v43 = vpack.c.b16 %v631_v32, %v630_v29  ;;  %v458_v44 = vsel %vm5450_vm4, %v453_v33, %v457_v18  ;;  %v254_v22 = vshrl.u32 %v174_v41, 16  ;;  %v192_v18 = vld [vmem:[%s5426_s6 + $0x78] sm:$0xf]  ;;  %v193_v32 = vld [vmem:[%s5426_s6 + $0x7c] sm:$0xf] }
  0x31   : > { %v548_v45 = vor.u32 %v547_v35, %v544_v34  ;;  %v638_v50 = vunpack.c.l.b16 %v458_v44  ;;  %v557_v51 = vrot.slane %v555_v39, 4  ;;  %v563_v52 = vrot.slane %v561_v40, 5  ;;  %v220_v33 = vld [vmem:[%s5426_s6 + $0x80] sm:$0x1] }
  0x32   : > { %v468_v49 = vsel %vm5450_vm4, %v463_v37, %v467_v20  ;;  %4500 = vmatmul.msk.bf16.gmra.mxu1 %vm685_vm3, %v657_v43  ;;  %v257_v23 = vshll.u32 %v174_v41, 16  ;;  %v263_v56 = vshll.u32 %v5527_v47, 16  ;;  %v267_v57 = vshrl.u32 %v5527_v47, 16 }
  0x33   : > { %v639_v53 = vunpack.c.l.b16 %v468_v49  ;;  %v549_v54 = vrot.slane %v548_v45, 4  ;;  %v558_v55 = vor.u32 %v557_v51, %v553_v38  ;;  %v273_v58 = vshll.u32 %v5530_v48, 16  ;;  %v200_v51 = vld [vmem:[%s5426_s6 + $0xa8] sm:$0xf] }
  0x34   : > { %v256_v62 = vrot.slane %v254_v22, 4  ;;  %v259_v63 = vrot.slane %v257_v23, 5  ;;  %v265_v5 = vrot.slane %v263_v56, 5  ;;  %v269_v6 = vrot.slane %v267_v57, 4  ;;  %v201_v22 = vld [vmem:[%s5426_s6 + $0xac] sm:$0xf] }
  0x35   : > { %v661_v60 = vpack.c.b16 %v639_v53, %v638_v50  ;;  %v554_v61 = vsel %vm5450_vm4, %v549_v54, %v553_v38  ;;  %v559_v3 = vrot.slane %v558_v55, 4  ;;  %v275_v8 = vrot.slane %v273_v58, 5  ;;  %v224_v57 = vld [vmem:[%s5426_s6 + $0xb0] sm:$0x1] }
  0x36   : > { %v646_v4 = vunpack.c.l.b16 %v554_v61  ;;  %v260_v7 = vor.u32 %v259_v63, %v256_v62  ;;  %v374_v12 = vshrl.u32 %v184_v46, 16  ;;  %v377_v13 = vshll.u32 %v184_v46, 16 }
  0x37   : > { %4504 = vmatmul.msk.bf16.gmra.mxu2 %vm685_vm3, %v661_v60  ;;  %v564_v14 = vsel %vm5450_vm4, %v559_v3, %v563_v52  ;;  %v270_v15 = vor.u32 %v269_v6, %v265_v5  ;;  %v383_v16 = vshll.u32 %v5540_v59, 16  ;;  %v387_v17 = vshrl.u32 %v5540_v59, 16  ;;  %v176_v3 = vld [vmem:[%s5426_s6 + $0x18] sm:$0xf] }
  0x38   : > { %v647_v19 = vunpack.c.l.b16 %v564_v14  ;;  %v261_v20 = vrot.slane %v260_v7, 4  ;;  %v376_v21 = vrot.slane %v374_v12, 4  ;;  %v379_v24 = vrot.slane %v377_v13, 5 }
  0x39   : > { %v271_v25 = vrot.slane %v270_v15, 4  ;;  %v385_v26 = vrot.slane %v383_v16, 5  ;;  %v389_v27 = vrot.slane %v387_v17, 4  ;;  %v393_v28 = vshll.u32 %v5555_v9, 16  ;;  %v5580_v15 = vld [vmem:[%s5426_s6 + $0x1c] sm:$0xf] }
  0x3a   : > { %v665_v29 = vpack.c.b16 %v647_v19, %v646_v4  ;;  %v266_v30 = vsel %vm5450_vm4, %v261_v20, %v265_v5  ;;  %v380_v31 = vor.u32 %v379_v24, %v376_v21  ;;  %v470_v34 = vshrl.u32 %v192_v18, 16 }
  0x3b   : > { %v276_v35 = vsel %vm5450_vm4, %v271_v25, %v275_v8  ;;  %v622_v36 = vunpack.c.l.b16 %v266_v30  ;;  %v390_v37 = vor.u32 %v389_v27, %v385_v26  ;;  %v395_v38 = vrot.slane %v393_v28, 5 }
  0x3c   : > { %4508 = vmatmul.msk.bf16.gmra.mxu3 %vm685_vm3, %v665_v29  ;;  %v623_v39 = vunpack.c.l.b16 %v276_v35  ;;  %v381_v40 = vrot.slane %v380_v31, 4  ;;  %v472_v41 = vrot.slane %v470_v34, 4  ;;  %v473_v43 = vshll.u32 %v192_v18, 16  ;;  %v5586_v18 = vld [vmem:[%s5426_s6 + $0x20] sm:$0x1] }
  0x3d   : > { %v391_v44 = vrot.slane %v390_v37, 4  ;;  %v479_v45 = vshll.u32 %v193_v32, 16  ;;  %v483_v49 = vshrl.u32 %v193_v32, 16  ;;  %v489_v50 = vshll.u32 %v220_v33, 16  ;;  %v5256_v35 = vld [vmem:[%s6888_s1 + $0x60] sm:$0xff] }
  0x3e   : > { %v653_v52 = vpack.c.b16 %v623_v39, %v622_v36  ;;  %v386_v53 = vsel %vm5450_vm4, %v381_v40, %v385_v26  ;;  %v475_v54 = vrot.slane %v473_v43, 5  ;;  %v566_v62 = vshrl.u32 %v200_v51, 16  ;;  %v186_v26 = vld [vmem:[%s5426_s6 + $0x54] sm:$0xf]  ;;  %v5598_v39 = vld [vmem:[%s5426_s6 + $0x58] sm:$0xf]  ;;  %2342 = vmatpush.bf16.msrb.mxu0 %v5256_v35 }
  0x3f   : > { %v396_v23 = vsel %vm5450_vm4, %v391_v44, %v395_v38  ;;  %v632_v46 = vunpack.c.l.b16 %v386_v53  ;;  %v481_v55 = vrot.slane %v479_v45, 5  ;;  %v485_v56 = vrot.slane %v483_v49, 4  ;;  %v5605_v49 = vld [vmem:[%s5426_s6 + $0x5c] sm:$0x1] }
  0x40   : > { %4496 = vmatmul.msk.bf16.gmra.mxu0 %vm685_vm3, %v653_v52  ;;  %v633_v58 = vunpack.c.l.b16 %v396_v23  ;;  %v476_v60 = vor.u32 %v475_v54, %v472_v41  ;;  %v491_v61 = vrot.slane %v489_v50, 5  ;;  %v569_v0 = vshll.u32 %v200_v51, 16  ;;  %v194_v50 = vld [vmem:[%s5426_s6 + $0x84] sm:$0xf] }
  0x41   : > { %v486_v63 = vor.u32 %v485_v56, %v481_v55  ;;  %v575_v1 = vshll.u32 %v201_v22, 16  ;;  %v579_v2 = vshrl.u32 %v201_v22, 16  ;;  %v568_v6 = vrot.slane %v566_v62, 4 }
  0x42   : > { %v658_v4 = vpack.c.b16 %v633_v58, %v632_v46  ;;  %v477_v5 = vrot.slane %v476_v60, 4  ;;  %v585_v7 = vshll.u32 %v224_v57, 16  ;;  %v571_v12 = vrot.slane %v569_v0, 5 }
  0x43   : > { %v487_v8 = vrot.slane %v486_v63, 4  ;;  %v577_v13 = vrot.slane %v575_v1, 5  ;;  %v581_v14 = vrot.slane %v579_v2, 4  ;;  %v278_v19 = vshrl.u32 %v176_v3, 16  ;;  %v195_v1 = vld [vmem:[%s5426_s6 + $0x88] sm:$0xf] }
  0x44   : > { %4501 = vmatmul.msk.bf16.gmra.mxu1 %vm685_vm3, %v658_v4  ;;  %v482_v16 = vsel %vm5450_vm4, %v477_v5, %v481_v55  ;;  %v587_v17 = vrot.slane %v585_v7, 5  ;;  %v572_v24 = vor.u32 %v571_v12, %v568_v6  ;;  %v281_v29 = vshll.u32 %v176_v3, 16  ;;  %v221_v4 = vld [vmem:[%s5426_s6 + $0x8c] sm:$0x1] }
  0x45   : > { %v492_v20 = vsel %vm5450_vm4, %v487_v8, %v491_v61  ;;  %v640_v21 = vunpack.c.l.b16 %v482_v16  ;;  %v582_v25 = vor.u32 %v581_v14, %v577_v13  ;;  %v280_v28 = vrot.slane %v278_v19, 4 }
  0x46   : > { %v641_v27 = vunpack.c.l.b16 %v492_v20  ;;  %v287_v30 = vshll.u32 %v5580_v15, 16  ;;  %v573_v31 = vrot.slane %v572_v24, 4  ;;  %v291_v33 = vshrl.u32 %v5580_v15, 16  ;;  %v202_v20 = vld [vmem:[%s5426_s6 + $0xb4] sm:$0xf] }
  0x47   : > { %v583_v32 = vrot.slane %v582_v25, 4  ;;  %v297_v34 = vshll.u32 %v5586_v18, 16  ;;  %v283_v37 = vrot.slane %v281_v29, 5  ;;  %v398_v40 = vshrl.u32 %v186_v26, 16 }
  0x48   : > { %v662_v36 = vpack.c.b16 %v641_v27, %v640_v21  ;;  %v289_v38 = vrot.slane %v287_v30, 5  ;;  %v578_v41 = vsel %vm5450_vm4, %v573_v31, %v577_v13  ;;  %v293_v44 = vrot.slane %v291_v33, 4  ;;  %v203_v30 = vld [vmem:[%s5426_s6 + $0xb8] sm:$0xf] }
  0x49   : > { %v588_v43 = vsel %vm5450_vm4, %v583_v32, %v587_v17  ;;  %v299_v45 = vrot.slane %v297_v34, 5  ;;  %v648_v51 = vunpack.c.l.b16 %v578_v41  ;;  %v284_v53 = vor.u32 %v283_v37, %v280_v28  ;;  %v225_v34 = vld [vmem:[%s5426_s6 + $0xbc] sm:$0x1] }
  0x4a   : > { %4505 = vmatmul.msk.bf16.gmra.mxu2 %vm685_vm3, %v662_v36  ;;  %v649_v52 = vunpack.c.l.b16 %v588_v43  ;;  %v400_v54 = vrot.slane %v398_v40, 4  ;;  %v294_v22 = vor.u32 %v293_v44, %v289_v38  ;;  %v401_v23 = vshll.u32 %v186_v26, 16 }
  0x4b   : > { %v407_v46 = vshll.u32 %v5598_v39, 16  ;;  %v411_v55 = vshrl.u32 %v5598_v39, 16  ;;  %v285_v57 = vrot.slane %v284_v53, 4  ;;  %v417_v58 = vshll.u32 %v5605_v49, 16 }
  0x4c   : > { %v666_v56 = vpack.c.b16 %v649_v52, %v648_v51  ;;  %v494_v60 = vshrl.u32 %v194_v50, 16  ;;  %v295_v61 = vrot.slane %v294_v22, 4  ;;  %v403_v62 = vrot.slane %v401_v23, 5  ;;  %v5631_v22 = vld [vmem:[%s5426_s6 + $0x28] sm:$0xf] }
  0x4d   : > { %v409_v63 = vrot.slane %v407_v46, 5  ;;  %v413_v0 = vrot.slane %v411_v55, 4  ;;  %v290_v2 = vsel %vm5450_vm4, %v285_v57, %v289_v38  ;;  %v419_v3 = vrot.slane %v417_v58, 5  ;;  %v5634_v57 = vld [vmem:[%s5426_s6 + $0x2c] sm:$0x1] }
  0x4e   : > { %4509 = vmatmul.msk.bf16.gmra.mxu3 %vm685_vm3, %v666_v56  ;;  %v496_v5 = vrot.slane %v494_v60, 4  ;;  %v497_v6 = vshll.u32 %v194_v50, 16  ;;  %v300_v7 = vsel %vm5450_vm4, %v295_v61, %v299_v45  ;;  %v624_v8 = vunpack.c.l.b16 %v290_v2  ;;  %v178_v50 = vld [vmem:[%s5426_s6 + $0x24] sm:$0xf] }
  0x4f   : > { %v404_v12 = vor.u32 %v403_v62, %v400_v54  ;;  %v414_v13 = vor.u32 %v413_v0, %v409_v63  ;;  %v625_v14 = vunpack.c.l.b16 %v300_v7  ;;  %v503_v17 = vshll.u32 %v195_v1, 16 }
  0x50   : > { %v499_v16 = vrot.slane %v497_v6, 5  ;;  %v507_v19 = vshrl.u32 %v195_v1, 16  ;;  %v513_v25 = vshll.u32 %v221_v4, 16  ;;  %v590_v35 = vshrl.u32 %v202_v20, 16 }
  0x51   : > { %v405_v21 = vrot.slane %v404_v12, 4  ;;  %v415_v24 = vrot.slane %v414_v13, 4  ;;  %v654_v26 = vpack.c.b16 %v625_v14, %v624_v8  ;;  %v505_v28 = vrot.slane %v503_v17, 5 }
  0x52   : > { %v500_v27 = vor.u32 %v499_v16, %v496_v5  ;;  %v509_v29 = vrot.slane %v507_v19, 4  ;;  %v515_v33 = vrot.slane %v513_v25, 5  ;;  %v592_v41 = vrot.slane %v590_v35, 4  ;;  %v5043_v16 = vld [vmem:[%s6888_s1 + $0xa0] sm:$0xf] }
  0x53   : > { %v410_v31 = vsel %vm5450_vm4, %v405_v21, %v409_v63  ;;  %v420_v32 = vsel %vm5450_vm4, %v415_v24, %v419_v3  ;;  %4497 = vmatmul.msk.bf16.gmra.mxu0 %vm685_vm3, %v654_v26  ;;  %v593_v43 = vshll.u32 %v202_v20, 16  ;;  %v599_v44 = vshll.u32 %v203_v30, 16  ;;  %v1064_v3 = vld [vmem:[%s5426_s6] sm:$0xe]  ;;  %v5280_v21 = vld [vmem:[%s6888_s1 + $0xa0] sm:$0x30] }
  0x54   : > { %v634_v36 = vunpack.c.l.b16 %v410_v31  ;;  %v635_v37 = vunpack.c.l.b16 %v420_v32  ;;  %v501_v38 = vrot.slane %v500_v27, 4  ;;  %v510_v40 = vor.u32 %v509_v29, %v505_v28  ;;  %v4784_v27 = vld [vmem:[%s5426_s6 + $0x10] sm:$0xf] }
  0x55   : > { %v603_v45 = vshrl.u32 %v203_v30, 16  ;;  %v609_v54 = vshll.u32 %v225_v34, 16  ;;  %v595_v46 = vrot.slane %v593_v43, 5  ;;  %v601_v55 = vrot.slane %v599_v44, 5 }
  0x56   : > { %v659_v51 = vpack.c.b16 %v635_v37, %v634_v36  ;;  %v506_v52 = vsel %vm5450_vm4, %v501_v38, %v505_v28  ;;  %v511_v53 = vrot.slane %v510_v40, 4  ;;  %v1120_v58 = vrot.slane %v5474_v11, 5  ;;  %v4783_v11 = vld [vmem:[%s5426_s6 + $0xc] sm:$0xf] }
  0x57   : > { %v642_v23 = vunpack.c.l.b16 %v506_v52  ;;  %v605_v56 = vrot.slane %v603_v45, 4  ;;  %v611_v61 = vrot.slane %v609_v54, 5  ;;  %v302_v62 = vshrl.u32 %v178_v50, 16 }
  0x58   : > { %4502 = vmatmul.msk.bf16.gmra.mxu1 %vm685_vm3, %v659_v51  ;;  %v516_v60 = vsel %vm5450_vm4, %v511_v53, %v515_v33  ;;  %v596_v0 = vor.u32 %v595_v46, %v592_v41  ;;  %v305_v2 = vshll.u32 %v178_v50, 16  ;;  %v311_v5 = vshll.u32 %v5631_v22, 16  ;;  %v4785_v51 = vld [vmem:[%s5426_s6 + $0x14] sm:$0x1]  ;;  %v5283_v46 = vld [vmem:[%s6888_s1 + $0xb8] sm:$0x30] }
  0x59   : > { %v643_v63 = vunpack.c.l.b16 %v516_v60  ;;  %v606_v1 = vor.u32 %v605_v56, %v601_v55  ;;  %v304_v4 = vrot.slane %v302_v62, 4  ;;  %v315_v6 = vshrl.u32 %v5631_v22, 16  ;;  %v5261_v62 = vld [vmem:[%s6888_s1 + $0x88] sm:$0x30] }
  0x5a   : > { %v321_v7 = vshll.u32 %v5634_v57, 16  ;;  %v597_v12 = vrot.slane %v596_v0, 4  ;;  %v307_v14 = vrot.slane %v305_v2, 5  ;;  %v313_v17 = vrot.slane %v311_v5, 5  ;;  %v5212_v0 = vld [vmem:[%s5426_s6] sm:$0xff] }
  0x5b   : > { %v663_v8 = vpack.c.b16 %v643_v63, %v642_v23  ;;  %v607_v13 = vrot.slane %v606_v1, 4  ;;  %v317_v19 = vrot.slane %v315_v6, 4  ;;  %v4603_v32 = vrot.slane %v1064_v3, 9  ;;  %v5191_v63 = vld [vmem:[%s6888_s1 + $0xd0] sm:$0xf] }
  0x5c   : > { %v323_v20 = vrot.slane %v321_v7, 5  ;;  %v602_v24 = vsel %vm5450_vm4, %v597_v12, %v601_v55  ;;  %v308_v26 = vor.u32 %v307_v14, %v304_v4  ;;  %v1117_v34 = vrot.slane %v5471_v10, 5  ;;  %v5125_v10 = vld [vmem:[%s6888_s1 + $0xb8] sm:$0xf]  ;;  %v4913_v55 = vld [vmem:[%s6888_s1 + $0x88] sm:$0xf] }
  0x5d   : > { %4506 = vmatmul.msk.bf16.gmra.mxu2 %vm685_vm3, %v663_v8  ;;  %v612_v25 = vsel %vm5450_vm4, %v607_v13, %v611_v61  ;;  %v650_v28 = vunpack.c.l.b16 %v602_v24  ;;  %v318_v30 = vor.u32 %v317_v19, %v313_v17  ;;  %v5044_v35 = vor.u32 %v5280_v21, %v5043_v16  ;;  %v5286_v5 = vld [vmem:[%s6888_s1 + $0xd0] sm:$0x30] }
  0x5e   : > { %v651_v29 = vunpack.c.l.b16 %v612_v25  ;;  %v309_v33 = vrot.slane %v308_v26, 4  ;;  %v1829_v36 = vshrl.u32 %v4783_v11, 16  ;;  %v1832_v40 = vshll.u32 %v4783_v11, 16  ;;  %v4787_v25 = vld [vmem:[%s5426_s6 + $0x1c] sm:$0xf] }
  0x5f   : > { %v319_v38 = vrot.slane %v318_v30, 4  ;;  %v1838_v41 = vshll.u32 %v4784_v27, 16  ;;  %v1118_v44 = vsel %vm5657_vm7, %v4603_v32, %v1117_v34  ;;  %v1119_v45 = vrot.slane %v1117_v34, 4 }
  0x60   : > { %v667_v37 = vpack.c.b16 %v651_v29, %v650_v28  ;;  %v314_v43 = vsel %vm5450_vm4, %v309_v33, %v313_v17  ;;  %v3062_v50 = vsel %vm734_vm0, %v5044_v35, 0  ;;  %v1234_v54 = vunpack.c.l.b16 %v1118_v44  ;;  %v1065_v29 = vld [vmem:[%s5426_s6 + $0xc] sm:$0xe] }
  0x61   : > { %v324_v52 = vsel %vm5450_vm4, %v319_v38, %v323_v20  ;;  %v626_v53 = vunpack.c.l.b16 %v314_v43  ;;  %3069 = vmatpush.bf16.msra.mxu2 %v3062_v50  ;;  %v1831_v23 = vrot.slane %v1829_v36, 4  ;;  %v1121_v60 = vsel %vm5657_vm7, %v1119_v45, %v1120_v58  ;;  %v4786_v20 = vld [vmem:[%s5426_s6 + $0x18] sm:$0xf]  ;;  %v5237_v36 = vld [vmem:[%s5426_s6 + $0xc] sm:$0xff] }
  0x62   : > { %4510 = vmatmul.msk.bf16.gmra.mxu3 %vm685_vm3, %v667_v37  ;;  %v627_v56 = vunpack.c.l.b16 %v324_v52  ;;  %v1834_v61 = vrot.slane %v1832_v40, 5  ;;  %v1235_v1 = vunpack.c.l.b16 %v1121_v60  ;;  %v1840_v2 = vrot.slane %v1838_v41, 5 }
  0x63   : > { %v1842_v3 = vshrl.u32 %v4784_v27, 16  ;;  %v1848_v4 = vshll.u32 %v4785_v51, 16  ;;  %v5126_v7 = vor.u32 %v5283_v46, %v5125_v10  ;;  %v4914_v14 = vor.u32 %v5261_v62, %v4913_v55  ;;  %v4788_v51 = vld [vmem:[%s5426_s6 + $0x20] sm:$0x1] }
  0x64   : > { %v655_v58 = vpack.c.b16 %v627_v56, %v626_v53  ;;  %v1835_v6 = vor.u32 %v1834_v61, %v1831_v23  ;;  %v1266_v11 = vpack.c.b16 %v1235_v1, %v1234_v54  ;;  %v5192_v16 = vor.u32 %v5286_v5, %v5191_v63  ;;  %v4789_v63 = vld [vmem:[%s5426_s6 + $0x24] sm:$0xf]  ;;  %v4790_v1 = vld [vmem:[%s5426_s6 + $0x28] sm:$0xf] }
  0x65   : > { %v1844_v8 = vrot.slane %v1842_v3, 4  ;;  %v3738_v13 = vsel %vm734_vm0, %v5126_v7, 0  ;;  %v1850_v19 = vrot.slane %v1848_v4, 5  ;;  %v2753_v21 = vsel %vm734_vm0, %v4914_v14, 0  ;;  %v1066_v3 = vld [vmem:[%s5426_s6 + $0x18] sm:$0xe] }
  0x66   : > { %4498 = vmatmul.msk.bf16.gmra.mxu0 %vm685_vm3, %v655_v58  ;;  %v1836_v12 = vrot.slane %v1835_v6, 4  ;;  %3745 = vmatpush.bf16.msra.mxu3 %v3738_v13  ;;  %v4158_v24 = vsel %vm734_vm0, %v5192_v16, 0  ;;  %v1124_v27 = vrot.slane %v5527_v47, 5  ;;  %v1853_v30 = vshrl.u32 %v4786_v20, 16 }
  0x67   : > { %v1845_v17 = vor.u32 %v1844_v8, %v1840_v2  ;;  %2760 = vmatpush.bf16.msra.mxu1 %v2753_v21  ;;  %4165 = vmatpush.bf16.msra.mxu0 %v4158_v24  ;;  %v1856_v33 = vshll.u32 %v4786_v20, 16  ;;  %v1862_v34 = vshll.u32 %v4787_v25, 16  ;;  %v1866_v35 = vshrl.u32 %v4787_v25, 16  ;;  %v5238_v8 = vld [vmem:[%s5426_s6 + $0x18] sm:$0xff]  ;;  %v4791_v24 = vld [vmem:[%s5426_s6 + $0x2c] sm:$0x1] }
  0x68   : > { %4587 = vmatmul.msk.bf16.vlgmr.msrb.gmra.mxu1 %vm685_vm3, %v5212_v0  ;;  %v1841_v28 = vsel %vm5450_vm4, %v1836_v12, %v1840_v2  ;;  %v4604_v37 = vrot.slane %v1065_v29, 9  ;;  %v1126_v38 = vrot.slane %v1124_v27, 4  ;;  %v1127_v47 = vrot.slane %v5530_v48, 5  ;;  %v5213_v48 = vld [vmem:[%s5426_s6 + $0xc] sm:$0xff] }
  0x69   : > { %v1846_v26 = vrot.slane %v1845_v17, 4  ;;  %v2219_v40 = vunpack.c.l.b16 %v1841_v28  ;;  %v1855_v43 = vrot.slane %v1853_v30, 4  ;;  %v1858_v44 = vrot.slane %v1856_v33, 5 }
  0x6a   : > { %v1864_v45 = vrot.slane %v1862_v34, 5  ;;  %v1868_v50 = vrot.slane %v1866_v35, 4  ;;  %v1125_v10 = vsel %vm5657_vm7, %v4604_v37, %v1124_v27  ;;  %v1128_v52 = vsel %vm5657_vm7, %v1126_v38, %v1127_v47  ;;  %v4792_v37 = vld [vmem:[%s5426_s6 + $0x30] sm:$0xf]  ;;  %v4793_v47 = vld [vmem:[%s5426_s6 + $0x34] sm:$0xf] }
  0x6b   : > { %v1851_v32 = vsel %vm5450_vm4, %v1846_v26, %v1850_v19  ;;  %v1859_v54 = vor.u32 %v1858_v44, %v1855_v43  ;;  %v1872_v46 = vshll.u32 %v4788_v51, 16  ;;  %v1236_v55 = vunpack.c.l.b16 %v1125_v10  ;;  %v1067_v43 = vld [vmem:[%s5426_s6 + $0x24] sm:$0xe] }
  0x6c   : > { %v2220_v41 = vunpack.c.l.b16 %v1851_v32  ;;  %v1869_v23 = vor.u32 %v1868_v50, %v1864_v45  ;;  %v1237_v56 = vunpack.c.l.b16 %v1128_v52  ;;  %v1131_v2 = vrot.slane %v5580_v15, 5  ;;  %v5239_v52 = vld [vmem:[%s5426_s6 + $0x24] sm:$0xff] }
  0x6d   : > { %4637 = vmatmul.msk.bf16.vlgmr.msrb.gmra.mxu2 %vm685_vm3, %v1266_v11  ;;  %v1860_v60 = vrot.slane %v1859_v54, 4  ;;  %v1874_v62 = vrot.slane %v1872_v46, 5  ;;  %v1877_v4 = vshrl.u32 %v4789_v63, 16  ;;  %v1880_v5 = vshll.u32 %v4789_v63, 16 }
  0x6e   : > { %v2251_v53 = vpack.c.b16 %v2220_v41, %v2219_v40  ;;  %v1870_v61 = vrot.slane %v1869_v23, 4  ;;  %v1267_v0 = vpack.c.b16 %v1237_v56, %v1236_v55  ;;  %v1886_v7 = vshll.u32 %v4790_v1, 16 }
  0x6f   : > { %v1865_v58 = vsel %vm5450_vm4, %v1860_v60, %v1864_v45  ;;  %v1890_v11 = vshrl.u32 %v4790_v1, 16  ;;  %v4605_v12 = vrot.slane %v1066_v3, 9  ;;  %v1133_v13 = vrot.slane %v1131_v2, 4 }
  0x70   : > { %v1875_v6 = vsel %vm5450_vm4, %v1870_v61, %v1874_v62  ;;  %v1134_v15 = vrot.slane %v5586_v18, 5  ;;  %v2221_v14 = vunpack.c.l.b16 %v1865_v58  ;;  %v1879_v17 = vrot.slane %v1877_v4, 4  ;;  %v5214_v18 = vld [vmem:[%s5426_s6 + $0x18] sm:$0xff] }
  0x71   : > { %v2222_v16 = vunpack.c.l.b16 %v1875_v6  ;;  %v1882_v19 = vrot.slane %v1880_v5, 5  ;;  %v1888_v20 = vrot.slane %v1886_v7, 5  ;;  %v1892_v21 = vrot.slane %v1890_v11, 4  ;;  %v4794_v61 = vld [vmem:[%s5426_s6 + $0x38] sm:$0x1] }
  0x72   : > { %4767 = vmatmul.msk.bf16.vlgmr.msrb.gmra.mxu3 %vm685_vm3, %v5237_v36  ;;  %v1132_v25 = vsel %vm5657_vm7, %v4605_v12, %v1131_v2  ;;  %v1135_v26 = vsel %vm5657_vm7, %v1133_v13, %v1134_v15  ;;  %v1896_v30 = vshll.u32 %v4791_v24, 16  ;;  %v1138_v40 = vrot.slane %v5631_v22, 5  ;;  %v4795_v58 = vld [vmem:[%s5426_s6 + $0x3c] sm:$0xf]  ;;  %v4796_v6 = vld [vmem:[%s5426_s6 + $0x40] sm:$0xf] }
  0x73   : > { %v2252_v27 = vpack.c.b16 %v2222_v16, %v2221_v14  ;;  %v1883_v28 = vor.u32 %v1882_v19, %v1879_v17  ;;  %v1893_v29 = vor.u32 %v1892_v21, %v1888_v20  ;;  %v1238_v32 = vunpack.c.l.b16 %v1132_v25  ;;  %v5306_v13 = vld [vmem:[%s5426_s6 + $0x34] sm:$0xf]  ;;  %v1068_v14 = vld [vmem:[%s5426_s6 + $0x30] sm:$0xe] }
  0x74   : > { %v1239_v33 = vunpack.c.l.b16 %v1135_v26  ;;  %v1898_v36 = vrot.slane %v1896_v30, 5  ;;  %v1901_v44 = vshrl.u32 %v4792_v37, 16  ;;  %v1904_v50 = vshll.u32 %v4792_v37, 16  ;;  %v4797_v37 = vld [vmem:[%s5426_s6 + $0x44] sm:$0x1] }
  0x75   : > { %v1884_v34 = vrot.slane %v1883_v28, 4  ;;  %v1894_v35 = vrot.slane %v1893_v29, 4  ;;  %v1910_v51 = vshll.u32 %v4793_v47, 16  ;;  %v1914_v10 = vshrl.u32 %v4793_v47, 16  ;;  %v5307_v28 = vld [vmem:[%s5426_s6 + $0x38] sm:$0x1] }
  0x76   : > { %4849 = vmatmul.msk.bf16.vlgmr.msrb.gmra.mxu0 %vm685_vm3, %v2251_v53  ;;  %v1268_v38 = vpack.c.b16 %v1239_v33, %v1238_v32  ;;  %v4606_v53 = vrot.slane %v1067_v43, 9  ;;  %v1141_v22 = vrot.slane %v5634_v57, 5  ;;  %v1903_v46 = vrot.slane %v1901_v44, 4  ;;  %v5215_v57 = vld [vmem:[%s5426_s6 + $0x24] sm:$0xff]  ;;  %v5240_v29 = vld [vmem:[%s5426_s6 + $0x30] sm:$0xff] }
  0x77   : > { %v1889_v41 = vsel %vm5450_vm4, %v1884_v34, %v1888_v20  ;;  %v1899_v45 = vsel %vm5450_vm4, %v1894_v35, %v1898_v36  ;;  %v1906_v55 = vrot.slane %v1904_v50, 5  ;;  %v1912_v56 = vrot.slane %v1910_v51, 5 }
  0x78   : > { %4588 = vmatmul.msk.bf16.gmra.mxu1 %vm685_vm3, %v5213_v48  ;;  %v1140_v48 = vrot.slane %v1138_v40, 4  ;;  %v2223_v54 = vunpack.c.l.b16 %v1889_v41  ;;  %v2224_v23 = vunpack.c.l.b16 %v1899_v45  ;;  %v1916_v60 = vrot.slane %v1914_v10, 4  ;;  %v5216_v45 = vld [vmem:[%s5426_s6 + $0x30] sm:$0xff] }
  0x79   : > { %v1139_v62 = vsel %vm5657_vm7, %v4606_v53, %v1138_v40  ;;  %v1907_v1 = vor.u32 %v1906_v55, %v1903_v46  ;;  %v1920_v3 = vshll.u32 %v4794_v61, 16  ;;  %v1145_v15 = vrot.slane %v5306_v13, 5  ;;  %v5260_v46 = vld [vmem:[%s6888_s1 + $0x80] sm:$0xff]  ;;  %v4798_v55 = vld [vmem:[%s5426_s6 + $0x48] sm:$0xf] }
  0x7a   : > { %v1142_v63 = vsel %vm5657_vm7, %v1140_v48, %v1141_v22  ;;  %v1917_v2 = vor.u32 %v1916_v60, %v1912_v56  ;;  %v1240_v4 = vunpack.c.l.b16 %v1139_v62  ;;  %v1925_v16 = vshrl.u32 %v4795_v58, 16  ;;  %2761 = vmatpush.bf16.msra.mxu1 %v5260_v46  ;;  %v5309_v13 = vld [vmem:[%s5426_s6 + $0x44] sm:$0x1] }
  0x7b   : > { %v1241_v5 = vunpack.c.l.b16 %v1142_v63  ;;  %v1908_v7 = vrot.slane %v1907_v1, 4  ;;  %v1928_v17 = vshll.u32 %v4795_v58, 16  ;;  %v1934_v19 = vshll.u32 %v4796_v6, 16 }
  0x7c   : > { %v1918_v11 = vrot.slane %v1917_v2, 4  ;;  %v1938_v20 = vshrl.u32 %v4796_v6, 16  ;;  %v4607_v26 = vrot.slane %v1068_v14, 9  ;;  %v1927_v30 = vrot.slane %v1925_v16, 4  ;;  %v1069_v2 = vld [vmem:[%s5426_s6 + $0x3c] sm:$0xe] }
  0x7d   : > { %4638 = vmatmul.msk.bf16.gmra.mxu2 %vm685_vm3, %v1267_v0  ;;  %v2253_v0 = vpack.c.b16 %v2224_v23, %v2223_v54  ;;  %v1269_v12 = vpack.c.b16 %v1241_v5, %v1240_v4  ;;  %v1913_v24 = vsel %vm5450_vm4, %v1908_v7, %v1912_v56  ;;  %v1930_v32 = vrot.slane %v1928_v17, 5  ;;  %v5279_v54 = vld [vmem:[%s6888_s1 + $0x98] sm:$0xff]  ;;  %v5282_v23 = vld [vmem:[%s6888_s1 + $0xb0] sm:$0xff]  ;;  %v4799_v56 = vld [vmem:[%s5426_s6 + $0x4c] sm:$0xf] }
  0x7e   : > { %v1936_v33 = vrot.slane %v1934_v19, 5  ;;  %v1940_v34 = vrot.slane %v1938_v20, 4  ;;  %v2225_v35 = vunpack.c.l.b16 %v1913_v24  ;;  %v1944_v43 = vshll.u32 %v4797_v37, 16  ;;  %3070 = vmatpush.bf16.msra.mxu2 %v5279_v54  ;;  %3746 = vmatpush.bf16.msra.mxu3 %v5282_v23  ;;  %v5241_v7 = vld [vmem:[%s5426_s6 + $0x3c] sm:$0xff] }
  0x7f   : > { %v1931_v40 = vor.u32 %v1930_v32, %v1927_v30  ;;  %v1952_v4 = vshll.u32 %v4798_v55, 16  ;;  %v1958_v5 = vshll.u32 %v4799_v56, 16  ;;  %v1962_v58 = vshrl.u32 %v4799_v56, 16 }
  0x80   : > { %v1941_v41 = vor.u32 %v1940_v34, %v1936_v33  ;;  %v1946_v22 = vrot.slane %v1944_v43, 5  ;;  %v5217_v34 = vld [vmem:[%s5426_s6 + $0x3c] sm:$0xff]  ;;  %vm4381_vm8 = vcmask 257024  }
  0x81   : > { %v1932_v53 = vrot.slane %v1931_v40, 4  ;;  %v1954_v19 = vrot.slane %v1952_v4, 5  ;;  %v1960_v20 = vrot.slane %v1958_v5, 5  ;;  %v1964_v24 = vrot.slane %v1962_v58, 4 }
  0x82   : > { %4768 = vmatmul.msk.bf16.gmra.mxu3 %vm685_vm3, %v5238_v8  ;;  %v1922_v8 = vrot.slane %v1920_v3, 5  ;;  %v1942_v48 = vrot.slane %v1941_v41, 4  ;;  %v1949_v3 = vshrl.u32 %v4798_v55, 16 }
  0x83   : > { %v1937_v62 = vsel %vm5450_vm4, %v1932_v53, %v1936_v33  ;;  %v1965_v32 = vor.u32 %v1964_v24, %v1960_v20 }
  0x84   : > { %v1923_v25 = vsel %vm5450_vm4, %v1918_v11, %v1922_v8  ;;  %v1947_v63 = vsel %vm5450_vm4, %v1942_v48, %v1946_v22  ;;  %v2227_v6 = vunpack.c.l.b16 %v1937_v62  ;;  %v4608_v8 = vrot.slane %v1069_v2, 9  ;;  %v1070_v22 = vld [vmem:[%s5426_s6 + $0x48] sm:$0xe] }
  0x85   : > { %v2226_v36 = vunpack.c.l.b16 %v1923_v25  ;;  %v2228_v11 = vunpack.c.l.b16 %v1947_v63  ;;  %v1951_v17 = vrot.slane %v1949_v3, 4  ;;  %v4800_v25 = vld [vmem:[%s5426_s6 + $0x50] sm:$0x1]  ;;  %v4609_v62 = vrot.slane %v1070_v22, 9 }
  0x86   : > { %4850 = vmatmul.msk.bf16.gmra.mxu0 %vm685_vm3, %v2252_v27  ;;  %v1147_v27 = vrot.slane %v1145_v15, 4  ;;  %v1968_v33 = vshll.u32 %v4800_v25, 16  ;;  %v4804_v25 = vld [vmem:[%s5426_s6 + $0x60] sm:$0xf] }
  0x87   : > { %v2254_v44 = vpack.c.b16 %v2226_v36, %v2225_v35  ;;  %v1955_v30 = vor.u32 %v1954_v19, %v1951_v17 }
  0x88   : > { %4589 = vmatmul.msk.bf16.gmra.mxu1 %vm685_vm3, %v5214_v18  ;;  %v1148_v18 = vrot.slane %v5307_v28, 5  ;;  %v5285_v28 = vld [vmem:[%s6888_s1 + $0xc8] sm:$0xff]  ;;  %v1970_v40 = vrot.slane %v1968_v33, 5 }
  0x89   : > { %4166 = vmatpush.bf16.msra.mxu0 %v5285_v28 }
  0x8a   : > { %v1149_v47 = vsel %vm5657_vm7, %v1147_v27, %v1148_v18  ;;  %v2255_v18 = vpack.c.b16 %v2228_v11, %v2227_v6 }
  0x8b   : > { %v1243_v51 = vunpack.c.l.b16 %v1149_v47  ;;  %v1966_v47 = vrot.slane %v1965_v32, 4 }
  0x8d   : > { %4639 = vmatmul.msk.bf16.gmra.mxu2 %vm685_vm3, %v1268_v38  ;;  %v1146_v38 = vsel %vm5657_vm7, %v4607_v26, %v1145_v15  ;;  %v1155_v15 = vrot.slane %v5309_v13, 5  ;;  %v1971_v48 = vsel %vm5450_vm4, %v1966_v47, %v1970_v40  ;;  %v5218_v13 = vld [vmem:[%s5426_s6 + $0x48] sm:$0xff] }
  0x8e   : > { %v1242_v50 = vunpack.c.l.b16 %v1146_v38  ;;  %v1956_v38 = vrot.slane %v1955_v30, 4 }
  0x90   : > { %v1270_v61 = vpack.c.b16 %v1243_v51, %v1242_v50  ;;  %v4802_v50 = vld [vmem:[%s5426_s6 + $0x58] sm:$0xf]  ;;  %v1159_v51 = vrot.slane %v5540_v59, 5  ;;  %v1961_v53 = vsel %vm5450_vm4, %v1956_v38, %v1960_v20  ;;  %v1162_v59 = vrot.slane %v5555_v9, 5 }
  0x91   : > { %v1982_v46 = vshll.u32 %v4802_v50, 16  ;;  %v1986_v55 = vshrl.u32 %v4802_v50, 16  ;;  %v1166_v38 = vrot.slane %v5598_v39, 5 }
  0x92   : > { %4769 = vmatmul.msk.bf16.gmra.mxu3 %vm685_vm3, %v5239_v52  ;;  %v1161_v63 = vrot.slane %v1159_v51, 4  ;;  %v1160_v11 = vsel %vm5657_vm7, %v4609_v62, %v1159_v51 }
  0x93   : > { %v1984_v5 = vrot.slane %v1982_v46, 5  ;;  %v1988_v58 = vrot.slane %v1986_v55, 4  ;;  %v1246_v20 = vunpack.c.l.b16 %v1160_v11  ;;  %v1169_v46 = vrot.slane %v5605_v49, 5 }
  0x94   : > { %v1163_v9 = vsel %vm5657_vm7, %v1161_v63, %v1162_v59  ;;  %v4806_v63 = vld [vmem:[%s5426_s6 + $0x68] sm:$0x1] }
  0x95   : > { %v1989_v17 = vor.u32 %v1988_v58, %v1984_v5  ;;  %v1247_v24 = vunpack.c.l.b16 %v1163_v9 }
  0x96   : > { %4851 = vmatmul.msk.bf16.gmra.mxu0 %vm685_vm3, %v2253_v0  ;;  %v5308_v0 = vld [vmem:[%s5426_s6 + $0x40] sm:$0xf] }
  0x97   : > { %v1990_v30 = vrot.slane %v1989_v17, 4  ;;  %v1272_v33 = vpack.c.b16 %v1247_v24, %v1246_v20  ;;  %v4807_v20 = vld [vmem:[%s5426_s6 + $0x6c] sm:$0xf]  ;;  %v4808_v24 = vld [vmem:[%s5426_s6 + $0x70] sm:$0xf] }
  0x98   : > { %4590 = vmatmul.msk.bf16.gmra.mxu1 %vm685_vm3, %v5215_v57  ;;  %v1152_v57 = vrot.slane %v5308_v0, 5  ;;  %v2229_v0 = vunpack.c.l.b16 %v1961_v53 }
  0x9a   : > { %v1153_v26 = vsel %vm5657_vm7, %v4608_v8, %v1152_v57 }
  0x9b   : > { %v1244_v36 = vunpack.c.l.b16 %v1153_v26  ;;  %v4805_v26 = vld [vmem:[%s5426_s6 + $0x64] sm:$0xf] }
  0x9c   : > { %v5761_v21 = vpop.f32.mrf.mxu1  ;;  %v2010_v47 = vshrl.u32 %v4805_v26, 16 }
  0x9d   : > { %4640 = vmatmul.msk.bf16.gmra.mxu2 %vm685_vm3, %v1269_v12  ;;  %v1154_v12 = vrot.slane %v1152_v57, 4  ;;  %v2230_v57 = vunpack.c.l.b16 %v1971_v48 }
  0x9e   : > { %v2012_v55 = vrot.slane %v2010_v47, 4  ;;  %v2030_v47 = vshll.u32 %v4808_v24, 16 }
  0x9f   : > { %v1156_v27 = vsel %vm5657_vm7, %v1154_v12, %v1155_v15  ;;  %v2256_v8 = vpack.c.b16 %v2230_v57, %v2229_v0 }
  0xa0   : > { %v1245_v37 = vunpack.c.l.b16 %v1156_v27 }
  0xa2   : > { %4770 = vmatmul.msk.bf16.gmra.mxu3 %vm685_vm3, %v5240_v29  ;;  %v1271_v43 = vpack.c.b16 %v1245_v37, %v1244_v36  ;;  %v2000_v36 = vshll.u32 %v4804_v25, 16  ;;  %v2006_v37 = vshll.u32 %v4805_v26, 16 }
  0xa4   : > { %v5779_v52 = vpop.f32.mrf.mxu1  ;;  %v2002_v48 = vrot.slane %v2000_v36, 5  ;;  %v2008_v22 = vrot.slane %v2006_v37, 5  ;;  %v1072_v36 = vld [vmem:[%s5426_s6 + $0x60] sm:$0xe]  ;;  %v2021_v37 = vshrl.u32 %v4807_v20, 16 }
  0xa6   : > { %v5777_v10 = vpop.f32.mrf.mxu2  ;;  %4852 = vmatmul.msk.bf16.gmra.mxu0 %vm685_vm3, %v2254_v44  ;;  %v2013_v49 = vor.u32 %v2012_v55, %v2008_v22 }
  0xa8   : > { %4591 = vmatmul.msk.bf16.gmra.mxu1 %vm685_vm3, %v5216_v45  ;;  %v4801_v45 = vld [vmem:[%s5426_s6 + $0x54] sm:$0xf]  ;;  %v2014_v17 = vrot.slane %v2013_v49, 4 }
  0xa9   : > { %v1973_v54 = vshrl.u32 %v4801_v45, 16  ;;  %v1976_v23 = vshll.u32 %v4801_v45, 16 }
  0xaa   : > { %v5794_v60 = vpop.f32.mrf.mxu0  ;;  %v5801_v1 = vpop.f32.mrf.mxu3 }
  0xab   : > { %v1975_v3 = vrot.slane %v1973_v54, 4  ;;  %v1978_v4 = vrot.slane %v1976_v23, 5  ;;  %v5243_v54 = vld [vmem:[%s5426_s6 + $0x54] sm:$0xff]  ;;  %v1168_v23 = vrot.slane %v1166_v38, 4 }
  0xad   : > { %4641 = vmatmul.msk.bf16.gmra.mxu2 %vm685_vm3, %v1270_v61  ;;  %v5242_v61 = vld [vmem:[%s5426_s6 + $0x48] sm:$0xff]  ;;  %v1979_v15 = vor.u32 %v1978_v4, %v1975_v3  ;;  %v1170_v4 = vsel %vm5657_vm7, %v1168_v23, %v1169_v46  ;;  %v2023_v46 = vrot.slane %v2021_v37, 4  ;;  %v4811_v37 = vld [vmem:[%s5426_s6 + $0x7c] sm:$0xf] }
  0xae   : > { %v5807_v14 = vpop.f32.mrf.mxu2 }
  0xaf   : > { %v5809_v16 = vpop.f32.mrf.mxu1 }
  0xb2   : > { %4771 = vmatmul.msk.bf16.gmra.mxu3 %vm685_vm3, %v5241_v7  ;;  %v5820_v29 = vpop.f32.mrf.mxu0  ;;  %v5823_v35 = vpop.f32.mrf.mxu3  ;;  %v4803_v7 = vld [vmem:[%s5426_s6 + $0x5c] sm:$0x1] }
  0xb3   : > { %v1992_v19 = vshll.u32 %v4803_v7, 16  ;;  %v5219_v7 = vld [vmem:[%s5426_s6 + $0x54] sm:$0xff] }
  0xb5   : > { %v1994_v32 = vrot.slane %v1992_v19, 5 }
  0xb6   : > { %4853 = vmatmul.msk.bf16.gmra.mxu0 %vm685_vm3, %v2255_v18  ;;  %v1980_v18 = vrot.slane %v1979_v15, 4 }
  0xb7   : > { %v5826_v41 = vpop.f32.mrf.mxu1  ;;  %v1995_v50 = vsel %vm5450_vm4, %v1990_v30, %v1994_v32  ;;  %v5310_v32 = vld [vmem:[%s5426_s6 + $0x64] sm:$0xf] }
  0xb8   : > { %4592 = vmatmul.msk.bf16.gmra.mxu1 %vm685_vm3, %v5217_v34  ;;  %v1997_v34 = vshrl.u32 %v4804_v25, 16  ;;  %v1985_v45 = vsel %vm5450_vm4, %v1980_v18, %v1984_v5  ;;  %v2232_v62 = vunpack.c.l.b16 %v1995_v50  ;;  %v2016_v5 = vshll.u32 %v4806_v63, 16 }
  0xba   : > { %v5829_v44 = vpop.f32.mrf.mxu2  ;;  %v1999_v53 = vrot.slane %v1997_v34, 4  ;;  %v2018_v19 = vrot.slane %v2016_v5, 5 }
  0xbc   : > { %v2003_v57 = vor.u32 %v2002_v48, %v1999_v53  ;;  %v2019_v30 = vsel %vm5450_vm4, %v2014_v17, %v2018_v19  ;;  %v5244_v48 = vld [vmem:[%s5426_s6 + $0x60] sm:$0xff] }
  0xbd   : > { %v5839_v56 = vpop.f32.mrf.mxu0  ;;  %4642 = vmatmul.msk.bf16.gmra.mxu2 %vm685_vm3, %v1271_v43  ;;  %v1071_v43 = vld [vmem:[%s5426_s6 + $0x54] sm:$0xe] }
  0xbe   : > { %v4610_v39 = vrot.slane %v1071_v43, 9  ;;  %v2004_v15 = vrot.slane %v2003_v57, 4  ;;  %v2034_v43 = vshrl.u32 %v4808_v24, 16  ;;  %v4809_v57 = vld [vmem:[%s5426_s6 + $0x74] sm:$0x1] }
  0xbf   : > { %v5844_v2 = vpop.f32.mrf.mxu3 }
  0xc0   : > { %v1167_v3 = vsel %vm5657_vm7, %v4610_v39, %v1166_v38  ;;  %v2009_v18 = vsel %vm5450_vm4, %v2004_v15, %v2008_v22  ;;  %v2024_v38 = vshll.u32 %v4807_v20, 16  ;;  %v4611_v39 = vrot.slane %v1072_v36, 9  ;;  %v4810_v36 = vld [vmem:[%s5426_s6 + $0x78] sm:$0xf] }
  0xc1   : > { %v5846_v6 = vpop.f32.mrf.mxu1  ;;  %v1248_v9 = vunpack.c.l.b16 %v1167_v3  ;;  %v2233_v22 = vunpack.c.l.b16 %v2009_v18 }
  0xc2   : > { %4772 = vmatmul.msk.bf16.gmra.mxu3 %vm685_vm3, %v5242_v61  ;;  %v5854_v12 = vpop.f32.mrf.mxu2  ;;  %v2231_v61 = vunpack.c.l.b16 %v1985_v45  ;;  %v5311_v45 = vld [vmem:[%s5426_s6 + $0x68] sm:$0x1]  ;;  %v2026_v55 = vrot.slane %v2024_v38, 5  ;;  %v5312_v38 = vld [vmem:[%s5426_s6 + $0x70] sm:$0xf] }
  0xc3   : > { %v1176_v50 = vrot.slane %v5311_v45, 5  ;;  %v1073_v45 = vld [vmem:[%s5426_s6 + $0x6c] sm:$0xe] }
  0xc4   : > { %v2257_v58 = vpack.c.b16 %v2232_v62, %v2231_v61  ;;  %v2032_v61 = vrot.slane %v2030_v47, 5  ;;  %v2036_v62 = vrot.slane %v2034_v43, 4  ;;  %v2027_v5 = vor.u32 %v2026_v55, %v2023_v46  ;;  %v5313_v55 = vld [vmem:[%s5426_s6 + $0x74] sm:$0x1] }
  0xc5   : > { %v5860_v27 = vpop.f32.mrf.mxu0  ;;  %v1180_v47 = vrot.slane %v5312_v38, 5 }
  0xc6   : > { %4854 = vmatmul.msk.bf16.gmra.mxu0 %vm685_vm3, %v2256_v8  ;;  %v1249_v8 = vunpack.c.l.b16 %v1170_v4 }
  0xc7   : > { %v5862_v28 = vpop.f32.mrf.mxu3 }
  0xc8   : > { %4593 = vmatmul.msk.bf16.gmra.mxu1 %vm685_vm3, %v5218_v13  ;;  %v1273_v25 = vpack.c.b16 %v1249_v8, %v1248_v9  ;;  %v5220_v8 = vld [vmem:[%s5426_s6 + $0x60] sm:$0xff] }
  0xc9   : > { %v5866_v40 = vpop.f32.mrf.mxu1 }
  0xcd   : > { %4643 = vmatmul.msk.bf16.gmra.mxu2 %vm685_vm3, %v1272_v33  ;;  %v5874_v51 = vpop.f32.mrf.mxu2  ;;  %v1173_v33 = vrot.slane %v5310_v32, 5 }
  0xcf   : > { %v1175_v23 = vrot.slane %v1173_v33, 4  ;;  %v1174_v3 = vsel %vm5657_vm7, %v4611_v39, %v1173_v33  ;;  %v2058_v39 = vshrl.u32 %v4811_v37, 16 }
  0xd0   : > { %v5879_v59 = vpop.f32.mrf.mxu0  ;;  %v1250_v19 = vunpack.c.l.b16 %v1174_v3  ;;  %v4612_v3 = vrot.slane %v1073_v45, 9 }
  0xd1   : > { %v5881_v0 = vpop.f32.mrf.mxu3  ;;  %v1177_v4 = vsel %vm5657_vm7, %v1175_v23, %v1176_v50 }
  0xd2   : > { %4773 = vmatmul.msk.bf16.gmra.mxu3 %vm685_vm3, %v5243_v54  ;;  %v2234_v54 = vunpack.c.l.b16 %v2019_v30  ;;  %v1251_v20 = vunpack.c.l.b16 %v1177_v4  ;;  %v1182_v4 = vrot.slane %v1180_v47, 4 }
  0xd4   : > { %v2258_v49 = vpack.c.b16 %v2234_v54, %v2233_v22  ;;  %v1274_v33 = vpack.c.b16 %v1251_v20, %v1250_v19  ;;  %v2048_v22 = vshll.u32 %v4810_v36, 16  ;;  %v2054_v54 = vshll.u32 %v4811_v37, 16 }
  0xd5   : > { %v5889_v11 = vpop.f32.mrf.mxu1  ;;  %v5891_v13 = vpop.f32.mrf.mxu2  ;;  %v2060_v19 = vrot.slane %v2058_v39, 4 }
  0xd6   : > { %4855 = vmatmul.msk.bf16.gmra.mxu0 %vm685_vm3, %v2257_v58  ;;  %v2037_v58 = vor.u32 %v2036_v62, %v2032_v61  ;;  %v1183_v62 = vrot.slane %v5313_v55, 5 }
  0xd8   : > { %4594 = vmatmul.msk.bf16.gmra.mxu1 %vm685_vm3, %v5219_v7  ;;  %v5897_v26 = vpop.f32.mrf.mxu0  ;;  %v2040_v7 = vshll.u32 %v4809_v57, 16  ;;  %v2038_v18 = vrot.slane %v2037_v58, 4  ;;  %v5245_v57 = vld [vmem:[%s5426_s6 + $0x6c] sm:$0xff] }
  0xd9   : > { %v5904_v34 = vpop.f32.mrf.mxu3 }
  0xda   : > { %v2042_v30 = vrot.slane %v2040_v7, 5 }
  0xdd   : > { %4644 = vmatmul.msk.bf16.gmra.mxu2 %vm685_vm3, %v1273_v25  ;;  %v5909_v53 = vpop.f32.mrf.mxu1  ;;  %v2028_v25 = vrot.slane %v2027_v5, 4 }
  0xdf   : > { %v2033_v43 = vsel %vm5450_vm4, %v2028_v25, %v2032_v61  ;;  %v4812_v25 = vld [vmem:[%s5426_s6 + $0x80] sm:$0x1] }
  0xe0   : > { %v5912_v63 = vpop.f32.mrf.mxu2 }
  0xe2   : > { %4774 = vmatmul.msk.bf16.gmra.mxu3 %vm685_vm3, %v5244_v48  ;;  %v2045_v48 = vshrl.u32 %v4810_v36, 16  ;;  %v5221_v36 = vld [vmem:[%s5426_s6 + $0x6c] sm:$0xff] }
  0xe3   : > { %v5920_v9 = vpop.f32.mrf.mxu0 }
  0xe4   : > { %v2047_v7 = vrot.slane %v2045_v48, 4 }
  0xe5   : > { %v5923_v15 = vpop.f32.mrf.mxu3  ;;  %v984_v17 = vpop.f32.mrf.mxu1 }
  0xe6   : > { %v985_v24 = vadd.f32 %v984_v17, %v5794_v60  ;;  %4856 = vmatmul.msk.bf16.gmra.mxu0 %vm685_vm3, %v2258_v49  ;;  %v2043_v60 = vsel %vm5450_vm4, %v2038_v18, %v2042_v30  ;;  %v2235_v49 = vunpack.c.l.b16 %v2033_v43  ;;  %v2056_v17 = vrot.slane %v2054_v54, 5 }
  0xe7   : > { %v2236_v5 = vunpack.c.l.b16 %v2043_v60  ;;  %v1181_v18 = vsel %vm5657_vm7, %v4612_v3, %v1180_v47  ;;  %v2064_v43 = vshll.u32 %v4812_v25, 16 }
  0xe8   : > { %v5927_v32 = vpop.f32.mrf.mxu2  ;;  %4595 = vmatmul.msk.bf16.gmra.mxu1 %vm685_vm3, %v5220_v8  ;;  %v2050_v8 = vrot.slane %v2048_v22, 5  ;;  %v2061_v38 = vor.u32 %v2060_v19, %v2056_v17 }
  0xe9   : > { %v2259_v30 = vpack.c.b16 %v2236_v5, %v2235_v49  ;;  %v2066_v55 = vrot.slane %v2064_v43, 5  ;;  %v4814_v49 = vld [vmem:[%s5426_s6 + $0x88] sm:$0xf]  ;;  %v5314_v5 = vld [vmem:[%s5426_s6 + $0x7c] sm:$0xf] }
  0xea   : > { %v2051_v37 = vor.u32 %v2050_v8, %v2047_v7  ;;  %v1074_v7 = vld [vmem:[%s5426_s6 + $0x78] sm:$0xe] }
  0xeb   : > { %v5938_v50 = vpop.f32.mrf.mxu0 }
  0xec   : > { %v2052_v39 = vrot.slane %v2051_v37, 4 }
  0xed   : > { %v5940_v23 = vpop.f32.mrf.mxu3  ;;  %4645 = vmatmul.msk.bf16.gmra.mxu2 %vm685_vm3, %v1274_v33  ;;  %v986_v46 = vpop.f32.mrf.mxu1 }
  0xee   : > { %v987_v61 = vadd.f32 %v986_v46, %v5820_v29  ;;  %v1184_v29 = vsel %vm5657_vm7, %v1182_v4, %v1183_v62  ;;  %v2062_v46 = vrot.slane %v2061_v38, 4  ;;  %v4813_v62 = vld [vmem:[%s5426_s6 + $0x84] sm:$0xf]  ;;  %v5246_v38 = vld [vmem:[%s5426_s6 + $0x78] sm:$0xff] }
  0xef   : > { %v1253_v48 = vunpack.c.l.b16 %v1184_v29  ;;  %v2072_v8 = vshll.u32 %v4813_v62, 16  ;;  %v2082_v29 = vshrl.u32 %v4814_v49, 16 }
  0xf0   : > { %v1359_v58 = vpop.f32.mrf.mxu2  ;;  %v2067_v25 = vsel %vm5450_vm4, %v2062_v46, %v2066_v55 }
  0xf1   : > { %v1439_v20 = vadd.f32 %v1359_v58, %v985_v24  ;;  %v1252_v24 = vunpack.c.l.b16 %v1181_v18  ;;  %v1187_v58 = vrot.slane %v5314_v5, 5  ;;  %v2078_v18 = vshll.u32 %v4814_v49, 16 }
  0xf2   : > { %4775 = vmatmul.msk.bf16.gmra.mxu3 %vm685_vm3, %v5245_v57 }
  0xf3   : > { %v2344_v33 = vpop.f32.mrf.mxu0  ;;  %v1275_v4 = vpack.c.b16 %v1253_v48, %v1252_v24  ;;  %v5281_v24 = vld [vmem:[%s6888_s1 + $0xa8] sm:$0xff]  ;;  %v2080_v55 = vrot.slane %v2078_v18, 5 }
  0xf4   : > { %3747 = vmatpush.bf16.msra.mxu3 %v5281_v24 }
  0xf5   : > { %v1668_v60 = vpop.f32.mrf.mxu3  ;;  %v989_v45 = vpop.f32.mrf.mxu1 }
  0xf6   : > { %v1748_v22 = vadd.f32 %v1668_v60, %v1439_v20  ;;  %v990_v47 = vadd.f32 %v989_v45, %v5839_v56  ;;  %4857 = vmatmul.msk.bf16.gmra.mxu0 %vm685_vm3, %v2259_v30  ;;  %v2069_v56 = vshrl.u32 %v4813_v62, 16  ;;  %v2057_v20 = vsel %vm5450_vm4, %v2052_v39, %v2056_v17  ;;  %v5315_v30 = vld [vmem:[%s5426_s6 + $0x80] sm:$0x1]  ;;  %v5278_v17 = vld [vmem:[%s6888_s1 + $0x90] sm:$0xff] }
  0xf7   : > { %v4613_v60 = vrot.slane %v1074_v7, 9  ;;  %v1189_v45 = vrot.slane %v1187_v58, 4  ;;  %v2237_v48 = vunpack.c.l.b16 %v2057_v20  ;;  %v2074_v39 = vrot.slane %v2072_v8, 5  ;;  %3071 = vmatpush.bf16.msra.mxu2 %v5278_v17  ;;  %v5222_v20 = vld [vmem:[%s5426_s6 + $0x78] sm:$0xff]  ;;  %v4816_v17 = vld [vmem:[%s5426_s6 + $0x90] sm:$0xf] }
  0xf8   : > { %v1361_v54 = vpop.f32.mrf.mxu2  ;;  %4596 = vmatmul.msk.bf16.gmra.mxu1 %vm685_vm3, %v5221_v36  ;;  %v5957_v57 = vadd.f32 %v2344_v33, %v1748_v22  ;;  %v1190_v33 = vrot.slane %v5315_v30, 5  ;;  %v2238_v22 = vunpack.c.l.b16 %v2067_v25  ;;  %v2084_v62 = vrot.slane %v2082_v29, 4 }
  0xf9   : > { %v1440_v3 = vadd.f32 %v1361_v54, %v987_v61  ;;  %v2071_v54 = vrot.slane %v2069_v56, 4  ;;  %v1188_v49 = vsel %vm5657_vm7, %v4613_v60, %v1187_v58 }
  0xfa   : > { %v1191_v5 = vsel %vm5657_vm7, %v1189_v45, %v1190_v33  ;;  %v2260_v7 = vpack.c.b16 %v2238_v22, %v2237_v48  ;;  %v2085_v25 = vor.u32 %v2084_v62, %v2080_v55  ;;  %v1254_v30 = vunpack.c.l.b16 %v1188_v49  ;;  %v4817_v22 = vld [vmem:[%s5426_s6 + $0x94] sm:$0xf]  ;;  %v1075_v62 = vld [vmem:[%s5426_s6 + $0x84] sm:$0xe] }
  0xfb   : > { %v2346_v19 = vpop.f32.mrf.mxu0  ;;  %v2075_v56 = vor.u32 %v2074_v39, %v2071_v54  ;;  %v5316_v54 = vld [vmem:[%s5426_s6 + $0x88] sm:$0xf] }
  0xfc   : > { %v2086_v60 = vrot.slane %v2085_v25, 4  ;;  %v1194_v39 = vrot.slane %v5316_v54, 5 }
  0xfd   : > { %v1670_v61 = vpop.f32.mrf.mxu3  ;;  %4646 = vmatmul.msk.bf16.gmra.mxu2 %vm685_vm3, %v1275_v4  ;;  %v991_v36 = vpop.f32.mrf.mxu1  ;;  %v4815_v4 = vld [vmem:[%s5426_s6 + $0x8c] sm:$0x1] }
  0xfe   : > { %v1749_v37 = vadd.f32 %v1670_v61, %v1440_v3  ;;  %v992_v43 = vadd.f32 %v991_v36, %v5860_v27  ;;  %v2088_v18 = vshll.u32 %v4815_v4, 16  ;;  %v1255_v61 = vunpack.c.l.b16 %v1191_v5 }
  0xff   : > { %v2076_v36 = vrot.slane %v2075_v56, 4  ;;  %v2096_v5 = vshll.u32 %v4816_v17, 16  ;;  %v2106_v56 = vshrl.u32 %v4817_v22, 16 }
 0x100   : > { %v1364_v46 = vpop.f32.mrf.mxu2  ;;  %v5976_v27 = vadd.f32 %v2346_v19, %v1749_v37  ;;  %v5284_v37 = vld [vmem:[%s6888_s1 + $0xc0] sm:$0xff]  ;;  %v2090_v45 = vrot.slane %v2088_v18, 5 }
 0x101   : > { %v1441_v3 = vadd.f32 %v1364_v46, %v990_v47  ;;  %v5259_v47 = vld [vmem:[%s6888_s1 + $0x78] sm:$0xff]  ;;  %4167 = vmatpush.bf16.msra.mxu0 %v5284_v37  ;;  %v2081_v46 = vsel %vm5450_vm4, %v2076_v36, %v2080_v55  ;;  %v2098_v37 = vrot.slane %v2096_v5, 5 }
 0x102   : > { %4776 = vmatmul.msk.bf16.gmra.mxu3 %vm685_vm3, %v5246_v38  ;;  %2762 = vmatpush.bf16.msra.mxu1 %v5259_v47  ;;  %v2091_v49 = vsel %vm5450_vm4, %v2086_v60, %v2090_v45  ;;  %v5247_v47 = vld [vmem:[%s5426_s6 + $0x84] sm:$0xff]  ;;  %v2108_v60 = vrot.slane %v2106_v56, 4 }
 0x103   : > { %v2349_v8 = vpop.f32.mrf.mxu0 }
 0x105   : > { %v1673_v19 = vpop.f32.mrf.mxu3  ;;  %v994_v29 = vpop.f32.mrf.mxu1 }
 0x106   : > { %v1750_v58 = vadd.f32 %v1673_v19, %v1441_v3  ;;  %v995_v33 = vadd.f32 %v994_v29, %v5879_v59  ;;  %4858 = vmatmul.msk.bf16.gmra.mxu0 %vm685_vm3, %v2260_v7  ;;  %v1276_v59 = vpack.c.b16 %v1255_v61, %v1254_v30  ;;  %v2093_v3 = vshrl.u32 %v4816_v17, 16 }
 0x107   : > { %v2102_v7 = vshll.u32 %v4817_v22, 16  ;;  %v4614_v19 = vrot.slane %v1075_v62, 9  ;;  %v1196_v29 = vrot.slane %v1194_v39, 4  ;;  %v2239_v30 = vunpack.c.l.b16 %v2081_v46  ;;  %v5223_v46 = vld [vmem:[%s5426_s6 + $0x84] sm:$0xff] }
 0x108   : > { %v1366_v38 = vpop.f32.mrf.mxu2  ;;  %4597 = vmatmul.msk.bf16.gmra.mxu1 %vm685_vm3, %v5222_v20  ;;  %v5995_v24 = vadd.f32 %v2349_v8, %v1750_v58  ;;  %v5317_v8 = vld [vmem:[%s5426_s6 + $0x8c] sm:$0x1]  ;;  %v2240_v61 = vunpack.c.l.b16 %v2091_v49  ;;  %v2095_v58 = vrot.slane %v2093_v3, 4 }
 0x109   : > { %v1442_v48 = vadd.f32 %v1366_v38, %v992_v43  ;;  %v1197_v43 = vrot.slane %v5317_v8, 5  ;;  %v2104_v38 = vrot.slane %v2102_v7, 5 }
 0x10a   : > { %v2261_v22 = vpack.c.b16 %v2240_v61, %v2239_v30  ;;  %v2099_v62 = vor.u32 %v2098_v37, %v2095_v58  ;;  %v4820_v30 = vld [vmem:[%s5426_s6 + $0xa0] sm:$0xf]  ;;  %v1076_v37 = vld [vmem:[%s5426_s6 + $0x90] sm:$0xe] }
 0x10b   : > { %v2351_v4 = vpop.f32.mrf.mxu0  ;;  %v2109_v3 = vor.u32 %v2108_v60, %v2104_v38 }
 0x10d   : > { %v1675_v20 = vpop.f32.mrf.mxu3  ;;  %4647 = vmatmul.msk.bf16.gmra.mxu2 %vm685_vm3, %v1276_v59  ;;  %v996_v25 = vpop.f32.mrf.mxu1  ;;  %v4818_v59 = vld [vmem:[%s5426_s6 + $0x98] sm:$0x1] }
 0x10e   : > { %v1751_v18 = vadd.f32 %v1675_v20, %v1442_v48  ;;  %v997_v55 = vadd.f32 %v996_v25, %v5897_v26  ;;  %v1195_v26 = vsel %vm5657_vm7, %v4614_v19, %v1194_v39  ;;  %v1198_v48 = vsel %vm5657_vm7, %v1196_v29, %v1197_v43  ;;  %v4819_v39 = vld [vmem:[%s5426_s6 + $0x9c] sm:$0xf] }
 0x10f   : > { %v2112_v49 = vshll.u32 %v4818_v59, 16  ;;  %v1257_v7 = vunpack.c.l.b16 %v1198_v48  ;;  %v2100_v20 = vrot.slane %v2099_v62, 4  ;;  %v2110_v25 = vrot.slane %v2109_v3, 4 }
 0x110   : > { %v1369_v36 = vpop.f32.mrf.mxu2  ;;  %v6008_v45 = vadd.f32 %v2351_v4, %v1751_v18  ;;  %v2117_v61 = vshrl.u32 %v4819_v39, 16  ;;  %v2120_v58 = vshll.u32 %v4819_v39, 16  ;;  %v2130_v48 = vshrl.u32 %v4820_v30, 16 }
 0x111   : > { %v1443_v17 = vadd.f32 %v1369_v36, %v995_v33  ;;  %v1256_v33 = vunpack.c.l.b16 %v1195_v26  ;;  %v2114_v18 = vrot.slane %v2112_v49, 5  ;;  %v5318_v36 = vld [vmem:[%s5426_s6 + $0x94] sm:$0xf]  ;;  %v2126_v26 = vshll.u32 %v4820_v30, 16 }
 0x112   : > { %4777 = vmatmul.msk.bf16.gmra.mxu3 %vm685_vm3, %v5247_v47  ;;  %v2119_v62 = vrot.slane %v2117_v61, 4  ;;  %v2122_v3 = vrot.slane %v2120_v58, 5 }
 0x113   : > { %v2354_v54 = vpop.f32.mrf.mxu0  ;;  %v1277_v29 = vpack.c.b16 %v1257_v7, %v1256_v33  ;;  %v2115_v59 = vsel %vm5450_vm4, %v2110_v25, %v2114_v18  ;;  %v4615_v33 = vrot.slane %v1076_v37, 9 }
 0x114   : > { %v2123_v30 = vor.u32 %v2122_v3, %v2119_v62  ;;  %v4823_v62 = vld [vmem:[%s5426_s6 + $0xac] sm:$0xf] }
 0x115   : > { %v1678_v5 = vpop.f32.mrf.mxu3  ;;  %v999_v4 = vpop.f32.mrf.mxu1 }
 0x116   : > { %v1752_v56 = vadd.f32 %v1678_v5, %v1443_v17  ;;  %v1000_v8 = vadd.f32 %v999_v4, %v5920_v9  ;;  %4859 = vmatmul.msk.bf16.gmra.mxu0 %vm685_vm3, %v2261_v22  ;;  %v1201_v9 = vrot.slane %v5318_v36, 5  ;;  %v2105_v17 = vsel %vm5450_vm4, %v2100_v20, %v2104_v38  ;;  %v5319_v22 = vld [vmem:[%s5426_s6 + $0x98] sm:$0x1]  ;;  %v5248_v5 = vld [vmem:[%s5426_s6 + $0x90] sm:$0xff] }
 0x117   : > { %v2241_v7 = vunpack.c.l.b16 %v2105_v17  ;;  %v2132_v20 = vrot.slane %v2130_v48, 4  ;;  %v5224_v36 = vld [vmem:[%s5426_s6 + $0x90] sm:$0xff] }
 0x118   : > { %v1371_v43 = vpop.f32.mrf.mxu2  ;;  %4598 = vmatmul.msk.bf16.gmra.mxu1 %vm685_vm3, %v5223_v46  ;;  %v6021_v47 = vadd.f32 %v2354_v54, %v1752_v56  ;;  %v1204_v54 = vrot.slane %v5319_v22, 5  ;;  %v1203_v38 = vrot.slane %v1201_v9, 4  ;;  %v2242_v56 = vunpack.c.l.b16 %v2115_v59 }
 0x119   : > { %v1444_v19 = vadd.f32 %v1371_v43, %v997_v55  ;;  %v2128_v43 = vrot.slane %v2126_v26, 5  ;;  %v2124_v22 = vrot.slane %v2123_v30, 4  ;;  %v5321_v30 = vld [vmem:[%s5426_s6 + $0xa4] sm:$0x1] }
 0x11a   : > { %v2262_v61 = vpack.c.b16 %v2242_v56, %v2241_v7  ;;  %v5320_v7 = vld [vmem:[%s5426_s6 + $0xa0] sm:$0xf] }
 0x11b   : > { %v2356_v60 = vpop.f32.mrf.mxu0  ;;  %v2133_v37 = vor.u32 %v2132_v20, %v2128_v43  ;;  %v1208_v56 = vrot.slane %v5320_v7, 5  ;;  %v1077_v20 = vld [vmem:[%s5426_s6 + $0x9c] sm:$0xe] }
 0x11d   : > { %v1680_v55 = vpop.f32.mrf.mxu3  ;;  %4648 = vmatmul.msk.bf16.gmra.mxu2 %vm685_vm3, %v1277_v29  ;;  %v1001_v46 = vpop.f32.mrf.mxu1  ;;  %v4821_v29 = vld [vmem:[%s5426_s6 + $0xa4] sm:$0x1] }
 0x11e   : > { %v1753_v49 = vadd.f32 %v1680_v55, %v1444_v19  ;;  %v1002_v4 = vadd.f32 %v1001_v46, %v5938_v50  ;;  %v1202_v19 = vsel %vm5657_vm7, %v4615_v33, %v1201_v9  ;;  %v1205_v50 = vsel %vm5657_vm7, %v1203_v38, %v1204_v54  ;;  %v4822_v55 = vld [vmem:[%s5426_s6 + $0xa8] sm:$0xf] }
 0x11f   : > { %v2136_v17 = vshll.u32 %v4821_v29, 16  ;;  %v1259_v26 = vunpack.c.l.b16 %v1205_v50  ;;  %v2134_v54 = vrot.slane %v2133_v37, 4  ;;  %v2141_v33 = vshrl.u32 %v4822_v55, 16 }
 0x120   : > { %v1374_v39 = vpop.f32.mrf.mxu2  ;;  %v6034_v25 = vadd.f32 %v2356_v60, %v1753_v49  ;;  %v2129_v38 = vsel %vm5450_vm4, %v2124_v22, %v2128_v43  ;;  %v2154_v29 = vshrl.u32 %v4823_v62, 16 }
 0x121   : > { %v1445_v18 = vadd.f32 %v1374_v39, %v1000_v8  ;;  %v1258_v8 = vunpack.c.l.b16 %v1202_v19  ;;  %v2138_v46 = vrot.slane %v2136_v17, 5  ;;  %v2144_v39 = vshll.u32 %v4822_v55, 16  ;;  %v5249_v17 = vld [vmem:[%s5426_s6 + $0x9c] sm:$0xff] }
 0x122   : > { %4778 = vmatmul.msk.bf16.gmra.mxu3 %vm685_vm3, %v5248_v5  ;;  %v2143_v43 = vrot.slane %v2141_v33, 4 }
 0x123   : > { %v2359_v58 = vpop.f32.mrf.mxu0  ;;  %v1278_v5 = vpack.c.b16 %v1259_v26, %v1258_v8  ;;  %v2139_v50 = vsel %vm5450_vm4, %v2134_v54, %v2138_v46  ;;  %v1210_v8 = vrot.slane %v1208_v56, 4  ;;  %v2146_v26 = vrot.slane %v2144_v39, 5  ;;  %v4824_v46 = vld [vmem:[%s5426_s6 + $0xb0] sm:$0x1] }
 0x124   : > { %v2244_v22 = vunpack.c.l.b16 %v2139_v50 }
 0x125   : > { %v1683_v60 = vpop.f32.mrf.mxu3  ;;  %v1004_v59 = vpop.f32.mrf.mxu1  ;;  %v2147_v33 = vor.u32 %v2146_v26, %v2143_v43 }
 0x126   : > { %v1754_v48 = vadd.f32 %v1683_v60, %v1445_v18  ;;  %4860 = vmatmul.msk.bf16.gmra.mxu0 %vm685_vm3, %v2262_v61  ;;  %v2150_v18 = vshll.u32 %v4823_v62, 16  ;;  %v1211_v61 = vrot.slane %v5321_v30, 5  ;;  %v4616_v60 = vrot.slane %v1077_v20, 9  ;;  %v5225_v20 = vld [vmem:[%s5426_s6 + $0x9c] sm:$0xff] }
 0x128   : > { %v1376_v9 = vpop.f32.mrf.mxu2  ;;  %4599 = vmatmul.msk.bf16.gmra.mxu1 %vm685_vm3, %v5224_v36  ;;  %v6047_v3 = vadd.f32 %v2359_v58, %v1754_v48  ;;  %v2243_v58 = vunpack.c.l.b16 %v2129_v38  ;;  %v1005_v48 = vadd.f32 %v1004_v59, %v5761_v21  ;;  %v2152_v55 = vrot.slane %v2150_v18, 5 }
 0x129   : > { %v1446_v49 = vadd.f32 %v1376_v9, %v1002_v4  ;;  %v2156_v9 = vrot.slane %v2154_v29, 4  ;;  %v2160_v38 = vshll.u32 %v4824_v46, 16 }
 0x12a   : > { %v2263_v21 = vpack.c.b16 %v2244_v22, %v2243_v58  ;;  %v4825_v58 = vld [vmem:[%s5426_s6 + $0xb4] sm:$0xf] }
 0x12b   : > { %v2361_v19 = vpop.f32.mrf.mxu0  ;;  %v2157_v59 = vor.u32 %v2156_v9, %v2152_v55  ;;  %v2162_v43 = vrot.slane %v2160_v38, 5  ;;  %v2168_v46 = vshll.u32 %v4825_v58, 16 }
 0x12d   : > { %v1685_v4 = vpop.f32.mrf.mxu3  ;;  %4649 = vmatmul.msk.bf16.gmra.mxu2 %vm685_vm3, %v1278_v5  ;;  %v1006_v36 = vpop.f32.mrf.mxu1  ;;  %v1212_v5 = vsel %vm5657_vm7, %v1210_v8, %v1211_v61  ;;  %v2158_v61 = vrot.slane %v2157_v59, 4 }
 0x12e   : > { %v1755_v37 = vadd.f32 %v1685_v4, %v1446_v49  ;;  %v1209_v49 = vsel %vm5657_vm7, %v4616_v60, %v1208_v56  ;;  %v1261_v50 = vunpack.c.l.b16 %v1212_v5  ;;  %v2148_v4 = vrot.slane %v2147_v33, 4  ;;  %v5323_v33 = vld [vmem:[%s5426_s6 + $0xb0] sm:$0x1] }
 0x12f   : > { %v1007_v56 = vadd.f32 %v1006_v36, %v5779_v52  ;;  %v2165_v52 = vshrl.u32 %v4825_v58, 16  ;;  %v2163_v36 = vsel %vm5450_vm4, %v2158_v61, %v2162_v43 }
 0x130   : > { %v1379_v54 = vpop.f32.mrf.mxu2  ;;  %v6060_v62 = vadd.f32 %v2361_v19, %v1755_v37  ;;  %v1260_v19 = vunpack.c.l.b16 %v1209_v49  ;;  %v2153_v9 = vsel %vm5450_vm4, %v2148_v4, %v2152_v55 }
 0x131   : > { %v1447_v7 = vadd.f32 %v1379_v54, %v1005_v48  ;;  %v5322_v48 = vld [vmem:[%s5426_s6 + $0xac] sm:$0xf]  ;;  %v1078_v54 = vld [vmem:[%s5426_s6 + $0xa8] sm:$0xe] }
 0x132   : > { %4779 = vmatmul.msk.bf16.gmra.mxu3 %vm685_vm3, %v5249_v17  ;;  %v4826_v17 = vld [vmem:[%s5426_s6 + $0xb8] sm:$0xf]  ;;  %v1279_v26 = vpack.c.b16 %v1261_v50, %v1260_v19  ;;  %v1215_v22 = vrot.slane %v5322_v48, 5  ;;  %v2245_v19 = vunpack.c.l.b16 %v2153_v9  ;;  %v2246_v50 = vunpack.c.l.b16 %v2163_v36  ;;  %v4827_v48 = vld [vmem:[%s5426_s6 + $0xbc] sm:$0x1] }
 0x133   : > { %v2364_v39 = vpop.f32.mrf.mxu0  ;;  %v2178_v49 = vshrl.u32 %v4826_v17, 16 }
 0x135   : > { %v1688_v18 = vpop.f32.mrf.mxu3  ;;  %v1009_v29 = vpop.f32.mrf.mxu1  ;;  %v2180_v43 = vrot.slane %v2178_v49, 4 }
 0x136   : > { %v1756_v30 = vadd.f32 %v1688_v18, %v1447_v7  ;;  %4861 = vmatmul.msk.bf16.gmra.mxu0 %vm685_vm3, %v2263_v21  ;;  %v2174_v7 = vshll.u32 %v4826_v17, 16  ;;  %v1218_v21 = vrot.slane %v5323_v33, 5  ;;  %v5250_v18 = vld [vmem:[%s5426_s6 + $0xa8] sm:$0xff]  ;;  %v1010_v4 = vadd.f32 %v1009_v29, %v5809_v16 }
 0x137   : > { %v2264_v16 = vpack.c.b16 %v2246_v50, %v2245_v19 }
 0x138   : > { %v1381_v37 = vpop.f32.mrf.mxu2  ;;  %4600 = vmatmul.msk.bf16.gmra.mxu1 %vm685_vm3, %v5225_v20  ;;  %v6073_v60 = vadd.f32 %v2364_v39, %v1756_v30  ;;  %v4617_v39 = vrot.slane %v1078_v54, 9  ;;  %v1217_v20 = vrot.slane %v1215_v22, 4  ;;  %v2167_v30 = vrot.slane %v2165_v52, 4  ;;  %v5226_v52 = vld [vmem:[%s5426_s6 + $0xa8] sm:$0xff] }
 0x139   : > { %v1448_v8 = vadd.f32 %v1381_v37, %v1007_v56  ;;  %v2170_v56 = vrot.slane %v2168_v46, 5  ;;  %v6085_v61 = vrot.slane %v2174_v7, 5  ;;  %v2184_v7 = vshll.u32 %v4827_v48, 16 }
 0x13b   : > { %v2366_v5 = vpop.f32.mrf.mxu0  ;;  %v2171_v29 = vor.u32 %v2170_v56, %v2167_v30  ;;  %v2181_v9 = vor.u32 %v2180_v43, %v6085_v61  ;;  %v2186_v30 = vrot.slane %v2184_v7, 5 }
 0x13d   : > { %v1690_v59 = vpop.f32.mrf.mxu3  ;;  %4650 = vmatmul.msk.bf16.gmra.mxu2 %vm685_vm3, %v1279_v26  ;;  %v1011_v38 = vpop.f32.mrf.mxu1  ;;  %v1216_v26 = vsel %vm5657_vm7, %v4617_v39, %v1215_v22  ;;  %v4828_v22 = vld [vmem:[%s5426_s6 + $0xc0] sm:$0xf]  ;;  %v5324_v39 = vld [vmem:[%s5426_s6 + $0x10] sm:$0xf] }
 0x13e   : > { %v1757_v55 = vadd.f32 %v1690_v59, %v1448_v8  ;;  %v1219_v8 = vsel %vm5657_vm7, %v1217_v20, %v1218_v21  ;;  %v1262_v36 = vunpack.c.l.b16 %v1216_v26  ;;  %v4829_v59 = vld [vmem:[%s5426_s6 + $0xc4] sm:$0xf]  ;;  %v2522_v21 = vrot.slane %v5324_v39, 5 }
 0x13f   : > { %v1263_v46 = vunpack.c.l.b16 %v1219_v8  ;;  %v1012_v20 = vadd.f32 %v1011_v38, %v5826_v41  ;;  %v2192_v56 = vshll.u32 %v4828_v22, 16  ;;  %v5325_v8 = vld [vmem:[%s5426_s6 + $0xb8] sm:$0xf]  ;;  %v1079_v38 = vld [vmem:[%s5426_s6 + $0xb4] sm:$0xe] }
 0x140   : > { %v1384_v58 = vpop.f32.mrf.mxu2  ;;  %v6087_v37 = vadd.f32 %v2366_v5, %v1757_v55  ;;  %v2172_v55 = vrot.slane %v2171_v29, 4  ;;  %v1222_v48 = vrot.slane %v5325_v8, 5  ;;  %v2524_v29 = vrot.slane %v2522_v21, 4  ;;  %v5251_v8 = vld [vmem:[%s5426_s6 + $0xb4] sm:$0xff] }
 0x141   : > { %v1449_v17 = vadd.f32 %v1384_v58, %v1010_v4  ;;  %v1280_v50 = vpack.c.b16 %v1263_v46, %v1262_v36  ;;  %v2189_v4 = vshrl.u32 %v4828_v22, 16  ;;  %v2198_v58 = vshll.u32 %v4829_v59, 16 }
 0x142   : > { %6895 = vst [vmem:[#allocation2_spill] sm:$0xff] %v6087_v37  ;;  %4780 = vmatmul.msk.bf16.gmra.mxu3 %vm685_vm3, %v5250_v18  ;;  %v2182_v18 = vrot.slane %v2181_v9, 4  ;;  %v5327_v9 = vld [vmem:[%s5426_s6 + $0x14] sm:$0x1]  ;;  %v2177_v36 = vsel %vm5450_vm4, %v2172_v55, %v6085_v61 }
 0x143   : > { %v2369_v54 = vpop.f32.mrf.mxu0  ;;  %v2191_v22 = vrot.slane %v2189_v4, 4  ;;  %v2247_v55 = vunpack.c.l.b16 %v2177_v36 }
 0x144   : > { %v2187_v46 = vsel %vm5450_vm4, %v2182_v18, %v2186_v30  ;;  %v4830_v30 = vld [vmem:[%s5426_s6 + $0xc8] sm:$0x1] }
 0x145   : > { %v1693_v49 = vpop.f32.mrf.mxu3  ;;  %v1014_v5 = vpop.f32.mrf.mxu1  ;;  %v2248_v18 = vunpack.c.l.b16 %v2187_v46  ;;  %v5227_v46 = vld [vmem:[%s5426_s6 + $0xb4] sm:$0xff] }
 0x146   : > { %v1758_v33 = vadd.f32 %v1693_v49, %v1449_v17  ;;  %4862 = vmatmul.msk.bf16.gmra.mxu0 %vm685_vm3, %v2264_v16  ;;  %v2202_v17 = vshrl.u32 %v4829_v59, 16  ;;  %v5326_v16 = vld [vmem:[%s5426_s6 + $0xbc] sm:$0x1]  ;;  %v2525_v49 = vrot.slane %v5327_v9, 5  ;;  %v6115_v59 = vrot.slane %v2198_v58, 5 }
 0x147   : > { %v1225_v41 = vrot.slane %v5326_v16, 5  ;;  %v4618_v16 = vrot.slane %v1079_v38, 9  ;;  %v1224_v9 = vrot.slane %v1222_v48, 4  ;;  %v1015_v61 = vadd.f32 %v1014_v5, %v5846_v6 }
 0x148   : > { %v1386_v19 = vpop.f32.mrf.mxu2  ;;  %4601 = vmatmul.msk.bf16.gmra.mxu1 %vm685_vm3, %v5226_v52  ;;  %v6103_v26 = vadd.f32 %v2369_v54, %v1758_v33  ;;  %v2194_v33 = vrot.slane %v2192_v56, 5  ;;  %v2204_v39 = vrot.slane %v2202_v17, 4  ;;  %v2526_v4 = vsel %vm5657_vm7, %v2524_v29, %v2525_v49  ;;  %v5061_v29 = vld [vmem:[%s5426_s6 + $0x18] sm:$0xf] }
 0x149   : > { %v1450_v43 = vadd.f32 %v1386_v19, %v1012_v20  ;;  %v4865_v20 = vld [vmem:[%s5426_s6 + $0xc] sm:$0xe]  ;;  %v2640_v17 = vunpack.c.l.b16 %v2526_v4  ;;  %v1223_v6 = vsel %vm5657_vm7, %v4618_v16, %v1222_v48  ;;  %v1226_v5 = vsel %vm5657_vm7, %v1224_v9, %v1225_v41 }
 0x14a   : > { %6896 = vst [vmem:[#allocation3_spill] sm:$0xff] %v6103_v26  ;;  %v4881_v26 = vrot.slane %v4865_v20, 9  ;;  %v2205_v38 = vor.u32 %v2204_v39, %v6115_v59  ;;  %v1264_v20 = vunpack.c.l.b16 %v1223_v6  ;;  %v1265_v48 = vunpack.c.l.b16 %v1226_v5  ;;  %v5063_v5 = vld [vmem:[%s5426_s6 + $0x20] sm:$0x1] }
 0x14b   : > { %v2371_v52 = vpop.f32.mrf.mxu0  ;;  %v3234_v39 = vshrl.u32 %v5061_v29, 16 }
 0x14c   : > { %v2206_v41 = vrot.slane %v2205_v38, 4 }
 0x14d   : > { %v1695_v54 = vpop.f32.mrf.mxu3  ;;  %4651 = vmatmul.msk.bf16.gmra.mxu2 %vm685_vm3, %v1280_v50  ;;  %v1016_v7 = vpop.f32.mrf.mxu1  ;;  %v2523_v50 = vsel %vm5657_vm7, %v4881_v26, %v2522_v21  ;;  %v2208_v21 = vshll.u32 %v4830_v30, 16  ;;  %v2265_v26 = vpack.c.b16 %v2248_v18, %v2247_v55 }
 0x14e   : > { %v1759_v19 = vadd.f32 %v1695_v54, %v1450_v43  ;;  %v2195_v43 = vor.u32 %v2194_v33, %v2191_v22  ;;  %v2639_v58 = vunpack.c.l.b16 %v2523_v50  ;;  %v6138_v54 = vld [vmem:[%s5426_s6 + $0x1c] sm:$0xf]  ;;  %v1281_v50 = vpack.c.b16 %v1265_v48, %v1264_v20 }
 0x14f   : > { %v2210_v9 = vrot.slane %v2208_v21, 5  ;;  %v3247_v55 = vshrl.u32 %v6138_v54, 16  ;;  %v3253_v48 = vshll.u32 %v5063_v5, 16 }
 0x150   : > { %v1389_v37 = vpop.f32.mrf.mxu2  ;;  %v6131_v36 = vpack.c.b16 %v2640_v17, %v2639_v58  ;;  %v6134_v49 = vadd.f32 %v2371_v52, %v1759_v19  ;;  %v3237_v52 = vshll.u32 %v5061_v29, 16  ;;  %v3243_v19 = vshll.u32 %v6138_v54, 16  ;;  %v5252_v29 = vld [vmem:[%s5426_s6 + $0xc0] sm:$0xff] }
 0x151   : > { %v1451_v56 = vadd.f32 %v1389_v37, %v1015_v61  ;;  %v1017_v61 = vadd.f32 %v1016_v7, %v5866_v40  ;;  %v2211_v40 = vsel %vm5450_vm4, %v2206_v41, %v2210_v9  ;;  %v3236_v7 = vrot.slane %v3234_v39, 4  ;;  %v5064_v41 = vld [vmem:[%s5426_s6 + $0x24] sm:$0xf] }
 0x152   : > { %4781 = vmatmul.msk.bf16.gmra.mxu3 %vm685_vm3, %v5251_v8  ;;  %v2196_v8 = vrot.slane %v2195_v43, 4  ;;  %v3239_v43 = vrot.slane %v3237_v52, 5  ;;  %v3245_v58 = vrot.slane %v3243_v19, 5  ;;  %v3249_v17 = vrot.slane %v3247_v55, 4  ;;  %v6159_v19 = vld [vmem:[%s5426_s6 + $0x28] sm:$0xf] }
 0x153   : > { %v2374_v37 = vpop.f32.mrf.mxu0  ;;  %v3255_v52 = vrot.slane %v3253_v48, 5 }
 0x154   : > { %v3250_v20 = vor.u32 %v3249_v17, %v3245_v58  ;;  %v5329_v17 = vld [vmem:[%s5426_s6 + $0x20] sm:$0x1] }
 0x155   : > { %v1698_v22 = vpop.f32.mrf.mxu3  ;;  %v1019_v33 = vpop.f32.mrf.mxu1 }
 0x156   : > { %v1760_v16 = vadd.f32 %v1698_v22, %v1451_v56  ;;  %4863 = vmatmul.msk.bf16.gmra.mxu0 %vm685_vm3, %v2265_v26  ;;  %v2201_v56 = vsel %vm5450_vm4, %v2196_v8, %v6115_v59  ;;  %v1020_v59 = vadd.f32 %v1019_v33, %v5889_v11  ;;  %v3240_v22 = vor.u32 %v3239_v43, %v3236_v7  ;;  %v5143_v33 = vld [vmem:[%s5426_s6 + $0x18] sm:$0xe]  ;;  %v5328_v7 = vld [vmem:[%s5426_s6 + $0x1c] sm:$0xf] }
 0x157   : > { %v2529_v43 = vrot.slane %v5328_v7, 5 }
 0x158   : > { %v1391_v18 = vpop.f32.mrf.mxu2  ;;  %4602 = vmatmul.msk.bf16.gmra.mxu1 %vm685_vm3, %v5227_v46  ;;  %v6145_v4 = vadd.f32 %v2374_v37, %v1760_v16  ;;  %v2249_v37 = vunpack.c.l.b16 %v2201_v56  ;;  %v2250_v46 = vunpack.c.l.b16 %v2211_v40  ;;  %v3241_v39 = vrot.slane %v3240_v22, 4 }
 0x159   : > { %v1452_v30 = vadd.f32 %v1391_v18, %v1017_v61  ;;  %v3251_v61 = vrot.slane %v3250_v20, 4  ;;  %v3927_v18 = vrot.slane %v6138_v54, 5  ;;  %v5159_v22 = vrot.slane %v5143_v33, 9 }
 0x15a   : > { %v2266_v9 = vpack.c.b16 %v2250_v46, %v2249_v37  ;;  %v4866_v37 = vld [vmem:[%s5426_s6 + $0x18] sm:$0xe]  ;;  %v3267_v46 = vshll.u32 %v6159_v19, 16  ;;  %v3246_v54 = vsel %vm5450_vm4, %v3241_v39, %v3245_v58 }
 0x15b   : > { %v2376_v6 = vpop.f32.mrf.mxu0  ;;  %v3929_v48 = vrot.slane %v3927_v18, 4  ;;  %v4882_v7 = vrot.slane %v4866_v37, 9  ;;  %v3624_v58 = vunpack.c.l.b16 %v3246_v54 }
 0x15d   : > { %v1700_v38 = vpop.f32.mrf.mxu3  ;;  %4652 = vmatmul.msk.bf16.gmra.mxu2 %vm685_vm3, %v1281_v50  ;;  %v1021_v21 = vpop.f32.mrf.mxu1  ;;  %v3261_v50 = vshll.u32 %v5064_v41, 16 }
 0x15e   : > { %v1761_v26 = vadd.f32 %v1700_v38, %v1452_v30  ;;  %v3258_v30 = vshrl.u32 %v5064_v41, 16  ;;  %v2532_v38 = vrot.slane %v5329_v17, 5  ;;  %v3269_v17 = vrot.slane %v3267_v46, 5 }
 0x15f   : > { %v3263_v41 = vrot.slane %v3261_v50, 5 }
 0x160   : > { %v1394_v8 = vpop.f32.mrf.mxu2  ;;  %v6161_v55 = vadd.f32 %v2376_v6, %v1761_v26  ;;  %v3271_v6 = vshrl.u32 %v6159_v19, 16  ;;  %v1022_v26 = vadd.f32 %v1021_v21, %v5909_v53  ;;  %v2531_v53 = vrot.slane %v2529_v43, 4 }
 0x161   : > { %v1453_v16 = vadd.f32 %v1394_v8, %v1020_v59  ;;  %v3256_v59 = vsel %vm5450_vm4, %v3251_v61, %v3255_v52  ;;  %v3930_v8 = vrot.slane %v5063_v5, 5  ;;  %v6182_v52 = vld [vmem:[%s5426_s6 + $0x2c] sm:$0x1] }
 0x162   : > { %4782 = vmatmul.msk.bf16.gmra.mxu3 %vm685_vm3, %v5252_v29  ;;  %v3625_v39 = vunpack.c.l.b16 %v3256_v59  ;;  %v3273_v61 = vrot.slane %v3271_v6, 4 }
 0x163   : > { %v2379_v11 = vpop.f32.mrf.mxu0  ;;  %v3931_v5 = vsel %vm5657_vm7, %v3929_v48, %v3930_v8 }
 0x164   : > { %v3656_v6 = vpack.c.b16 %v3625_v39, %v3624_v58  ;;  %v6202_v39 = vld [vmem:[%s5426_s6 + $0x34] sm:$0xf] }
 0x165   : > { %v1703_v56 = vpop.f32.mrf.mxu3  ;;  %v1024_v40 = vpop.f32.mrf.mxu1 }
 0x166   : > { %v1762_v29 = vadd.f32 %v1703_v56, %v1453_v16  ;;  %4864 = vmatmul.msk.bf16.gmra.mxu0 %vm685_vm3, %v2266_v9  ;;  %v3260_v16 = vrot.slane %v3258_v30, 4  ;;  %v5262_v9 = vld [vmem:[%s5426_s6 + $0x18] sm:$0xff]  ;;  %v1025_v54 = vadd.f32 %v1024_v40, %v5777_v10 }
 0x168   : > { %v1396_v20 = vpop.f32.mrf.mxu2  ;;  %4915 = vmatmul.msk.bf16.vlgmr.msra.gmra.mxu1 %vm685_vm3, %v6131_v36  ;;  %v6179_v21 = vadd.f32 %v2379_v11, %v1762_v29  ;;  %v3928_v36 = vsel %vm5657_vm7, %v5159_v22, %v3927_v18  ;;  %v2530_v11 = vsel %vm5657_vm7, %v4882_v7, %v2529_v43  ;;  %v2533_v29 = vsel %vm5657_vm7, %v2531_v53, %v2532_v38  ;;  %v5067_v53 = vld [vmem:[%s5426_s6 + $0x30] sm:$0xf] }
 0x169   : > { %v1454_v56 = vadd.f32 %v1396_v20, %v1022_v26  ;;  %v3264_v37 = vor.u32 %v3263_v41, %v3260_v16  ;;  %v3274_v26 = vor.u32 %v3273_v61, %v3269_v17  ;;  %v3277_v18 = vshll.u32 %v6182_v52, 16  ;;  %v5144_v41 = vld [vmem:[%s5426_s6 + $0x24] sm:$0xe] }
 0x16a   : > { %v4044_v59 = vunpack.c.l.b16 %v3928_v36  ;;  %v4045_v22 = vunpack.c.l.b16 %v3931_v5  ;;  %v2641_v48 = vunpack.c.l.b16 %v2530_v11  ;;  %v2642_v8 = vunpack.c.l.b16 %v2533_v29  ;;  %v5330_v29 = vld [vmem:[%s5426_s6 + $0x28] sm:$0xf] }
 0x16b   : > { %v2381_v33 = vpop.f32.mrf.mxu0  ;;  %v3275_v38 = vrot.slane %v3274_v26, 4  ;;  %v3279_v16 = vrot.slane %v3277_v18, 5  ;;  %v3937_v11 = vrot.slane %v6182_v52, 5  ;;  %v3282_v26 = vshrl.u32 %v5067_v53, 16  ;;  %v5331_v52 = vld [vmem:[%s5426_s6 + $0x2c] sm:$0x1] }
 0x16c   : > { %v4076_v7 = vpack.c.b16 %v4045_v22, %v4044_v59  ;;  %v2672_v58 = vpack.c.b16 %v2642_v8, %v2641_v48  ;;  %v3295_v59 = vshrl.u32 %v6202_v39, 16  ;;  %v2539_v22 = vrot.slane %v5331_v52, 5  ;;  %v5263_v8 = vld [vmem:[%s5426_s6 + $0x24] sm:$0xff] }
 0x16d   : > { %v1705_v30 = vpop.f32.mrf.mxu3  ;;  %5045 = vmatmul.msk.bf16.vlgmr.msra.gmra.mxu2 %vm685_vm3, %v5262_v9  ;;  %v1026_v50 = vpop.f32.mrf.mxu1  ;;  %v3265_v9 = vrot.slane %v3264_v37, 4 }
 0x16e   : > { %v1763_v46 = vadd.f32 %v1705_v30, %v1454_v56  ;;  %v3934_v56 = vrot.slane %v6159_v19, 5  ;;  %v5160_v30 = vrot.slane %v5144_v41, 9  ;;  %v2536_v19 = vrot.slane %v5330_v29, 5 }
 0x16f   : > { %v3270_v5 = vsel %vm5450_vm4, %v3265_v9, %v3269_v17  ;;  %v1027_v18 = vadd.f32 %v1026_v50, %v5807_v14  ;;  %v3291_v17 = vshll.u32 %v6202_v39, 16  ;;  %v3297_v29 = vrot.slane %v3295_v59, 4 }
 0x170   : > { %v1399_v20 = vpop.f32.mrf.mxu2  ;;  %v6199_v10 = vadd.f32 %v2381_v33, %v1763_v46  ;;  %v3280_v33 = vsel %vm5450_vm4, %v3275_v38, %v3279_v16  ;;  %v3936_v46 = vrot.slane %v3934_v56, 4  ;;  %v2538_v9 = vrot.slane %v2536_v19, 4 }
 0x171   : > { %v1455_v43 = vadd.f32 %v1399_v20, %v1025_v54  ;;  %v3285_v54 = vshll.u32 %v5067_v53, 16  ;;  %v3626_v16 = vunpack.c.l.b16 %v3270_v5  ;;  %v3627_v41 = vunpack.c.l.b16 %v3280_v33 }
 0x172   : > { %5127 = vmatmul.msk.bf16.vlgmr.msra.gmra.mxu3 %vm685_vm3, %v3656_v6  ;;  %v4867_v6 = vld [vmem:[%s5426_s6 + $0x24] sm:$0xe]  ;;  %v3935_v14 = vsel %vm5657_vm7, %v5160_v30, %v3934_v56  ;;  %v3938_v50 = vsel %vm5657_vm7, %v3936_v46, %v3937_v11  ;;  %v2540_v56 = vsel %vm5657_vm7, %v2538_v9, %v2539_v22 }
 0x173   : > { %v2384_v40 = vpop.f32.mrf.mxu0  ;;  %v3287_v53 = vrot.slane %v3285_v54, 5  ;;  %v3657_v11 = vpack.c.b16 %v3627_v41, %v3626_v16  ;;  %v4047_v33 = vunpack.c.l.b16 %v3938_v50  ;;  %v3941_v50 = vrot.slane %v6202_v39, 5 }
 0x175   : > { %v1708_v61 = vpop.f32.mrf.mxu3  ;;  %v1029_v36 = vpop.f32.mrf.mxu1 }
 0x176   : > { %v1764_v37 = vadd.f32 %v1708_v61, %v1455_v43  ;;  %5193 = vmatmul.msk.bf16.vlgmr.msra.gmra.mxu0 %vm685_vm3, %v4076_v7  ;;  %v4883_v43 = vrot.slane %v4867_v6, 9  ;;  %v3284_v7 = vrot.slane %v3282_v26, 4  ;;  %v3293_v61 = vrot.slane %v3291_v17, 5 }
 0x177   : > { %v1030_v46 = vadd.f32 %v1029_v36, %v5829_v44  ;;  %v6237_v44 = vld [vmem:[%s5426_s6 + $0x40] sm:$0xf] }
 0x178   : > { %v1401_v20 = vpop.f32.mrf.mxu2  ;;  %4916 = vmatmul.msk.bf16.gmra.mxu1 %vm685_vm3, %v2672_v58  ;;  %v6218_v38 = vadd.f32 %v2384_v40, %v1764_v37  ;;  %v6225_v58 = vld [vmem:[%s5426_s6 + $0x38] sm:$0x1]  ;;  %v2537_v5 = vsel %vm5657_vm7, %v4883_v43, %v2536_v19  ;;  %v4046_v37 = vunpack.c.l.b16 %v3935_v14  ;;  %v3288_v6 = vor.u32 %v3287_v53, %v3284_v7  ;;  %v5070_v19 = vld [vmem:[%s5426_s6 + $0x3c] sm:$0xf]  ;;  %v5145_v14 = vld [vmem:[%s5426_s6 + $0x30] sm:$0xe] }
 0x179   : > { %v1456_v48 = vadd.f32 %v1401_v20, %v1027_v18  ;;  %v3298_v26 = vor.u32 %v3297_v29, %v3293_v61  ;;  %v3301_v54 = vshll.u32 %v6225_v58, 16  ;;  %v2643_v59 = vunpack.c.l.b16 %v2537_v5  ;;  %v5332_v5 = vld [vmem:[%s5426_s6 + $0x34] sm:$0xf] }
 0x17a   : > { %v2644_v20 = vunpack.c.l.b16 %v2540_v56  ;;  %v4077_v22 = vpack.c.b16 %v4047_v33, %v4046_v37  ;;  %v3306_v7 = vshrl.u32 %v5070_v19, 16  ;;  %v3309_v53 = vshll.u32 %v5070_v19, 16 }
 0x17b   : > { %v2386_v52 = vpop.f32.mrf.mxu0  ;;  %v3299_v43 = vrot.slane %v3298_v26, 4  ;;  %v3303_v9 = vrot.slane %v3301_v54, 5  ;;  %v2543_v56 = vrot.slane %v5332_v5, 5  ;;  %v5161_v54 = vrot.slane %v5145_v14, 9 }
 0x17c   : > { %v2673_v41 = vpack.c.b16 %v2644_v20, %v2643_v59  ;;  %v3943_v59 = vrot.slane %v3941_v50, 4  ;;  %v3944_v20 = vrot.slane %v6225_v58, 5  ;;  %v3311_v19 = vrot.slane %v3309_v53, 5 }
 0x17d   : > { %v1710_v18 = vpop.f32.mrf.mxu3  ;;  %5046 = vmatmul.msk.bf16.gmra.mxu2 %vm685_vm3, %v5263_v8  ;;  %v1031_v40 = vpop.f32.mrf.mxu1  ;;  %v3304_v26 = vsel %vm5450_vm4, %v3299_v43, %v3303_v9  ;;  %v6260_v9 = vld [vmem:[%s5426_s6 + $0x44] sm:$0x1] }
 0x17e   : > { %v1765_v30 = vadd.f32 %v1710_v18, %v1456_v48  ;;  %v3289_v48 = vrot.slane %v3288_v6, 4  ;;  %v3315_v6 = vshll.u32 %v6237_v44, 16  ;;  %v3945_v58 = vsel %vm5657_vm7, %v3943_v59, %v3944_v20 }
 0x180   : > { %v1404_v17 = vpop.f32.mrf.mxu2  ;;  %v6239_v36 = vadd.f32 %v2386_v52, %v1765_v30  ;;  %v3319_v52 = vshrl.u32 %v6237_v44, 16  ;;  %v1032_v30 = vadd.f32 %v1031_v40, %v5854_v12  ;;  %v3294_v39 = vsel %vm5450_vm4, %v3289_v48, %v3293_v61 }
 0x181   : > { %v1457_v8 = vadd.f32 %v1404_v17, %v1030_v46  ;;  %v4868_v46 = vld [vmem:[%s5426_s6 + $0x30] sm:$0xe]  ;;  %v2545_v12 = vrot.slane %v2543_v56, 4  ;;  %v3628_v61 = vunpack.c.l.b16 %v3294_v39  ;;  %v3629_v48 = vunpack.c.l.b16 %v3304_v26 }
 0x182   : > { %5128 = vmatmul.msk.bf16.gmra.mxu3 %vm685_vm3, %v3657_v11  ;;  %v5333_v11 = vld [vmem:[%s5426_s6 + $0x38] sm:$0x1]  ;;  %v4884_v5 = vrot.slane %v4868_v46, 9  ;;  %v3321_v43 = vrot.slane %v3319_v52, 4 }
 0x183   : > { %v2389_v16 = vpop.f32.mrf.mxu0  ;;  %v2546_v37 = vrot.slane %v5333_v11, 5  ;;  %v3317_v11 = vrot.slane %v3315_v6, 5  ;;  %v3658_v52 = vpack.c.b16 %v3629_v48, %v3628_v61  ;;  %v6280_v48 = vld [vmem:[%s5426_s6 + $0x4c] sm:$0xf] }
 0x185   : > { %v1713_v29 = vpop.f32.mrf.mxu3  ;;  %v1034_v18 = vpop.f32.mrf.mxu1 }
 0x186   : > { %v1766_v33 = vadd.f32 %v1713_v29, %v1457_v8  ;;  %5194 = vmatmul.msk.bf16.gmra.mxu0 %vm685_vm3, %v4077_v22  ;;  %v3308_v8 = vrot.slane %v3306_v7, 4  ;;  %v5264_v22 = vld [vmem:[%s5426_s6 + $0x30] sm:$0xff]  ;;  %v1035_v39 = vadd.f32 %v1034_v18, %v5874_v51 }
 0x188   : > { %v1406_v17 = vpop.f32.mrf.mxu2  ;;  %4917 = vmatmul.msk.bf16.gmra.mxu1 %vm685_vm3, %v2673_v41  ;;  %v6257_v40 = vadd.f32 %v2389_v16, %v1766_v33  ;;  %v3942_v41 = vsel %vm5657_vm7, %v5161_v54, %v3941_v50  ;;  %v2544_v16 = vsel %vm5657_vm7, %v4884_v5, %v2543_v56  ;;  %v2547_v33 = vsel %vm5657_vm7, %v2545_v12, %v2546_v37  ;;  %v5073_v12 = vld [vmem:[%s5426_s6 + $0x48] sm:$0xf] }
 0x189   : > { %v1458_v29 = vadd.f32 %v1406_v17, %v1032_v30  ;;  %v3312_v46 = vor.u32 %v3311_v19, %v3308_v8  ;;  %v3322_v30 = vor.u32 %v3321_v43, %v3317_v11  ;;  %v3325_v50 = vshll.u32 %v6260_v9, 16  ;;  %v5146_v19 = vld [vmem:[%s5426_s6 + $0x3c] sm:$0xe] }
 0x18a   : > { %v4048_v26 = vunpack.c.l.b16 %v3942_v41  ;;  %v4049_v54 = vunpack.c.l.b16 %v3945_v58  ;;  %v2645_v59 = vunpack.c.l.b16 %v2544_v16  ;;  %v2646_v20 = vunpack.c.l.b16 %v2547_v33  ;;  %v5334_v33 = vld [vmem:[%s5426_s6 + $0x40] sm:$0xf] }
 0x18b   : > { %v2391_v14 = vpop.f32.mrf.mxu0  ;;  %v3323_v37 = vrot.slane %v3322_v30, 4  ;;  %v3327_v8 = vrot.slane %v3325_v50, 5  ;;  %v3951_v16 = vrot.slane %v6260_v9, 5  ;;  %v3330_v30 = vshrl.u32 %v5073_v12, 16  ;;  %v5335_v9 = vld [vmem:[%s5426_s6 + $0x44] sm:$0x1] }
 0x18c   : > { %v4078_v5 = vpack.c.b16 %v4049_v54, %v4048_v26  ;;  %v2674_v61 = vpack.c.b16 %v2646_v20, %v2645_v59  ;;  %v3343_v26 = vshrl.u32 %v6280_v48, 16  ;;  %v2553_v54 = vrot.slane %v5335_v9, 5  ;;  %v5265_v20 = vld [vmem:[%s5426_s6 + $0x3c] sm:$0xff] }
 0x18d   : > { %v1715_v7 = vpop.f32.mrf.mxu3  ;;  %5047 = vmatmul.msk.bf16.gmra.mxu2 %vm685_vm3, %v5264_v22  ;;  %v1036_v53 = vpop.f32.mrf.mxu1  ;;  %v3313_v22 = vrot.slane %v3312_v46, 4 }
 0x18e   : > { %v1767_v6 = vadd.f32 %v1715_v7, %v1458_v29  ;;  %v3948_v29 = vrot.slane %v6237_v44, 5  ;;  %v5162_v7 = vrot.slane %v5146_v19, 9  ;;  %v2550_v44 = vrot.slane %v5334_v33, 5 }
 0x18f   : > { %v3318_v58 = vsel %vm5450_vm4, %v3313_v22, %v3317_v11  ;;  %v1037_v50 = vadd.f32 %v1036_v53, %v5891_v13  ;;  %v3339_v11 = vshll.u32 %v6280_v48, 16  ;;  %v3345_v33 = vrot.slane %v3343_v26, 4 }
 0x190   : > { %v1409_v17 = vpop.f32.mrf.mxu2  ;;  %v6277_v51 = vadd.f32 %v2391_v14, %v1767_v6  ;;  %v3328_v14 = vsel %vm5450_vm4, %v3323_v37, %v3327_v8  ;;  %v3950_v6 = vrot.slane %v3948_v29, 4  ;;  %v2552_v22 = vrot.slane %v2550_v44, 4 }
 0x191   : > { %v1459_v56 = vadd.f32 %v1409_v17, %v1035_v39  ;;  %v3333_v39 = vshll.u32 %v5073_v12, 16  ;;  %v3630_v8 = vunpack.c.l.b16 %v3318_v58  ;;  %v3631_v19 = vunpack.c.l.b16 %v3328_v14 }
 0x192   : > { %5129 = vmatmul.msk.bf16.gmra.mxu3 %vm685_vm3, %v3658_v52  ;;  %v4869_v52 = vld [vmem:[%s5426_s6 + $0x3c] sm:$0xe]  ;;  %v3949_v13 = vsel %vm5657_vm7, %v5162_v7, %v3948_v29  ;;  %v3952_v53 = vsel %vm5657_vm7, %v3950_v6, %v3951_v16  ;;  %v2554_v29 = vsel %vm5657_vm7, %v2552_v22, %v2553_v54 }
 0x193   : > { %v2394_v18 = vpop.f32.mrf.mxu0  ;;  %v3335_v12 = vrot.slane %v3333_v39, 5  ;;  %v3659_v16 = vpack.c.b16 %v3631_v19, %v3630_v8  ;;  %v4051_v14 = vunpack.c.l.b16 %v3952_v53  ;;  %v3955_v53 = vrot.slane %v6280_v48, 5 }
 0x195   : > { %v1718_v43 = vpop.f32.mrf.mxu3  ;;  %v1039_v41 = vpop.f32.mrf.mxu1 }
 0x196   : > { %v1768_v46 = vadd.f32 %v1718_v43, %v1459_v56  ;;  %5195 = vmatmul.msk.bf16.gmra.mxu0 %vm685_vm3, %v4078_v5  ;;  %v4885_v56 = vrot.slane %v4869_v52, 9  ;;  %v3332_v5 = vrot.slane %v3330_v30, 4  ;;  %v3341_v43 = vrot.slane %v3339_v11, 5 }
 0x197   : > { %v1040_v6 = vadd.f32 %v1039_v41, %v5912_v63  ;;  %v6315_v63 = vld [vmem:[%s5426_s6 + $0x58] sm:$0xf] }
 0x198   : > { %v1411_v17 = vpop.f32.mrf.mxu2  ;;  %4918 = vmatmul.msk.bf16.gmra.mxu1 %vm685_vm3, %v2674_v61  ;;  %v6296_v37 = vadd.f32 %v2394_v18, %v1768_v46  ;;  %v6303_v61 = vld [vmem:[%s5426_s6 + $0x50] sm:$0x1]  ;;  %v2551_v58 = vsel %vm5657_vm7, %v4885_v56, %v2550_v44  ;;  %v4050_v46 = vunpack.c.l.b16 %v3949_v13  ;;  %v3336_v52 = vor.u32 %v3335_v12, %v3332_v5  ;;  %v5076_v44 = vld [vmem:[%s5426_s6 + $0x54] sm:$0xf]  ;;  %v5147_v13 = vld [vmem:[%s5426_s6 + $0x48] sm:$0xe] }
 0x199   : > { %v1460_v59 = vadd.f32 %v1411_v17, %v1037_v50  ;;  %v3346_v30 = vor.u32 %v3345_v33, %v3341_v43  ;;  %v3349_v39 = vshll.u32 %v6303_v61, 16  ;;  %v2647_v26 = vunpack.c.l.b16 %v2551_v58  ;;  %v5336_v58 = vld [vmem:[%s5426_s6 + $0x4c] sm:$0xf] }
 0x19a   : > { %v2648_v17 = vunpack.c.l.b16 %v2554_v29  ;;  %v4079_v54 = vpack.c.b16 %v4051_v14, %v4050_v46  ;;  %v3354_v5 = vshrl.u32 %v5076_v44, 16  ;;  %v3357_v12 = vshll.u32 %v5076_v44, 16 }
 0x19b   : > { %v2396_v9 = vpop.f32.mrf.mxu0  ;;  %v3347_v56 = vrot.slane %v3346_v30, 4  ;;  %v3351_v22 = vrot.slane %v3349_v39, 5  ;;  %v2557_v29 = vrot.slane %v5336_v58, 5  ;;  %v5163_v39 = vrot.slane %v5147_v13, 9 }
 0x19c   : > { %v2675_v19 = vpack.c.b16 %v2648_v17, %v2647_v26  ;;  %v3957_v26 = vrot.slane %v3955_v53, 4  ;;  %v3958_v17 = vrot.slane %v6303_v61, 5  ;;  %v3359_v44 = vrot.slane %v3357_v12, 5 }
 0x19d   : > { %v1720_v50 = vpop.f32.mrf.mxu3  ;;  %5048 = vmatmul.msk.bf16.gmra.mxu2 %vm685_vm3, %v5265_v20  ;;  %v1041_v18 = vpop.f32.mrf.mxu1  ;;  %v3352_v30 = vsel %vm5450_vm4, %v3347_v56, %v3351_v22  ;;  %v6338_v22 = vld [vmem:[%s5426_s6 + $0x5c] sm:$0x1] }
 0x19e   : > { %v1769_v7 = vadd.f32 %v1720_v50, %v1460_v59  ;;  %v3337_v59 = vrot.slane %v3336_v52, 4  ;;  %v3363_v52 = vshll.u32 %v6315_v63, 16  ;;  %v3959_v61 = vsel %vm5657_vm7, %v3957_v26, %v3958_v17 }
 0x1a0   : > { %v1414_v11 = vpop.f32.mrf.mxu2  ;;  %v6317_v41 = vadd.f32 %v2396_v9, %v1769_v7  ;;  %v3367_v9 = vshrl.u32 %v6315_v63, 16  ;;  %v1042_v7 = vadd.f32 %v1041_v18, %v5927_v32  ;;  %v3342_v48 = vsel %vm5450_vm4, %v3337_v59, %v3341_v43 }
 0x1a1   : > { %v1461_v20 = vadd.f32 %v1414_v11, %v1040_v6  ;;  %v4870_v6 = vld [vmem:[%s5426_s6 + $0x48] sm:$0xe]  ;;  %v2559_v32 = vrot.slane %v2557_v29, 4  ;;  %v3632_v43 = vunpack.c.l.b16 %v3342_v48  ;;  %v3633_v59 = vunpack.c.l.b16 %v3352_v30 }
 0x1a2   : > { %5130 = vmatmul.msk.bf16.gmra.mxu3 %vm685_vm3, %v3659_v16  ;;  %v5337_v16 = vld [vmem:[%s5426_s6 + $0x50] sm:$0x1]  ;;  %v4886_v58 = vrot.slane %v4870_v6, 9  ;;  %v3369_v56 = vrot.slane %v3367_v9, 4 }
 0x1a3   : > { %v2399_v8 = vpop.f32.mrf.mxu0  ;;  %v2560_v46 = vrot.slane %v5337_v16, 5  ;;  %v3365_v16 = vrot.slane %v3363_v52, 5  ;;  %v3660_v9 = vpack.c.b16 %v3633_v59, %v3632_v43  ;;  %v6358_v59 = vld [vmem:[%s5426_s6 + $0x64] sm:$0xf] }
 0x1a5   : > { %v1723_v33 = vpop.f32.mrf.mxu3  ;;  %v1044_v50 = vpop.f32.mrf.mxu1 }
 0x1a6   : > { %v1770_v14 = vadd.f32 %v1723_v33, %v1461_v20  ;;  %5196 = vmatmul.msk.bf16.gmra.mxu0 %vm685_vm3, %v4079_v54  ;;  %v3356_v20 = vrot.slane %v3354_v5, 4  ;;  %v5266_v54 = vld [vmem:[%s5426_s6 + $0x48] sm:$0xff]  ;;  %v1045_v48 = vadd.f32 %v1044_v50, %v5801_v1 }
 0x1a8   : > { %v1416_v11 = vpop.f32.mrf.mxu2  ;;  %4919 = vmatmul.msk.bf16.gmra.mxu1 %vm685_vm3, %v2675_v19  ;;  %v6335_v18 = vadd.f32 %v2399_v8, %v1770_v14  ;;  %v3956_v19 = vsel %vm5657_vm7, %v5163_v39, %v3955_v53  ;;  %v2558_v8 = vsel %vm5657_vm7, %v4886_v58, %v2557_v29  ;;  %v2561_v14 = vsel %vm5657_vm7, %v2559_v32, %v2560_v46  ;;  %v5079_v32 = vld [vmem:[%s5426_s6 + $0x60] sm:$0xf] }
 0x1a9   : > { %v1462_v33 = vadd.f32 %v1416_v11, %v1042_v7  ;;  %v3360_v6 = vor.u32 %v3359_v44, %v3356_v20  ;;  %v3370_v7 = vor.u32 %v3369_v56, %v3365_v16  ;;  %v3373_v53 = vshll.u32 %v6338_v22, 16  ;;  %v5148_v44 = vld [vmem:[%s5426_s6 + $0x54] sm:$0xe] }
 0x1aa   : > { %v4052_v30 = vunpack.c.l.b16 %v3956_v19  ;;  %v4053_v39 = vunpack.c.l.b16 %v3959_v61  ;;  %v2649_v26 = vunpack.c.l.b16 %v2558_v8  ;;  %v2650_v17 = vunpack.c.l.b16 %v2561_v14  ;;  %v5338_v14 = vld [vmem:[%s5426_s6 + $0x58] sm:$0xf] }
 0x1ab   : > { %v2401_v13 = vpop.f32.mrf.mxu0  ;;  %v3371_v46 = vrot.slane %v3370_v7, 4  ;;  %v3375_v20 = vrot.slane %v3373_v53, 5  ;;  %v3965_v8 = vrot.slane %v6338_v22, 5  ;;  %v3378_v7 = vshrl.u32 %v5079_v32, 16  ;;  %v5339_v22 = vld [vmem:[%s5426_s6 + $0x5c] sm:$0x1] }
 0x1ac   : > { %v4080_v58 = vpack.c.b16 %v4053_v39, %v4052_v30  ;;  %v2676_v43 = vpack.c.b16 %v2650_v17, %v2649_v26  ;;  %v3391_v30 = vshrl.u32 %v6358_v59, 16  ;;  %v2567_v39 = vrot.slane %v5339_v22, 5  ;;  %v5267_v17 = vld [vmem:[%s5426_s6 + $0x54] sm:$0xff] }
 0x1ad   : > { %v1725_v5 = vpop.f32.mrf.mxu3  ;;  %5049 = vmatmul.msk.bf16.gmra.mxu2 %vm685_vm3, %v5266_v54  ;;  %v1046_v12 = vpop.f32.mrf.mxu1  ;;  %v3361_v54 = vrot.slane %v3360_v6, 4 }
 0x1ae   : > { %v1771_v52 = vadd.f32 %v1725_v5, %v1462_v33  ;;  %v3962_v33 = vrot.slane %v6315_v63, 5  ;;  %v5164_v5 = vrot.slane %v5148_v44, 9  ;;  %v2564_v63 = vrot.slane %v5338_v14, 5 }
 0x1af   : > { %v3366_v61 = vsel %vm5450_vm4, %v3361_v54, %v3365_v16  ;;  %v1047_v53 = vadd.f32 %v1046_v12, %v5823_v35  ;;  %v3387_v16 = vshll.u32 %v6358_v59, 16  ;;  %v3393_v14 = vrot.slane %v3391_v30, 4 }
 0x1b0   : > { %v1419_v11 = vpop.f32.mrf.mxu2  ;;  %v6355_v1 = vadd.f32 %v2401_v13, %v1771_v52  ;;  %v3376_v13 = vsel %vm5450_vm4, %v3371_v46, %v3375_v20  ;;  %v3964_v52 = vrot.slane %v3962_v33, 4  ;;  %v2566_v54 = vrot.slane %v2564_v63, 4 }
 0x1b1   : > { %v1463_v29 = vadd.f32 %v1419_v11, %v1045_v48  ;;  %v3381_v48 = vshll.u32 %v5079_v32, 16  ;;  %v3634_v20 = vunpack.c.l.b16 %v3366_v61  ;;  %v3635_v44 = vunpack.c.l.b16 %v3376_v13 }
 0x1b2   : > { %5131 = vmatmul.msk.bf16.gmra.mxu3 %vm685_vm3, %v3660_v9  ;;  %v4871_v9 = vld [vmem:[%s5426_s6 + $0x54] sm:$0xe]  ;;  %v3963_v35 = vsel %vm5657_vm7, %v5164_v5, %v3962_v33  ;;  %v3966_v12 = vsel %vm5657_vm7, %v3964_v52, %v3965_v8  ;;  %v2568_v33 = vsel %vm5657_vm7, %v2566_v54, %v2567_v39 }
 0x1b3   : > { %v2404_v50 = vpop.f32.mrf.mxu0  ;;  %v3383_v32 = vrot.slane %v3381_v48, 5  ;;  %v3661_v8 = vpack.c.b16 %v3635_v44, %v3634_v20  ;;  %v4055_v13 = vunpack.c.l.b16 %v3966_v12  ;;  %v3969_v12 = vrot.slane %v6358_v59, 5 }
 0x1b5   : > { %v1728_v56 = vpop.f32.mrf.mxu3  ;;  %v1049_v19 = vpop.f32.mrf.mxu1 }
 0x1b6   : > { %v1772_v6 = vadd.f32 %v1728_v56, %v1463_v29  ;;  %5197 = vmatmul.msk.bf16.gmra.mxu0 %vm685_vm3, %v4080_v58  ;;  %v4887_v29 = vrot.slane %v4871_v9, 9  ;;  %v3380_v58 = vrot.slane %v3378_v7, 4  ;;  %v3389_v56 = vrot.slane %v3387_v16, 5 }
 0x1b7   : > { %v1050_v52 = vadd.f32 %v1049_v19, %v5844_v2  ;;  %v6393_v2 = vld [vmem:[%s5426_s6 + $0x70] sm:$0xf] }
 0x1b8   : > { %v1421_v11 = vpop.f32.mrf.mxu2  ;;  %4920 = vmatmul.msk.bf16.gmra.mxu1 %vm685_vm3, %v2676_v43  ;;  %v6374_v46 = vadd.f32 %v2404_v50, %v1772_v6  ;;  %v6381_v43 = vld [vmem:[%s5426_s6 + $0x68] sm:$0x1]  ;;  %v2565_v61 = vsel %vm5657_vm7, %v4887_v29, %v2564_v63  ;;  %v4054_v6 = vunpack.c.l.b16 %v3963_v35  ;;  %v3384_v9 = vor.u32 %v3383_v32, %v3380_v58  ;;  %v5082_v63 = vld [vmem:[%s5426_s6 + $0x6c] sm:$0xf]  ;;  %v5149_v35 = vld [vmem:[%s5426_s6 + $0x60] sm:$0xe] }
 0x1b9   : > { %v1464_v26 = vadd.f32 %v1421_v11, %v1047_v53  ;;  %v3394_v7 = vor.u32 %v3393_v14, %v3389_v56  ;;  %v3397_v48 = vshll.u32 %v6381_v43, 16  ;;  %v2651_v30 = vunpack.c.l.b16 %v2565_v61  ;;  %v5340_v61 = vld [vmem:[%s5426_s6 + $0x64] sm:$0xf] }
 0x1ba   : > { %v2652_v11 = vunpack.c.l.b16 %v2568_v33  ;;  %v4081_v39 = vpack.c.b16 %v4055_v13, %v4054_v6  ;;  %v3402_v58 = vshrl.u32 %v5082_v63, 16  ;;  %v3405_v32 = vshll.u32 %v5082_v63, 16 }
 0x1bb   : > { %v2406_v22 = vpop.f32.mrf.mxu0  ;;  %v3395_v29 = vrot.slane %v3394_v7, 4  ;;  %v3399_v54 = vrot.slane %v3397_v48, 5  ;;  %v2571_v33 = vrot.slane %v5340_v61, 5  ;;  %v5165_v48 = vrot.slane %v5149_v35, 9 }
 0x1bc   : > { %v2677_v44 = vpack.c.b16 %v2652_v11, %v2651_v30  ;;  %v3971_v30 = vrot.slane %v3969_v12, 4  ;;  %v3972_v11 = vrot.slane %v6381_v43, 5  ;;  %v3407_v63 = vrot.slane %v3405_v32, 5 }
 0x1bd   : > { %v1730_v53 = vpop.f32.mrf.mxu3  ;;  %5050 = vmatmul.msk.bf16.gmra.mxu2 %vm685_vm3, %v5267_v17  ;;  %v1051_v50 = vpop.f32.mrf.mxu1  ;;  %v3400_v7 = vsel %vm5450_vm4, %v3395_v29, %v3399_v54  ;;  %v6418_v54 = vld [vmem:[%s5426_s6 + $0x74] sm:$0x1] }
 0x1be   : > { %v1773_v5 = vadd.f32 %v1730_v53, %v1464_v26  ;;  %v3385_v26 = vrot.slane %v3384_v9, 4  ;;  %v3411_v9 = vshll.u32 %v6393_v2, 16  ;;  %v3973_v43 = vsel %vm5657_vm7, %v3971_v30, %v3972_v11 }
 0x1c0   : > { %v1424_v16 = vpop.f32.mrf.mxu2  ;;  %v6395_v19 = vadd.f32 %v2406_v22, %v1773_v5  ;;  %v3415_v22 = vshrl.u32 %v6393_v2, 16  ;;  %v1052_v5 = vadd.f32 %v1051_v50, %v5862_v28  ;;  %v3390_v59 = vsel %vm5450_vm4, %v3385_v26, %v3389_v56 }
 0x1c1   : > { %v1465_v17 = vadd.f32 %v1424_v16, %v1050_v52  ;;  %v4872_v52 = vld [vmem:[%s5426_s6 + $0x60] sm:$0xe]  ;;  %v2573_v28 = vrot.slane %v2571_v33, 4  ;;  %v3636_v56 = vunpack.c.l.b16 %v3390_v59  ;;  %v3637_v26 = vunpack.c.l.b16 %v3400_v7 }
 0x1c2   : > { %5132 = vmatmul.msk.bf16.gmra.mxu3 %vm685_vm3, %v3661_v8  ;;  %v5341_v8 = vld [vmem:[%s5426_s6 + $0x68] sm:$0x1]  ;;  %v4888_v61 = vrot.slane %v4872_v52, 9  ;;  %v3417_v29 = vrot.slane %v3415_v22, 4 }
 0x1c3   : > { %v2409_v20 = vpop.f32.mrf.mxu0  ;;  %v2574_v6 = vrot.slane %v5341_v8, 5  ;;  %v6415_v8 = vrot.slane %v3411_v9, 5  ;;  %v3662_v22 = vpack.c.b16 %v3637_v26, %v3636_v56  ;;  %v6437_v56 = vld [vmem:[%s5426_s6 + $0x7c] sm:$0xf] }
 0x1c4   : > { %v2572_v32 = vsel %vm5657_vm7, %v4888_v61, %v2571_v33  ;;  %v5085_v33 = vld [vmem:[%s5426_s6 + $0x78] sm:$0xf] }
 0x1c5   : > { %v1733_v14 = vpop.f32.mrf.mxu3  ;;  %v1054_v53 = vpop.f32.mrf.mxu1  ;;  %v2653_v30 = vunpack.c.l.b16 %v2572_v32 }
 0x1c6   : > { %v1774_v13 = vadd.f32 %v1733_v14, %v1465_v17  ;;  %5198 = vmatmul.msk.bf16.gmra.mxu0 %vm685_vm3, %v4081_v39  ;;  %v3404_v17 = vrot.slane %v3402_v58, 4  ;;  %v5268_v39 = vld [vmem:[%s5426_s6 + $0x60] sm:$0xff]  ;;  %v1055_v59 = vadd.f32 %v1054_v53, %v5881_v0  ;;  %v3426_v0 = vshrl.u32 %v5085_v33, 16 }
 0x1c7   : > { %v3429_v53 = vshll.u32 %v5085_v33, 16  ;;  %v5269_v33 = vld [vmem:[%s5426_s6 + $0x6c] sm:$0xff] }
 0x1c8   : > { %v1426_v16 = vpop.f32.mrf.mxu2  ;;  %4921 = vmatmul.msk.bf16.gmra.mxu1 %vm685_vm3, %v2677_v44  ;;  %v6413_v50 = vadd.f32 %v2409_v20, %v1774_v13  ;;  %v3970_v44 = vsel %vm5657_vm7, %v5165_v48, %v3969_v12  ;;  %v2575_v13 = vsel %vm5657_vm7, %v2573_v28, %v2574_v6  ;;  %v3408_v52 = vor.u32 %v3407_v63, %v3404_v17  ;;  %v5150_v63 = vld [vmem:[%s5426_s6 + $0x6c] sm:$0xe] }
 0x1c9   : > { %v1466_v14 = vadd.f32 %v1426_v16, %v1052_v5  ;;  %v3418_v12 = vor.u32 %v3417_v29, %v6415_v8  ;;  %v3421_v5 = vshll.u32 %v6418_v54, 16  ;;  %v4056_v7 = vunpack.c.l.b16 %v3970_v44 }
 0x1ca   : > { %v4057_v48 = vunpack.c.l.b16 %v3973_v43  ;;  %v2654_v11 = vunpack.c.l.b16 %v2575_v13  ;;  %v3409_v61 = vrot.slane %v3408_v52, 4  ;;  %v5166_v13 = vrot.slane %v5150_v63, 9 }
 0x1cb   : > { %v2411_v35 = vpop.f32.mrf.mxu0  ;;  %v3419_v6 = vrot.slane %v3418_v12, 4  ;;  %v3423_v17 = vrot.slane %v3421_v5, 5  ;;  %v3979_v52 = vrot.slane %v6418_v54, 5  ;;  %v3439_v54 = vshrl.u32 %v6437_v56, 16 }
 0x1cc   : > { %v4082_v28 = vpack.c.b16 %v4057_v48, %v4056_v7  ;;  %v2678_v44 = vpack.c.b16 %v2654_v11, %v2653_v30  ;;  %v3414_v32 = vsel %vm5450_vm4, %v3409_v61, %v6415_v8  ;;  %v3428_v8 = vrot.slane %v3426_v0, 4  ;;  %v5343_v61 = vld [vmem:[%s5426_s6 + $0x74] sm:$0x1] }
 0x1cd   : > { %v1735_v58 = vpop.f32.mrf.mxu3  ;;  %5051 = vmatmul.msk.bf16.gmra.mxu2 %vm685_vm3, %v5268_v39  ;;  %v1056_v20 = vpop.f32.mrf.mxu1  ;;  %v3431_v48 = vrot.slane %v3429_v53, 5  ;;  %v3638_v63 = vunpack.c.l.b16 %v3414_v32 }
 0x1ce   : > { %v1775_v9 = vadd.f32 %v1735_v58, %v1466_v14  ;;  %v3976_v14 = vrot.slane %v6393_v2, 5  ;;  %v5342_v2 = vld [vmem:[%s5426_s6 + $0x70] sm:$0xf]  ;;  %v1057_v7 = vadd.f32 %v1056_v20, %v5904_v34 }
 0x1cf   : > { %v2578_v12 = vrot.slane %v5342_v2, 5  ;;  %v3432_v0 = vor.u32 %v3431_v48, %v3428_v8 }
 0x1d0   : > { %v1429_v16 = vpop.f32.mrf.mxu2  ;;  %v6439_v26 = vadd.f32 %v2411_v35, %v1775_v9  ;;  %v3424_v35 = vsel %vm5450_vm4, %v3419_v6, %v3423_v17  ;;  %v3978_v9 = vrot.slane %v3976_v14, 4  ;;  %v2581_v6 = vrot.slane %v5343_v61, 5 }
 0x1d1   : > { %v1467_v39 = vadd.f32 %v1429_v16, %v1055_v59  ;;  %v3435_v59 = vshll.u32 %v6437_v56, 16  ;;  %v3977_v34 = vsel %vm5657_vm7, %v5166_v13, %v3976_v14 }
 0x1d2   : > { %5133 = vmatmul.msk.bf16.gmra.mxu3 %vm685_vm3, %v3662_v22  ;;  %v4873_v22 = vld [vmem:[%s5426_s6 + $0x6c] sm:$0xe]  ;;  %v3980_v20 = vsel %vm5657_vm7, %v3978_v9, %v3979_v52  ;;  %v4058_v52 = vunpack.c.l.b16 %v3977_v34  ;;  %v3433_v9 = vrot.slane %v3432_v0, 4 }
 0x1d3   : > { %v2414_v29 = vpop.f32.mrf.mxu0  ;;  %v4889_v30 = vrot.slane %v4873_v22, 9  ;;  %v3437_v53 = vrot.slane %v3435_v59, 5  ;;  %v5087_v22 = vld [vmem:[%s5426_s6 + $0x80] sm:$0x1] }
 0x1d4   : > { %v3445_v8 = vshll.u32 %v5087_v22, 16 }
 0x1d5   : > { %v1738_v43 = vpop.f32.mrf.mxu3  ;;  %v1059_v58 = vpop.f32.mrf.mxu1 }
 0x1d6   : > { %v1776_v5 = vadd.f32 %v1738_v43, %v1467_v39  ;;  %5199 = vmatmul.msk.bf16.gmra.mxu0 %vm685_vm3, %v4082_v28  ;;  %v2580_v39 = vrot.slane %v2578_v12, 4  ;;  %v3639_v28 = vunpack.c.l.b16 %v3424_v35  ;;  %v1060_v35 = vadd.f32 %v1059_v58, %v5923_v15 }
 0x1d7   : > { %v3438_v15 = vsel %vm5450_vm4, %v3433_v9, %v3437_v53 }
 0x1d8   : > { %v1431_v16 = vpop.f32.mrf.mxu2  ;;  %4922 = vmatmul.msk.bf16.gmra.mxu1 %vm685_vm3, %v2678_v44  ;;  %v6456_v17 = vadd.f32 %v2414_v29, %v1776_v5  ;;  %v3441_v44 = vrot.slane %v3439_v54, 4  ;;  %v2579_v29 = vsel %vm5657_vm7, %v4889_v30, %v2578_v12  ;;  %v2582_v14 = vsel %vm5657_vm7, %v2580_v39, %v2581_v6  ;;  %v6476_v6 = vld [vmem:[%s5426_s6 + $0x88] sm:$0xf] }
 0x1d9   : > { %v1468_v11 = vadd.f32 %v1431_v16, %v1057_v7  ;;  %v3663_v13 = vpack.c.b16 %v3639_v28, %v3638_v63  ;;  %v4059_v5 = vunpack.c.l.b16 %v3980_v20  ;;  %v2655_v54 = vunpack.c.l.b16 %v2579_v29 }
 0x1da   : > { %6897 = vst [vmem:[#allocation4_spill] sm:$0xff] %v6456_v17  ;;  %v3442_v59 = vor.u32 %v3441_v44, %v3437_v53  ;;  %v2656_v16 = vunpack.c.l.b16 %v2582_v14  ;;  %v5088_v17 = vld [vmem:[%s5426_s6 + $0x84] sm:$0xf]  ;;  %v3983_v30 = vrot.slane %v6437_v56, 5  ;;  %v3986_v29 = vrot.slane %v5087_v22, 5 }
 0x1db   : > { %v2416_v43 = vpop.f32.mrf.mxu0  ;;  %v4083_v12 = vpack.c.b16 %v4059_v5, %v4058_v52  ;;  %v3450_v34 = vshrl.u32 %v5088_v17, 16  ;;  %v3453_v20 = vshll.u32 %v5088_v17, 16  ;;  %v4874_v14 = vld [vmem:[%s5426_s6 + $0x78] sm:$0xe]  ;;  %v3459_v5 = vshll.u32 %v6476_v6, 16 }
 0x1dc   : > { %v3443_v58 = vrot.slane %v3442_v59, 4  ;;  %v2679_v28 = vpack.c.b16 %v2656_v16, %v2655_v54  ;;  %v3985_v53 = vrot.slane %v3983_v30, 4  ;;  %v4890_v59 = vrot.slane %v4874_v14, 9  ;;  %v5270_v16 = vld [vmem:[%s5426_s6 + $0x78] sm:$0xff] }
 0x1dd   : > { %v1740_v2 = vpop.f32.mrf.mxu3  ;;  %5052 = vmatmul.msk.bf16.gmra.mxu2 %vm685_vm3, %v5269_v33  ;;  %v1061_v7 = vpop.f32.mrf.mxu1  ;;  %v5151_v33 = vld [vmem:[%s5426_s6 + $0x78] sm:$0xe] }
 0x1de   : > { %v1777_v32 = vadd.f32 %v1740_v2, %v1468_v11  ;;  %v3447_v11 = vrot.slane %v3445_v8, 5  ;;  %v5167_v39 = vrot.slane %v5151_v33, 9  ;;  %v1062_v17 = vadd.f32 %v1061_v7, %v5940_v23 }
 0x1df   : > { %v3452_v8 = vrot.slane %v3450_v34, 4 }
 0x1e0   : > { %v1434_v48 = vpop.f32.mrf.mxu2  ;;  %v6478_v0 = vadd.f32 %v2416_v43, %v1777_v32  ;;  %v3448_v43 = vsel %vm5450_vm4, %v3443_v58, %v3447_v11  ;;  %v3640_v32 = vunpack.c.l.b16 %v3438_v15  ;;  %v3984_v9 = vsel %vm5657_vm7, %v5167_v39, %v3983_v30 }
 0x1e1   : > { %v1469_v61 = vadd.f32 %v1434_v48, %v1060_v35  ;;  %v3463_v35 = vshrl.u32 %v6476_v6, 16  ;;  %v3455_v48 = vrot.slane %v3453_v20, 5  ;;  %v3641_v7 = vunpack.c.l.b16 %v3448_v43 }
 0x1e2   : > { %5134 = vmatmul.msk.bf16.gmra.mxu3 %vm685_vm3, %v3663_v13  ;;  %v5344_v13 = vld [vmem:[%s5426_s6 + $0x7c] sm:$0xf]  ;;  %v3987_v15 = vsel %vm5657_vm7, %v3985_v53, %v3986_v29  ;;  %v6497_v58 = vrot.slane %v3459_v5, 5  ;;  %v4060_v39 = vunpack.c.l.b16 %v3984_v9 }
 0x1e3   : > { %v2419_v63 = vpop.f32.mrf.mxu0  ;;  %v2585_v56 = vrot.slane %v5344_v13, 5  ;;  %v3465_v11 = vrot.slane %v3463_v35, 4  ;;  %v4061_v20 = vunpack.c.l.b16 %v3987_v15  ;;  %v3456_v14 = vor.u32 %v3455_v48, %v3452_v8  ;;  %v5152_v35 = vld [vmem:[%s5426_s6 + $0x84] sm:$0xe]  ;;  %v6511_v15 = vld [vmem:[%s5426_s6 + $0x94] sm:$0xf] }
 0x1e5   : > { %v1743_v44 = vpop.f32.mrf.mxu3  ;;  %v2764_v2 = vpop.f32.mrf.mxu1  ;;  %v2587_v33 = vrot.slane %v2585_v56, 4  ;;  %v3466_v53 = vor.u32 %v3465_v11, %v6497_v58 }
 0x1e6   : > { %v1778_v52 = vadd.f32 %v1743_v44, %v1469_v61  ;;  %5200 = vmatmul.msk.bf16.gmra.mxu0 %vm685_vm3, %v4083_v12  ;;  %v5345_v61 = vld [vmem:[%s5426_s6 + $0x80] sm:$0x1]  ;;  %v2844_v43 = vadd.f32 %v2764_v2, %v5957_v57 }
 0x1e7   : > { %v2588_v12 = vrot.slane %v5345_v61, 5  ;;  %v5091_v61 = vld [vmem:[%s5426_s6 + $0x90] sm:$0xf]  ;;  %v3467_v8 = vrot.slane %v3466_v53, 4 }
 0x1e8   : > { %v1436_v22 = vpop.f32.mrf.mxu2  ;;  %4923 = vmatmul.msk.bf16.gmra.mxu1 %vm685_vm3, %v2679_v28  ;;  %v6493_v23 = vadd.f32 %v2419_v63, %v1778_v52  ;;  %v5090_v28 = vld [vmem:[%s5426_s6 + $0x8c] sm:$0x1]  ;;  %v2586_v63 = vsel %vm5657_vm7, %v4890_v59, %v2585_v56  ;;  %v3664_v52 = vpack.c.b16 %v3641_v7, %v3640_v32  ;;  %v4084_v56 = vpack.c.b16 %v4061_v20, %v4060_v39 }
 0x1e9   : > { %v1470_v54 = vadd.f32 %v1436_v22, %v1062_v17  ;;  %v2589_v29 = vsel %vm5657_vm7, %v2587_v33, %v2588_v12  ;;  %v3469_v5 = vshll.u32 %v5090_v28, 16  ;;  %v3990_v17 = vrot.slane %v6476_v6, 5 }
 0x1ea   : > { %v2657_v9 = vunpack.c.l.b16 %v2586_v63  ;;  %v3457_v59 = vrot.slane %v3456_v14, 4  ;;  %v3993_v6 = vrot.slane %v5090_v28, 5  ;;  %v3474_v12 = vshrl.u32 %v5091_v61, 16  ;;  %v5346_v63 = vld [vmem:[%s5426_s6 + $0x88] sm:$0xf] }
 0x1eb   : > { %v2421_v30 = vpop.f32.mrf.mxu0  ;;  %v3471_v48 = vrot.slane %v3469_v5, 5  ;;  %v3992_v33 = vrot.slane %v3990_v17, 4  ;;  %v3477_v11 = vshll.u32 %v5091_v61, 16  ;;  %v3483_v39 = vshll.u32 %v6511_v15, 16  ;;  %v6522_v28 = vld [vmem:[%s6889_s2] ss:$0 sm:$0xff] }
 0x1ec   : > { %v3487_v14 = vshrl.u32 %v6511_v15, 16 }
 0x1ed   : > { %v1745_v34 = vpop.f32.mrf.mxu3  ;;  %5053 = vmatmul.msk.bf16.gmra.mxu2 %vm685_vm3, %v5270_v16  ;;  %v2766_v44 = vpop.f32.mrf.mxu1  ;;  %v2658_v16 = vunpack.c.l.b16 %v2589_v29  ;;  %v2592_v29 = vrot.slane %v5346_v63, 5  ;;  %v3472_v53 = vsel %vm5450_vm4, %v3467_v8, %v3471_v48  ;;  %v6537_v61 = vrot.slane %v3483_v39, 5  ;;  %v5347_v8 = vld [vmem:[%s5426_s6 + $0x8c] sm:$0x1] }
 0x1ee   : > { %v1779_v13 = vadd.f32 %v1745_v34, %v1470_v54  ;;  %v5168_v54 = vrot.slane %v5152_v35, 9  ;;  %v3994_v35 = vsel %vm5657_vm7, %v3992_v33, %v3993_v6  ;;  %v2595_v48 = vrot.slane %v5347_v8, 5  ;;  %v6563_v8 = vld [vmem:[%s5426_s6 + $0xa0] sm:$0xf] }
 0x1ef   : > { %v2680_v7 = vpack.c.b16 %v2658_v16, %v2657_v9  ;;  %v2845_v9 = vadd.f32 %v2766_v44, %v5976_v27  ;;  %v3479_v16 = vrot.slane %v3477_v11, 5  ;;  %v6544_v27 = vld [vmem:[%s5426_s6 + $0x98] sm:$0x1]  ;;  %v4063_v11 = vunpack.c.l.b16 %v3994_v35 }
 0x1f0   : > { %v3073_v22 = vpop.f32.mrf.mxu2  ;;  %v6514_v57 = vadd.f32 %v2421_v30, %v1779_v13  ;;  %v3462_v30 = vsel %vm5450_vm4, %v3457_v59, %v6497_v58  ;;  %v4875_v13 = vld [vmem:[%s5426_s6 + $0x84] sm:$0xe]  ;;  %v3991_v5 = vsel %vm5657_vm7, %v5168_v54, %v3990_v17  ;;  %v3489_v17 = vrot.slane %v3487_v14, 4 }
 0x1f1   : > { %v3153_v32 = vadd.f32 %v3073_v22, %v2844_v43  ;;  %v3476_v43 = vrot.slane %v3474_v12, 4  ;;  %v4891_v59 = vrot.slane %v4875_v13, 9  ;;  %v3642_v6 = vunpack.c.l.b16 %v3462_v30 }
 0x1f2   : > { %5135 = vmatmul.msk.bf16.gmra.mxu3 %vm685_vm3, %v3664_v52  ;;  %v3643_v12 = vunpack.c.l.b16 %v3472_v53  ;;  %v3490_v30 = vor.u32 %v3489_v17, %v6537_v61  ;;  %v3493_v35 = vshll.u32 %v6544_v27, 16 }
 0x1f3   : > { %v4169_v2 = vpop.f32.mrf.mxu0  ;;  %v2593_v63 = vsel %vm5657_vm7, %v4891_v59, %v2592_v29  ;;  %v5094_v59 = vld [vmem:[%s5426_s6 + $0x9c] sm:$0xf] }
 0x1f5   : > { %v3749_v34 = vpop.f32.mrf.mxu3  ;;  %v2769_v20 = vpop.f32.mrf.mxu1 }
 0x1f6   : > { %v3829_v52 = vadd.f32 %v3749_v34, %v3153_v32  ;;  %5201 = vmatmul.msk.bf16.gmra.mxu0 %vm685_vm3, %v4084_v56  ;;  %v5271_v56 = vld [vmem:[%s5426_s6 + $0x84] sm:$0xff]  ;;  %v2594_v32 = vrot.slane %v2592_v29, 4 }
 0x1f8   : > { %v4249_v22 = vadd.f32 %v4169_v2, %v3829_v52  ;;  %v3075_v58 = vpop.f32.mrf.mxu2  ;;  %4924 = vmatmul.msk.bf16.gmra.mxu1 %vm685_vm3, %v2680_v7  ;;  %v4062_v7 = vunpack.c.l.b16 %v3991_v5  ;;  %v2596_v14 = vsel %vm5657_vm7, %v2594_v32, %v2595_v48  ;;  %v3480_v52 = vor.u32 %v3479_v16, %v3476_v43 }
 0x1f9   : > { %v3154_v33 = vadd.f32 %v3075_v58, %v2845_v9  ;;  %v3665_v5 = vpack.c.b16 %v3643_v12, %v3642_v6  ;;  %v2846_v9 = vadd.f32 %v2769_v20, %v5995_v24  ;;  %v2660_v29 = vunpack.c.l.b16 %v2596_v14 }
 0x1fa   : > { %v4285_v54 = vadd.f32 %v6522_v28, %v4249_v22  ;;  %v4085_v43 = vpack.c.b16 %v4063_v11, %v4062_v7  ;;  %v3481_v16 = vrot.slane %v3480_v52, 4  ;;  %v3491_v32 = vrot.slane %v3490_v30, 4 }
 0x1fb   : > { %v4171_v2 = vpop.f32.mrf.mxu0  ;;  %v3997_v24 = vrot.slane %v6511_v15, 5  ;;  %v3498_v20 = vshrl.u32 %v5094_v59, 16  ;;  %v3501_v6 = vshll.u32 %v5094_v59, 16  ;;  %v3507_v12 = vshll.u32 %v6563_v8, 16  ;;  %v4876_v15 = vld [vmem:[%s5426_s6 + $0x90] sm:$0xe] }
 0x1fc   : > { %v4317_v44 = vmax.f32 %v4285_v54, 0.0  ;;  %v3495_v54 = vrot.slane %v3493_v35, 5  ;;  %v3486_v14 = vsel %vm5450_vm4, %v3481_v16, %v6537_v61  ;;  %v4000_v30 = vrot.slane %v6544_v27, 5 }
 0x1fd   : > { %v3751_v39 = vpop.f32.mrf.mxu3  ;;  %5054 = vmatmul.msk.bf16.gmra.mxu2 %vm685_vm3, %v5271_v56  ;;  %v2771_v34 = vpop.f32.mrf.mxu1  ;;  %v2659_v56 = vunpack.c.l.b16 %v2593_v63  ;;  %v6580_v61 = vrot.slane %v3507_v12, 5 }
 0x1fe   : > { %v4349_v13 = vpack.c.bf16 %v4317_v44, %v4317_v44  ;;  %v3830_v53 = vadd.f32 %v3751_v39, %v3154_v33  ;;  %v5153_v33 = vld [vmem:[%s5426_s6 + $0x90] sm:$0xe]  ;;  %v3511_v44 = vshrl.u32 %v6563_v8, 16  ;;  %v2847_v59 = vadd.f32 %v2771_v34, %v6008_v45 }
 0x1ff   : > { %v2681_v11 = vpack.c.b16 %v2660_v29, %v2659_v56  ;;  %v5169_v52 = vrot.slane %v5153_v33, 9  ;;  %v3503_v56 = vrot.slane %v3501_v6, 5 }
 0x200   : > { %4382 = vst.msk [vmem:[%s6549_s22] sm:$0xf] %vm4381_vm8, %v4349_v13  ;;  %v4250_v22 = vadd.f32 %v4171_v2, %v3830_v53  ;;  %v3078_v58 = vpop.f32.mrf.mxu2  ;;  %v5348_v13 = vld [vmem:[%s5426_s6 + $0x94] sm:$0xf]  ;;  %v3513_v29 = vrot.slane %v3511_v44, 4 }
 0x201   : > { %v3155_v17 = vadd.f32 %v3078_v58, %v2846_v9  ;;  %v2599_v53 = vrot.slane %v5348_v13, 5  ;;  %v3999_v9 = vrot.slane %v3997_v24, 4  ;;  %v3500_v58 = vrot.slane %v3498_v20, 4 }
 0x202   : > { %v4286_v48 = vadd.f32 %v6522_v28, %v4250_v22  ;;  %5136 = vmatmul.msk.bf16.gmra.mxu3 %vm685_vm3, %v3665_v5  ;;  %v3496_v22 = vsel %vm5450_vm4, %v3491_v32, %v3495_v54  ;;  %v5272_v32 = vld [vmem:[%s5426_s6 + $0x90] sm:$0xff]  ;;  %v3644_v54 = vunpack.c.l.b16 %v3486_v14 }
 0x203   : > { %v4174_v7 = vpop.f32.mrf.mxu0  ;;  %v2601_v33 = vrot.slane %v2599_v53, 4  ;;  %v3645_v44 = vunpack.c.l.b16 %v3496_v22  ;;  %v4001_v45 = vsel %vm5657_vm7, %v3999_v9, %v4000_v30  ;;  %v3504_v34 = vor.u32 %v3503_v56, %v3500_v58 }
 0x204   : > { %v4318_v2 = vmax.f32 %v4286_v48, 0.0  ;;  %v4892_v48 = vrot.slane %v4876_v15, 9  ;;  %v4065_v9 = vunpack.c.l.b16 %v4001_v45 }
 0x205   : > { %v3754_v39 = vpop.f32.mrf.mxu3  ;;  %v2774_v63 = vpop.f32.mrf.mxu1  ;;  %v3666_v22 = vpack.c.b16 %v3645_v44, %v3644_v54  ;;  %v3505_v56 = vrot.slane %v3504_v34, 4 }
 0x206   : > { %v4350_v5 = vpack.c.bf16 %v4318_v2, %v4318_v2  ;;  %v3831_v35 = vadd.f32 %v3754_v39, %v3155_v17  ;;  %5202 = vmatmul.msk.bf16.gmra.mxu0 %vm685_vm3, %v4085_v43  ;;  %v6587_v17 = vld [vmem:[%s5426_s6 + $0xa4] sm:$0x1]  ;;  %v5349_v43 = vld [vmem:[%s5426_s6 + $0x98] sm:$0x1]  ;;  %v3998_v2 = vsel %vm5657_vm7, %v5169_v52, %v3997_v24  ;;  %v2600_v15 = vsel %vm5657_vm7, %v4892_v48, %v2599_v53 }
 0x207   : > { %v2602_v20 = vrot.slane %v5349_v43, 5  ;;  %v2661_v58 = vunpack.c.l.b16 %v2600_v15  ;;  %v5097_v43 = vld [vmem:[%s5426_s6 + $0xa8] sm:$0xf]  ;;  %v4007_v44 = vrot.slane %v6587_v17, 5  ;;  %v5350_v15 = vld [vmem:[%s5426_s6 + $0xa0] sm:$0xf] }
 0x208   : > { %4383 = vst.msk [vmem:[%s6549_s22 + $0x4] sm:$0xf] %vm4381_vm8, %v4350_v5  ;;  %v4251_v27 = vadd.f32 %v4174_v7, %v3831_v35  ;;  %v3080_v16 = vpop.f32.mrf.mxu2  ;;  %4925 = vmatmul.msk.bf16.gmra.mxu1 %vm685_vm3, %v2681_v11  ;;  %v3514_v7 = vor.u32 %v3513_v29, %v6580_v61  ;;  %v3517_v11 = vshll.u32 %v6587_v17, 16  ;;  %v4064_v5 = vunpack.c.l.b16 %v3998_v2 }
 0x209   : > { %v3156_v12 = vadd.f32 %v3080_v16, %v2847_v59  ;;  %v2603_v52 = vsel %vm5657_vm7, %v2601_v33, %v2602_v20  ;;  %v2848_v59 = vadd.f32 %v2774_v63, %v6021_v47  ;;  %v4004_v33 = vrot.slane %v6563_v8, 5  ;;  %v6618_v8 = vld [vmem:[%s5426_s6 + $0xac] sm:$0xf] }
 0x20a   : > { %v4287_v6 = vadd.f32 %v6522_v28, %v4251_v27  ;;  %v3515_v29 = vrot.slane %v3514_v7, 4  ;;  %v3519_v27 = vrot.slane %v3517_v11, 5  ;;  %v2662_v48 = vunpack.c.l.b16 %v2603_v52 }
 0x20b   : > { %v4176_v14 = vpop.f32.mrf.mxu0  ;;  %v4086_v54 = vpack.c.b16 %v4065_v9, %v4064_v5  ;;  %v4006_v7 = vrot.slane %v4004_v33, 4  ;;  %v3522_v11 = vshrl.u32 %v5097_v43, 16  ;;  %v3535_v17 = vshrl.u32 %v6618_v8, 16 }
 0x20c   : > { %v4319_v39 = vmax.f32 %v4287_v6, 0.0  ;;  %v3520_v47 = vsel %vm5450_vm4, %v3515_v29, %v3519_v27  ;;  %v2682_v34 = vpack.c.b16 %v2662_v48, %v2661_v58 }
 0x20d   : > { %v3756_v13 = vpop.f32.mrf.mxu3  ;;  %5055 = vmatmul.msk.bf16.gmra.mxu2 %vm685_vm3, %v5272_v32  ;;  %v2776_v24 = vpop.f32.mrf.mxu1  ;;  %v5154_v32 = vld [vmem:[%s5426_s6 + $0x9c] sm:$0xe]  ;;  %v3647_v9 = vunpack.c.l.b16 %v3520_v47  ;;  %v3537_v47 = vrot.slane %v3535_v17, 4 }
 0x20e   : > { %v4351_v30 = vpack.c.bf16 %v4319_v39, %v4319_v39  ;;  %v3832_v35 = vadd.f32 %v3756_v13, %v3156_v12  ;;  %v3510_v12 = vsel %vm5450_vm4, %v3505_v56, %v6580_v61  ;;  %v5170_v63 = vrot.slane %v5154_v32, 9 }
 0x20f   : > { %v2606_v13 = vrot.slane %v5350_v15, 5  ;;  %v3525_v61 = vshll.u32 %v5097_v43, 16  ;;  %v2849_v29 = vadd.f32 %v2776_v24, %v6034_v25  ;;  %v5351_v43 = vld [vmem:[%s5426_s6 + $0xa4] sm:$0x1]  ;;  %v6639_v25 = vld [vmem:[%s5426_s6 + $0xb0] sm:$0x1] }
 0x210   : > { %4384 = vst.msk [vmem:[%s6549_s22 + $0x8] sm:$0xf] %vm4381_vm8, %v4351_v30  ;;  %v4252_v53 = vadd.f32 %v4176_v14, %v3832_v35  ;;  %v3083_v16 = vpop.f32.mrf.mxu2  ;;  %v4877_v30 = vld [vmem:[%s5426_s6 + $0x9c] sm:$0xe]  ;;  %v3531_v35 = vshll.u32 %v6618_v8, 16  ;;  %v4005_v58 = vsel %vm5657_vm7, %v5170_v63, %v4004_v33 }
 0x211   : > { %v3157_v6 = vadd.f32 %v3083_v16, %v2848_v59  ;;  %v3524_v59 = vrot.slane %v3522_v11, 4  ;;  %v5273_v16 = vld [vmem:[%s5426_s6 + $0x9c] sm:$0xff]  ;;  %v4893_v48 = vrot.slane %v4877_v30, 9  ;;  %v2608_v32 = vrot.slane %v2606_v13, 4 }
 0x212   : > { %v4288_v20 = vadd.f32 %v6522_v28, %v4252_v53  ;;  %5137 = vmatmul.msk.bf16.gmra.mxu3 %vm685_vm3, %v3666_v22  ;;  %v3646_v22 = vunpack.c.l.b16 %v3510_v12  ;;  %v4008_v53 = vsel %vm5657_vm7, %v4006_v7, %v4007_v44  ;;  %v6636_v12 = vrot.slane %v3531_v35, 5 }
 0x213   : > { %v4179_v45 = vpop.f32.mrf.mxu0  ;;  %v4066_v44 = vunpack.c.l.b16 %v4005_v58  ;;  %v2607_v11 = vsel %vm5657_vm7, %v4893_v48, %v2606_v13  ;;  %v3541_v30 = vshll.u32 %v6639_v25, 16  ;;  %v5100_v13 = vld [vmem:[%s5426_s6 + $0xb4] sm:$0xf] }
 0x214   : > { %v4320_v2 = vmax.f32 %v4288_v20, 0.0  ;;  %v2609_v20 = vrot.slane %v5351_v43, 5  ;;  %v3546_v43 = vshrl.u32 %v5100_v13, 16 }
 0x215   : > { %v3759_v39 = vpop.f32.mrf.mxu3  ;;  %v2779_v14 = vpop.f32.mrf.mxu1  ;;  %v3543_v48 = vrot.slane %v3541_v30, 5 }
 0x216   : > { %v4352_v5 = vpack.c.bf16 %v4320_v2, %v4320_v2  ;;  %v3833_v52 = vadd.f32 %v3759_v39, %v3157_v6  ;;  %5203 = vmatmul.msk.bf16.gmra.mxu0 %vm685_vm3, %v4086_v54  ;;  %v3527_v54 = vrot.slane %v3525_v61, 5  ;;  %v3667_v2 = vpack.c.b16 %v3647_v9, %v3646_v22 }
 0x217   : > { %v2610_v39 = vsel %vm5657_vm7, %v2608_v32, %v2609_v20  ;;  %v2850_v17 = vadd.f32 %v2779_v14, %v6047_v3  ;;  %v2663_v9 = vunpack.c.l.b16 %v2607_v11  ;;  %v5155_v32 = vld [vmem:[%s5426_s6 + $0xa8] sm:$0xe]  ;;  %v3549_v20 = vshll.u32 %v5100_v13, 16 }
 0x218   : > { %4385 = vst.msk [vmem:[%s6549_s22 + $0xc] sm:$0xf] %vm4381_vm8, %v4352_v5  ;;  %v4253_v56 = vadd.f32 %v4179_v45, %v3833_v52  ;;  %v3085_v27 = vpop.f32.mrf.mxu2  ;;  %4926 = vmatmul.msk.bf16.gmra.mxu1 %vm685_vm3, %v2682_v34  ;;  %v4067_v34 = vunpack.c.l.b16 %v4008_v53  ;;  %v3528_v15 = vor.u32 %v3527_v54, %v3524_v59  ;;  %v3538_v52 = vor.u32 %v3537_v47, %v6636_v12  ;;  %v5274_v13 = vld [vmem:[%s5426_s6 + $0xa8] sm:$0xff] }
 0x219   : > { %v3158_v6 = vadd.f32 %v3085_v27, %v2849_v29  ;;  %v2664_v58 = vunpack.c.l.b16 %v2610_v39  ;;  %v4011_v47 = vrot.slane %v6618_v8, 5  ;;  %v3548_v8 = vrot.slane %v3546_v43, 4 }
 0x21a   : > { %v4289_v33 = vadd.f32 %v6522_v28, %v4253_v56  ;;  %v6653_v56 = vld [vmem:[%s5426_s6 + $0xb8] sm:$0xf]  ;;  %v4087_v29 = vpack.c.b16 %v4067_v34, %v4066_v44  ;;  %v3529_v27 = vrot.slane %v3528_v15, 4  ;;  %v5352_v44 = vld [vmem:[%s5426_s6 + $0xac] sm:$0xf] }
 0x21b   : > { %v4181_v63 = vpop.f32.mrf.mxu0  ;;  %v3555_v3 = vshll.u32 %v6653_v56, 16  ;;  %v3559_v14 = vshrl.u32 %v6653_v56, 16 }
 0x21c   : > { %v4321_v24 = vmax.f32 %v4289_v33, 0.0  ;;  %v3534_v39 = vsel %vm5450_vm4, %v3529_v27, %v6636_v12  ;;  %v4013_v12 = vrot.slane %v4011_v47, 4 }
 0x21d   : > { %v3761_v45 = vpop.f32.mrf.mxu3  ;;  %5056 = vmatmul.msk.bf16.gmra.mxu2 %vm685_vm3, %v5273_v16  ;;  %v2781_v7 = vpop.f32.mrf.mxu1  ;;  %v3539_v16 = vrot.slane %v3538_v52, 4  ;;  %v6669_v52 = vrot.slane %v3555_v3, 5  ;;  %v3561_v30 = vrot.slane %v3559_v14, 4 }
 0x21e   : > { %v4353_v61 = vpack.c.bf16 %v4321_v24, %v4321_v24  ;;  %v3834_v5 = vadd.f32 %v3761_v45, %v3158_v6  ;;  %v2683_v6 = vpack.c.b16 %v2664_v58, %v2663_v9  ;;  %v2613_v45 = vrot.slane %v5352_v44, 5  ;;  %v6677_v58 = vld [vmem:[%s5426_s6 + $0xbc] sm:$0x1] }
 0x21f   : > { %v3544_v15 = vsel %vm5450_vm4, %v3539_v16, %v3543_v48  ;;  %v4014_v9 = vrot.slane %v6639_v25, 5  ;;  %v3565_v25 = vshll.u32 %v6677_v58, 16 }
 0x220   : > { %4386 = vst.msk [vmem:[%s6549_s22 + $0x10] sm:$0xf] %vm4381_vm8, %v4353_v61  ;;  %v4254_v35 = vadd.f32 %v4181_v63, %v3834_v5  ;;  %v3088_v22 = vpop.f32.mrf.mxu2  ;;  %v4878_v61 = vld [vmem:[%s5426_s6 + $0xa8] sm:$0xe]  ;;  %v3551_v5 = vrot.slane %v3549_v20, 5  ;;  %v2615_v27 = vrot.slane %v2613_v45, 4  ;;  %v3649_v43 = vunpack.c.l.b16 %v3544_v15 }
 0x221   : > { %v3159_v59 = vadd.f32 %v3088_v22, %v2850_v17  ;;  %v2851_v17 = vadd.f32 %v2781_v7, %v6060_v62  ;;  %v3562_v20 = vor.u32 %v3561_v30, %v6669_v52 }
 0x222   : > { %v4290_v53 = vadd.f32 %v6522_v28, %v4254_v35  ;;  %5138 = vmatmul.msk.bf16.gmra.mxu3 %vm685_vm3, %v3667_v2  ;;  %v5171_v2 = vrot.slane %v5155_v32, 9  ;;  %v3648_v32 = vunpack.c.l.b16 %v3534_v39  ;;  %v3552_v7 = vor.u32 %v3551_v5, %v3548_v8 }
 0x223   : > { %v4184_v33 = vpop.f32.mrf.mxu0  ;;  %v3567_v8 = vrot.slane %v3565_v25, 5 }
 0x224   : > { %v4322_v54 = vmax.f32 %v4290_v53, 0.0  ;;  %v5353_v53 = vld [vmem:[%s5426_s6 + $0xb0] sm:$0x1]  ;;  %v4012_v62 = vsel %vm5657_vm7, %v5171_v2, %v4011_v47  ;;  %v3553_v15 = vrot.slane %v3552_v7, 4  ;;  %v5354_v7 = vld [vmem:[%s5426_s6 + $0xb8] sm:$0xf] }
 0x225   : > { %v3764_v24 = vpop.f32.mrf.mxu3  ;;  %v2784_v63 = vpop.f32.mrf.mxu1 }
 0x226   : > { %v4354_v34 = vpack.c.bf16 %v4322_v54, %v4322_v54  ;;  %v3835_v11 = vadd.f32 %v3764_v24, %v3159_v59  ;;  %5204 = vmatmul.msk.bf16.gmra.mxu0 %vm685_vm3, %v4087_v29  ;;  %v4894_v29 = vrot.slane %v4878_v61, 9  ;;  %v2616_v59 = vrot.slane %v5353_v53, 5 }
 0x227   : > { %v4015_v54 = vsel %vm5657_vm7, %v4013_v12, %v4014_v9  ;;  %v3563_v61 = vrot.slane %v3562_v20, 4  ;;  %v2852_v30 = vadd.f32 %v2784_v63, %v6073_v60  ;;  %v6705_v60 = vld [vmem:[%s5426_s6 + $0xc4] sm:$0xf]  ;;  %v2620_v20 = vrot.slane %v5354_v7, 5 }
 0x228   : > { %4387 = vst.msk [vmem:[%s6549_s22 + $0x14] sm:$0xf] %vm4381_vm8, %v4354_v34  ;;  %v4255_v35 = vadd.f32 %v4184_v33, %v3835_v11  ;;  %v3090_v22 = vpop.f32.mrf.mxu2  ;;  %4927 = vmatmul.msk.bf16.gmra.mxu1 %vm685_vm3, %v2683_v6  ;;  %v2614_v24 = vsel %vm5657_vm7, %v4894_v29, %v2613_v45  ;;  %v2617_v47 = vsel %vm5657_vm7, %v2615_v27, %v2616_v59  ;;  %v4068_v11 = vunpack.c.l.b16 %v4012_v62 }
 0x229   : > { %v3160_v48 = vadd.f32 %v3090_v22, %v2851_v17  ;;  %v3668_v34 = vpack.c.b16 %v3649_v43, %v3648_v32  ;;  %v4069_v39 = vunpack.c.l.b16 %v4015_v54  ;;  %v2666_v17 = vunpack.c.l.b16 %v2617_v47  ;;  %v5103_v22 = vld [vmem:[%s5426_s6 + $0xc0] sm:$0xf] }
 0x22a   : > { %v4291_v16 = vadd.f32 %v6522_v28, %v4255_v35  ;;  %v2665_v35 = vunpack.c.l.b16 %v2614_v24  ;;  %v3558_v29 = vsel %vm5450_vm4, %v3553_v15, %v6669_v52  ;;  %v3568_v27 = vsel %vm5450_vm4, %v3563_v61, %v3567_v8  ;;  %v5275_v8 = vld [vmem:[%s5426_s6 + $0xb4] sm:$0xff] }
 0x22b   : > { %v4186_v14 = vpop.f32.mrf.mxu0  ;;  %v3570_v32 = vshrl.u32 %v5103_v22, 16  ;;  %v3573_v25 = vshll.u32 %v5103_v22, 16  ;;  %v3579_v54 = vshll.u32 %v6705_v60, 16  ;;  %v3650_v24 = vunpack.c.l.b16 %v3558_v29 }
 0x22c   : > { %v4323_v3 = vmax.f32 %v4291_v16, 0.0  ;;  %v2684_v59 = vpack.c.b16 %v2666_v17, %v2665_v35  ;;  %v5156_v16 = vld [vmem:[%s5426_s6 + $0xb4] sm:$0xe] }
 0x22d   : > { %v3766_v33 = vpop.f32.mrf.mxu3  ;;  %5057 = vmatmul.msk.bf16.gmra.mxu2 %vm685_vm3, %v5274_v13  ;;  %v2786_v6 = vpop.f32.mrf.mxu1  ;;  %v4088_v13 = vpack.c.b16 %v4069_v39, %v4068_v11  ;;  %v5172_v47 = vrot.slane %v5156_v16, 9  ;;  %v3572_v61 = vrot.slane %v3570_v32, 4  ;;  %v3575_v17 = vrot.slane %v3573_v25, 5 }
 0x22e   : > { %v4355_v2 = vpack.c.bf16 %v4323_v3, %v4323_v3  ;;  %v3836_v44 = vadd.f32 %v3766_v33, %v3160_v48  ;;  %v4018_v48 = vrot.slane %v6653_v56, 5  ;;  %v3583_v33 = vshrl.u32 %v6705_v60, 16 }
 0x22f   : > { %v3651_v56 = vunpack.c.l.b16 %v3568_v27  ;;  %v3576_v7 = vor.u32 %v3575_v17, %v3572_v61  ;;  %v5157_v61 = vld [vmem:[%s5426_s6 + $0xc0] sm:$0xe]  ;;  %v6747_v17 = vld [vmem:[%s5426_s6 + $0xd0] sm:$0xf] }
 0x230   : > { %4388 = vst.msk [vmem:[%s6549_s22 + $0x18] sm:$0xf] %vm4381_vm8, %v4355_v2  ;;  %v4256_v5 = vadd.f32 %v4186_v14, %v3836_v44  ;;  %v3093_v45 = vpop.f32.mrf.mxu2  ;;  %v4879_v14 = vld [vmem:[%s5426_s6 + $0xb4] sm:$0xe]  ;;  %v4021_v2 = vrot.slane %v6677_v58, 5  ;;  %v4020_v15 = vrot.slane %v4018_v48, 4  ;;  %v4019_v27 = vsel %vm5657_vm7, %v5172_v47, %v4018_v48 }
 0x231   : > { %v3161_v9 = vadd.f32 %v3093_v45, %v2852_v30  ;;  %v2622_v30 = vrot.slane %v2620_v20, 4  ;;  %v5355_v45 = vld [vmem:[%s5426_s6 + $0xbc] sm:$0x1] }
 0x232   : > { %v4292_v12 = vadd.f32 %v6522_v28, %v4256_v5  ;;  %5139 = vmatmul.msk.bf16.gmra.mxu3 %vm685_vm3, %v3668_v34  ;;  %v6898_v34 = vld [vmem:[#allocation2_spill] sm:$0xff]  ;;  %v4895_v5 = vrot.slane %v4879_v14, 9  ;;  %v2623_v35 = vrot.slane %v5355_v45, 5  ;;  %v4070_v14 = vunpack.c.l.b16 %v4019_v27 }
 0x233   : > { %v4189_v53 = vpop.f32.mrf.mxu0  ;;  %v2853_v11 = vadd.f32 %v2786_v6, %v6898_v34  ;;  %v4025_v45 = vrot.slane %v6705_v60, 5  ;;  %v4880_v60 = vld [vmem:[%s5426_s6 + $0xc0] sm:$0xe] }
 0x234   : > { %v4324_v63 = vmax.f32 %v4292_v12, 0.0  ;;  %v6722_v12 = vrot.slane %v3579_v54, 5  ;;  %v2621_v32 = vsel %vm5657_vm7, %v4895_v5, %v2620_v20 }
 0x235   : > { %v3769_v43 = vpop.f32.mrf.mxu3  ;;  %v2789_v62 = vpop.f32.mrf.mxu1  ;;  %v2667_v47 = vunpack.c.l.b16 %v2621_v32 }
 0x236   : > { %v4356_v52 = vpack.c.bf16 %v4324_v63, %v4324_v63  ;;  %v3837_v3 = vadd.f32 %v3769_v43, %v3161_v9  ;;  %5205 = vmatmul.msk.bf16.gmra.mxu0 %vm685_vm3, %v4088_v13  ;;  %v3585_v9 = vrot.slane %v3583_v33, 4  ;;  %v6725_v13 = vld [vmem:[%s5426_s6 + $0xc8] sm:$0x1]  ;;  %v4022_v63 = vsel %vm5657_vm7, %v4020_v15, %v4021_v2 }
 0x237   : > { %v2624_v43 = vsel %vm5657_vm7, %v2622_v30, %v2623_v35  ;;  %v3589_v48 = vshll.u32 %v6725_v13, 16  ;;  %v4071_v54 = vunpack.c.l.b16 %v4022_v63  ;;  %v5106_v35 = vld [vmem:[%s5426_s6 + $0xcc] sm:$0xf] }
 0x238   : > { %4389 = vst.msk [vmem:[%s6549_s22 + $0x1c] sm:$0xf] %vm4381_vm8, %v4356_v52  ;;  %v4257_v44 = vadd.f32 %v4189_v53, %v3837_v3  ;;  %v3095_v39 = vpop.f32.mrf.mxu2  ;;  %4928 = vmatmul.msk.bf16.gmra.mxu1 %vm685_vm3, %v2684_v59  ;;  %v3669_v59 = vpack.c.b16 %v3651_v56, %v3650_v24  ;;  %v3586_v3 = vor.u32 %v3585_v9, %v6722_v12  ;;  %v6899_v24 = vld [vmem:[#allocation3_spill] sm:$0xff]  ;;  %v2668_v2 = vunpack.c.l.b16 %v2624_v43 }
 0x239   : > { %v3162_v58 = vadd.f32 %v3095_v39, %v2853_v11  ;;  %v2854_v56 = vadd.f32 %v2789_v62, %v6899_v24  ;;  %v3591_v15 = vrot.slane %v3589_v48, 5  ;;  %v5173_v9 = vrot.slane %v5157_v61, 9 }
 0x23a   : > { %v4293_v22 = vadd.f32 %v6522_v28, %v4257_v44  ;;  %v3577_v44 = vrot.slane %v3576_v7, 4  ;;  %v3587_v39 = vrot.slane %v3586_v3, 4  ;;  %v2685_v62 = vpack.c.b16 %v2668_v2, %v2667_v47 }
 0x23b   : > { %v4191_v29 = vpop.f32.mrf.mxu0  ;;  %v3594_v32 = vshrl.u32 %v5106_v35, 16  ;;  %v3597_v43 = vshll.u32 %v5106_v35, 16  ;;  %v3603_v7 = vshll.u32 %v6747_v17, 16  ;;  %v4896_v24 = vrot.slane %v4880_v60, 9 }
 0x23c   : > { %v4325_v6 = vmax.f32 %v4293_v22, 0.0 }
 0x23d   : > { %v3771_v53 = vpop.f32.mrf.mxu3  ;;  %5058 = vmatmul.msk.bf16.gmra.mxu2 %vm685_vm3, %v5275_v8  ;;  %v2791_v16 = vpop.f32.mrf.mxu1  ;;  %v4089_v8 = vpack.c.b16 %v4071_v54, %v4070_v14  ;;  %v4028_v14 = vrot.slane %v6725_v13, 5  ;;  %v5276_v54 = vld [vmem:[%s5426_s6 + $0xc0] sm:$0xff] }
 0x23e   : > { %v4357_v25 = vpack.c.bf16 %v4325_v6, %v4325_v6  ;;  %v3838_v52 = vadd.f32 %v3771_v53, %v3162_v58  ;;  %v5356_v6 = vld [vmem:[%s5426_s6 + $0xc4] sm:$0xf]  ;;  %v3582_v53 = vsel %vm5450_vm4, %v3577_v44, %v6722_v12  ;;  %v2855_v3 = vadd.f32 %v2791_v16, %v6134_v49 }
 0x23f   : > { %v4027_v12 = vrot.slane %v4025_v45, 4  ;;  %v4026_v49 = vsel %vm5657_vm7, %v5173_v9, %v4025_v45  ;;  %v3596_v16 = vrot.slane %v3594_v32, 4 }
 0x240   : > { %4390 = vst.msk [vmem:[%s6549_s22 + $0x20] sm:$0xf] %vm4381_vm8, %v4357_v25  ;;  %v4258_v33 = vadd.f32 %v4191_v29, %v3838_v52  ;;  %v3098_v20 = vpop.f32.mrf.mxu2  ;;  %v2627_v29 = vrot.slane %v5356_v6, 5  ;;  %v3607_v25 = vshrl.u32 %v6747_v17, 16 }
 0x241   : > { %v3163_v11 = vadd.f32 %v3098_v20, %v2854_v56  ;;  %v5357_v20 = vld [vmem:[%s5426_s6 + $0xc8] sm:$0x1] }
 0x242   : > { %v4294_v34 = vadd.f32 %v6522_v28, %v4258_v33  ;;  %5140 = vmatmul.msk.bf16.gmra.mxu3 %vm685_vm3, %v3669_v59  ;;  %v3592_v59 = vsel %vm5450_vm4, %v3587_v39, %v3591_v15  ;;  %v3652_v33 = vunpack.c.l.b16 %v3582_v53  ;;  %v2629_v56 = vrot.slane %v2627_v29, 4 }
 0x243   : > { %v4194_v30 = vpop.f32.mrf.mxu0  ;;  %v2630_v47 = vrot.slane %v5357_v20, 5  ;;  %v3605_v39 = vrot.slane %v3603_v7, 5  ;;  %v3609_v15 = vrot.slane %v3607_v25, 4  ;;  %v2628_v35 = vsel %vm5657_vm7, %v4896_v24, %v2627_v29  ;;  %v5158_v20 = vld [vmem:[%s5426_s6 + $0xcc] sm:$0xe] }
 0x244   : > { %v4326_v5 = vmax.f32 %v4294_v34, 0.0  ;;  %v3653_v34 = vunpack.c.l.b16 %v3592_v59  ;;  %v2669_v25 = vunpack.c.l.b16 %v2628_v35 }
 0x245   : > { %v3774_v22 = vpop.f32.mrf.mxu3  ;;  %v2794_v58 = vpop.f32.mrf.mxu1  ;;  %v2631_v45 = vsel %vm5657_vm7, %v2629_v56, %v2630_v47  ;;  %v3610_v59 = vor.u32 %v3609_v15, %v3605_v39  ;;  %v4032_v47 = vrot.slane %v6747_v17, 5 }
 0x246   : > { %v4358_v27 = vpack.c.bf16 %v4326_v5, %v4326_v5  ;;  %v3839_v63 = vadd.f32 %v3774_v22, %v3163_v11  ;;  %5206 = vmatmul.msk.bf16.gmra.mxu0 %vm685_vm3, %v4089_v8  ;;  %v3599_v11 = vrot.slane %v3597_v43, 5  ;;  %v4029_v8 = vsel %vm5657_vm7, %v4027_v12, %v4028_v14  ;;  %v5108_v5 = vld [vmem:[%s5426_s6 + $0xd4] sm:$0x1] }
 0x247   : > { %v3670_v6 = vpack.c.b16 %v3653_v34, %v3652_v33  ;;  %v3613_v60 = vshll.u32 %v5108_v5, 16  ;;  %v2856_v43 = vadd.f32 %v2794_v58, %v6145_v4  ;;  %v2670_v29 = vunpack.c.l.b16 %v2631_v45 }
 0x248   : > { %4391 = vst.msk [vmem:[%s6549_s22 + $0x24] sm:$0xf] %vm4381_vm8, %v4358_v27  ;;  %v4259_v52 = vadd.f32 %v4194_v30, %v3839_v63  ;;  %v3100_v48 = vpop.f32.mrf.mxu2  ;;  %4929 = vmatmul.msk.bf16.gmra.mxu1 %vm685_vm3, %v2685_v62  ;;  %v4072_v27 = vunpack.c.l.b16 %v4026_v49  ;;  %v4073_v63 = vunpack.c.l.b16 %v4029_v8  ;;  %v3600_v53 = vor.u32 %v3599_v11, %v3596_v16  ;;  %v5277_v8 = vld [vmem:[%s5426_s6 + $0xcc] sm:$0xff] }
 0x249   : > { %v3164_v44 = vadd.f32 %v3100_v48, %v2855_v3  ;;  %v3611_v14 = vrot.slane %v3610_v59, 4  ;;  %v2686_v56 = vpack.c.b16 %v2670_v29, %v2669_v25  ;;  %v5174_v16 = vrot.slane %v5158_v20, 9 }
 0x24a   : > { %v4295_v2 = vadd.f32 %v6522_v28, %v4259_v52  ;;  %v4090_v48 = vpack.c.b16 %v4073_v63, %v4072_v27  ;;  %v3601_v12 = vrot.slane %v3600_v53, 4 }
 0x24b   : > { %v4196_v13 = vpop.f32.mrf.mxu0 }
 0x24c   : > { %v4327_v61 = vmax.f32 %v4295_v2, 0.0  ;;  %v3606_v34 = vsel %vm5450_vm4, %v3601_v12, %v3605_v39 }
 0x24d   : > { %v3776_v30 = vpop.f32.mrf.mxu3  ;;  %5059 = vmatmul.msk.bf16.gmra.mxu2 %vm685_vm3, %v5276_v54  ;;  %v2796_v62 = vpop.f32.mrf.mxu1  ;;  %v3615_v54 = vrot.slane %v3613_v60, 5  ;;  %v3654_v39 = vunpack.c.l.b16 %v3606_v34 }
 0x24e   : > { %v4359_v22 = vpack.c.bf16 %v4327_v61, %v4327_v61  ;;  %v3840_v9 = vadd.f32 %v3776_v30, %v3164_v44  ;;  %v2857_v15 = vadd.f32 %v2796_v62, %v6161_v55  ;;  %v4034_v61 = vrot.slane %v4032_v47, 4 }
 0x24f   : > { %v3616_v49 = vsel %vm5450_vm4, %v3611_v14, %v3615_v54 }
 0x250   : > { %4392 = vst.msk [vmem:[%s6549_s22 + $0x28] sm:$0xf] %vm4381_vm8, %v4359_v22  ;;  %v4260_v32 = vadd.f32 %v4196_v13, %v3840_v9  ;;  %v3103_v7 = vpop.f32.mrf.mxu2  ;;  %v4035_v13 = vrot.slane %v5108_v5, 5  ;;  %v3655_v45 = vunpack.c.l.b16 %v3616_v49  ;;  %v4033_v9 = vsel %vm5657_vm7, %v5174_v16, %v4032_v47 }
 0x251   : > { %v3165_v3 = vadd.f32 %v3103_v7, %v2856_v43  ;;  %v4074_v53 = vunpack.c.l.b16 %v4033_v9 }
 0x252   : > { %v4296_v52 = vadd.f32 %v6522_v28, %v4260_v32  ;;  %5141 = vmatmul.msk.bf16.gmra.mxu3 %vm685_vm3, %v3670_v6  ;;  %v4036_v55 = vsel %vm5657_vm7, %v4034_v61, %v4035_v13  ;;  %v3671_v63 = vpack.c.b16 %v3655_v45, %v3654_v39 }
 0x253   : > { %v4199_v24 = vpop.f32.mrf.mxu0  ;;  %v4075_v59 = vunpack.c.l.b16 %v4036_v55 }
 0x254   : > { %v4328_v33 = vmax.f32 %v4296_v52, 0.0 }
 0x255   : > { %v3779_v4 = vpop.f32.mrf.mxu3  ;;  %v2799_v58 = vpop.f32.mrf.mxu1  ;;  %v4091_v25 = vpack.c.b16 %v4075_v59, %v4074_v53 }
 0x256   : > { %v4360_v2 = vpack.c.bf16 %v4328_v33, %v4328_v33  ;;  %v3841_v44 = vadd.f32 %v3779_v4, %v3165_v3  ;;  %5207 = vmatmul.msk.bf16.gmra.mxu0 %vm685_vm3, %v4090_v48  ;;  %v2858_v32 = vadd.f32 %v2799_v58, %v6179_v21 }
 0x258   : > { %4393 = vst.msk [vmem:[%s6549_s22 + $0x2c] sm:$0xf] %vm4381_vm8, %v4360_v2  ;;  %v4261_v11 = vadd.f32 %v4199_v24, %v3841_v44  ;;  %v3105_v17 = vpop.f32.mrf.mxu2  ;;  %4930 = vmatmul.msk.bf16.gmra.mxu1 %vm685_vm3, %v2686_v56 }
 0x259   : > { %v3166_v35 = vadd.f32 %v3105_v17, %v2857_v15 }
 0x25a   : > { %v4297_v30 = vadd.f32 %v6522_v28, %v4261_v11 }
 0x25b   : > { %v4201_v22 = vpop.f32.mrf.mxu0 }
 0x25c   : > { %v4329_v42 = vmax.f32 %v4297_v30, 0.0 }
 0x25d   : > { %v3781_v62 = vpop.f32.mrf.mxu3  ;;  %5060 = vmatmul.msk.bf16.gmra.mxu2 %vm685_vm3, %v5277_v8  ;;  %v2801_v6 = vpop.f32.mrf.mxu1 }
 0x25e   : > { %v4361_v5 = vpack.c.bf16 %v4329_v42, %v4329_v42  ;;  %v3842_v27 = vadd.f32 %v3781_v62, %v3166_v35  ;;  %v2859_v21 = vadd.f32 %v2801_v6, %v6199_v10 }
 0x260   : > { %4394 = vst.msk [vmem:[%s6549_s22 + $0x30] sm:$0xf] %vm4381_vm8, %v4361_v5  ;;  %v4262_v60 = vadd.f32 %v4201_v22, %v3842_v27  ;;  %v3108_v43 = vpop.f32.mrf.mxu2 }
 0x261   : > { %v3167_v31 = vadd.f32 %v3108_v43, %v2858_v32 }
 0x262   : > { %v4298_v7 = vadd.f32 %v6522_v28, %v4262_v60  ;;  %5142 = vmatmul.msk.bf16.gmra.mxu3 %vm685_vm3, %v3671_v63 }
 0x263   : > { %v4204_v52 = vpop.f32.mrf.mxu0 }
 0x264   : > { %v4330_v29 = vmax.f32 %v4298_v7, 0.0 }
 0x265   : > { %v3784_v3 = vpop.f32.mrf.mxu3  ;;  %v2804_v48 = vpop.f32.mrf.mxu1 }
 0x266   : > { %v4362_v12 = vpack.c.bf16 %v4330_v29, %v4330_v29  ;;  %v3843_v14 = vadd.f32 %v3784_v3, %v3167_v31  ;;  %5208 = vmatmul.msk.bf16.gmra.mxu0 %vm685_vm3, %v4091_v25  ;;  %v2860_v49 = vadd.f32 %v2804_v48, %v6218_v38 }
 0x268   : > { %4395 = vst.msk [vmem:[%s6549_s22 + $0x34] sm:$0xf] %vm4381_vm8, %v4362_v12  ;;  %v4263_v54 = vadd.f32 %v4204_v52, %v3843_v14  ;;  %v3110_v33 = vpop.f32.mrf.mxu2 }
 0x269   : > { %v3168_v56 = vadd.f32 %v3110_v33, %v2859_v21 }
 0x26a   : > { %v4299_v24 = vadd.f32 %v6522_v28, %v4263_v54 }
 0x26b   : > { %v4206_v47 = vpop.f32.mrf.mxu0 }
 0x26c   : > { %v4331_v20 = vmax.f32 %v4299_v24, 0.0 }
 0x26d   : > { %v3786_v4 = vpop.f32.mrf.mxu3  ;;  %v2806_v58 = vpop.f32.mrf.mxu1 }
 0x26e   : > { %v4363_v2 = vpack.c.bf16 %v4331_v20, %v4331_v20  ;;  %v3844_v44 = vadd.f32 %v3786_v4, %v3168_v56  ;;  %v2861_v39 = vadd.f32 %v2806_v58, %v6239_v36 }
 0x270   : > { %4396 = vst.msk [vmem:[%s6549_s22 + $0x38] sm:$0xf] %vm4381_vm8, %v4363_v2  ;;  %v4264_v34 = vadd.f32 %v4206_v47, %v3844_v44  ;;  %v3113_v16 = vpop.f32.mrf.mxu2 }
 0x271   : > { %v3169_v10 = vadd.f32 %v3113_v16, %v2860_v49 }
 0x272   : > { %v4300_v11 = vadd.f32 %v6522_v28, %v4264_v34 }
 0x273   : > { %v4209_v17 = vpop.f32.mrf.mxu0 }
 0x274   : > { %v4332_v15 = vmax.f32 %v4300_v11, 0.0 }
 0x275   : > { %v3789_v61 = vpop.f32.mrf.mxu3  ;;  %v2809_v13 = vpop.f32.mrf.mxu1 }
 0x276   : > { %v4364_v8 = vpack.c.bf16 %v4332_v15, %v4332_v15  ;;  %v3845_v30 = vadd.f32 %v3789_v61, %v3169_v10  ;;  %v2862_v63 = vadd.f32 %v2809_v13, %v6257_v40  ;;  %v6828_v40 = vld [vmem:[%s6889_s2] ss:$0 sm:$0xff] }
 0x278   : > { %4397 = vst.msk [vmem:[%s6549_s22 + $0x3c] sm:$0xf] %vm4381_vm8, %v4364_v8  ;;  %v4265_v35 = vadd.f32 %v4209_v17, %v3845_v30  ;;  %v3115_v45 = vpop.f32.mrf.mxu2 }
 0x279   : > { %v3170_v38 = vadd.f32 %v3115_v45, %v2861_v39 }
 0x27a   : > { %v4301_v42 = vadd.f32 %v6522_v28, %v4265_v35 }
 0x27b   : > { %v4211_v9 = vpop.f32.mrf.mxu0 }
 0x27c   : > { %v4333_v22 = vmax.f32 %v4301_v42, 0.0 }
 0x27d   : > { %v3791_v55 = vpop.f32.mrf.mxu3  ;;  %v2811_v62 = vpop.f32.mrf.mxu1 }
 0x27e   : > { %v4365_v6 = vpack.c.bf16 %v4333_v22, %v4333_v22  ;;  %v3846_v5 = vadd.f32 %v3791_v55, %v3170_v38  ;;  %v2863_v52 = vadd.f32 %v2811_v62, %v6277_v51 }
 0x280   : > { %4398 = vst.msk [vmem:[%s6549_s22 + $0x40] sm:$0xf] %vm4381_vm8, %v4365_v6  ;;  %v4266_v27 = vadd.f32 %v4211_v9, %v3846_v5  ;;  %v3118_v53 = vpop.f32.mrf.mxu2 }
 0x281   : > { %v3171_v36 = vadd.f32 %v3118_v53, %v2862_v63 }
 0x282   : > { %v4302_v59 = vadd.f32 %v6522_v28, %v4266_v27 }
 0x283   : > { %v4214_v32 = vpop.f32.mrf.mxu0 }
 0x284   : > { %v4334_v60 = vmax.f32 %v4302_v59, 0.0 }
 0x285   : > { %v3794_v43 = vpop.f32.mrf.mxu3  ;;  %v2814_v7 = vpop.f32.mrf.mxu1 }
 0x286   : > { %v4366_v31 = vpack.c.bf16 %v4334_v60, %v4334_v60  ;;  %v3847_v25 = vadd.f32 %v3794_v43, %v3171_v36  ;;  %v2864_v51 = vadd.f32 %v2814_v7, %v6296_v37 }
 0x288   : > { %4399 = vst.msk [vmem:[%s6549_s22 + $0x44] sm:$0xf] %vm4381_vm8, %v4366_v31  ;;  %v4267_v29 = vadd.f32 %v4214_v32, %v3847_v25  ;;  %v3120_v3 = vpop.f32.mrf.mxu2 }
 0x289   : > { %v3172_v48 = vadd.f32 %v3120_v3, %v2863_v52 }
 0x28a   : > { %v4303_v28 = vadd.f32 %v6828_v40, %v4267_v29 }
 0x28b   : > { %v4216_v14 = vpop.f32.mrf.mxu0 }
 0x28c   : > { %v4335_v12 = vmax.f32 %v4303_v28, 0.0 }
 0x28d   : > { %v3796_v54 = vpop.f32.mrf.mxu3  ;;  %v2816_v21 = vpop.f32.mrf.mxu1 }
 0x28e   : > { %v4367_v33 = vpack.c.bf16 %v4335_v12, %v4335_v12  ;;  %v3848_v24 = vadd.f32 %v3796_v54, %v3172_v48  ;;  %v2865_v10 = vadd.f32 %v2816_v21, %v6317_v41 }
 0x290   : > { %4400 = vst.msk [vmem:[%s6549_s22 + $0x48] sm:$0xf] %vm4381_vm8, %v4367_v33  ;;  %v4268_v56 = vadd.f32 %v4216_v14, %v3848_v24  ;;  %v3123_v20 = vpop.f32.mrf.mxu2 }
 0x291   : > { %v3173_v4 = vadd.f32 %v3123_v20, %v2864_v51 }
 0x292   : > { %v4304_v47 = vadd.f32 %v6828_v40, %v4268_v56 }
 0x293   : > { %v4219_v2 = vpop.f32.mrf.mxu0 }
 0x294   : > { %v4336_v58 = vmax.f32 %v4304_v47, 0.0 }
 0x295   : > { %v3799_v44 = vpop.f32.mrf.mxu3  ;;  %v2819_v34 = vpop.f32.mrf.mxu1 }
 0x296   : > { %v4368_v49 = vpack.c.bf16 %v4336_v58, %v4336_v58  ;;  %v3849_v16 = vadd.f32 %v3799_v44, %v3173_v4  ;;  %v2866_v42 = vadd.f32 %v2819_v34, %v6335_v18 }
 0x298   : > { %4401 = vst.msk [vmem:[%s6549_s22 + $0x4c] sm:$0xf] %vm4381_vm8, %v4368_v49  ;;  %v4269_v11 = vadd.f32 %v4219_v2, %v3849_v16  ;;  %v3125_v15 = vpop.f32.mrf.mxu2 }
 0x299   : > { %v3174_v37 = vadd.f32 %v3125_v15, %v2865_v10 }
 0x29a   : > { %v4305_v17 = vadd.f32 %v6828_v40, %v4269_v11 }
 0x29b   : > { %v4221_v13 = vpop.f32.mrf.mxu0 }
 0x29c   : > { %v4337_v61 = vmax.f32 %v4305_v17, 0.0 }
 0x29d   : > { %v3801_v8 = vpop.f32.mrf.mxu3  ;;  %v2821_v30 = vpop.f32.mrf.mxu1 }
 0x29e   : > { %v4369_v35 = vpack.c.bf16 %v4337_v61, %v4337_v61  ;;  %v3850_v39 = vadd.f32 %v3801_v8, %v3174_v37  ;;  %v2867_v53 = vadd.f32 %v2821_v30, %v6355_v1 }
 0x2a0   : > { %4402 = vst.msk [vmem:[%s6549_s22 + $0x50] sm:$0xf] %vm4381_vm8, %v4369_v35  ;;  %v4270_v45 = vadd.f32 %v4221_v13, %v3850_v39  ;;  %v3128_v38 = vpop.f32.mrf.mxu2 }
 0x2a1   : > { %v3175_v41 = vadd.f32 %v3128_v38, %v2866_v42 }
 0x2a2   : > { %v4306_v22 = vadd.f32 %v6828_v40, %v4270_v45 }
 0x2a3   : > { %v4224_v55 = vpop.f32.mrf.mxu0 }
 0x2a4   : > { %v4338_v9 = vmax.f32 %v4306_v22, 0.0 }
 0x2a5   : > { %v3804_v62 = vpop.f32.mrf.mxu3  ;;  %v2824_v6 = vpop.f32.mrf.mxu1 }
 0x2a6   : > { %v4370_v5 = vpack.c.bf16 %v4338_v9, %v4338_v9  ;;  %v3851_v27 = vadd.f32 %v3804_v62, %v3175_v41  ;;  %v2868_v52 = vadd.f32 %v2824_v6, %v6374_v46  ;;  %v6900_v62 = vld [vmem:[#allocation4_spill] sm:$0xff] }
 0x2a8   : > { %4403 = vst.msk [vmem:[%s6549_s22 + $0x54] sm:$0xf] %vm4381_vm8, %v4370_v5  ;;  %v4271_v63 = vadd.f32 %v4224_v55, %v3851_v27  ;;  %v3130_v59 = vpop.f32.mrf.mxu2 }
 0x2a9   : > { %v3176_v18 = vadd.f32 %v3130_v59, %v2867_v53 }
 0x2aa   : > { %v4307_v36 = vadd.f32 %v6828_v40, %v4271_v63 }
 0x2ab   : > { %v4226_v32 = vpop.f32.mrf.mxu0 }
 0x2ac   : > { %v4339_v60 = vmax.f32 %v4307_v36, 0.0 }
 0x2ad   : > { %v3806_v43 = vpop.f32.mrf.mxu3  ;;  %v2826_v7 = vpop.f32.mrf.mxu1 }
 0x2ae   : > { %v4371_v31 = vpack.c.bf16 %v4339_v60, %v4339_v60  ;;  %v3852_v25 = vadd.f32 %v3806_v43, %v3176_v18  ;;  %v2869_v56 = vadd.f32 %v2826_v7, %v6395_v19 }
 0x2b0   : > { %4404 = vst.msk [vmem:[%s6549_s22 + $0x58] sm:$0xf] %vm4381_vm8, %v4371_v31  ;;  %v4272_v29 = vadd.f32 %v4226_v32, %v3852_v25  ;;  %v3133_v3 = vpop.f32.mrf.mxu2 }
 0x2b1   : > { %v3177_v1 = vadd.f32 %v3133_v3, %v2868_v52 }
 0x2b2   : > { %v4308_v28 = vadd.f32 %v6828_v40, %v4272_v29 }
 0x2b3   : > { %v4229_v12 = vpop.f32.mrf.mxu0 }
 0x2b4   : > { %v4340_v48 = vmax.f32 %v4308_v28, 0.0 }
 0x2b5   : > { %v3809_v14 = vpop.f32.mrf.mxu3  ;;  %v2829_v54 = vpop.f32.mrf.mxu1 }
 0x2b6   : > { %v4372_v21 = vpack.c.bf16 %v4340_v48, %v4340_v48  ;;  %v3853_v33 = vadd.f32 %v3809_v14, %v3177_v1  ;;  %v2870_v16 = vadd.f32 %v2829_v54, %v6413_v50 }
 0x2b8   : > { %4405 = vst.msk [vmem:[%s6549_s22 + $0x5c] sm:$0xf] %vm4381_vm8, %v4372_v21  ;;  %v4273_v24 = vadd.f32 %v4229_v12, %v3853_v33  ;;  %v3135_v51 = vpop.f32.mrf.mxu2 }
 0x2b9   : > { %v3178_v46 = vadd.f32 %v3135_v51, %v2869_v56 }
 0x2ba   : > { %v4309_v20 = vadd.f32 %v6828_v40, %v4273_v24 }
 0x2bb   : > { %v4231_v4 = vpop.f32.mrf.mxu0 }
 0x2bc   : > { %v4341_v47 = vmax.f32 %v4309_v20, 0.0 }
 0x2bd   : > { %v3811_v58 = vpop.f32.mrf.mxu3  ;;  %v2831_v2 = vpop.f32.mrf.mxu1 }
 0x2be   : > { %v4373_v44 = vpack.c.bf16 %v4341_v47, %v4341_v47  ;;  %v3854_v34 = vadd.f32 %v3811_v58, %v3178_v46  ;;  %v2871_v35 = vadd.f32 %v2831_v2, %v6439_v26 }
 0x2c0   : > { %4406 = vst.msk [vmem:[%s6549_s22 + $0x60] sm:$0xf] %vm4381_vm8, %v4373_v44  ;;  %v4274_v49 = vadd.f32 %v4231_v4, %v3854_v34  ;;  %v3138_v11 = vpop.f32.mrf.mxu2 }
 0x2c1   : > { %v3179_v19 = vadd.f32 %v3138_v11, %v2870_v16 }
 0x2c2   : > { %v4310_v10 = vadd.f32 %v6828_v40, %v4274_v49 }
 0x2c3   : > { %v4234_v17 = vpop.f32.mrf.mxu0 }
 0x2c4   : > { %v4342_v15 = vmax.f32 %v4310_v10, 0.0 }
 0x2c5   : > { %v3814_v37 = vpop.f32.mrf.mxu3  ;;  %v2834_v8 = vpop.f32.mrf.mxu1 }
 0x2c6   : > { %v4374_v61 = vpack.c.bf16 %v4342_v15, %v4342_v15  ;;  %v3855_v13 = vadd.f32 %v3814_v37, %v3179_v19  ;;  %v2872_v6 = vadd.f32 %v2834_v8, %v6900_v62 }
 0x2c8   : > { %4407 = vst.msk [vmem:[%s6549_s22 + $0x64] sm:$0xf] %vm4381_vm8, %v4374_v61  ;;  %v4275_v30 = vadd.f32 %v4234_v17, %v3855_v13  ;;  %v3140_v39 = vpop.f32.mrf.mxu2 }
 0x2c9   : > { %v3180_v50 = vadd.f32 %v3140_v39, %v2871_v35 }
 0x2ca   : > { %v4311_v45 = vadd.f32 %v6828_v40, %v4275_v30 }
 0x2cb   : > { %v4236_v38 = vpop.f32.mrf.mxu0 }
 0x2cc   : > { %v4343_v42 = vmax.f32 %v4311_v45, 0.0 }
 0x2cd   : > { %v3816_v22 = vpop.f32.mrf.mxu3  ;;  %v2836_v27 = vpop.f32.mrf.mxu1 }
 0x2ce   : > { %v4375_v41 = vpack.c.bf16 %v4343_v42, %v4343_v42  ;;  %v3856_v9 = vadd.f32 %v3816_v22, %v3180_v50  ;;  %v2873_v43 = vadd.f32 %v2836_v27, %v6478_v0 }
 0x2d0   : > { %4408 = vst.msk [vmem:[%s6549_s22 + $0x68] sm:$0xf] %vm4381_vm8, %v4375_v41  ;;  %v4276_v55 = vadd.f32 %v4236_v38, %v3856_v9  ;;  %v3143_v5 = vpop.f32.mrf.mxu2 }
 0x2d1   : > { %v3181_v26 = vadd.f32 %v3143_v5, %v2872_v6 }
 0x2d2   : > { %v4312_v63 = vadd.f32 %v6828_v40, %v4276_v55 }
 0x2d3   : > { %v4239_v59 = vpop.f32.mrf.mxu0 }
 0x2d4   : > { %v4344_v53 = vmax.f32 %v4312_v63, 0.0 }
 0x2d5   : > { %v3819_v36 = vpop.f32.mrf.mxu3  ;;  %v2839_v29 = vpop.f32.mrf.mxu1 }
 0x2d6   : > { %v4376_v18 = vpack.c.bf16 %v4344_v53, %v4344_v53  ;;  %v3857_v60 = vadd.f32 %v3819_v36, %v3181_v26  ;;  %v2874_v14 = vadd.f32 %v2839_v29, %v6493_v23 }
 0x2d8   : > { %4409 = vst.msk [vmem:[%s6549_s22 + $0x6c] sm:$0xf] %vm4381_vm8, %v4376_v18  ;;  %v4277_v32 = vadd.f32 %v4239_v59, %v3857_v60  ;;  %v3145_v7 = vpop.f32.mrf.mxu2 }
 0x2d9   : > { %v3182_v25 = vadd.f32 %v3145_v7, %v2873_v43 }
 0x2da   : > { %v4313_v31 = vadd.f32 %v6828_v40, %v4277_v32 }
 0x2db   : > { %v4241_v3 = vpop.f32.mrf.mxu0 }
 0x2dc   : > { %v4345_v52 = vmax.f32 %v4313_v31, 0.0 }
 0x2dd   : > { %v3821_v28 = vpop.f32.mrf.mxu3  ;;  %v2841_v24 = vpop.f32.mrf.mxu1 }
 0x2de   : > { %v4377_v1 = vpack.c.bf16 %v4345_v52, %v4345_v52  ;;  %v3858_v48 = vadd.f32 %v3821_v28, %v3182_v25  ;;  %v2875_v4 = vadd.f32 %v2841_v24, %v6514_v57 }
 0x2e0   : > { %4410 = vst.msk [vmem:[%s6549_s22 + $0x70] sm:$0xf] %vm4381_vm8, %v4377_v1  ;;  %v4278_v12 = vadd.f32 %v4241_v3, %v3858_v48  ;;  %v3148_v54 = vpop.f32.mrf.mxu2 }
 0x2e1   : > { %v3183_v0 = vadd.f32 %v3148_v54, %v2874_v14 }
 0x2e2   : > { %v4314_v21 = vadd.f32 %v6828_v40, %v4278_v12 }
 0x2e3   : > { %v4244_v56 = vpop.f32.mrf.mxu0 }
 0x2e4   : > { %v4346_v33 = vmax.f32 %v4314_v21, 0.0 }
 0x2e5   : > { %v3824_v51 = vpop.f32.mrf.mxu3 }
 0x2e6   : > { %v4378_v20 = vpack.c.bf16 %v4346_v33, %v4346_v33  ;;  %v3859_v46 = vadd.f32 %v3824_v51, %v3183_v0 }
 0x2e8   : > { %4411 = vst.msk [vmem:[%s6549_s22 + $0x74] sm:$0xf] %vm4381_vm8, %v4378_v20  ;;  %v4279_v47 = vadd.f32 %v4244_v56, %v3859_v46  ;;  %v3150_v58 = vpop.f32.mrf.mxu2 }
 0x2e9   : > { %v3184_v2 = vadd.f32 %v3150_v58, %v2875_v4 }
 0x2ea   : > { %v4315_v23 = vadd.f32 %v6828_v40, %v4279_v47 }
 0x2eb   : > { %v4246_v11 = vpop.f32.mrf.mxu0 }
 0x2ec   : > { %v4347_v44 = vmax.f32 %v4315_v23, 0.0 }
 0x2ed   : > { %v3826_v34 = vpop.f32.mrf.mxu3 }
 0x2ee   : > { %v4379_v49 = vpack.c.bf16 %v4347_v44, %v4347_v44  ;;  %v3860_v16 = vadd.f32 %v3826_v34, %v3184_v2 }
 0x2f0   : > { %4412 = vst.msk [vmem:[%s6549_s22 + $0x78] sm:$0xf] %vm4381_vm8, %v4379_v49  ;;  %v4280_v10 = vadd.f32 %v4246_v11, %v3860_v16 }
 0x2f2   : > { %v4316_v19 = vadd.f32 %v6828_v40, %v4280_v10 }
 0x2f4   : > { %v4348_v15 = vmax.f32 %v4316_v19, 0.0 }
 0x2f6   : > { %v4380_v17 = vpack.c.bf16 %v4348_v15, %v4348_v15 }
 0x2f8   : > { %4413 = vst.msk [vmem:[%s6549_s22 + $0x7c] sm:$0xf] %vm4381_vm8, %v4380_v17 }
 0x2f9 PF: > { %s13_s12 = sadd.s32 1, %s5365_s12  }
 0x2fa   : > { %p10_p4 = scmp.ge.s32.totalorder %s13_s12, 4  }
 0x2fc   :  { %12 = sbr.rel (!%p10_p4) target bundleno = 1 (0x1), region = 72 }

// kernel: deeplab_forward.7
= control target key start
LH: loop header
LB: loop body
LE: loop exit
PB: predicated region body
PF: predicated region fallthrough
CT: control target
= control target key end

     0   :  { %s889_s9 = smov 0   ;;  %s1142_s0 = inlined_call_operand.vmem [shape: bf16[64,16], index: 0, kind: input, shape index: {}]   ;;  %s1143_s1 = inlined_call_operand.vmem [shape: bf16[2,16,1344], index: 1, kind: input, shape index: {}]   ;;  %s1144_s2 = inlined_call_operand.vmem [shape: bf16[2,64,1344], index: 2, kind: output, shape index: {}]  }
   0x1 LB: > { %s725_s10 = sadd.s32 4294967295, %s872_s9   ;;  %p729_p0 = scmp.ge.s32.totalorder %s872_s9, 1  ;;  %s872_s9 = sphi %s889_s9, %s12_s9  }
   0x2   : > { %p112_p1 = scmp.lt.s32.totalorder %s872_s9, 3 }
   0x4   : > { %p113_p2 = pnand %p729_p0, %p112_p1 }
   0x5   : > { %p134_p3 = scmp.lt.s32.totalorder (!%p113_p2), %s725_s10, 1 }
   0x6   : > { %116 = sbr.rel (%p113_p2) target bundleno = 326 (0x146), region = 28 }
   0xb   : > { %s1146_s10 = smov (!%p134_p3, %s725_s10), 1  ;;  %vm241_vm0 = vcmask 130048   ;;  %v911_v3 = vld [vmem:[%s1142_s0] sm:$0xff]  ;;  %v916_v4 = vld [vmem:[%s1142_s0 + $0x8] sm:$0xff]  ;;  %v940_v22 = vld [vmem:[%s1142_s0 + $0x10] sm:$0xff]  ;;  %vm626_vm1 = vcmask 519168  }
   0xc   : > { %s856_s11 = smul.u32 88, %s1146_s10  ;;  %v961_v35 = vld [vmem:[%s1142_s0 + $0x18] sm:$0xff] }
   0xd   : > { %s857_s23 = smul.u32 352, %s1146_s10 }
   0xe   : > { %s903_s14 = scalar_lea.vmem %s1143_s1, %s856_s11 }
   0xf   : > { %v750_v0 = vld [vmem:[%s903_s14] sm:$0xf]  ;;  %v847_v1 = vld [vmem:[%s903_s14 + $0x28] sm:$0xf0]  ;;  %v842_v2 = vld [vmem:[%s903_s14 + $0x4] sm:$0xf]  ;;  %s1023_s26 = scalar_lea.vmem %s1144_s2, %s857_s23 }
  0x10   : > { %v751_v5 = vor.u32 %v847_v1, %v750_v0  ;;  %v752_v6 = vld [vmem:[%s903_s14 + $0x2c] sm:$0xf0]  ;;  %v758_v7 = vld [vmem:[%s903_s14 + $0x8] sm:$0xf]  ;;  %v848_v8 = vld [vmem:[%s903_s14 + $0x30] sm:$0xf0] }
  0x11   : > { %v755_v9 = vor.u32 %v842_v2, %v752_v6  ;;  %v759_v10 = vor.u32 %v848_v8, %v758_v7  ;;  %v843_v11 = vld [vmem:[%s903_s14 + $0xc] sm:$0xf]  ;;  %v760_v12 = vld [vmem:[%s903_s14 + $0x34] sm:$0xf0]  ;;  %v850_v15 = vld [vmem:[%s903_s14 + $0x40] sm:$0xf0] }
  0x12   : > { %v774_v13 = vld [vmem:[%s903_s14 + $0x18] sm:$0xf]  ;;  %261 = vmatpush.bf16.msra.mxu0 %v751_v5  ;;  %853 = vmatpush.bf16.msra.mxu3 %v751_v5  ;;  %v763_v14 = vor.u32 %v843_v11, %v760_v12  ;;  %v844_v16 = vld [vmem:[%s903_s14 + $0x14] sm:$0xf]  ;;  %v768_v17 = vld [vmem:[%s903_s14 + $0x3c] sm:$0xf0] }
  0x13   : > { %854 = vmatpush.bf16.msra.mxu1 %v755_v9  ;;  %855 = vmatpush.bf16.msra.mxu2 %v759_v10  ;;  %v775_v18 = vor.u32 %v850_v15, %v774_v13  ;;  %v771_v19 = vor.u32 %v844_v16, %v768_v17  ;;  %v766_v20 = vld [vmem:[%s903_s14 + $0x10] sm:$0xf]  ;;  %v849_v21 = vld [vmem:[%s903_s14 + $0x38] sm:$0xf0]  ;;  %v776_v25 = vld [vmem:[%s903_s14 + $0x44] sm:$0xf0] }
  0x14   : > { %v767_v23 = vor.u32 %v849_v21, %v766_v20  ;;  %v845_v24 = vld [vmem:[%s903_s14 + $0x1c] sm:$0xf]  ;;  %v790_v26 = vld [vmem:[%s903_s14 + $0x28] sm:$0xf]  ;;  %v852_v28 = vld [vmem:[%s903_s14 + $0x50] sm:$0xf0] }
  0x15   : > { %792 = vmatmul.msk.bf16.vlgmr.msra.gmra.mxu0 %vm241_vm0, %v911_v3  ;;  %793 = vmatmul.msk.bf16.vlgmr.msra.gmra.mxu3 %vm241_vm0, %v916_v4  ;;  %v779_v27 = vor.u32 %v845_v24, %v776_v25  ;;  %v791_v29 = vor.u32 %v852_v28, %v790_v26  ;;  %v846_v30 = vld [vmem:[%s903_s14 + $0x24] sm:$0xf]  ;;  %v784_v31 = vld [vmem:[%s903_s14 + $0x4c] sm:$0xf0]  ;;  %v782_v33 = vld [vmem:[%s903_s14 + $0x20] sm:$0xf] }
  0x16   : > { %348 = vmatpush.bf16.msrb.mxu3 %v763_v14  ;;  %290 = vmatpush.bf16.msrb.mxu0 %v755_v9  ;;  %v787_v32 = vor.u32 %v846_v30, %v784_v31  ;;  %v851_v34 = vld [vmem:[%s903_s14 + $0x48] sm:$0xf0] }
  0x17   : > { %797 = vmatmul.msk.bf16.vlgmr.msra.gmra.mxu1 %vm241_vm0, %v916_v4  ;;  %801 = vmatmul.msk.bf16.vlgmr.msra.gmra.mxu2 %vm241_vm0, %v916_v4  ;;  %v783_v36 = vor.u32 %v851_v34, %v782_v33 }
  0x18   : > { %435 = vmatpush.bf16.msrb.mxu2 %v775_v18  ;;  %406 = vmatpush.bf16.msrb.mxu1 %v771_v19 }
  0x1a   : > { %319 = vmatpush.bf16.msra.mxu0 %v759_v10  ;;  %464 = vmatpush.bf16.msra.mxu3 %v779_v27 }
  0x1c   : > { %551 = vmatpush.bf16.msra.mxu2 %v791_v29  ;;  %522 = vmatpush.bf16.msra.mxu1 %v787_v32 }
  0x25   : > { %794 = vmatmul.msk.bf16.gmra.mxu3 %vm241_vm0, %v940_v22  ;;  %796 = vmatmul.msk.bf16.vlgmr.msrb.gmra.mxu0 %vm241_vm0, %v911_v3 }
  0x26   : > { %377 = vmatpush.bf16.msrb.mxu0 %v767_v23 }
  0x27   : > { %798 = vmatmul.msk.bf16.gmra.mxu1 %vm241_vm0, %v940_v22  ;;  %802 = vmatmul.msk.bf16.gmra.mxu2 %vm241_vm0, %v940_v22 }
  0x35   : > { %795 = vmatmul.msk.bf16.gmra.mxu3 %vm241_vm0, %v961_v35  ;;  %800 = vmatmul.msk.bf16.vlgmr.msra.gmra.mxu0 %vm241_vm0, %v911_v3 }
  0x36   : > { %493 = vmatpush.bf16.msra.mxu0 %v783_v36 }
  0x37   : > { %799 = vmatmul.msk.bf16.gmra.mxu1 %vm241_vm0, %v961_v35  ;;  %803 = vmatmul.msk.bf16.gmra.mxu2 %vm241_vm0, %v961_v35 }
  0x45   : > { %804 = vmatmul.msk.bf16.vlgmr.msrb.gmra.mxu3 %vm241_vm0, %v911_v3  ;;  %808 = vmatmul.msk.bf16.vlgmr.msrb.gmra.mxu0 %vm241_vm0, %v911_v3 }
  0x47   : > { %812 = vmatmul.msk.bf16.vlgmr.msrb.gmra.mxu1 %vm241_vm0, %v911_v3  ;;  %816 = vmatmul.msk.bf16.vlgmr.msrb.gmra.mxu2 %vm241_vm0, %v911_v3 }
  0x55   : > { %805 = vmatmul.msk.bf16.gmra.mxu3 %vm241_vm0, %v916_v4  ;;  %809 = vmatmul.msk.bf16.gmra.mxu0 %vm241_vm0, %v916_v4 }
  0x57   : > { %813 = vmatmul.msk.bf16.gmra.mxu1 %vm241_vm0, %v916_v4  ;;  %817 = vmatmul.msk.bf16.gmra.mxu2 %vm241_vm0, %v916_v4 }
  0x65   : > { %806 = vmatmul.msk.bf16.gmra.mxu3 %vm241_vm0, %v940_v22  ;;  %810 = vmatmul.msk.bf16.gmra.mxu0 %vm241_vm0, %v940_v22 }
  0x67   : > { %814 = vmatmul.msk.bf16.gmra.mxu1 %vm241_vm0, %v940_v22  ;;  %818 = vmatmul.msk.bf16.gmra.mxu2 %vm241_vm0, %v940_v22 }
  0x75   : > { %807 = vmatmul.msk.bf16.gmra.mxu3 %vm241_vm0, %v961_v35  ;;  %811 = vmatmul.msk.bf16.gmra.mxu0 %vm241_vm0, %v961_v35 }
  0x77   : > { %815 = vmatmul.msk.bf16.gmra.mxu1 %vm241_vm0, %v961_v35  ;;  %819 = vmatmul.msk.bf16.gmra.mxu2 %vm241_vm0, %v961_v35 }
  0x85   : > { %820 = vmatmul.msk.bf16.vlgmr.msra.gmra.mxu3 %vm241_vm0, %v911_v3  ;;  %824 = vmatmul.msk.bf16.vlgmr.msra.gmra.mxu0 %vm241_vm0, %v911_v3 }
  0x87   : > { %828 = vmatmul.msk.bf16.vlgmr.msra.gmra.mxu1 %vm241_vm0, %v911_v3  ;;  %832 = vmatmul.msk.bf16.vlgmr.msra.gmra.mxu2 %vm241_vm0, %v911_v3 }
  0x92   : > { %v263_v37 = vpop.f32.mrf.mxu0 }
  0x94   : > { %v297_v38 = vpop.f32.mrf.mxu1 }
  0x95   : > { %821 = vmatmul.msk.bf16.gmra.mxu3 %vm241_vm0, %v916_v4  ;;  %825 = vmatmul.msk.bf16.gmra.mxu0 %vm241_vm0, %v916_v4 }
  0x97   : > { %829 = vmatmul.msk.bf16.gmra.mxu1 %vm241_vm0, %v916_v4  ;;  %833 = vmatmul.msk.bf16.gmra.mxu2 %vm241_vm0, %v916_v4 }
  0x98   : > { %v268_v39 = vpop.f32.mrf.mxu3 }
  0x99   : > { %v585_v40 = vpack.c.bf16 %v297_v38, %v268_v39 }
  0x9a   : > { %v1025_v41 = vpop.f32.mrf.mxu2  ;;  %v265_v42 = vpop.f32.mrf.mxu0 }
  0x9b   : > { %634 = vst [vmem:[%s1023_s26 + $0x58] sm:$0xff] %v585_v40 }
  0x9c   : > { %v299_v43 = vpop.f32.mrf.mxu1 }
  0xa0   : > { %v270_v44 = vpop.f32.mrf.mxu3 }
  0xa1   : > { %v591_v45 = vpack.c.bf16 %v299_v43, %v270_v44 }
  0xa2   : > { %v1028_v46 = vpop.f32.mrf.mxu2  ;;  %v292_v47 = vpop.f32.mrf.mxu0 }
  0xa3   : > { %640 = vst [vmem:[%s1023_s26 + $0x84] sm:$0xff] %v591_v45  ;;  %v573_v48 = vpack.c.bf16 %v292_v47, %v263_v37 }
  0xa4   : > { %v302_v49 = vpop.f32.mrf.mxu1 }
  0xa5   : > { %621 = vst [vmem:[%s1023_s26] sm:$0xff] %v573_v48  ;;  %822 = vmatmul.msk.bf16.gmra.mxu3 %vm241_vm0, %v940_v22  ;;  %826 = vmatmul.msk.bf16.gmra.mxu0 %vm241_vm0, %v940_v22 }
  0xa7   : > { %830 = vmatmul.msk.bf16.gmra.mxu1 %vm241_vm0, %v940_v22  ;;  %834 = vmatmul.msk.bf16.gmra.mxu2 %vm241_vm0, %v940_v22 }
  0xa8   : > { %v273_v50 = vpop.f32.mrf.mxu3 }
  0xa9   : > { %v597_v51 = vpack.c.bf16 %v302_v49, %v273_v50 }
  0xaa   : > { %v1040_v52 = vpop.f32.mrf.mxu2  ;;  %v294_v53 = vpop.f32.mrf.mxu0 }
  0xab   : > { %646 = vst [vmem:[%s1023_s26 + $0xb0] sm:$0xff] %v597_v51  ;;  %v579_v54 = vpack.c.bf16 %v294_v53, %v265_v42 }
  0xac   : > { %v304_v55 = vpop.f32.mrf.mxu1 }
  0xad   : > { %628 = vst [vmem:[%s1023_s26 + $0x2c] sm:$0xff] %v579_v54 }
  0xb0   : > { %v275_v56 = vpop.f32.mrf.mxu3 }
  0xb1   : > { %v603_v57 = vpack.c.bf16 %v304_v55, %v275_v56 }
  0xb2   : > { %v1044_v58 = vpop.f32.mrf.mxu2  ;;  %v321_v59 = vpop.f32.mrf.mxu0 }
  0xb3   : > { %652 = vst [vmem:[%s1023_s26 + $0xdc] sm:$0xff] %v603_v57 }
  0xb4   : > { %v307_v60 = vpop.f32.mrf.mxu1 }
  0xb5   : > { %823 = vmatmul.msk.bf16.gmra.mxu3 %vm241_vm0, %v961_v35  ;;  %827 = vmatmul.msk.bf16.gmra.mxu0 %vm241_vm0, %v961_v35 }
  0xb7   : > { %831 = vmatmul.msk.bf16.gmra.mxu1 %vm241_vm0, %v961_v35  ;;  %835 = vmatmul.msk.bf16.gmra.mxu2 %vm241_vm0, %v961_v35 }
  0xb8   : > { %v278_v61 = vpop.f32.mrf.mxu3 }
  0xb9   : > { %v609_v62 = vpack.c.bf16 %v307_v60, %v278_v61 }
  0xba   : > { %v1055_v63 = vpop.f32.mrf.mxu2  ;;  %v323_v0 = vpop.f32.mrf.mxu0 }
  0xbb   : > { %658 = vst [vmem:[%s1023_s26 + $0x108] sm:$0xff] %v609_v62 }
  0xbc   : > { %v309_v1 = vpop.f32.mrf.mxu1 }
  0xc0   : > { %v280_v2 = vpop.f32.mrf.mxu3 }
  0xc1   : > { %v615_v3 = vpack.c.bf16 %v309_v1, %v280_v2 }
  0xc2   : > { %v1058_v4 = vpop.f32.mrf.mxu2  ;;  %v379_v5 = vpop.f32.mrf.mxu0 }
  0xc3   : > { %664 = vst [vmem:[%s1023_s26 + $0x134] sm:$0xff] %v615_v3 }
  0xc4   : > { %v408_v6 = vpop.f32.mrf.mxu1 }
  0xc5   : > { %v575_v7 = vpack.c.bf16 %v408_v6, %v379_v5 }
  0xc7   : > { %623 = vst [vmem:[%s1023_s26 + $0x10] sm:$0xff] %v575_v7 }
  0xc8   : > { %v350_v8 = vpop.f32.mrf.mxu3 }
  0xc9   : > { %v574_v9 = vpack.c.bf16 %v350_v8, %v321_v59 }
  0xca   : > { %v1062_v10 = vpop.f32.mrf.mxu2  ;;  %v381_v11 = vpop.f32.mrf.mxu0 }
  0xcb   : > { %622 = vst [vmem:[%s1023_s26 + $0x8] sm:$0xff] %v574_v9 }
  0xcc   : > { %v410_v12 = vpop.f32.mrf.mxu1 }
  0xcd   : > { %v581_v13 = vpack.c.bf16 %v410_v12, %v381_v11 }
  0xcf   : > { %630 = vst [vmem:[%s1023_s26 + $0x3c] sm:$0xff] %v581_v13 }
  0xd0   : > { %v352_v14 = vpop.f32.mrf.mxu3 }
  0xd1   : > { %v580_v15 = vpack.c.bf16 %v352_v14, %v323_v0 }
  0xd2   : > { %v1066_v16 = vpop.f32.mrf.mxu2  ;;  %v384_v17 = vpop.f32.mrf.mxu0 }
  0xd3   : > { %629 = vst [vmem:[%s1023_s26 + $0x34] sm:$0xff] %v580_v15 }
  0xd4   : > { %v413_v18 = vpop.f32.mrf.mxu1 }
  0xd5   : > { %v587_v19 = vpack.c.bf16 %v413_v18, %v384_v17 }
  0xd7   : > { %636 = vst [vmem:[%s1023_s26 + $0x68] sm:$0xff] %v587_v19 }
  0xd8   : > { %v355_v20 = vpop.f32.mrf.mxu3 }
  0xd9   : > { %v586_v21 = vpack.c.bf16 %v355_v20, %v1025_v41 }
  0xda   : > { %v1071_v22 = vpop.f32.mrf.mxu2  ;;  %v386_v23 = vpop.f32.mrf.mxu0 }
  0xdb   : > { %635 = vst [vmem:[%s1023_s26 + $0x60] sm:$0xff] %v586_v21 }
  0xdc   : > { %v415_v24 = vpop.f32.mrf.mxu1 }
  0xdd   : > { %v593_v25 = vpack.c.bf16 %v415_v24, %v386_v23 }
  0xdf   : > { %642 = vst [vmem:[%s1023_s26 + $0x94] sm:$0xff] %v593_v25 }
  0xe0   : > { %v357_v26 = vpop.f32.mrf.mxu3 }
  0xe1   : > { %v592_v27 = vpack.c.bf16 %v357_v26, %v1028_v46 }
  0xe2   : > { %v1076_v28 = vpop.f32.mrf.mxu2  ;;  %v389_v29 = vpop.f32.mrf.mxu0 }
  0xe3   : > { %641 = vst [vmem:[%s1023_s26 + $0x8c] sm:$0xff] %v592_v27 }
  0xe4   : > { %v418_v30 = vpop.f32.mrf.mxu1 }
  0xe5   : > { %v599_v31 = vpack.c.bf16 %v418_v30, %v389_v29 }
  0xe7   : > { %648 = vst [vmem:[%s1023_s26 + $0xc0] sm:$0xff] %v599_v31 }
  0xe8   : > { %v360_v32 = vpop.f32.mrf.mxu3 }
  0xe9   : > { %v598_v33 = vpack.c.bf16 %v360_v32, %v1040_v52 }
  0xea   : > { %v1081_v34 = vpop.f32.mrf.mxu2  ;;  %v391_v35 = vpop.f32.mrf.mxu0 }
  0xeb   : > { %647 = vst [vmem:[%s1023_s26 + $0xb8] sm:$0xff] %v598_v33 }
  0xec   : > { %v420_v36 = vpop.f32.mrf.mxu1 }
  0xed   : > { %v605_v37 = vpack.c.bf16 %v420_v36, %v391_v35 }
  0xef   : > { %654 = vst [vmem:[%s1023_s26 + $0xec] sm:$0xff] %v605_v37 }
  0xf0   : > { %v362_v38 = vpop.f32.mrf.mxu3 }
  0xf1   : > { %v604_v39 = vpack.c.bf16 %v362_v38, %v1044_v58 }
  0xf2   : > { %v1086_v40 = vpop.f32.mrf.mxu2  ;;  %v394_v41 = vpop.f32.mrf.mxu0 }
  0xf3   : > { %653 = vst [vmem:[%s1023_s26 + $0xe4] sm:$0xff] %v604_v39 }
  0xf4   : > { %v423_v42 = vpop.f32.mrf.mxu1 }
  0xf5   : > { %v611_v43 = vpack.c.bf16 %v423_v42, %v394_v41 }
  0xf7   : > { %660 = vst [vmem:[%s1023_s26 + $0x118] sm:$0xff] %v611_v43 }
  0xf8   : > { %v365_v44 = vpop.f32.mrf.mxu3 }
  0xf9   : > { %v610_v45 = vpack.c.bf16 %v365_v44, %v1055_v63 }
  0xfa   : > { %v1091_v46 = vpop.f32.mrf.mxu2  ;;  %v396_v47 = vpop.f32.mrf.mxu0 }
  0xfb   : > { %659 = vst [vmem:[%s1023_s26 + $0x110] sm:$0xff] %v610_v45 }
  0xfc   : > { %v425_v48 = vpop.f32.mrf.mxu1 }
  0xfd   : > { %v617_v49 = vpack.c.bf16 %v425_v48, %v396_v47 }
  0xff   : > { %666 = vst [vmem:[%s1023_s26 + $0x144] sm:$0xff] %v617_v49 }
 0x100   : > { %v367_v50 = vpop.f32.mrf.mxu3 }
 0x101   : > { %v616_v51 = vpack.c.bf16 %v367_v50, %v1058_v4 }
 0x102   : > { %v1096_v52 = vpop.f32.mrf.mxu2  ;;  %v495_v53 = vpop.f32.mrf.mxu0 }
 0x103   : > { %665 = vst [vmem:[%s1023_s26 + $0x13c] sm:$0xff] %v616_v51 }
 0x104   : > { %v524_v54 = vpop.f32.mrf.mxu1 }
 0x105   : > { %v577_v55 = vpack.c.bf16 %v524_v54, %v495_v53 }
 0x107   : > { %625 = vst [vmem:[%s1023_s26 + $0x20] sm:$0xff] %v577_v55 }
 0x108   : > { %v466_v56 = vpop.f32.mrf.mxu3 }
 0x109   : > { %v576_v57 = vpack.c.bf16 %v466_v56, %v1062_v10 }
 0x10a   : > { %v553_v58 = vpop.f32.mrf.mxu2  ;;  %v497_v60 = vpop.f32.mrf.mxu0 }
 0x10b   : > { %v578_v59 = vpack.c.bf16 %v553_v58, %v553_v58  ;;  %624 = vst [vmem:[%s1023_s26 + $0x18] sm:$0xff] %v576_v57 }
 0x10c   : > { %v526_v61 = vpop.f32.mrf.mxu1 }
 0x10d   : > { %627 = vst.msk [vmem:[%s1023_s26 + $0x28] sm:$0xf] %vm626_vm1, %v578_v59  ;;  %v583_v62 = vpack.c.bf16 %v526_v61, %v497_v60 }
 0x10f   : > { %632 = vst [vmem:[%s1023_s26 + $0x4c] sm:$0xff] %v583_v62 }
 0x110   : > { %v468_v63 = vpop.f32.mrf.mxu3 }
 0x111   : > { %v582_v0 = vpack.c.bf16 %v468_v63, %v1066_v16 }
 0x112   : > { %v555_v1 = vpop.f32.mrf.mxu2  ;;  %v500_v3 = vpop.f32.mrf.mxu0 }
 0x113   : > { %v584_v2 = vpack.c.bf16 %v555_v1, %v555_v1  ;;  %631 = vst [vmem:[%s1023_s26 + $0x44] sm:$0xff] %v582_v0 }
 0x114   : > { %v529_v4 = vpop.f32.mrf.mxu1 }
 0x115   : > { %633 = vst.msk [vmem:[%s1023_s26 + $0x54] sm:$0xf] %vm626_vm1, %v584_v2  ;;  %v589_v5 = vpack.c.bf16 %v529_v4, %v500_v3 }
 0x117   : > { %638 = vst [vmem:[%s1023_s26 + $0x78] sm:$0xff] %v589_v5 }
 0x118   : > { %v471_v6 = vpop.f32.mrf.mxu3 }
 0x119   : > { %v588_v7 = vpack.c.bf16 %v471_v6, %v1071_v22 }
 0x11a   : > { %v558_v8 = vpop.f32.mrf.mxu2  ;;  %v502_v10 = vpop.f32.mrf.mxu0 }
 0x11b   : > { %v590_v9 = vpack.c.bf16 %v558_v8, %v558_v8  ;;  %637 = vst [vmem:[%s1023_s26 + $0x70] sm:$0xff] %v588_v7 }
 0x11c   : > { %v531_v11 = vpop.f32.mrf.mxu1 }
 0x11d   : > { %639 = vst.msk [vmem:[%s1023_s26 + $0x80] sm:$0xf] %vm626_vm1, %v590_v9  ;;  %v595_v12 = vpack.c.bf16 %v531_v11, %v502_v10 }
 0x11f   : > { %644 = vst [vmem:[%s1023_s26 + $0xa4] sm:$0xff] %v595_v12 }
 0x120   : > { %v473_v13 = vpop.f32.mrf.mxu3 }
 0x121   : > { %v594_v14 = vpack.c.bf16 %v473_v13, %v1076_v28 }
 0x122   : > { %v560_v15 = vpop.f32.mrf.mxu2  ;;  %v505_v17 = vpop.f32.mrf.mxu0 }
 0x123   : > { %v596_v16 = vpack.c.bf16 %v560_v15, %v560_v15  ;;  %643 = vst [vmem:[%s1023_s26 + $0x9c] sm:$0xff] %v594_v14 }
 0x124   : > { %v534_v18 = vpop.f32.mrf.mxu1 }
 0x125   : > { %645 = vst.msk [vmem:[%s1023_s26 + $0xac] sm:$0xf] %vm626_vm1, %v596_v16  ;;  %v601_v19 = vpack.c.bf16 %v534_v18, %v505_v17 }
 0x127   : > { %650 = vst [vmem:[%s1023_s26 + $0xd0] sm:$0xff] %v601_v19 }
 0x128   : > { %v476_v20 = vpop.f32.mrf.mxu3 }
 0x129   : > { %v600_v21 = vpack.c.bf16 %v476_v20, %v1081_v34 }
 0x12a   : > { %v563_v22 = vpop.f32.mrf.mxu2  ;;  %v507_v24 = vpop.f32.mrf.mxu0 }
 0x12b   : > { %v602_v23 = vpack.c.bf16 %v563_v22, %v563_v22  ;;  %649 = vst [vmem:[%s1023_s26 + $0xc8] sm:$0xff] %v600_v21 }
 0x12c   : > { %v536_v25 = vpop.f32.mrf.mxu1 }
 0x12d   : > { %651 = vst.msk [vmem:[%s1023_s26 + $0xd8] sm:$0xf] %vm626_vm1, %v602_v23  ;;  %v607_v26 = vpack.c.bf16 %v536_v25, %v507_v24 }
 0x12f   : > { %656 = vst [vmem:[%s1023_s26 + $0xfc] sm:$0xff] %v607_v26 }
 0x130   : > { %v478_v27 = vpop.f32.mrf.mxu3 }
 0x131   : > { %v606_v28 = vpack.c.bf16 %v478_v27, %v1086_v40 }
 0x132   : > { %v565_v29 = vpop.f32.mrf.mxu2  ;;  %v510_v31 = vpop.f32.mrf.mxu0 }
 0x133   : > { %v608_v30 = vpack.c.bf16 %v565_v29, %v565_v29  ;;  %655 = vst [vmem:[%s1023_s26 + $0xf4] sm:$0xff] %v606_v28 }
 0x134   : > { %v539_v32 = vpop.f32.mrf.mxu1 }
 0x135   : > { %657 = vst.msk [vmem:[%s1023_s26 + $0x104] sm:$0xf] %vm626_vm1, %v608_v30  ;;  %v613_v33 = vpack.c.bf16 %v539_v32, %v510_v31 }
 0x137   : > { %662 = vst [vmem:[%s1023_s26 + $0x128] sm:$0xff] %v613_v33 }
 0x138   : > { %v481_v34 = vpop.f32.mrf.mxu3 }
 0x139   : > { %v612_v35 = vpack.c.bf16 %v481_v34, %v1091_v46 }
 0x13a   : > { %v568_v36 = vpop.f32.mrf.mxu2  ;;  %v512_v38 = vpop.f32.mrf.mxu0 }
 0x13b   : > { %v614_v37 = vpack.c.bf16 %v568_v36, %v568_v36  ;;  %661 = vst [vmem:[%s1023_s26 + $0x120] sm:$0xff] %v612_v35 }
 0x13c   : > { %v541_v39 = vpop.f32.mrf.mxu1 }
 0x13d   : > { %663 = vst.msk [vmem:[%s1023_s26 + $0x130] sm:$0xf] %vm626_vm1, %v614_v37  ;;  %v619_v40 = vpack.c.bf16 %v541_v39, %v512_v38 }
 0x13f   : > { %668 = vst [vmem:[%s1023_s26 + $0x154] sm:$0xff] %v619_v40 }
 0x140   : > { %v483_v41 = vpop.f32.mrf.mxu3 }
 0x141   : > { %v618_v42 = vpack.c.bf16 %v483_v41, %v1096_v52 }
 0x142   : > { %v570_v43 = vpop.f32.mrf.mxu2 }
 0x143   : > { %v620_v44 = vpack.c.bf16 %v570_v43, %v570_v43  ;;  %667 = vst [vmem:[%s1023_s26 + $0x14c] sm:$0xff] %v618_v42 }
 0x145   : > { %669 = vst.msk [vmem:[%s1023_s26 + $0x15c] sm:$0xf] %vm626_vm1, %v620_v44 }
 0x146 PF: > { %s12_s9 = sadd.s32 1, %s872_s9  }
 0x147   : > { %p9_p4 = scmp.ge.s32.totalorder %s12_s9, 4  }
 0x149   :  { %11 = sbr.rel (!%p9_p4) target bundleno = 1 (0x1), region = 58 }

</bundles_post_ra>
